<compile_context>
chip_gen: v7x
topology: tpu7x:2x2x1
jax: 0.10.0
libtpu: 0.0.40
codegen_flags: <defaults>
</compile_context>

<pallas_src>
import functools

import jax
import jax.numpy as jnp
from jax.experimental import pallas as pl
from jax.experimental.pallas import tpu as pltpu

INI = 0.01
NEG = 1e18


# --------------------------------------------------------------------------- #
# Fully fused forward kernel: encode -> actor (greedy, coverage, stop) -> critic
# --------------------------------------------------------------------------- #
def _ac_kernel(pooled_ref,
               sent_w_ref, art_w_ref, copy_ref, gen_ref, stop_ref,
               attn_wm_ref, hop_wm_ref, w_ih_ref, w_hh_ref, b_ref,
               hop_wq_ref, hop_v_ref, hop_cov_ref,
               attn_wq_ref, attn_v_ref, attn_cov_ref,
               init_h_ref, init_c_ref, init_i_ref,
               score_w_ref, score_b_ref,
               sel_ref, scores_ref,
               mem_s,
               *, n_hop, n_sents, n_hidden):
    f32 = jnp.float32
    H = n_hidden
    n_ext = 2 * n_sents + 1
    n_steps = n_sents + 1

    # ------------------------- encoder prologue (once) -----------------------
    # TODO(synk): the real sent/art encoders (Conv sentence enc + bi-LSTM article enc)
    # are externally injected modules not defined in the snippet; a deterministic
    # tanh(linear) x 2 stand-in is used on the pooled sentence embeddings.
    enc_sent = jnp.tanh(jnp.dot(pooled_ref[...], sent_w_ref[...],
                                preferred_element_type=f32))
    enc_art = jnp.tanh(jnp.dot(enc_sent, art_w_ref[...],
                               preferred_element_type=f32))              # [n_sents, D]

    # mem_ext = [enc + copy_marker ; enc + gen_marker ; stop]  (assembled once in VMEM)
    mem_s[0:n_sents, :] = enc_art + copy_ref[...]
    mem_s[n_sents:2 * n_sents, :] = enc_art + gen_ref[...]
    mem_s[2 * n_sents:n_ext, :] = stop_ref[...]
    mem_ext = mem_s[...]                                                  # [n_ext, D]

    a_attn = jnp.dot(mem_ext, attn_wm_ref[...], preferred_element_type=f32)  # [n_ext, H]
    a_hop = jnp.dot(mem_ext, hop_wm_ref[...], preferred_element_type=f32)    # [n_ext, H]
    c_attn = jnp.dot(enc_art, attn_wm_ref[...], preferred_element_type=f32)  # [n_sents, H]
    c_hop = jnp.dot(enc_art, hop_wm_ref[...], preferred_element_type=f32)    # [n_sents, H]

    # Hoisted loop-invariant LSTM matmuls.
    b_row = b_ref[...]                                                    # [1, 4H] (b_ih + b_hh)
    mem_gates = jnp.dot(mem_ext, w_ih_ref[...],
                        preferred_element_type=f32) + b_row               # [n_ext, 4H]  (actor)
    init_gates = jnp.dot(init_i_ref[...], w_ih_ref[...],
                         preferred_element_type=f32) + b_row              # [1, 4H]      (actor step 0)
    hh_gates_c = jnp.dot(init_h_ref[...], w_hh_ref[...],
                         preferred_element_type=f32) + b_row              # [1, 4H]      (critic, step-invariant)

    def lstm_from_gates(gates, c_prev):
        i_g = jax.nn.sigmoid(gates[:, 0 * H:1 * H])
        f_g = jax.nn.sigmoid(gates[:, 1 * H:2 * H])
        g_g = jnp.tanh(gates[:, 2 * H:3 * H])
        o_g = jax.nn.sigmoid(gates[:, 3 * H:4 * H])
        c_new = f_g * c_prev + i_g * g_g
        h_new = o_g * jnp.tanh(c_new)
        return h_new, c_new

    ids = jax.lax.broadcasted_iota(jnp.int32, (n_ext, 1), 0)
    ids_f = ids.astype(f32)
    lanes = jax.lax.broadcasted_iota(jnp.int32, sel_ref.shape, 1)

    # --------------- actor: PtrExtractorRLStop (eval/greedy + coverage) ------
    h = init_h_ref[...]
    c = init_c_ref[...]
    in_gates = init_gates
    cov = jnp.zeros((n_ext, 1), f32)
    sel_mask = jnp.zeros((n_ext, 1), f32)
    sel_acc = jnp.full(sel_ref.shape, -1, jnp.int32)

    for step in range(n_steps):
        # LSTM cell (input-side matmul pre-hoisted into in_gates)
        gates = in_gates + jnp.dot(h, w_hh_ref[...], preferred_element_type=f32)
        h, c = lstm_from_gates(gates, c)

        # hop attention (context only, with coverage); cov term is hop-invariant
        cov_hop = cov * hop_cov_ref[...]                                  # [n_ext, H]
        query = h
        for _ in range(n_hop):
            qw = jnp.dot(query, hop_wq_ref[...], preferred_element_type=f32)
            s = jnp.tanh(a_hop + qw + cov_hop)
            sc = jnp.sum(s * hop_v_ref[...], axis=-1, keepdims=True)      # [n_ext, 1]
            m = jnp.max(sc, axis=0, keepdims=True)
            e = jnp.exp(sc - m)
            prb = e / jnp.sum(e, axis=0, keepdims=True)
            query = jnp.sum(prb * a_hop, axis=0, keepdims=True)           # [1, H]

        # pointer score (with coverage)
        qw = jnp.dot(query, attn_wq_ref[...], preferred_element_type=f32)
        s = jnp.tanh(a_attn + qw + cov * attn_cov_ref[...])
        score = jnp.sum(s * attn_v_ref[...], axis=-1, keepdims=True)      # [n_ext, 1]

        # masking: previously selected copy/gen pairs; stop banned on first step
        masked = jnp.where(sel_mask > 0.0, jnp.float32(-NEG), score)
        if step == 0:
            masked = jnp.where(ids == 2 * n_sents, jnp.float32(-NEG), masked)

        # greedy argmax (first max index) + coverage update (softmax of masked score)
        mmax = jnp.max(masked, axis=0, keepdims=True)                     # [1, 1]
        sel_f = jnp.min(jnp.where(masked >= mmax, ids_f, jnp.float32(n_ext)),
                        axis=0, keepdims=True)
        sel_i = sel_f.astype(jnp.int32)                                   # [1, 1]
        e = jnp.exp(masked - mmax)
        cov = cov + e / jnp.sum(e, axis=0, keepdims=True)

        # ban the selected copy/gen index pair for all future steps
        other = jnp.where(sel_i < n_sents, sel_i + n_sents, sel_i - n_sents)
        banned = jnp.logical_or(ids == sel_i, ids == other).astype(f32)
        sel_mask = jnp.maximum(sel_mask, banned)

        # record selection into the lane-padded row
        sel_acc = jnp.where(lanes == step, sel_i, sel_acc)

        # next step's precomputed input gates = mem_gates[sel]  (one-hot reduce)
        onehot = (ids == sel_i).astype(f32)                               # [n_ext, 1]
        in_gates = jnp.sum(onehot * mem_gates, axis=0, keepdims=True)     # [1, 4H]
        # NOTE: steps after the stop token keep running (cheap, vector-only, NaN-free);
        # the host truncates at the first stop, reproducing the reference early break
        # without any per-step device->host sync.

    sel_ref[...] = sel_acc

    # ------------------------------ critic: PtrScorer ------------------------
    # NOTE: the reference never updates lstm_states inside this loop, so the recurrent
    # term init_h @ w_hh + b is step-invariant (hoisted as hh_gates_c above).
    lstm_in = init_i_ref[...]
    scores_acc = jnp.zeros(scores_ref.shape, f32)
    for step in range(n_steps):
        gates = jnp.dot(lstm_in, w_ih_ref[...], preferred_element_type=f32) + hh_gates_c
        h_c, _ = lstm_from_gates(gates, init_c_ref[...])

        query = h_c
        for _ in range(n_hop):
            qw = jnp.dot(query, hop_wq_ref[...], preferred_element_type=f32)
            s = jnp.tanh(c_hop + qw)
            sc = jnp.sum(s * hop_v_ref[...], axis=-1, keepdims=True)
            m = jnp.max(sc, axis=0, keepdims=True)
            e = jnp.exp(sc - m)
            prb = e / jnp.sum(e, axis=0, keepdims=True)
            query = jnp.sum(prb * c_hop, axis=0, keepdims=True)

        qw = jnp.dot(query, attn_wq_ref[...], preferred_element_type=f32)
        s = jnp.tanh(c_attn + qw)
        sc = jnp.sum(s * attn_v_ref[...], axis=-1, keepdims=True)
        m = jnp.max(sc, axis=0, keepdims=True)
        e = jnp.exp(sc - m)
        prb = e / jnp.sum(e, axis=0, keepdims=True)
        output = jnp.sum(prb * enc_art, axis=0, keepdims=True)            # [1, D]

        score = jnp.sum(output * score_w_ref[...], axis=-1, keepdims=True) + score_b_ref[...]
        scores_acc = jnp.where(lanes == step, score, scores_acc)
        lstm_in = output

    scores_ref[...] = scores_acc


# --------------------------------------------------------------------------- #
# Builder: one pallas_call + mean-pool under a single jit
# --------------------------------------------------------------------------- #
_PARAM_ORDER = ("sent_enc_w", "art_enc_w", "copy_marker", "gen_marker", "stop",
                "attn_wm", "hop_wm", "w_ih", "w_hh", "b",
                "hop_wq", "hop_v", "hop_cov", "attn_wq", "attn_v", "attn_cov",
                "init_h", "init_c", "init_i", "score_w", "score_b")


def make_forward(n_sents, input_dim, n_hidden, n_hop):
    n_ext = 2 * n_sents + 1
    n_steps = n_sents + 1
    pad = ((n_steps + 127) // 128) * 128          # lane-dense output rows

    kernel = functools.partial(_ac_kernel, n_hop=n_hop, n_sents=n_sents,
                               n_hidden=n_hidden)
    n_inputs = 1 + len(_PARAM_ORDER)
    vmem = lambda: pl.BlockSpec(memory_space=pltpu.MemorySpace.VMEM)

    call = pl.pallas_call(
        kernel,
        out_shape=(jax.ShapeDtypeStruct((1, pad), jnp.int32),     # selections (-1 padded)
                   jax.ShapeDtypeStruct((1, pad), jnp.float32)),  # critic scores
        in_specs=[vmem() for _ in range(n_inputs)],
        out_specs=(vmem(), vmem()),
        scratch_shapes=[pltpu.VMEM((n_ext, input_dim), jnp.float32)],  # mem_ext
    )

    @jax.jit
    def forward(raw_article_sents, params):
        # TODO(synk): art_batcher / Conv sentence encoder not defined in the snippet;
        # deterministic mean-pool stand-in feeding the in-kernel tanh(linear) encoders.
        pooled = jnp.mean(raw_article_sents, axis=1)              # [n_sents, emb]
        return call(pooled, *[params[k] for k in _PARAM_ORDER])

    return forward


# --------------------------------------------------------------------------- #
# Parameters (deterministic synthetic init; n_layer = 1, batch = 1, all f32)
# --------------------------------------------------------------------------- #
def init_params(key, emb=32, input_dim=32, n_hidden=32):
    ks = jax.random.split(key, 21)
    u = lambda k, shape, a: jax.random.uniform(k, shape, jnp.float32, -a, a)
    p = {}
    # stand-in encoders
    p["sent_enc_w"] = u(ks[0], (emb, input_dim), 0.1)
    p["art_enc_w"] = u(ks[1], (input_dim, input_dim), 0.1)
    # shared LSTMPointerNet parameters
    p["init_h"] = u(ks[2], (1, n_hidden), 0.1)
    p["init_c"] = u(ks[3], (1, n_hidden), 0.1)
    p["init_i"] = u(ks[4], (1, input_dim), 0.1)
    p["w_ih"] = u(ks[5], (input_dim, 4 * n_hidden), 0.1)
    p["w_hh"] = u(ks[6], (n_hidden, 4 * n_hidden), 0.1)
    p["b"] = u(ks[7], (1, 4 * n_hidden), 0.1)                    # b_ih + b_hh combined
    p["attn_wm"] = u(ks[8], (input_dim, n_hidden), 0.1)
    p["attn_wq"] = u(ks[9], (n_hidden, n_hidden), 0.1)
    p["attn_v"] = u(ks[10], (1, n_hidden), 0.1)
    p["hop_wm"] = u(ks[11], (input_dim, n_hidden), 0.1)
    p["hop_wq"] = u(ks[12], (n_hidden, n_hidden), 0.1)
    p["hop_v"] = u(ks[13], (1, n_hidden), 0.1)
    # PtrExtractorRLStop extras
    p["stop"] = u(ks[14], (1, input_dim), INI)
    p["copy_marker"] = u(ks[15], (1, input_dim), INI)
    p["gen_marker"] = u(ks[16], (1, input_dim), INI)
    p["hop_cov"] = u(ks[17], (1, n_hidden), INI)
    p["attn_cov"] = u(ks[18], (1, n_hidden), INI)
    # PtrScorer extras
    p["score_w"] = u(ks[19], (1, input_dim), 0.1)
    p["score_b"] = u(ks[20], (1, 1), 0.1)
    return p


# --------------------------------------------------------------------------- #
# ActorCritic.forward (host-side truncation at the stop token)
# --------------------------------------------------------------------------- #
def actor_critic_forward(raw_article_sents, params, forward_fn):
    sel_row, scores_row = forward_fn(raw_article_sents, params)
    jax.block_until_ready((sel_row, scores_row))

    n_sents = raw_article_sents.shape[0]
    sel_np = jax.device_get(sel_row)[0]
    scores_np = jax.device_get(scores_row)[0]

    outputs = []
    for i in range(n_sents + 1):
        v = int(sel_np[i])
        outputs.append(v)
        if v == 2 * n_sents:                                      # stop token selected
            break
    scores = [float(scores_np[i]) for i in range(len(outputs))]
    # TODO(synk): training branch uses torch.distributions.Categorical sampling
    # (stochastic); only the deterministic eval/greedy selection is reproduced here.
    return outputs, scores


if __name__ == "__main__":
    key = jax.random.PRNGKey(0)
    pkey, xkey = jax.random.split(key)

    num_sents, seq_len, emb = 8, 8, 32
    input_dim, n_hidden, n_hop = 32, 32, 1

    params = init_params(pkey, emb=emb, input_dim=input_dim, n_hidden=n_hidden)
    raw_article_sents = jax.random.normal(xkey, (num_sents, seq_len, emb), jnp.float32)

    forward_fn = make_forward(num_sents, input_dim, n_hidden, n_hop)
    outputs, scores = actor_critic_forward(raw_article_sents, params, forward_fn)

    assert 1 <= len(outputs) <= num_sents + 1
    assert len(scores) == len(outputs)
    assert all(0 <= v <= 2 * num_sents for v in outputs)
    print("KERNEL_OK")
</pallas_src>

<mosaic_0001>
module attributes {stable_mosaic.version = 11 : i64} {
  func.func @_ac_kernel(%arg0: memref<8x32xf32, #tpu.memory_space<vmem>>, %arg1: memref<32x32xf32, #tpu.memory_space<vmem>>, %arg2: memref<32x32xf32, #tpu.memory_space<vmem>>, %arg3: memref<1x32xf32, #tpu.memory_space<vmem>>, %arg4: memref<1x32xf32, #tpu.memory_space<vmem>>, %arg5: memref<1x32xf32, #tpu.memory_space<vmem>>, %arg6: memref<32x32xf32, #tpu.memory_space<vmem>>, %arg7: memref<32x32xf32, #tpu.memory_space<vmem>>, %arg8: memref<32x128xf32, #tpu.memory_space<vmem>>, %arg9: memref<32x128xf32, #tpu.memory_space<vmem>>, %arg10: memref<1x128xf32, #tpu.memory_space<vmem>>, %arg11: memref<32x32xf32, #tpu.memory_space<vmem>>, %arg12: memref<1x32xf32, #tpu.memory_space<vmem>>, %arg13: memref<1x32xf32, #tpu.memory_space<vmem>>, %arg14: memref<32x32xf32, #tpu.memory_space<vmem>>, %arg15: memref<1x32xf32, #tpu.memory_space<vmem>>, %arg16: memref<1x32xf32, #tpu.memory_space<vmem>>, %arg17: memref<1x32xf32, #tpu.memory_space<vmem>>, %arg18: memref<1x32xf32, #tpu.memory_space<vmem>>, %arg19: memref<1x32xf32, #tpu.memory_space<vmem>>, %arg20: memref<1x32xf32, #tpu.memory_space<vmem>>, %arg21: memref<1x1xf32, #tpu.memory_space<vmem>>, %arg22: memref<1x128xi32, #tpu.memory_space<vmem>>, %arg23: memref<1x128xf32, #tpu.memory_space<vmem>>, %arg24: memref<17x32xf32, #tpu.memory_space<vmem>>) attributes {dimension_semantics = [], scalar_prefetch = 0 : i64, scratch_operands = 1 : i64, tpu.core_type = #tpu.core_type<tc>} {
    %c0 = arith.constant 0 : index
    %c0_0 = arith.constant 0 : index
    %0 = vector.load %arg0[%c0, %c0_0] : memref<8x32xf32, #tpu.memory_space<vmem>>, vector<8x32xf32>
    %c0_1 = arith.constant 0 : index
    %c0_2 = arith.constant 0 : index
    %1 = vector.load %arg1[%c0_1, %c0_2] : memref<32x32xf32, #tpu.memory_space<vmem>>, vector<32x32xf32>
    %cst = arith.constant dense<0.000000e+00> : vector<8x32xf32>
    %2 = tpu.matmul %0, %1, %cst {dimension_numbers = #tpu.dot_dimension_numbers<[1], [0], [0], [1], [0, 0, 1, 1], [], []>} : vector<8x32xf32>, vector<32x32xf32>, vector<8x32xf32> -> vector<8x32xf32>
    %3 = math.tanh %2 : vector<8x32xf32>
    %c0_3 = arith.constant 0 : index
    %c0_4 = arith.constant 0 : index
    %4 = vector.load %arg2[%c0_3, %c0_4] : memref<32x32xf32, #tpu.memory_space<vmem>>, vector<32x32xf32>
    %cst_5 = arith.constant dense<0.000000e+00> : vector<8x32xf32>
    %5 = tpu.matmul %3, %4, %cst_5 {dimension_numbers = #tpu.dot_dimension_numbers<[1], [0], [0], [1], [0, 0, 1, 1], [], []>} : vector<8x32xf32>, vector<32x32xf32>, vector<8x32xf32> -> vector<8x32xf32>
    %6 = math.tanh %5 : vector<8x32xf32>
    %c0_6 = arith.constant 0 : index
    %c0_7 = arith.constant 0 : index
    %7 = vector.load %arg3[%c0_6, %c0_7] : memref<1x32xf32, #tpu.memory_space<vmem>>, vector<1x32xf32>
    %8 = vector.broadcast %7 : vector<1x32xf32> to vector<8x32xf32>
    %9 = arith.addf %6, %8 : vector<8x32xf32>
    %c0_8 = arith.constant 0 : index
    %c0_9 = arith.constant 0 : index
    %10 = vector.load %arg24[%c0_8, %c0_9] : memref<17x32xf32, #tpu.memory_space<vmem>>, vector<8x32xf32>
    tpu.vector_store %arg24[%c0_8, %c0_9], %9 {strides = array<i32>} : memref<17x32xf32, #tpu.memory_space<vmem>>, vector<8x32xf32>,
    %c0_10 = arith.constant 0 : index
    %c0_11 = arith.constant 0 : index
    %11 = vector.load %arg4[%c0_10, %c0_11] : memref<1x32xf32, #tpu.memory_space<vmem>>, vector<1x32xf32>
    %12 = vector.broadcast %11 : vector<1x32xf32> to vector<8x32xf32>
    %13 = arith.addf %6, %12 : vector<8x32xf32>
    %c8 = arith.constant 8 : index
    %c0_12 = arith.constant 0 : index
    %14 = vector.load %arg24[%c8, %c0_12] : memref<17x32xf32, #tpu.memory_space<vmem>>, vector<8x32xf32>
    tpu.vector_store %arg24[%c8, %c0_12], %13 {strides = array<i32>} : memref<17x32xf32, #tpu.memory_space<vmem>>, vector<8x32xf32>,
    %c0_13 = arith.constant 0 : index
    %c0_14 = arith.constant 0 : index
    %15 = vector.load %arg5[%c0_13, %c0_14] : memref<1x32xf32, #tpu.memory_space<vmem>>, vector<1x32xf32>
    %c16 = arith.constant 16 : index
    %c0_15 = arith.constant 0 : index
    %16 = vector.load %arg24[%c16, %c0_15] : memref<17x32xf32, #tpu.memory_space<vmem>>, vector<1x32xf32>
    tpu.vector_store %arg24[%c16, %c0_15], %15 {strides = array<i32>} : memref<17x32xf32, #tpu.memory_space<vmem>>, vector<1x32xf32>,
    %c0_16 = arith.constant 0 : index
    %c0_17 = arith.constant 0 : index
    %17 = vector.load %arg24[%c0_16, %c0_17] : memref<17x32xf32, #tpu.memory_space<vmem>>, vector<17x32xf32>
    %c0_18 = arith.constant 0 : index
    %c0_19 = arith.constant 0 : index
    %18 = vector.load %arg6[%c0_18, %c0_19] : memref<32x32xf32, #tpu.memory_space<vmem>>, vector<32x32xf32>
    %cst_20 = arith.constant dense<0.000000e+00> : vector<17x32xf32>
    %19 = tpu.matmul %17, %18, %cst_20 {dimension_numbers = #tpu.dot_dimension_numbers<[1], [0], [0], [1], [0, 0, 1, 1], [], []>} : vector<17x32xf32>, vector<32x32xf32>, vector<17x32xf32> -> vector<17x32xf32>
    %c0_21 = arith.constant 0 : index
    %c0_22 = arith.constant 0 : index
    %20 = vector.load %arg7[%c0_21, %c0_22] : memref<32x32xf32, #tpu.memory_space<vmem>>, vector<32x32xf32>
    %cst_23 = arith.constant dense<0.000000e+00> : vector<17x32xf32>
    %21 = tpu.matmul %17, %20, %cst_23 {dimension_numbers = #tpu.dot_dimension_numbers<[1], [0], [0], [1], [0, 0, 1, 1], [], []>} : vector<17x32xf32>, vector<32x32xf32>, vector<17x32xf32> -> vector<17x32xf32>
    %c0_24 = arith.constant 0 : index
    %c0_25 = arith.constant 0 : index
    %22 = vector.load %arg6[%c0_24, %c0_25] : memref<32x32xf32, #tpu.memory_space<vmem>>, vector<32x32xf32>
    %cst_26 = arith.constant dense<0.000000e+00> : vector<8x32xf32>
    %23 = tpu.matmul %6, %22, %cst_26 {dimension_numbers = #tpu.dot_dimension_numbers<[1], [0], [0], [1], [0, 0, 1, 1], [], []>} : vector<8x32xf32>, vector<32x32xf32>, vector<8x32xf32> -> vector<8x32xf32>
    %c0_27 = arith.constant 0 : index
    %c0_28 = arith.constant 0 : index
    %24 = vector.load %arg7[%c0_27, %c0_28] : memref<32x32xf32, #tpu.memory_space<vmem>>, vector<32x32xf32>
    %cst_29 = arith.constant dense<0.000000e+00> : vector<8x32xf32>
    %25 = tpu.matmul %6, %24, %cst_29 {dimension_numbers = #tpu.dot_dimension_numbers<[1], [0], [0], [1], [0, 0, 1, 1], [], []>} : vector<8x32xf32>, vector<32x32xf32>, vector<8x32xf32> -> vector<8x32xf32>
    %c0_30 = arith.constant 0 : index
    %c0_31 = arith.constant 0 : index
    %26 = vector.load %arg10[%c0_30, %c0_31] : memref<1x128xf32, #tpu.memory_space<vmem>>, vector<1x128xf32>
    %c0_32 = arith.constant 0 : index
    %c0_33 = arith.constant 0 : index
    %27 = vector.load %arg8[%c0_32, %c0_33] : memref<32x128xf32, #tpu.memory_space<vmem>>, vector<32x128xf32>
    %cst_34 = arith.constant dense<0.000000e+00> : vector<17x128xf32>
    %28 = tpu.matmul %17, %27, %cst_34 {dimension_numbers = #tpu.dot_dimension_numbers<[1], [0], [0], [1], [0, 0, 1, 1], [], []>} : vector<17x32xf32>, vector<32x128xf32>, vector<17x128xf32> -> vector<17x128xf32>
    %29 = vector.broadcast %26 : vector<1x128xf32> to vector<17x128xf32>
    %30 = arith.addf %28, %29 : vector<17x128xf32>
    %c0_35 = arith.constant 0 : index
    %c0_36 = arith.constant 0 : index
    %31 = vector.load %arg19[%c0_35, %c0_36] : memref<1x32xf32, #tpu.memory_space<vmem>>, vector<1x32xf32>
    %c0_37 = arith.constant 0 : index
    %c0_38 = arith.constant 0 : index
    %32 = vector.load %arg8[%c0_37, %c0_38] : memref<32x128xf32, #tpu.memory_space<vmem>>, vector<32x128xf32>
    %cst_39 = arith.constant dense<0.000000e+00> : vector<1x128xf32>
    %33 = tpu.matmul %31, %32, %cst_39 {dimension_numbers = #tpu.dot_dimension_numbers<[1], [0], [0], [1], [0, 0, 1, 1], [], []>} : vector<1x32xf32>, vector<32x128xf32>, vector<1x128xf32> -> vector<1x128xf32>
    %34 = arith.addf %33, %26 : vector<1x128xf32>
    %c0_40 = arith.constant 0 : index
    %c0_41 = arith.constant 0 : index
    %35 = vector.load %arg17[%c0_40, %c0_41] : memref<1x32xf32, #tpu.memory_space<vmem>>, vector<1x32xf32>
    %c0_42 = arith.constant 0 : index
    %c0_43 = arith.constant 0 : index
    %36 = vector.load %arg9[%c0_42, %c0_43] : memref<32x128xf32, #tpu.memory_space<vmem>>, vector<32x128xf32>
    %cst_44 = arith.constant dense<0.000000e+00> : vector<1x128xf32>
    %37 = tpu.matmul %35, %36, %cst_44 {dimension_numbers = #tpu.dot_dimension_numbers<[1], [0], [0], [1], [0, 0, 1, 1], [], []>} : vector<1x32xf32>, vector<32x128xf32>, vector<1x128xf32> -> vector<1x128xf32>
    %38 = arith.addf %37, %26 : vector<1x128xf32>
    %39 = tpu.iota {dimensions = array<i32: 0>} : vector<17x1xi32>
    %40 = arith.sitofp %39 : vector<17x1xi32> to vector<17x1xf32>
    %41 = tpu.iota {dimensions = array<i32: 1>} : vector<1x128xi32>
    %c0_45 = arith.constant 0 : index
    %c0_46 = arith.constant 0 : index
    %42 = vector.load %arg17[%c0_45, %c0_46] : memref<1x32xf32, #tpu.memory_space<vmem>>, vector<1x32xf32>
    %c0_47 = arith.constant 0 : index
    %c0_48 = arith.constant 0 : index
    %43 = vector.load %arg18[%c0_47, %c0_48] : memref<1x32xf32, #tpu.memory_space<vmem>>, vector<1x32xf32>
    %cst_49 = arith.constant 0.000000e+00 : f32
    %44 = vector.broadcast %cst_49 : f32 to vector<17x1xf32>
    %cst_50 = arith.constant 0.000000e+00 : f32
    %45 = vector.broadcast %cst_50 : f32 to vector<17x1xf32>
    %c-1_i32 = arith.constant -1 : i32
    %46 = vector.broadcast %c-1_i32 : i32 to vector<1x128xi32>
    %c0_51 = arith.constant 0 : index
    %c0_52 = arith.constant 0 : index
    %47 = vector.load %arg9[%c0_51, %c0_52] : memref<32x128xf32, #tpu.memory_space<vmem>>, vector<32x128xf32>
    %cst_53 = arith.constant dense<0.000000e+00> : vector<1x128xf32>
    %48 = tpu.matmul %42, %47, %cst_53 {dimension_numbers = #tpu.dot_dimension_numbers<[1], [0], [0], [1], [0, 0, 1, 1], [], []>} : vector<1x32xf32>, vector<32x128xf32>, vector<1x128xf32> -> vector<1x128xf32>
    %49 = arith.addf %34, %48 : vector<1x128xf32>
    %50 = vector.extract_strided_slice %49 {offsets = [0, 0], sizes = [1, 32], strides = [1, 1]} : vector<1x128xf32> to vector<1x32xf32>
    %51 = arith.negf %50 : vector<1x32xf32>
    %52 = math.exp %51 : vector<1x32xf32>
    %cst_54 = arith.constant 1.000000e+00 : f32
    %53 = vector.broadcast %cst_54 : f32 to vector<1x32xf32>
    %54 = arith.addf %53, %52 : vector<1x32xf32>
    %55 = arith.divf %53, %54 : vector<1x32xf32>
    %56 = vector.extract_strided_slice %49 {offsets = [0, 32], sizes = [1, 32], strides = [1, 1]} : vector<1x128xf32> to vector<1x32xf32>
    %57 = arith.negf %56 : vector<1x32xf32>
    %58 = math.exp %57 : vector<1x32xf32>
    %cst_55 = arith.constant 1.000000e+00 : f32
    %59 = vector.broadcast %cst_55 : f32 to vector<1x32xf32>
    %60 = arith.addf %59, %58 : vector<1x32xf32>
    %61 = arith.divf %59, %60 : vector<1x32xf32>
    %62 = vector.extract_strided_slice %49 {offsets = [0, 64], sizes = [1, 32], strides = [1, 1]} : vector<1x128xf32> to vector<1x32xf32>
    %63 = math.tanh %62 : vector<1x32xf32>
    %64 = vector.extract_strided_slice %49 {offsets = [0, 96], sizes = [1, 32], strides = [1, 1]} : vector<1x128xf32> to vector<1x32xf32>
    %65 = arith.negf %64 : vector<1x32xf32>
    %66 = math.exp %65 : vector<1x32xf32>
    %cst_56 = arith.constant 1.000000e+00 : f32
    %67 = vector.broadcast %cst_56 : f32 to vector<1x32xf32>
    %68 = arith.addf %67, %66 : vector<1x32xf32>
    %69 = arith.divf %67, %68 : vector<1x32xf32>
    %70 = arith.mulf %61, %43 : vector<1x32xf32>
    %71 = arith.mulf %55, %63 : vector<1x32xf32>
    %72 = arith.addf %70, %71 : vector<1x32xf32>
    %73 = math.tanh %72 : vector<1x32xf32>
    %74 = arith.mulf %69, %73 : vector<1x32xf32>
    %c0_57 = arith.constant 0 : index
    %c0_58 = arith.constant 0 : index
    %75 = vector.load %arg13[%c0_57, %c0_58] : memref<1x32xf32, #tpu.memory_space<vmem>>, vector<1x32xf32>
    %76 = vector.broadcast %44 : vector<17x1xf32> to vector<17x32xf32>
    %77 = vector.broadcast %75 : vector<1x32xf32> to vector<17x32xf32>
    %78 = arith.mulf %76, %77 : vector<17x32xf32>
    %c0_59 = arith.constant 0 : index
    %c0_60 = arith.constant 0 : index
    %79 = vector.load %arg11[%c0_59, %c0_60] : memref<32x32xf32, #tpu.memory_space<vmem>>, vector<32x32xf32>
    %cst_61 = arith.constant dense<0.000000e+00> : vector<1x32xf32>
    %80 = tpu.matmul %74, %79, %cst_61 {dimension_numbers = #tpu.dot_dimension_numbers<[1], [0], [0], [1], [0, 0, 1, 1], [], []>} : vector<1x32xf32>, vector<32x32xf32>, vector<1x32xf32> -> vector<1x32xf32>
    %81 = vector.broadcast %80 : vector<1x32xf32> to vector<17x32xf32>
    %82 = arith.addf %21, %81 : vector<17x32xf32>
    %83 = arith.addf %82, %78 : vector<17x32xf32>
    %84 = math.tanh %83 : vector<17x32xf32>
    %c0_62 = arith.constant 0 : index
    %c0_63 = arith.constant 0 : index
    %85 = vector.load %arg12[%c0_62, %c0_63] : memref<1x32xf32, #tpu.memory_space<vmem>>, vector<1x32xf32>
    %86 = vector.broadcast %85 : vector<1x32xf32> to vector<17x32xf32>
    %87 = arith.mulf %84, %86 : vector<17x32xf32>
    %cst_64 = arith.constant dense<0.000000e+00> : vector<17xf32>
    %88 = vector.multi_reduction <add>, %87, %cst_64 [1] : vector<17x32xf32> to vector<17xf32>
    %89 = vector.shape_cast %88 : vector<17xf32> to vector<17x1xf32>
    %cst_65 = arith.constant dense<0xFF800000> : vector<1xf32>
    %90 = vector.multi_reduction <maximumf>, %89, %cst_65 [0] : vector<17x1xf32> to vector<1xf32>
    %91 = vector.shape_cast %90 : vector<1xf32> to vector<1x1xf32>
    %92 = vector.broadcast %91 : vector<1x1xf32> to vector<17x1xf32>
    %93 = arith.subf %89, %92 : vector<17x1xf32>
    %94 = math.exp %93 : vector<17x1xf32>
    %cst_66 = arith.constant dense<0.000000e+00> : vector<1xf32>
    %95 = vector.multi_reduction <add>, %94, %cst_66 [0] : vector<17x1xf32> to vector<1xf32>
    %96 = vector.shape_cast %95 : vector<1xf32> to vector<1x1xf32>
    %97 = vector.broadcast %96 : vector<1x1xf32> to vector<17x1xf32>
    %98 = arith.divf %94, %97 : vector<17x1xf32>
    %99 = vector.broadcast %98 : vector<17x1xf32> to vector<17x32xf32>
    %100 = arith.mulf %99, %21 : vector<17x32xf32>
    %cst_67 = arith.constant dense<0.000000e+00> : vector<32xf32>
    %101 = vector.multi_reduction <add>, %100, %cst_67 [0] : vector<17x32xf32> to vector<32xf32>
    %102 = vector.shape_cast %101 : vector<32xf32> to vector<1x32xf32>
    %c0_68 = arith.constant 0 : index
    %c0_69 = arith.constant 0 : index
    %103 = vector.load %arg14[%c0_68, %c0_69] : memref<32x32xf32, #tpu.memory_space<vmem>>, vector<32x32xf32>
    %cst_70 = arith.constant dense<0.000000e+00> : vector<1x32xf32>
    %104 = tpu.matmul %102, %103, %cst_70 {dimension_numbers = #tpu.dot_dimension_numbers<[1], [0], [0], [1], [0, 0, 1, 1], [], []>} : vector<1x32xf32>, vector<32x32xf32>, vector<1x32xf32> -> vector<1x32xf32>
    %105 = vector.broadcast %104 : vector<1x32xf32> to vector<17x32xf32>
    %106 = arith.addf %19, %105 : vector<17x32xf32>
    %c0_71 = arith.constant 0 : index
    %c0_72 = arith.constant 0 : index
    %107 = vector.load %arg16[%c0_71, %c0_72] : memref<1x32xf32, #tpu.memory_space<vmem>>, vector<1x32xf32>
    %108 = vector.broadcast %44 : vector<17x1xf32> to vector<17x32xf32>
    %109 = vector.broadcast %107 : vector<1x32xf32> to vector<17x32xf32>
    %110 = arith.mulf %108, %109 : vector<17x32xf32>
    %111 = arith.addf %106, %110 : vector<17x32xf32>
    %112 = math.tanh %111 : vector<17x32xf32>
    %c0_73 = arith.constant 0 : index
    %c0_74 = arith.constant 0 : index
    %113 = vector.load %arg15[%c0_73, %c0_74] : memref<1x32xf32, #tpu.memory_space<vmem>>, vector<1x32xf32>
    %114 = vector.broadcast %113 : vector<1x32xf32> to vector<17x32xf32>
    %115 = arith.mulf %112, %114 : vector<17x32xf32>
    %cst_75 = arith.constant dense<0.000000e+00> : vector<17xf32>
    %116 = vector.multi_reduction <add>, %115, %cst_75 [1] : vector<17x32xf32> to vector<17xf32>
    %117 = vector.shape_cast %116 : vector<17xf32> to vector<17x1xf32>
    %cst_76 = arith.constant 0.000000e+00 : f32
    %118 = vector.broadcast %cst_76 : f32 to vector<17x1xf32>
    %119 = arith.cmpf ogt, %45, %118 : vector<17x1xf32>
    %cst_77 = arith.constant -9.99999984E+17 : f32
    %120 = vector.broadcast %cst_77 : f32 to vector<17x1xf32>
    %121 = arith.select %119, %120, %117 : vector<17x1xi1>, vector<17x1xf32>
    %c16_i32 = arith.constant 16 : i32
    %122 = vector.broadcast %c16_i32 : i32 to vector<17x1xi32>
    %123 = arith.cmpi eq, %39, %122 : vector<17x1xi32>
    %cst_78 = arith.constant -9.99999984E+17 : f32
    %124 = vector.broadcast %cst_78 : f32 to vector<17x1xf32>
    %125 = arith.select %123, %124, %121 : vector<17x1xi1>, vector<17x1xf32>
    %cst_79 = arith.constant dense<0xFF800000> : vector<1xf32>
    %126 = vector.multi_reduction <maximumf>, %125, %cst_79 [0] : vector<17x1xf32> to vector<1xf32>
    %127 = vector.shape_cast %126 : vector<1xf32> to vector<1x1xf32>
    %128 = vector.broadcast %127 : vector<1x1xf32> to vector<17x1xf32>
    %129 = arith.cmpf oge, %125, %128 : vector<17x1xf32>
    %cst_80 = arith.constant 1.700000e+01 : f32
    %130 = vector.broadcast %cst_80 : f32 to vector<17x1xf32>
    %131 = arith.select %129, %40, %130 : vector<17x1xi1>, vector<17x1xf32>
    %cst_81 = arith.constant dense<0x7F800000> : vector<1xf32>
    %132 = vector.multi_reduction <minimumf>, %131, %cst_81 [0] : vector<17x1xf32> to vector<1xf32>
    %133 = vector.shape_cast %132 : vector<1xf32> to vector<1x1xf32>
    %134 = arith.fptosi %133 : vector<1x1xf32> to vector<1x1xi32>
    %135 = vector.broadcast %127 : vector<1x1xf32> to vector<17x1xf32>
    %136 = arith.subf %125, %135 : vector<17x1xf32>
    %137 = math.exp %136 : vector<17x1xf32>
    %cst_82 = arith.constant dense<0.000000e+00> : vector<1xf32>
    %138 = vector.multi_reduction <add>, %137, %cst_82 [0] : vector<17x1xf32> to vector<1xf32>
    %139 = vector.shape_cast %138 : vector<1xf32> to vector<1x1xf32>
    %140 = vector.broadcast %139 : vector<1x1xf32> to vector<17x1xf32>
    %141 = arith.divf %137, %140 : vector<17x1xf32>
    %142 = arith.addf %44, %141 : vector<17x1xf32>
    %c8_i32 = arith.constant 8 : i32
    %143 = vector.broadcast %c8_i32 : i32 to vector<1x1xi32>
    %144 = arith.cmpi slt, %134, %143 : vector<1x1xi32>
    %c8_i32_83 = arith.constant 8 : i32
    %145 = vector.broadcast %c8_i32_83 : i32 to vector<1x1xi32>
    %146 = arith.addi %134, %145 : vector<1x1xi32>
    %c8_i32_84 = arith.constant 8 : i32
    %147 = vector.broadcast %c8_i32_84 : i32 to vector<1x1xi32>
    %148 = arith.subi %134, %147 : vector<1x1xi32>
    %149 = arith.select %144, %146, %148 : vector<1x1xi1>, vector<1x1xi32>
    %150 = vector.broadcast %134 : vector<1x1xi32> to vector<17x1xi32>
    %151 = arith.cmpi eq, %39, %150 : vector<17x1xi32>
    %152 = vector.broadcast %149 : vector<1x1xi32> to vector<17x1xi32>
    %153 = arith.cmpi eq, %39, %152 : vector<17x1xi32>
    %154 = arith.ori %151, %153 : vector<17x1xi1>
    %155 = arith.extui %154 : vector<17x1xi1> to vector<17x1xi32>
    %156 = arith.sitofp %155 : vector<17x1xi32> to vector<17x1xf32>
    %157 = arith.maximumf %45, %156 : vector<17x1xf32>
    %c0_i32 = arith.constant 0 : i32
    %158 = vector.broadcast %c0_i32 : i32 to vector<1x128xi32>
    %159 = arith.cmpi eq, %41, %158 : vector<1x128xi32>
    %160 = vector.shape_cast %134 : vector<1x1xi32> to vector<1x1xi32>
    %161 = vector.broadcast %160 : vector<1x1xi32> to vector<1x128xi32>
    %162 = arith.select %159, %161, %46 : vector<1x128xi1>, vector<1x128xi32>
    %163 = vector.broadcast %134 : vector<1x1xi32> to vector<17x1xi32>
    %164 = arith.cmpi eq, %39, %163 : vector<17x1xi32>
    %165 = arith.extui %164 : vector<17x1xi1> to vector<17x1xi32>
    %166 = arith.sitofp %165 : vector<17x1xi32> to vector<17x1xf32>
    %167 = vector.broadcast %166 : vector<17x1xf32> to vector<17x128xf32>
    %168 = arith.mulf %167, %30 : vector<17x128xf32>
    %cst_85 = arith.constant dense<0.000000e+00> : vector<128xf32>
    %169 = vector.multi_reduction <add>, %168, %cst_85 [0] : vector<17x128xf32> to vector<128xf32>
    %170 = vector.shape_cast %169 : vector<128xf32> to vector<1x128xf32>
    %c0_86 = arith.constant 0 : index
    %c0_87 = arith.constant 0 : index
    %171 = vector.load %arg9[%c0_86, %c0_87] : memref<32x128xf32, #tpu.memory_space<vmem>>, vector<32x128xf32>
    %cst_88 = arith.constant dense<0.000000e+00> : vector<1x128xf32>
    %172 = tpu.matmul %74, %171, %cst_88 {dimension_numbers = #tpu.dot_dimension_numbers<[1], [0], [0], [1], [0, 0, 1, 1], [], []>} : vector<1x32xf32>, vector<32x128xf32>, vector<1x128xf32> -> vector<1x128xf32>
    %173 = arith.addf %170, %172 : vector<1x128xf32>
    %174 = vector.extract_strided_slice %173 {offsets = [0, 0], sizes = [1, 32], strides = [1, 1]} : vector<1x128xf32> to vector<1x32xf32>
    %175 = arith.negf %174 : vector<1x32xf32>
    %176 = math.exp %175 : vector<1x32xf32>
    %cst_89 = arith.constant 1.000000e+00 : f32
    %177 = vector.broadcast %cst_89 : f32 to vector<1x32xf32>
    %178 = arith.addf %177, %176 : vector<1x32xf32>
    %179 = arith.divf %177, %178 : vector<1x32xf32>
    %180 = vector.extract_strided_slice %173 {offsets = [0, 32], sizes = [1, 32], strides = [1, 1]} : vector<1x128xf32> to vector<1x32xf32>
    %181 = arith.negf %180 : vector<1x32xf32>
    %182 = math.exp %181 : vector<1x32xf32>
    %cst_90 = arith.constant 1.000000e+00 : f32
    %183 = vector.broadcast %cst_90 : f32 to vector<1x32xf32>
    %184 = arith.addf %183, %182 : vector<1x32xf32>
    %185 = arith.divf %183, %184 : vector<1x32xf32>
    %186 = vector.extract_strided_slice %173 {offsets = [0, 64], sizes = [1, 32], strides = [1, 1]} : vector<1x128xf32> to vector<1x32xf32>
    %187 = math.tanh %186 : vector<1x32xf32>
    %188 = vector.extract_strided_slice %173 {offsets = [0, 96], sizes = [1, 32], strides = [1, 1]} : vector<1x128xf32> to vector<1x32xf32>
    %189 = arith.negf %188 : vector<1x32xf32>
    %190 = math.exp %189 : vector<1x32xf32>
    %cst_91 = arith.constant 1.000000e+00 : f32
    %191 = vector.broadcast %cst_91 : f32 to vector<1x32xf32>
    %192 = arith.addf %191, %190 : vector<1x32xf32>
    %193 = arith.divf %191, %192 : vector<1x32xf32>
    %194 = arith.mulf %185, %72 : vector<1x32xf32>
    %195 = arith.mulf %179, %187 : vector<1x32xf32>
    %196 = arith.addf %194, %195 : vector<1x32xf32>
    %197 = math.tanh %196 : vector<1x32xf32>
    %198 = arith.mulf %193, %197 : vector<1x32xf32>
    %c0_92 = arith.constant 0 : index
    %c0_93 = arith.constant 0 : index
    %199 = vector.load %arg13[%c0_92, %c0_93] : memref<1x32xf32, #tpu.memory_space<vmem>>, vector<1x32xf32>
    %200 = vector.broadcast %142 : vector<17x1xf32> to vector<17x32xf32>
    %201 = vector.broadcast %199 : vector<1x32xf32> to vector<17x32xf32>
    %202 = arith.mulf %200, %201 : vector<17x32xf32>
    %c0_94 = arith.constant 0 : index
    %c0_95 = arith.constant 0 : index
    %203 = vector.load %arg11[%c0_94, %c0_95] : memref<32x32xf32, #tpu.memory_space<vmem>>, vector<32x32xf32>
    %cst_96 = arith.constant dense<0.000000e+00> : vector<1x32xf32>
    %204 = tpu.matmul %198, %203, %cst_96 {dimension_numbers = #tpu.dot_dimension_numbers<[1], [0], [0], [1], [0, 0, 1, 1], [], []>} : vector<1x32xf32>, vector<32x32xf32>, vector<1x32xf32> -> vector<1x32xf32>
    %205 = vector.broadcast %204 : vector<1x32xf32> to vector<17x32xf32>
    %206 = arith.addf %21, %205 : vector<17x32xf32>
    %207 = arith.addf %206, %202 : vector<17x32xf32>
    %208 = math.tanh %207 : vector<17x32xf32>
    %c0_97 = arith.constant 0 : index
    %c0_98 = arith.constant 0 : index
    %209 = vector.load %arg12[%c0_97, %c0_98] : memref<1x32xf32, #tpu.memory_space<vmem>>, vector<1x32xf32>
    %210 = vector.broadcast %209 : vector<1x32xf32> to vector<17x32xf32>
    %211 = arith.mulf %208, %210 : vector<17x32xf32>
    %cst_99 = arith.constant dense<0.000000e+00> : vector<17xf32>
    %212 = vector.multi_reduction <add>, %211, %cst_99 [1] : vector<17x32xf32> to vector<17xf32>
    %213 = vector.shape_cast %212 : vector<17xf32> to vector<17x1xf32>
    %cst_100 = arith.constant dense<0xFF800000> : vector<1xf32>
    %214 = vector.multi_reduction <maximumf>, %213, %cst_100 [0] : vector<17x1xf32> to vector<1xf32>
    %215 = vector.shape_cast %214 : vector<1xf32> to vector<1x1xf32>
    %216 = vector.broadcast %215 : vector<1x1xf32> to vector<17x1xf32>
    %217 = arith.subf %213, %216 : vector<17x1xf32>
    %218 = math.exp %217 : vector<17x1xf32>
    %cst_101 = arith.constant dense<0.000000e+00> : vector<1xf32>
    %219 = vector.multi_reduction <add>, %218, %cst_101 [0] : vector<17x1xf32> to vector<1xf32>
    %220 = vector.shape_cast %219 : vector<1xf32> to vector<1x1xf32>
    %221 = vector.broadcast %220 : vector<1x1xf32> to vector<17x1xf32>
    %222 = arith.divf %218, %221 : vector<17x1xf32>
    %223 = vector.broadcast %222 : vector<17x1xf32> to vector<17x32xf32>
    %224 = arith.mulf %223, %21 : vector<17x32xf32>
    %cst_102 = arith.constant dense<0.000000e+00> : vector<32xf32>
    %225 = vector.multi_reduction <add>, %224, %cst_102 [0] : vector<17x32xf32> to vector<32xf32>
    %226 = vector.shape_cast %225 : vector<32xf32> to vector<1x32xf32>
    %c0_103 = arith.constant 0 : index
    %c0_104 = arith.constant 0 : index
    %227 = vector.load %arg14[%c0_103, %c0_104] : memref<32x32xf32, #tpu.memory_space<vmem>>, vector<32x32xf32>
    %cst_105 = arith.constant dense<0.000000e+00> : vector<1x32xf32>
    %228 = tpu.matmul %226, %227, %cst_105 {dimension_numbers = #tpu.dot_dimension_numbers<[1], [0], [0], [1], [0, 0, 1, 1], [], []>} : vector<1x32xf32>, vector<32x32xf32>, vector<1x32xf32> -> vector<1x32xf32>
    %229 = vector.broadcast %228 : vector<1x32xf32> to vector<17x32xf32>
    %230 = arith.addf %19, %229 : vector<17x32xf32>
    %c0_106 = arith.constant 0 : index
    %c0_107 = arith.constant 0 : index
    %231 = vector.load %arg16[%c0_106, %c0_107] : memref<1x32xf32, #tpu.memory_space<vmem>>, vector<1x32xf32>
    %232 = vector.broadcast %142 : vector<17x1xf32> to vector<17x32xf32>
    %233 = vector.broadcast %231 : vector<1x32xf32> to vector<17x32xf32>
    %234 = arith.mulf %232, %233 : vector<17x32xf32>
    %235 = arith.addf %230, %234 : vector<17x32xf32>
    %236 = math.tanh %235 : vector<17x32xf32>
    %c0_108 = arith.constant 0 : index
    %c0_109 = arith.constant 0 : index
    %237 = vector.load %arg15[%c0_108, %c0_109] : memref<1x32xf32, #tpu.memory_space<vmem>>, vector<1x32xf32>
    %238 = vector.broadcast %237 : vector<1x32xf32> to vector<17x32xf32>
    %239 = arith.mulf %236, %238 : vector<17x32xf32>
    %cst_110 = arith.constant dense<0.000000e+00> : vector<17xf32>
    %240 = vector.multi_reduction <add>, %239, %cst_110 [1] : vector<17x32xf32> to vector<17xf32>
    %241 = vector.shape_cast %240 : vector<17xf32> to vector<17x1xf32>
    %cst_111 = arith.constant 0.000000e+00 : f32
    %242 = vector.broadcast %cst_111 : f32 to vector<17x1xf32>
    %243 = arith.cmpf ogt, %157, %242 : vector<17x1xf32>
    %cst_112 = arith.constant -9.99999984E+17 : f32
    %244 = vector.broadcast %cst_112 : f32 to vector<17x1xf32>
    %245 = arith.select %243, %244, %241 : vector<17x1xi1>, vector<17x1xf32>
    %cst_113 = arith.constant dense<0xFF800000> : vector<1xf32>
    %246 = vector.multi_reduction <maximumf>, %245, %cst_113 [0] : vector<17x1xf32> to vector<1xf32>
    %247 = vector.shape_cast %246 : vector<1xf32> to vector<1x1xf32>
    %248 = vector.broadcast %247 : vector<1x1xf32> to vector<17x1xf32>
    %249 = arith.cmpf oge, %245, %248 : vector<17x1xf32>
    %cst_114 = arith.constant 1.700000e+01 : f32
    %250 = vector.broadcast %cst_114 : f32 to vector<17x1xf32>
    %251 = arith.select %249, %40, %250 : vector<17x1xi1>, vector<17x1xf32>
    %cst_115 = arith.constant dense<0x7F800000> : vector<1xf32>
    %252 = vector.multi_reduction <minimumf>, %251, %cst_115 [0] : vector<17x1xf32> to vector<1xf32>
    %253 = vector.shape_cast %252 : vector<1xf32> to vector<1x1xf32>
    %254 = arith.fptosi %253 : vector<1x1xf32> to vector<1x1xi32>
    %255 = vector.broadcast %247 : vector<1x1xf32> to vector<17x1xf32>
    %256 = arith.subf %245, %255 : vector<17x1xf32>
    %257 = math.exp %256 : vector<17x1xf32>
    %cst_116 = arith.constant dense<0.000000e+00> : vector<1xf32>
    %258 = vector.multi_reduction <add>, %257, %cst_116 [0] : vector<17x1xf32> to vector<1xf32>
    %259 = vector.shape_cast %258 : vector<1xf32> to vector<1x1xf32>
    %260 = vector.broadcast %259 : vector<1x1xf32> to vector<17x1xf32>
    %261 = arith.divf %257, %260 : vector<17x1xf32>
    %262 = arith.addf %142, %261 : vector<17x1xf32>
    %c8_i32_117 = arith.constant 8 : i32
    %263 = vector.broadcast %c8_i32_117 : i32 to vector<1x1xi32>
    %264 = arith.cmpi slt, %254, %263 : vector<1x1xi32>
    %c8_i32_118 = arith.constant 8 : i32
    %265 = vector.broadcast %c8_i32_118 : i32 to vector<1x1xi32>
    %266 = arith.addi %254, %265 : vector<1x1xi32>
    %c8_i32_119 = arith.constant 8 : i32
    %267 = vector.broadcast %c8_i32_119 : i32 to vector<1x1xi32>
    %268 = arith.subi %254, %267 : vector<1x1xi32>
    %269 = arith.select %264, %266, %268 : vector<1x1xi1>, vector<1x1xi32>
    %270 = vector.broadcast %254 : vector<1x1xi32> to vector<17x1xi32>
    %271 = arith.cmpi eq, %39, %270 : vector<17x1xi32>
    %272 = vector.broadcast %269 : vector<1x1xi32> to vector<17x1xi32>
    %273 = arith.cmpi eq, %39, %272 : vector<17x1xi32>
    %274 = arith.ori %271, %273 : vector<17x1xi1>
    %275 = arith.extui %274 : vector<17x1xi1> to vector<17x1xi32>
    %276 = arith.sitofp %275 : vector<17x1xi32> to vector<17x1xf32>
    %277 = arith.maximumf %157, %276 : vector<17x1xf32>
    %c1_i32 = arith.constant 1 : i32
    %278 = vector.broadcast %c1_i32 : i32 to vector<1x128xi32>
    %279 = arith.cmpi eq, %41, %278 : vector<1x128xi32>
    %280 = vector.shape_cast %254 : vector<1x1xi32> to vector<1x1xi32>
    %281 = vector.broadcast %280 : vector<1x1xi32> to vector<1x128xi32>
    %282 = arith.select %279, %281, %162 : vector<1x128xi1>, vector<1x128xi32>
    %283 = vector.broadcast %254 : vector<1x1xi32> to vector<17x1xi32>
    %284 = arith.cmpi eq, %39, %283 : vector<17x1xi32>
    %285 = arith.extui %284 : vector<17x1xi1> to vector<17x1xi32>
    %286 = arith.sitofp %285 : vector<17x1xi32> to vector<17x1xf32>
    %287 = vector.broadcast %286 : vector<17x1xf32> to vector<17x128xf32>
    %288 = arith.mulf %287, %30 : vector<17x128xf32>
    %cst_120 = arith.constant dense<0.000000e+00> : vector<128xf32>
    %289 = vector.multi_reduction <add>, %288, %cst_120 [0] : vector<17x128xf32> to vector<128xf32>
    %290 = vector.shape_cast %289 : vector<128xf32> to vector<1x128xf32>
    %c0_121 = arith.constant 0 : index
    %c0_122 = arith.constant 0 : index
    %291 = vector.load %arg9[%c0_121, %c0_122] : memref<32x128xf32, #tpu.memory_space<vmem>>, vector<32x128xf32>
    %cst_123 = arith.constant dense<0.000000e+00> : vector<1x128xf32>
    %292 = tpu.matmul %198, %291, %cst_123 {dimension_numbers = #tpu.dot_dimension_numbers<[1], [0], [0], [1], [0, 0, 1, 1], [], []>} : vector<1x32xf32>, vector<32x128xf32>, vector<1x128xf32> -> vector<1x128xf32>
    %293 = arith.addf %290, %292 : vector<1x128xf32>
    %294 = vector.extract_strided_slice %293 {offsets = [0, 0], sizes = [1, 32], strides = [1, 1]} : vector<1x128xf32> to vector<1x32xf32>
    %295 = arith.negf %294 : vector<1x32xf32>
    %296 = math.exp %295 : vector<1x32xf32>
    %cst_124 = arith.constant 1.000000e+00 : f32
    %297 = vector.broadcast %cst_124 : f32 to vector<1x32xf32>
    %298 = arith.addf %297, %296 : vector<1x32xf32>
    %299 = arith.divf %297, %298 : vector<1x32xf32>
    %300 = vector.extract_strided_slice %293 {offsets = [0, 32], sizes = [1, 32], strides = [1, 1]} : vector<1x128xf32> to vector<1x32xf32>
    %301 = arith.negf %300 : vector<1x32xf32>
    %302 = math.exp %301 : vector<1x32xf32>
    %cst_125 = arith.constant 1.000000e+00 : f32
    %303 = vector.broadcast %cst_125 : f32 to vector<1x32xf32>
    %304 = arith.addf %303, %302 : vector<1x32xf32>
    %305 = arith.divf %303, %304 : vector<1x32xf32>
    %306 = vector.extract_strided_slice %293 {offsets = [0, 64], sizes = [1, 32], strides = [1, 1]} : vector<1x128xf32> to vector<1x32xf32>
    %307 = math.tanh %306 : vector<1x32xf32>
    %308 = vector.extract_strided_slice %293 {offsets = [0, 96], sizes = [1, 32], strides = [1, 1]} : vector<1x128xf32> to vector<1x32xf32>
    %309 = arith.negf %308 : vector<1x32xf32>
    %310 = math.exp %309 : vector<1x32xf32>
    %cst_126 = arith.constant 1.000000e+00 : f32
    %311 = vector.broadcast %cst_126 : f32 to vector<1x32xf32>
    %312 = arith.addf %311, %310 : vector<1x32xf32>
    %313 = arith.divf %311, %312 : vector<1x32xf32>
    %314 = arith.mulf %305, %196 : vector<1x32xf32>
    %315 = arith.mulf %299, %307 : vector<1x32xf32>
    %316 = arith.addf %314, %315 : vector<1x32xf32>
    %317 = math.tanh %316 : vector<1x32xf32>
    %318 = arith.mulf %313, %317 : vector<1x32xf32>
    %c0_127 = arith.constant 0 : index
    %c0_128 = arith.constant 0 : index
    %319 = vector.load %arg13[%c0_127, %c0_128] : memref<1x32xf32, #tpu.memory_space<vmem>>, vector<1x32xf32>
    %320 = vector.broadcast %262 : vector<17x1xf32> to vector<17x32xf32>
    %321 = vector.broadcast %319 : vector<1x32xf32> to vector<17x32xf32>
    %322 = arith.mulf %320, %321 : vector<17x32xf32>
    %c0_129 = arith.constant 0 : index
    %c0_130 = arith.constant 0 : index
    %323 = vector.load %arg11[%c0_129, %c0_130] : memref<32x32xf32, #tpu.memory_space<vmem>>, vector<32x32xf32>
    %cst_131 = arith.constant dense<0.000000e+00> : vector<1x32xf32>
    %324 = tpu.matmul %318, %323, %cst_131 {dimension_numbers = #tpu.dot_dimension_numbers<[1], [0], [0], [1], [0, 0, 1, 1], [], []>} : vector<1x32xf32>, vector<32x32xf32>, vector<1x32xf32> -> vector<1x32xf32>
    %325 = vector.broadcast %324 : vector<1x32xf32> to vector<17x32xf32>
    %326 = arith.addf %21, %325 : vector<17x32xf32>
    %327 = arith.addf %326, %322 : vector<17x32xf32>
    %328 = math.tanh %327 : vector<17x32xf32>
    %c0_132 = arith.constant 0 : index
    %c0_133 = arith.constant 0 : index
    %329 = vector.load %arg12[%c0_132, %c0_133] : memref<1x32xf32, #tpu.memory_space<vmem>>, vector<1x32xf32>
    %330 = vector.broadcast %329 : vector<1x32xf32> to vector<17x32xf32>
    %331 = arith.mulf %328, %330 : vector<17x32xf32>
    %cst_134 = arith.constant dense<0.000000e+00> : vector<17xf32>
    %332 = vector.multi_reduction <add>, %331, %cst_134 [1] : vector<17x32xf32> to vector<17xf32>
    %333 = vector.shape_cast %332 : vector<17xf32> to vector<17x1xf32>
    %cst_135 = arith.constant dense<0xFF800000> : vector<1xf32>
    %334 = vector.multi_reduction <maximumf>, %333, %cst_135 [0] : vector<17x1xf32> to vector<1xf32>
    %335 = vector.shape_cast %334 : vector<1xf32> to vector<1x1xf32>
    %336 = vector.broadcast %335 : vector<1x1xf32> to vector<17x1xf32>
    %337 = arith.subf %333, %336 : vector<17x1xf32>
    %338 = math.exp %337 : vector<17x1xf32>
    %cst_136 = arith.constant dense<0.000000e+00> : vector<1xf32>
    %339 = vector.multi_reduction <add>, %338, %cst_136 [0] : vector<17x1xf32> to vector<1xf32>
    %340 = vector.shape_cast %339 : vector<1xf32> to vector<1x1xf32>
    %341 = vector.broadcast %340 : vector<1x1xf32> to vector<17x1xf32>
    %342 = arith.divf %338, %341 : vector<17x1xf32>
    %343 = vector.broadcast %342 : vector<17x1xf32> to vector<17x32xf32>
    %344 = arith.mulf %343, %21 : vector<17x32xf32>
    %cst_137 = arith.constant dense<0.000000e+00> : vector<32xf32>
    %345 = vector.multi_reduction <add>, %344, %cst_137 [0] : vector<17x32xf32> to vector<32xf32>
    %346 = vector.shape_cast %345 : vector<32xf32> to vector<1x32xf32>
    %c0_138 = arith.constant 0 : index
    %c0_139 = arith.constant 0 : index
    %347 = vector.load %arg14[%c0_138, %c0_139] : memref<32x32xf32, #tpu.memory_space<vmem>>, vector<32x32xf32>
    %cst_140 = arith.constant dense<0.000000e+00> : vector<1x32xf32>
    %348 = tpu.matmul %346, %347, %cst_140 {dimension_numbers = #tpu.dot_dimension_numbers<[1], [0], [0], [1], [0, 0, 1, 1], [], []>} : vector<1x32xf32>, vector<32x32xf32>, vector<1x32xf32> -> vector<1x32xf32>
    %349 = vector.broadcast %348 : vector<1x32xf32> to vector<17x32xf32>
    %350 = arith.addf %19, %349 : vector<17x32xf32>
    %c0_141 = arith.constant 0 : index
    %c0_142 = arith.constant 0 : index
    %351 = vector.load %arg16[%c0_141, %c0_142] : memref<1x32xf32, #tpu.memory_space<vmem>>, vector<1x32xf32>
    %352 = vector.broadcast %262 : vector<17x1xf32> to vector<17x32xf32>
    %353 = vector.broadcast %351 : vector<1x32xf32> to vector<17x32xf32>
    %354 = arith.mulf %352, %353 : vector<17x32xf32>
    %355 = arith.addf %350, %354 : vector<17x32xf32>
    %356 = math.tanh %355 : vector<17x32xf32>
    %c0_143 = arith.constant 0 : index
    %c0_144 = arith.constant 0 : index
    %357 = vector.load %arg15[%c0_143, %c0_144] : memref<1x32xf32, #tpu.memory_space<vmem>>, vector<1x32xf32>
    %358 = vector.broadcast %357 : vector<1x32xf32> to vector<17x32xf32>
    %359 = arith.mulf %356, %358 : vector<17x32xf32>
    %cst_145 = arith.constant dense<0.000000e+00> : vector<17xf32>
    %360 = vector.multi_reduction <add>, %359, %cst_145 [1] : vector<17x32xf32> to vector<17xf32>
    %361 = vector.shape_cast %360 : vector<17xf32> to vector<17x1xf32>
    %cst_146 = arith.constant 0.000000e+00 : f32
    %362 = vector.broadcast %cst_146 : f32 to vector<17x1xf32>
    %363 = arith.cmpf ogt, %277, %362 : vector<17x1xf32>
    %cst_147 = arith.constant -9.99999984E+17 : f32
    %364 = vector.broadcast %cst_147 : f32 to vector<17x1xf32>
    %365 = arith.select %363, %364, %361 : vector<17x1xi1>, vector<17x1xf32>
    %cst_148 = arith.constant dense<0xFF800000> : vector<1xf32>
    %366 = vector.multi_reduction <maximumf>, %365, %cst_148 [0] : vector<17x1xf32> to vector<1xf32>
    %367 = vector.shape_cast %366 : vector<1xf32> to vector<1x1xf32>
    %368 = vector.broadcast %367 : vector<1x1xf32> to vector<17x1xf32>
    %369 = arith.cmpf oge, %365, %368 : vector<17x1xf32>
    %cst_149 = arith.constant 1.700000e+01 : f32
    %370 = vector.broadcast %cst_149 : f32 to vector<17x1xf32>
    %371 = arith.select %369, %40, %370 : vector<17x1xi1>, vector<17x1xf32>
    %cst_150 = arith.constant dense<0x7F800000> : vector<1xf32>
    %372 = vector.multi_reduction <minimumf>, %371, %cst_150 [0] : vector<17x1xf32> to vector<1xf32>
    %373 = vector.shape_cast %372 : vector<1xf32> to vector<1x1xf32>
    %374 = arith.fptosi %373 : vector<1x1xf32> to vector<1x1xi32>
    %375 = vector.broadcast %367 : vector<1x1xf32> to vector<17x1xf32>
    %376 = arith.subf %365, %375 : vector<17x1xf32>
    %377 = math.exp %376 : vector<17x1xf32>
    %cst_151 = arith.constant dense<0.000000e+00> : vector<1xf32>
    %378 = vector.multi_reduction <add>, %377, %cst_151 [0] : vector<17x1xf32> to vector<1xf32>
    %379 = vector.shape_cast %378 : vector<1xf32> to vector<1x1xf32>
    %380 = vector.broadcast %379 : vector<1x1xf32> to vector<17x1xf32>
    %381 = arith.divf %377, %380 : vector<17x1xf32>
    %382 = arith.addf %262, %381 : vector<17x1xf32>
    %c8_i32_152 = arith.constant 8 : i32
    %383 = vector.broadcast %c8_i32_152 : i32 to vector<1x1xi32>
    %384 = arith.cmpi slt, %374, %383 : vector<1x1xi32>
    %c8_i32_153 = arith.constant 8 : i32
    %385 = vector.broadcast %c8_i32_153 : i32 to vector<1x1xi32>
    %386 = arith.addi %374, %385 : vector<1x1xi32>
    %c8_i32_154 = arith.constant 8 : i32
    %387 = vector.broadcast %c8_i32_154 : i32 to vector<1x1xi32>
    %388 = arith.subi %374, %387 : vector<1x1xi32>
    %389 = arith.select %384, %386, %388 : vector<1x1xi1>, vector<1x1xi32>
    %390 = vector.broadcast %374 : vector<1x1xi32> to vector<17x1xi32>
    %391 = arith.cmpi eq, %39, %390 : vector<17x1xi32>
    %392 = vector.broadcast %389 : vector<1x1xi32> to vector<17x1xi32>
    %393 = arith.cmpi eq, %39, %392 : vector<17x1xi32>
    %394 = arith.ori %391, %393 : vector<17x1xi1>
    %395 = arith.extui %394 : vector<17x1xi1> to vector<17x1xi32>
    %396 = arith.sitofp %395 : vector<17x1xi32> to vector<17x1xf32>
    %397 = arith.maximumf %277, %396 : vector<17x1xf32>
    %c2_i32 = arith.constant 2 : i32
    %398 = vector.broadcast %c2_i32 : i32 to vector<1x128xi32>
    %399 = arith.cmpi eq, %41, %398 : vector<1x128xi32>
    %400 = vector.shape_cast %374 : vector<1x1xi32> to vector<1x1xi32>
    %401 = vector.broadcast %400 : vector<1x1xi32> to vector<1x128xi32>
    %402 = arith.select %399, %401, %282 : vector<1x128xi1>, vector<1x128xi32>
    %403 = vector.broadcast %374 : vector<1x1xi32> to vector<17x1xi32>
    %404 = arith.cmpi eq, %39, %403 : vector<17x1xi32>
    %405 = arith.extui %404 : vector<17x1xi1> to vector<17x1xi32>
    %406 = arith.sitofp %405 : vector<17x1xi32> to vector<17x1xf32>
    %407 = vector.broadcast %406 : vector<17x1xf32> to vector<17x128xf32>
    %408 = arith.mulf %407, %30 : vector<17x128xf32>
    %cst_155 = arith.constant dense<0.000000e+00> : vector<128xf32>
    %409 = vector.multi_reduction <add>, %408, %cst_155 [0] : vector<17x128xf32> to vector<128xf32>
    %410 = vector.shape_cast %409 : vector<128xf32> to vector<1x128xf32>
    %c0_156 = arith.constant 0 : index
    %c0_157 = arith.constant 0 : index
    %411 = vector.load %arg9[%c0_156, %c0_157] : memref<32x128xf32, #tpu.memory_space<vmem>>, vector<32x128xf32>
    %cst_158 = arith.constant dense<0.000000e+00> : vector<1x128xf32>
    %412 = tpu.matmul %318, %411, %cst_158 {dimension_numbers = #tpu.dot_dimension_numbers<[1], [0], [0], [1], [0, 0, 1, 1], [], []>} : vector<1x32xf32>, vector<32x128xf32>, vector<1x128xf32> -> vector<1x128xf32>
    %413 = arith.addf %410, %412 : vector<1x128xf32>
    %414 = vector.extract_strided_slice %413 {offsets = [0, 0], sizes = [1, 32], strides = [1, 1]} : vector<1x128xf32> to vector<1x32xf32>
    %415 = arith.negf %414 : vector<1x32xf32>
    %416 = math.exp %415 : vector<1x32xf32>
    %cst_159 = arith.constant 1.000000e+00 : f32
    %417 = vector.broadcast %cst_159 : f32 to vector<1x32xf32>
    %418 = arith.addf %417, %416 : vector<1x32xf32>
    %419 = arith.divf %417, %418 : vector<1x32xf32>
    %420 = vector.extract_strided_slice %413 {offsets = [0, 32], sizes = [1, 32], strides = [1, 1]} : vector<1x128xf32> to vector<1x32xf32>
    %421 = arith.negf %420 : vector<1x32xf32>
    %422 = math.exp %421 : vector<1x32xf32>
    %cst_160 = arith.constant 1.000000e+00 : f32
    %423 = vector.broadcast %cst_160 : f32 to vector<1x32xf32>
    %424 = arith.addf %423, %422 : vector<1x32xf32>
    %425 = arith.divf %423, %424 : vector<1x32xf32>
    %426 = vector.extract_strided_slice %413 {offsets = [0, 64], sizes = [1, 32], strides = [1, 1]} : vector<1x128xf32> to vector<1x32xf32>
    %427 = math.tanh %426 : vector<1x32xf32>
    %428 = vector.extract_strided_slice %413 {offsets = [0, 96], sizes = [1, 32], strides = [1, 1]} : vector<1x128xf32> to vector<1x32xf32>
    %429 = arith.negf %428 : vector<1x32xf32>
    %430 = math.exp %429 : vector<1x32xf32>
    %cst_161 = arith.constant 1.000000e+00 : f32
    %431 = vector.broadcast %cst_161 : f32 to vector<1x32xf32>
    %432 = arith.addf %431, %430 : vector<1x32xf32>
    %433 = arith.divf %431, %432 : vector<1x32xf32>
    %434 = arith.mulf %425, %316 : vector<1x32xf32>
    %435 = arith.mulf %419, %427 : vector<1x32xf32>
    %436 = arith.addf %434, %435 : vector<1x32xf32>
    %437 = math.tanh %436 : vector<1x32xf32>
    %438 = arith.mulf %433, %437 : vector<1x32xf32>
    %c0_162 = arith.constant 0 : index
    %c0_163 = arith.constant 0 : index
    %439 = vector.load %arg13[%c0_162, %c0_163] : memref<1x32xf32, #tpu.memory_space<vmem>>, vector<1x32xf32>
    %440 = vector.broadcast %382 : vector<17x1xf32> to vector<17x32xf32>
    %441 = vector.broadcast %439 : vector<1x32xf32> to vector<17x32xf32>
    %442 = arith.mulf %440, %441 : vector<17x32xf32>
    %c0_164 = arith.constant 0 : index
    %c0_165 = arith.constant 0 : index
    %443 = vector.load %arg11[%c0_164, %c0_165] : memref<32x32xf32, #tpu.memory_space<vmem>>, vector<32x32xf32>
    %cst_166 = arith.constant dense<0.000000e+00> : vector<1x32xf32>
    %444 = tpu.matmul %438, %443, %cst_166 {dimension_numbers = #tpu.dot_dimension_numbers<[1], [0], [0], [1], [0, 0, 1, 1], [], []>} : vector<1x32xf32>, vector<32x32xf32>, vector<1x32xf32> -> vector<1x32xf32>
    %445 = vector.broadcast %444 : vector<1x32xf32> to vector<17x32xf32>
    %446 = arith.addf %21, %445 : vector<17x32xf32>
    %447 = arith.addf %446, %442 : vector<17x32xf32>
    %448 = math.tanh %447 : vector<17x32xf32>
    %c0_167 = arith.constant 0 : index
    %c0_168 = arith.constant 0 : index
    %449 = vector.load %arg12[%c0_167, %c0_168] : memref<1x32xf32, #tpu.memory_space<vmem>>, vector<1x32xf32>
    %450 = vector.broadcast %449 : vector<1x32xf32> to vector<17x32xf32>
    %451 = arith.mulf %448, %450 : vector<17x32xf32>
    %cst_169 = arith.constant dense<0.000000e+00> : vector<17xf32>
    %452 = vector.multi_reduction <add>, %451, %cst_169 [1] : vector<17x32xf32> to vector<17xf32>
    %453 = vector.shape_cast %452 : vector<17xf32> to vector<17x1xf32>
    %cst_170 = arith.constant dense<0xFF800000> : vector<1xf32>
    %454 = vector.multi_reduction <maximumf>, %453, %cst_170 [0] : vector<17x1xf32> to vector<1xf32>
    %455 = vector.shape_cast %454 : vector<1xf32> to vector<1x1xf32>
    %456 = vector.broadcast %455 : vector<1x1xf32> to vector<17x1xf32>
    %457 = arith.subf %453, %456 : vector<17x1xf32>
    %458 = math.exp %457 : vector<17x1xf32>
    %cst_171 = arith.constant dense<0.000000e+00> : vector<1xf32>
    %459 = vector.multi_reduction <add>, %458, %cst_171 [0] : vector<17x1xf32> to vector<1xf32>
    %460 = vector.shape_cast %459 : vector<1xf32> to vector<1x1xf32>
    %461 = vector.broadcast %460 : vector<1x1xf32> to vector<17x1xf32>
    %462 = arith.divf %458, %461 : vector<17x1xf32>
    %463 = vector.broadcast %462 : vector<17x1xf32> to vector<17x32xf32>
    %464 = arith.mulf %463, %21 : vector<17x32xf32>
    %cst_172 = arith.constant dense<0.000000e+00> : vector<32xf32>
    %465 = vector.multi_reduction <add>, %464, %cst_172 [0] : vector<17x32xf32> to vector<32xf32>
    %466 = vector.shape_cast %465 : vector<32xf32> to vector<1x32xf32>
    %c0_173 = arith.constant 0 : index
    %c0_174 = arith.constant 0 : index
    %467 = vector.load %arg14[%c0_173, %c0_174] : memref<32x32xf32, #tpu.memory_space<vmem>>, vector<32x32xf32>
    %cst_175 = arith.constant dense<0.000000e+00> : vector<1x32xf32>
    %468 = tpu.matmul %466, %467, %cst_175 {dimension_numbers = #tpu.dot_dimension_numbers<[1], [0], [0], [1], [0, 0, 1, 1], [], []>} : vector<1x32xf32>, vector<32x32xf32>, vector<1x32xf32> -> vector<1x32xf32>
    %469 = vector.broadcast %468 : vector<1x32xf32> to vector<17x32xf32>
    %470 = arith.addf %19, %469 : vector<17x32xf32>
    %c0_176 = arith.constant 0 : index
    %c0_177 = arith.constant 0 : index
    %471 = vector.load %arg16[%c0_176, %c0_177] : memref<1x32xf32, #tpu.memory_space<vmem>>, vector<1x32xf32>
    %472 = vector.broadcast %382 : vector<17x1xf32> to vector<17x32xf32>
    %473 = vector.broadcast %471 : vector<1x32xf32> to vector<17x32xf32>
    %474 = arith.mulf %472, %473 : vector<17x32xf32>
    %475 = arith.addf %470, %474 : vector<17x32xf32>
    %476 = math.tanh %475 : vector<17x32xf32>
    %c0_178 = arith.constant 0 : index
    %c0_179 = arith.constant 0 : index
    %477 = vector.load %arg15[%c0_178, %c0_179] : memref<1x32xf32, #tpu.memory_space<vmem>>, vector<1x32xf32>
    %478 = vector.broadcast %477 : vector<1x32xf32> to vector<17x32xf32>
    %479 = arith.mulf %476, %478 : vector<17x32xf32>
    %cst_180 = arith.constant dense<0.000000e+00> : vector<17xf32>
    %480 = vector.multi_reduction <add>, %479, %cst_180 [1] : vector<17x32xf32> to vector<17xf32>
    %481 = vector.shape_cast %480 : vector<17xf32> to vector<17x1xf32>
    %cst_181 = arith.constant 0.000000e+00 : f32
    %482 = vector.broadcast %cst_181 : f32 to vector<17x1xf32>
    %483 = arith.cmpf ogt, %397, %482 : vector<17x1xf32>
    %cst_182 = arith.constant -9.99999984E+17 : f32
    %484 = vector.broadcast %cst_182 : f32 to vector<17x1xf32>
    %485 = arith.select %483, %484, %481 : vector<17x1xi1>, vector<17x1xf32>
    %cst_183 = arith.constant dense<0xFF800000> : vector<1xf32>
    %486 = vector.multi_reduction <maximumf>, %485, %cst_183 [0] : vector<17x1xf32> to vector<1xf32>
    %487 = vector.shape_cast %486 : vector<1xf32> to vector<1x1xf32>
    %488 = vector.broadcast %487 : vector<1x1xf32> to vector<17x1xf32>
    %489 = arith.cmpf oge, %485, %488 : vector<17x1xf32>
    %cst_184 = arith.constant 1.700000e+01 : f32
    %490 = vector.broadcast %cst_184 : f32 to vector<17x1xf32>
    %491 = arith.select %489, %40, %490 : vector<17x1xi1>, vector<17x1xf32>
    %cst_185 = arith.constant dense<0x7F800000> : vector<1xf32>
    %492 = vector.multi_reduction <minimumf>, %491, %cst_185 [0] : vector<17x1xf32> to vector<1xf32>
    %493 = vector.shape_cast %492 : vector<1xf32> to vector<1x1xf32>
    %494 = arith.fptosi %493 : vector<1x1xf32> to vector<1x1xi32>
    %495 = vector.broadcast %487 : vector<1x1xf32> to vector<17x1xf32>
    %496 = arith.subf %485, %495 : vector<17x1xf32>
    %497 = math.exp %496 : vector<17x1xf32>
    %cst_186 = arith.constant dense<0.000000e+00> : vector<1xf32>
    %498 = vector.multi_reduction <add>, %497, %cst_186 [0] : vector<17x1xf32> to vector<1xf32>
    %499 = vector.shape_cast %498 : vector<1xf32> to vector<1x1xf32>
    %500 = vector.broadcast %499 : vector<1x1xf32> to vector<17x1xf32>
    %501 = arith.divf %497, %500 : vector<17x1xf32>
    %502 = arith.addf %382, %501 : vector<17x1xf32>
    %c8_i32_187 = arith.constant 8 : i32
    %503 = vector.broadcast %c8_i32_187 : i32 to vector<1x1xi32>
    %504 = arith.cmpi slt, %494, %503 : vector<1x1xi32>
    %c8_i32_188 = arith.constant 8 : i32
    %505 = vector.broadcast %c8_i32_188 : i32 to vector<1x1xi32>
    %506 = arith.addi %494, %505 : vector<1x1xi32>
    %c8_i32_189 = arith.constant 8 : i32
    %507 = vector.broadcast %c8_i32_189 : i32 to vector<1x1xi32>
    %508 = arith.subi %494, %507 : vector<1x1xi32>
    %509 = arith.select %504, %506, %508 : vector<1x1xi1>, vector<1x1xi32>
    %510 = vector.broadcast %494 : vector<1x1xi32> to vector<17x1xi32>
    %511 = arith.cmpi eq, %39, %510 : vector<17x1xi32>
    %512 = vector.broadcast %509 : vector<1x1xi32> to vector<17x1xi32>
    %513 = arith.cmpi eq, %39, %512 : vector<17x1xi32>
    %514 = arith.ori %511, %513 : vector<17x1xi1>
    %515 = arith.extui %514 : vector<17x1xi1> to vector<17x1xi32>
    %516 = arith.sitofp %515 : vector<17x1xi32> to vector<17x1xf32>
    %517 = arith.maximumf %397, %516 : vector<17x1xf32>
    %c3_i32 = arith.constant 3 : i32
    %518 = vector.broadcast %c3_i32 : i32 to vector<1x128xi32>
    %519 = arith.cmpi eq, %41, %518 : vector<1x128xi32>
    %520 = vector.shape_cast %494 : vector<1x1xi32> to vector<1x1xi32>
    %521 = vector.broadcast %520 : vector<1x1xi32> to vector<1x128xi32>
    %522 = arith.select %519, %521, %402 : vector<1x128xi1>, vector<1x128xi32>
    %523 = vector.broadcast %494 : vector<1x1xi32> to vector<17x1xi32>
    %524 = arith.cmpi eq, %39, %523 : vector<17x1xi32>
    %525 = arith.extui %524 : vector<17x1xi1> to vector<17x1xi32>
    %526 = arith.sitofp %525 : vector<17x1xi32> to vector<17x1xf32>
    %527 = vector.broadcast %526 : vector<17x1xf32> to vector<17x128xf32>
    %528 = arith.mulf %527, %30 : vector<17x128xf32>
    %cst_190 = arith.constant dense<0.000000e+00> : vector<128xf32>
    %529 = vector.multi_reduction <add>, %528, %cst_190 [0] : vector<17x128xf32> to vector<128xf32>
    %530 = vector.shape_cast %529 : vector<128xf32> to vector<1x128xf32>
    %c0_191 = arith.constant 0 : index
    %c0_192 = arith.constant 0 : index
    %531 = vector.load %arg9[%c0_191, %c0_192] : memref<32x128xf32, #tpu.memory_space<vmem>>, vector<32x128xf32>
    %cst_193 = arith.constant dense<0.000000e+00> : vector<1x128xf32>
    %532 = tpu.matmul %438, %531, %cst_193 {dimension_numbers = #tpu.dot_dimension_numbers<[1], [0], [0], [1], [0, 0, 1, 1], [], []>} : vector<1x32xf32>, vector<32x128xf32>, vector<1x128xf32> -> vector<1x128xf32>
    %533 = arith.addf %530, %532 : vector<1x128xf32>
    %534 = vector.extract_strided_slice %533 {offsets = [0, 0], sizes = [1, 32], strides = [1, 1]} : vector<1x128xf32> to vector<1x32xf32>
    %535 = arith.negf %534 : vector<1x32xf32>
    %536 = math.exp %535 : vector<1x32xf32>
    %cst_194 = arith.constant 1.000000e+00 : f32
    %537 = vector.broadcast %cst_194 : f32 to vector<1x32xf32>
    %538 = arith.addf %537, %536 : vector<1x32xf32>
    %539 = arith.divf %537, %538 : vector<1x32xf32>
    %540 = vector.extract_strided_slice %533 {offsets = [0, 32], sizes = [1, 32], strides = [1, 1]} : vector<1x128xf32> to vector<1x32xf32>
    %541 = arith.negf %540 : vector<1x32xf32>
    %542 = math.exp %541 : vector<1x32xf32>
    %cst_195 = arith.constant 1.000000e+00 : f32
    %543 = vector.broadcast %cst_195 : f32 to vector<1x32xf32>
    %544 = arith.addf %543, %542 : vector<1x32xf32>
    %545 = arith.divf %543, %544 : vector<1x32xf32>
    %546 = vector.extract_strided_slice %533 {offsets = [0, 64], sizes = [1, 32], strides = [1, 1]} : vector<1x128xf32> to vector<1x32xf32>
    %547 = math.tanh %546 : vector<1x32xf32>
    %548 = vector.extract_strided_slice %533 {offsets = [0, 96], sizes = [1, 32], strides = [1, 1]} : vector<1x128xf32> to vector<1x32xf32>
    %549 = arith.negf %548 : vector<1x32xf32>
    %550 = math.exp %549 : vector<1x32xf32>
    %cst_196 = arith.constant 1.000000e+00 : f32
    %551 = vector.broadcast %cst_196 : f32 to vector<1x32xf32>
    %552 = arith.addf %551, %550 : vector<1x32xf32>
    %553 = arith.divf %551, %552 : vector<1x32xf32>
    %554 = arith.mulf %545, %436 : vector<1x32xf32>
    %555 = arith.mulf %539, %547 : vector<1x32xf32>
    %556 = arith.addf %554, %555 : vector<1x32xf32>
    %557 = math.tanh %556 : vector<1x32xf32>
    %558 = arith.mulf %553, %557 : vector<1x32xf32>
    %c0_197 = arith.constant 0 : index
    %c0_198 = arith.constant 0 : index
    %559 = vector.load %arg13[%c0_197, %c0_198] : memref<1x32xf32, #tpu.memory_space<vmem>>, vector<1x32xf32>
    %560 = vector.broadcast %502 : vector<17x1xf32> to vector<17x32xf32>
    %561 = vector.broadcast %559 : vector<1x32xf32> to vector<17x32xf32>
    %562 = arith.mulf %560, %561 : vector<17x32xf32>
    %c0_199 = arith.constant 0 : index
    %c0_200 = arith.constant 0 : index
    %563 = vector.load %arg11[%c0_199, %c0_200] : memref<32x32xf32, #tpu.memory_space<vmem>>, vector<32x32xf32>
    %cst_201 = arith.constant dense<0.000000e+00> : vector<1x32xf32>
    %564 = tpu.matmul %558, %563, %cst_201 {dimension_numbers = #tpu.dot_dimension_numbers<[1], [0], [0], [1], [0, 0, 1, 1], [], []>} : vector<1x32xf32>, vector<32x32xf32>, vector<1x32xf32> -> vector<1x32xf32>
    %565 = vector.broadcast %564 : vector<1x32xf32> to vector<17x32xf32>
    %566 = arith.addf %21, %565 : vector<17x32xf32>
    %567 = arith.addf %566, %562 : vector<17x32xf32>
    %568 = math.tanh %567 : vector<17x32xf32>
    %c0_202 = arith.constant 0 : index
    %c0_203 = arith.constant 0 : index
    %569 = vector.load %arg12[%c0_202, %c0_203] : memref<1x32xf32, #tpu.memory_space<vmem>>, vector<1x32xf32>
    %570 = vector.broadcast %569 : vector<1x32xf32> to vector<17x32xf32>
    %571 = arith.mulf %568, %570 : vector<17x32xf32>
    %cst_204 = arith.constant dense<0.000000e+00> : vector<17xf32>
    %572 = vector.multi_reduction <add>, %571, %cst_204 [1] : vector<17x32xf32> to vector<17xf32>
    %573 = vector.shape_cast %572 : vector<17xf32> to vector<17x1xf32>
    %cst_205 = arith.constant dense<0xFF800000> : vector<1xf32>
    %574 = vector.multi_reduction <maximumf>, %573, %cst_205 [0] : vector<17x1xf32> to vector<1xf32>
    %575 = vector.shape_cast %574 : vector<1xf32> to vector<1x1xf32>
    %576 = vector.broadcast %575 : vector<1x1xf32> to vector<17x1xf32>
    %577 = arith.subf %573, %576 : vector<17x1xf32>
    %578 = math.exp %577 : vector<17x1xf32>
    %cst_206 = arith.constant dense<0.000000e+00> : vector<1xf32>
    %579 = vector.multi_reduction <add>, %578, %cst_206 [0] : vector<17x1xf32> to vector<1xf32>
    %580 = vector.shape_cast %579 : vector<1xf32> to vector<1x1xf32>
    %581 = vector.broadcast %580 : vector<1x1xf32> to vector<17x1xf32>
    %582 = arith.divf %578, %581 : vector<17x1xf32>
    %583 = vector.broadcast %582 : vector<17x1xf32> to vector<17x32xf32>
    %584 = arith.mulf %583, %21 : vector<17x32xf32>
    %cst_207 = arith.constant dense<0.000000e+00> : vector<32xf32>
    %585 = vector.multi_reduction <add>, %584, %cst_207 [0] : vector<17x32xf32> to vector<32xf32>
    %586 = vector.shape_cast %585 : vector<32xf32> to vector<1x32xf32>
    %c0_208 = arith.constant 0 : index
    %c0_209 = arith.constant 0 : index
    %587 = vector.load %arg14[%c0_208, %c0_209] : memref<32x32xf32, #tpu.memory_space<vmem>>, vector<32x32xf32>
    %cst_210 = arith.constant dense<0.000000e+00> : vector<1x32xf32>
    %588 = tpu.matmul %586, %587, %cst_210 {dimension_numbers = #tpu.dot_dimension_numbers<[1], [0], [0], [1], [0, 0, 1, 1], [], []>} : vector<1x32xf32>, vector<32x32xf32>, vector<1x32xf32> -> vector<1x32xf32>
    %589 = vector.broadcast %588 : vector<1x32xf32> to vector<17x32xf32>
    %590 = arith.addf %19, %589 : vector<17x32xf32>
    %c0_211 = arith.constant 0 : index
    %c0_212 = arith.constant 0 : index
    %591 = vector.load %arg16[%c0_211, %c0_212] : memref<1x32xf32, #tpu.memory_space<vmem>>, vector<1x32xf32>
    %592 = vector.broadcast %502 : vector<17x1xf32> to vector<17x32xf32>
    %593 = vector.broadcast %591 : vector<1x32xf32> to vector<17x32xf32>
    %594 = arith.mulf %592, %593 : vector<17x32xf32>
    %595 = arith.addf %590, %594 : vector<17x32xf32>
    %596 = math.tanh %595 : vector<17x32xf32>
    %c0_213 = arith.constant 0 : index
    %c0_214 = arith.constant 0 : index
    %597 = vector.load %arg15[%c0_213, %c0_214] : memref<1x32xf32, #tpu.memory_space<vmem>>, vector<1x32xf32>
    %598 = vector.broadcast %597 : vector<1x32xf32> to vector<17x32xf32>
    %599 = arith.mulf %596, %598 : vector<17x32xf32>
    %cst_215 = arith.constant dense<0.000000e+00> : vector<17xf32>
    %600 = vector.multi_reduction <add>, %599, %cst_215 [1] : vector<17x32xf32> to vector<17xf32>
    %601 = vector.shape_cast %600 : vector<17xf32> to vector<17x1xf32>
    %cst_216 = arith.constant 0.000000e+00 : f32
    %602 = vector.broadcast %cst_216 : f32 to vector<17x1xf32>
    %603 = arith.cmpf ogt, %517, %602 : vector<17x1xf32>
    %cst_217 = arith.constant -9.99999984E+17 : f32
    %604 = vector.broadcast %cst_217 : f32 to vector<17x1xf32>
    %605 = arith.select %603, %604, %601 : vector<17x1xi1>, vector<17x1xf32>
    %cst_218 = arith.constant dense<0xFF800000> : vector<1xf32>
    %606 = vector.multi_reduction <maximumf>, %605, %cst_218 [0] : vector<17x1xf32> to vector<1xf32>
    %607 = vector.shape_cast %606 : vector<1xf32> to vector<1x1xf32>
    %608 = vector.broadcast %607 : vector<1x1xf32> to vector<17x1xf32>
    %609 = arith.cmpf oge, %605, %608 : vector<17x1xf32>
    %cst_219 = arith.constant 1.700000e+01 : f32
    %610 = vector.broadcast %cst_219 : f32 to vector<17x1xf32>
    %611 = arith.select %609, %40, %610 : vector<17x1xi1>, vector<17x1xf32>
    %cst_220 = arith.constant dense<0x7F800000> : vector<1xf32>
    %612 = vector.multi_reduction <minimumf>, %611, %cst_220 [0] : vector<17x1xf32> to vector<1xf32>
    %613 = vector.shape_cast %612 : vector<1xf32> to vector<1x1xf32>
    %614 = arith.fptosi %613 : vector<1x1xf32> to vector<1x1xi32>
    %615 = vector.broadcast %607 : vector<1x1xf32> to vector<17x1xf32>
    %616 = arith.subf %605, %615 : vector<17x1xf32>
    %617 = math.exp %616 : vector<17x1xf32>
    %cst_221 = arith.constant dense<0.000000e+00> : vector<1xf32>
    %618 = vector.multi_reduction <add>, %617, %cst_221 [0] : vector<17x1xf32> to vector<1xf32>
    %619 = vector.shape_cast %618 : vector<1xf32> to vector<1x1xf32>
    %620 = vector.broadcast %619 : vector<1x1xf32> to vector<17x1xf32>
    %621 = arith.divf %617, %620 : vector<17x1xf32>
    %622 = arith.addf %502, %621 : vector<17x1xf32>
    %c8_i32_222 = arith.constant 8 : i32
    %623 = vector.broadcast %c8_i32_222 : i32 to vector<1x1xi32>
    %624 = arith.cmpi slt, %614, %623 : vector<1x1xi32>
    %c8_i32_223 = arith.constant 8 : i32
    %625 = vector.broadcast %c8_i32_223 : i32 to vector<1x1xi32>
    %626 = arith.addi %614, %625 : vector<1x1xi32>
    %c8_i32_224 = arith.constant 8 : i32
    %627 = vector.broadcast %c8_i32_224 : i32 to vector<1x1xi32>
    %628 = arith.subi %614, %627 : vector<1x1xi32>
    %629 = arith.select %624, %626, %628 : vector<1x1xi1>, vector<1x1xi32>
    %630 = vector.broadcast %614 : vector<1x1xi32> to vector<17x1xi32>
    %631 = arith.cmpi eq, %39, %630 : vector<17x1xi32>
    %632 = vector.broadcast %629 : vector<1x1xi32> to vector<17x1xi32>
    %633 = arith.cmpi eq, %39, %632 : vector<17x1xi32>
    %634 = arith.ori %631, %633 : vector<17x1xi1>
    %635 = arith.extui %634 : vector<17x1xi1> to vector<17x1xi32>
    %636 = arith.sitofp %635 : vector<17x1xi32> to vector<17x1xf32>
    %637 = arith.maximumf %517, %636 : vector<17x1xf32>
    %c4_i32 = arith.constant 4 : i32
    %638 = vector.broadcast %c4_i32 : i32 to vector<1x128xi32>
    %639 = arith.cmpi eq, %41, %638 : vector<1x128xi32>
    %640 = vector.shape_cast %614 : vector<1x1xi32> to vector<1x1xi32>
    %641 = vector.broadcast %640 : vector<1x1xi32> to vector<1x128xi32>
    %642 = arith.select %639, %641, %522 : vector<1x128xi1>, vector<1x128xi32>
    %643 = vector.broadcast %614 : vector<1x1xi32> to vector<17x1xi32>
    %644 = arith.cmpi eq, %39, %643 : vector<17x1xi32>
    %645 = arith.extui %644 : vector<17x1xi1> to vector<17x1xi32>
    %646 = arith.sitofp %645 : vector<17x1xi32> to vector<17x1xf32>
    %647 = vector.broadcast %646 : vector<17x1xf32> to vector<17x128xf32>
    %648 = arith.mulf %647, %30 : vector<17x128xf32>
    %cst_225 = arith.constant dense<0.000000e+00> : vector<128xf32>
    %649 = vector.multi_reduction <add>, %648, %cst_225 [0] : vector<17x128xf32> to vector<128xf32>
    %650 = vector.shape_cast %649 : vector<128xf32> to vector<1x128xf32>
    %c0_226 = arith.constant 0 : index
    %c0_227 = arith.constant 0 : index
    %651 = vector.load %arg9[%c0_226, %c0_227] : memref<32x128xf32, #tpu.memory_space<vmem>>, vector<32x128xf32>
    %cst_228 = arith.constant dense<0.000000e+00> : vector<1x128xf32>
    %652 = tpu.matmul %558, %651, %cst_228 {dimension_numbers = #tpu.dot_dimension_numbers<[1], [0], [0], [1], [0, 0, 1, 1], [], []>} : vector<1x32xf32>, vector<32x128xf32>, vector<1x128xf32> -> vector<1x128xf32>
    %653 = arith.addf %650, %652 : vector<1x128xf32>
    %654 = vector.extract_strided_slice %653 {offsets = [0, 0], sizes = [1, 32], strides = [1, 1]} : vector<1x128xf32> to vector<1x32xf32>
    %655 = arith.negf %654 : vector<1x32xf32>
    %656 = math.exp %655 : vector<1x32xf32>
    %cst_229 = arith.constant 1.000000e+00 : f32
    %657 = vector.broadcast %cst_229 : f32 to vector<1x32xf32>
    %658 = arith.addf %657, %656 : vector<1x32xf32>
    %659 = arith.divf %657, %658 : vector<1x32xf32>
    %660 = vector.extract_strided_slice %653 {offsets = [0, 32], sizes = [1, 32], strides = [1, 1]} : vector<1x128xf32> to vector<1x32xf32>
    %661 = arith.negf %660 : vector<1x32xf32>
    %662 = math.exp %661 : vector<1x32xf32>
    %cst_230 = arith.constant 1.000000e+00 : f32
    %663 = vector.broadcast %cst_230 : f32 to vector<1x32xf32>
    %664 = arith.addf %663, %662 : vector<1x32xf32>
    %665 = arith.divf %663, %664 : vector<1x32xf32>
    %666 = vector.extract_strided_slice %653 {offsets = [0, 64], sizes = [1, 32], strides = [1, 1]} : vector<1x128xf32> to vector<1x32xf32>
    %667 = math.tanh %666 : vector<1x32xf32>
    %668 = vector.extract_strided_slice %653 {offsets = [0, 96], sizes = [1, 32], strides = [1, 1]} : vector<1x128xf32> to vector<1x32xf32>
    %669 = arith.negf %668 : vector<1x32xf32>
    %670 = math.exp %669 : vector<1x32xf32>
    %cst_231 = arith.constant 1.000000e+00 : f32
    %671 = vector.broadcast %cst_231 : f32 to vector<1x32xf32>
    %672 = arith.addf %671, %670 : vector<1x32xf32>
    %673 = arith.divf %671, %672 : vector<1x32xf32>
    %674 = arith.mulf %665, %556 : vector<1x32xf32>
    %675 = arith.mulf %659, %667 : vector<1x32xf32>
    %676 = arith.addf %674, %675 : vector<1x32xf32>
    %677 = math.tanh %676 : vector<1x32xf32>
    %678 = arith.mulf %673, %677 : vector<1x32xf32>
    %c0_232 = arith.constant 0 : index
    %c0_233 = arith.constant 0 : index
    %679 = vector.load %arg13[%c0_232, %c0_233] : memref<1x32xf32, #tpu.memory_space<vmem>>, vector<1x32xf32>
    %680 = vector.broadcast %622 : vector<17x1xf32> to vector<17x32xf32>
    %681 = vector.broadcast %679 : vector<1x32xf32> to vector<17x32xf32>
    %682 = arith.mulf %680, %681 : vector<17x32xf32>
    %c0_234 = arith.constant 0 : index
    %c0_235 = arith.constant 0 : index
    %683 = vector.load %arg11[%c0_234, %c0_235] : memref<32x32xf32, #tpu.memory_space<vmem>>, vector<32x32xf32>
    %cst_236 = arith.constant dense<0.000000e+00> : vector<1x32xf32>
    %684 = tpu.matmul %678, %683, %cst_236 {dimension_numbers = #tpu.dot_dimension_numbers<[1], [0], [0], [1], [0, 0, 1, 1], [], []>} : vector<1x32xf32>, vector<32x32xf32>, vector<1x32xf32> -> vector<1x32xf32>
    %685 = vector.broadcast %684 : vector<1x32xf32> to vector<17x32xf32>
    %686 = arith.addf %21, %685 : vector<17x32xf32>
    %687 = arith.addf %686, %682 : vector<17x32xf32>
    %688 = math.tanh %687 : vector<17x32xf32>
    %c0_237 = arith.constant 0 : index
    %c0_238 = arith.constant 0 : index
    %689 = vector.load %arg12[%c0_237, %c0_238] : memref<1x32xf32, #tpu.memory_space<vmem>>, vector<1x32xf32>
    %690 = vector.broadcast %689 : vector<1x32xf32> to vector<17x32xf32>
    %691 = arith.mulf %688, %690 : vector<17x32xf32>
    %cst_239 = arith.constant dense<0.000000e+00> : vector<17xf32>
    %692 = vector.multi_reduction <add>, %691, %cst_239 [1] : vector<17x32xf32> to vector<17xf32>
    %693 = vector.shape_cast %692 : vector<17xf32> to vector<17x1xf32>
    %cst_240 = arith.constant dense<0xFF800000> : vector<1xf32>
    %694 = vector.multi_reduction <maximumf>, %693, %cst_240 [0] : vector<17x1xf32> to vector<1xf32>
    %695 = vector.shape_cast %694 : vector<1xf32> to vector<1x1xf32>
    %696 = vector.broadcast %695 : vector<1x1xf32> to vector<17x1xf32>
    %697 = arith.subf %693, %696 : vector<17x1xf32>
    %698 = math.exp %697 : vector<17x1xf32>
    %cst_241 = arith.constant dense<0.000000e+00> : vector<1xf32>
    %699 = vector.multi_reduction <add>, %698, %cst_241 [0] : vector<17x1xf32> to vector<1xf32>
    %700 = vector.shape_cast %699 : vector<1xf32> to vector<1x1xf32>
    %701 = vector.broadcast %700 : vector<1x1xf32> to vector<17x1xf32>
    %702 = arith.divf %698, %701 : vector<17x1xf32>
    %703 = vector.broadcast %702 : vector<17x1xf32> to vector<17x32xf32>
    %704 = arith.mulf %703, %21 : vector<17x32xf32>
    %cst_242 = arith.constant dense<0.000000e+00> : vector<32xf32>
    %705 = vector.multi_reduction <add>, %704, %cst_242 [0] : vector<17x32xf32> to vector<32xf32>
    %706 = vector.shape_cast %705 : vector<32xf32> to vector<1x32xf32>
    %c0_243 = arith.constant 0 : index
    %c0_244 = arith.constant 0 : index
    %707 = vector.load %arg14[%c0_243, %c0_244] : memref<32x32xf32, #tpu.memory_space<vmem>>, vector<32x32xf32>
    %cst_245 = arith.constant dense<0.000000e+00> : vector<1x32xf32>
    %708 = tpu.matmul %706, %707, %cst_245 {dimension_numbers = #tpu.dot_dimension_numbers<[1], [0], [0], [1], [0, 0, 1, 1], [], []>} : vector<1x32xf32>, vector<32x32xf32>, vector<1x32xf32> -> vector<1x32xf32>
    %709 = vector.broadcast %708 : vector<1x32xf32> to vector<17x32xf32>
    %710 = arith.addf %19, %709 : vector<17x32xf32>
    %c0_246 = arith.constant 0 : index
    %c0_247 = arith.constant 0 : index
    %711 = vector.load %arg16[%c0_246, %c0_247] : memref<1x32xf32, #tpu.memory_space<vmem>>, vector<1x32xf32>
    %712 = vector.broadcast %622 : vector<17x1xf32> to vector<17x32xf32>
    %713 = vector.broadcast %711 : vector<1x32xf32> to vector<17x32xf32>
    %714 = arith.mulf %712, %713 : vector<17x32xf32>
    %715 = arith.addf %710, %714 : vector<17x32xf32>
    %716 = math.tanh %715 : vector<17x32xf32>
    %c0_248 = arith.constant 0 : index
    %c0_249 = arith.constant 0 : index
    %717 = vector.load %arg15[%c0_248, %c0_249] : memref<1x32xf32, #tpu.memory_space<vmem>>, vector<1x32xf32>
    %718 = vector.broadcast %717 : vector<1x32xf32> to vector<17x32xf32>
    %719 = arith.mulf %716, %718 : vector<17x32xf32>
    %cst_250 = arith.constant dense<0.000000e+00> : vector<17xf32>
    %720 = vector.multi_reduction <add>, %719, %cst_250 [1] : vector<17x32xf32> to vector<17xf32>
    %721 = vector.shape_cast %720 : vector<17xf32> to vector<17x1xf32>
    %cst_251 = arith.constant 0.000000e+00 : f32
    %722 = vector.broadcast %cst_251 : f32 to vector<17x1xf32>
    %723 = arith.cmpf ogt, %637, %722 : vector<17x1xf32>
    %cst_252 = arith.constant -9.99999984E+17 : f32
    %724 = vector.broadcast %cst_252 : f32 to vector<17x1xf32>
    %725 = arith.select %723, %724, %721 : vector<17x1xi1>, vector<17x1xf32>
    %cst_253 = arith.constant dense<0xFF800000> : vector<1xf32>
    %726 = vector.multi_reduction <maximumf>, %725, %cst_253 [0] : vector<17x1xf32> to vector<1xf32>
    %727 = vector.shape_cast %726 : vector<1xf32> to vector<1x1xf32>
    %728 = vector.broadcast %727 : vector<1x1xf32> to vector<17x1xf32>
    %729 = arith.cmpf oge, %725, %728 : vector<17x1xf32>
    %cst_254 = arith.constant 1.700000e+01 : f32
    %730 = vector.broadcast %cst_254 : f32 to vector<17x1xf32>
    %731 = arith.select %729, %40, %730 : vector<17x1xi1>, vector<17x1xf32>
    %cst_255 = arith.constant dense<0x7F800000> : vector<1xf32>
    %732 = vector.multi_reduction <minimumf>, %731, %cst_255 [0] : vector<17x1xf32> to vector<1xf32>
    %733 = vector.shape_cast %732 : vector<1xf32> to vector<1x1xf32>
    %734 = arith.fptosi %733 : vector<1x1xf32> to vector<1x1xi32>
    %735 = vector.broadcast %727 : vector<1x1xf32> to vector<17x1xf32>
    %736 = arith.subf %725, %735 : vector<17x1xf32>
    %737 = math.exp %736 : vector<17x1xf32>
    %cst_256 = arith.constant dense<0.000000e+00> : vector<1xf32>
    %738 = vector.multi_reduction <add>, %737, %cst_256 [0] : vector<17x1xf32> to vector<1xf32>
    %739 = vector.shape_cast %738 : vector<1xf32> to vector<1x1xf32>
    %740 = vector.broadcast %739 : vector<1x1xf32> to vector<17x1xf32>
    %741 = arith.divf %737, %740 : vector<17x1xf32>
    %742 = arith.addf %622, %741 : vector<17x1xf32>
    %c8_i32_257 = arith.constant 8 : i32
    %743 = vector.broadcast %c8_i32_257 : i32 to vector<1x1xi32>
    %744 = arith.cmpi slt, %734, %743 : vector<1x1xi32>
    %c8_i32_258 = arith.constant 8 : i32
    %745 = vector.broadcast %c8_i32_258 : i32 to vector<1x1xi32>
    %746 = arith.addi %734, %745 : vector<1x1xi32>
    %c8_i32_259 = arith.constant 8 : i32
    %747 = vector.broadcast %c8_i32_259 : i32 to vector<1x1xi32>
    %748 = arith.subi %734, %747 : vector<1x1xi32>
    %749 = arith.select %744, %746, %748 : vector<1x1xi1>, vector<1x1xi32>
    %750 = vector.broadcast %734 : vector<1x1xi32> to vector<17x1xi32>
    %751 = arith.cmpi eq, %39, %750 : vector<17x1xi32>
    %752 = vector.broadcast %749 : vector<1x1xi32> to vector<17x1xi32>
    %753 = arith.cmpi eq, %39, %752 : vector<17x1xi32>
    %754 = arith.ori %751, %753 : vector<17x1xi1>
    %755 = arith.extui %754 : vector<17x1xi1> to vector<17x1xi32>
    %756 = arith.sitofp %755 : vector<17x1xi32> to vector<17x1xf32>
    %757 = arith.maximumf %637, %756 : vector<17x1xf32>
    %c5_i32 = arith.constant 5 : i32
    %758 = vector.broadcast %c5_i32 : i32 to vector<1x128xi32>
    %759 = arith.cmpi eq, %41, %758 : vector<1x128xi32>
    %760 = vector.shape_cast %734 : vector<1x1xi32> to vector<1x1xi32>
    %761 = vector.broadcast %760 : vector<1x1xi32> to vector<1x128xi32>
    %762 = arith.select %759, %761, %642 : vector<1x128xi1>, vector<1x128xi32>
    %763 = vector.broadcast %734 : vector<1x1xi32> to vector<17x1xi32>
    %764 = arith.cmpi eq, %39, %763 : vector<17x1xi32>
    %765 = arith.extui %764 : vector<17x1xi1> to vector<17x1xi32>
    %766 = arith.sitofp %765 : vector<17x1xi32> to vector<17x1xf32>
    %767 = vector.broadcast %766 : vector<17x1xf32> to vector<17x128xf32>
    %768 = arith.mulf %767, %30 : vector<17x128xf32>
    %cst_260 = arith.constant dense<0.000000e+00> : vector<128xf32>
    %769 = vector.multi_reduction <add>, %768, %cst_260 [0] : vector<17x128xf32> to vector<128xf32>
    %770 = vector.shape_cast %769 : vector<128xf32> to vector<1x128xf32>
    %c0_261 = arith.constant 0 : index
    %c0_262 = arith.constant 0 : index
    %771 = vector.load %arg9[%c0_261, %c0_262] : memref<32x128xf32, #tpu.memory_space<vmem>>, vector<32x128xf32>
    %cst_263 = arith.constant dense<0.000000e+00> : vector<1x128xf32>
    %772 = tpu.matmul %678, %771, %cst_263 {dimension_numbers = #tpu.dot_dimension_numbers<[1], [0], [0], [1], [0, 0, 1, 1], [], []>} : vector<1x32xf32>, vector<32x128xf32>, vector<1x128xf32> -> vector<1x128xf32>
    %773 = arith.addf %770, %772 : vector<1x128xf32>
    %774 = vector.extract_strided_slice %773 {offsets = [0, 0], sizes = [1, 32], strides = [1, 1]} : vector<1x128xf32> to vector<1x32xf32>
    %775 = arith.negf %774 : vector<1x32xf32>
    %776 = math.exp %775 : vector<1x32xf32>
    %cst_264 = arith.constant 1.000000e+00 : f32
    %777 = vector.broadcast %cst_264 : f32 to vector<1x32xf32>
    %778 = arith.addf %777, %776 : vector<1x32xf32>
    %779 = arith.divf %777, %778 : vector<1x32xf32>
    %780 = vector.extract_strided_slice %773 {offsets = [0, 32], sizes = [1, 32], strides = [1, 1]} : vector<1x128xf32> to vector<1x32xf32>
    %781 = arith.negf %780 : vector<1x32xf32>
    %782 = math.exp %781 : vector<1x32xf32>
    %cst_265 = arith.constant 1.000000e+00 : f32
    %783 = vector.broadcast %cst_265 : f32 to vector<1x32xf32>
    %784 = arith.addf %783, %782 : vector<1x32xf32>
    %785 = arith.divf %783, %784 : vector<1x32xf32>
    %786 = vector.extract_strided_slice %773 {offsets = [0, 64], sizes = [1, 32], strides = [1, 1]} : vector<1x128xf32> to vector<1x32xf32>
    %787 = math.tanh %786 : vector<1x32xf32>
    %788 = vector.extract_strided_slice %773 {offsets = [0, 96], sizes = [1, 32], strides = [1, 1]} : vector<1x128xf32> to vector<1x32xf32>
    %789 = arith.negf %788 : vector<1x32xf32>
    %790 = math.exp %789 : vector<1x32xf32>
    %cst_266 = arith.constant 1.000000e+00 : f32
    %791 = vector.broadcast %cst_266 : f32 to vector<1x32xf32>
    %792 = arith.addf %791, %790 : vector<1x32xf32>
    %793 = arith.divf %791, %792 : vector<1x32xf32>
    %794 = arith.mulf %785, %676 : vector<1x32xf32>
    %795 = arith.mulf %779, %787 : vector<1x32xf32>
    %796 = arith.addf %794, %795 : vector<1x32xf32>
    %797 = math.tanh %796 : vector<1x32xf32>
    %798 = arith.mulf %793, %797 : vector<1x32xf32>
    %c0_267 = arith.constant 0 : index
    %c0_268 = arith.constant 0 : index
    %799 = vector.load %arg13[%c0_267, %c0_268] : memref<1x32xf32, #tpu.memory_space<vmem>>, vector<1x32xf32>
    %800 = vector.broadcast %742 : vector<17x1xf32> to vector<17x32xf32>
    %801 = vector.broadcast %799 : vector<1x32xf32> to vector<17x32xf32>
    %802 = arith.mulf %800, %801 : vector<17x32xf32>
    %c0_269 = arith.constant 0 : index
    %c0_270 = arith.constant 0 : index
    %803 = vector.load %arg11[%c0_269, %c0_270] : memref<32x32xf32, #tpu.memory_space<vmem>>, vector<32x32xf32>
    %cst_271 = arith.constant dense<0.000000e+00> : vector<1x32xf32>
    %804 = tpu.matmul %798, %803, %cst_271 {dimension_numbers = #tpu.dot_dimension_numbers<[1], [0], [0], [1], [0, 0, 1, 1], [], []>} : vector<1x32xf32>, vector<32x32xf32>, vector<1x32xf32> -> vector<1x32xf32>
    %805 = vector.broadcast %804 : vector<1x32xf32> to vector<17x32xf32>
    %806 = arith.addf %21, %805 : vector<17x32xf32>
    %807 = arith.addf %806, %802 : vector<17x32xf32>
    %808 = math.tanh %807 : vector<17x32xf32>
    %c0_272 = arith.constant 0 : index
    %c0_273 = arith.constant 0 : index
    %809 = vector.load %arg12[%c0_272, %c0_273] : memref<1x32xf32, #tpu.memory_space<vmem>>, vector<1x32xf32>
    %810 = vector.broadcast %809 : vector<1x32xf32> to vector<17x32xf32>
    %811 = arith.mulf %808, %810 : vector<17x32xf32>
    %cst_274 = arith.constant dense<0.000000e+00> : vector<17xf32>
    %812 = vector.multi_reduction <add>, %811, %cst_274 [1] : vector<17x32xf32> to vector<17xf32>
    %813 = vector.shape_cast %812 : vector<17xf32> to vector<17x1xf32>
    %cst_275 = arith.constant dense<0xFF800000> : vector<1xf32>
    %814 = vector.multi_reduction <maximumf>, %813, %cst_275 [0] : vector<17x1xf32> to vector<1xf32>
    %815 = vector.shape_cast %814 : vector<1xf32> to vector<1x1xf32>
    %816 = vector.broadcast %815 : vector<1x1xf32> to vector<17x1xf32>
    %817 = arith.subf %813, %816 : vector<17x1xf32>
    %818 = math.exp %817 : vector<17x1xf32>
    %cst_276 = arith.constant dense<0.000000e+00> : vector<1xf32>
    %819 = vector.multi_reduction <add>, %818, %cst_276 [0] : vector<17x1xf32> to vector<1xf32>
    %820 = vector.shape_cast %819 : vector<1xf32> to vector<1x1xf32>
    %821 = vector.broadcast %820 : vector<1x1xf32> to vector<17x1xf32>
    %822 = arith.divf %818, %821 : vector<17x1xf32>
    %823 = vector.broadcast %822 : vector<17x1xf32> to vector<17x32xf32>
    %824 = arith.mulf %823, %21 : vector<17x32xf32>
    %cst_277 = arith.constant dense<0.000000e+00> : vector<32xf32>
    %825 = vector.multi_reduction <add>, %824, %cst_277 [0] : vector<17x32xf32> to vector<32xf32>
    %826 = vector.shape_cast %825 : vector<32xf32> to vector<1x32xf32>
    %c0_278 = arith.constant 0 : index
    %c0_279 = arith.constant 0 : index
    %827 = vector.load %arg14[%c0_278, %c0_279] : memref<32x32xf32, #tpu.memory_space<vmem>>, vector<32x32xf32>
    %cst_280 = arith.constant dense<0.000000e+00> : vector<1x32xf32>
    %828 = tpu.matmul %826, %827, %cst_280 {dimension_numbers = #tpu.dot_dimension_numbers<[1], [0], [0], [1], [0, 0, 1, 1], [], []>} : vector<1x32xf32>, vector<32x32xf32>, vector<1x32xf32> -> vector<1x32xf32>
    %829 = vector.broadcast %828 : vector<1x32xf32> to vector<17x32xf32>
    %830 = arith.addf %19, %829 : vector<17x32xf32>
    %c0_281 = arith.constant 0 : index
    %c0_282 = arith.constant 0 : index
    %831 = vector.load %arg16[%c0_281, %c0_282] : memref<1x32xf32, #tpu.memory_space<vmem>>, vector<1x32xf32>
    %832 = vector.broadcast %742 : vector<17x1xf32> to vector<17x32xf32>
    %833 = vector.broadcast %831 : vector<1x32xf32> to vector<17x32xf32>
    %834 = arith.mulf %832, %833 : vector<17x32xf32>
    %835 = arith.addf %830, %834 : vector<17x32xf32>
    %836 = math.tanh %835 : vector<17x32xf32>
    %c0_283 = arith.constant 0 : index
    %c0_284 = arith.constant 0 : index
    %837 = vector.load %arg15[%c0_283, %c0_284] : memref<1x32xf32, #tpu.memory_space<vmem>>, vector<1x32xf32>
    %838 = vector.broadcast %837 : vector<1x32xf32> to vector<17x32xf32>
    %839 = arith.mulf %836, %838 : vector<17x32xf32>
    %cst_285 = arith.constant dense<0.000000e+00> : vector<17xf32>
    %840 = vector.multi_reduction <add>, %839, %cst_285 [1] : vector<17x32xf32> to vector<17xf32>
    %841 = vector.shape_cast %840 : vector<17xf32> to vector<17x1xf32>
    %cst_286 = arith.constant 0.000000e+00 : f32
    %842 = vector.broadcast %cst_286 : f32 to vector<17x1xf32>
    %843 = arith.cmpf ogt, %757, %842 : vector<17x1xf32>
    %cst_287 = arith.constant -9.99999984E+17 : f32
    %844 = vector.broadcast %cst_287 : f32 to vector<17x1xf32>
    %845 = arith.select %843, %844, %841 : vector<17x1xi1>, vector<17x1xf32>
    %cst_288 = arith.constant dense<0xFF800000> : vector<1xf32>
    %846 = vector.multi_reduction <maximumf>, %845, %cst_288 [0] : vector<17x1xf32> to vector<1xf32>
    %847 = vector.shape_cast %846 : vector<1xf32> to vector<1x1xf32>
    %848 = vector.broadcast %847 : vector<1x1xf32> to vector<17x1xf32>
    %849 = arith.cmpf oge, %845, %848 : vector<17x1xf32>
    %cst_289 = arith.constant 1.700000e+01 : f32
    %850 = vector.broadcast %cst_289 : f32 to vector<17x1xf32>
    %851 = arith.select %849, %40, %850 : vector<17x1xi1>, vector<17x1xf32>
    %cst_290 = arith.constant dense<0x7F800000> : vector<1xf32>
    %852 = vector.multi_reduction <minimumf>, %851, %cst_290 [0] : vector<17x1xf32> to vector<1xf32>
    %853 = vector.shape_cast %852 : vector<1xf32> to vector<1x1xf32>
    %854 = arith.fptosi %853 : vector<1x1xf32> to vector<1x1xi32>
    %855 = vector.broadcast %847 : vector<1x1xf32> to vector<17x1xf32>
    %856 = arith.subf %845, %855 : vector<17x1xf32>
    %857 = math.exp %856 : vector<17x1xf32>
    %cst_291 = arith.constant dense<0.000000e+00> : vector<1xf32>
    %858 = vector.multi_reduction <add>, %857, %cst_291 [0] : vector<17x1xf32> to vector<1xf32>
    %859 = vector.shape_cast %858 : vector<1xf32> to vector<1x1xf32>
    %860 = vector.broadcast %859 : vector<1x1xf32> to vector<17x1xf32>
    %861 = arith.divf %857, %860 : vector<17x1xf32>
    %862 = arith.addf %742, %861 : vector<17x1xf32>
    %c8_i32_292 = arith.constant 8 : i32
    %863 = vector.broadcast %c8_i32_292 : i32 to vector<1x1xi32>
    %864 = arith.cmpi slt, %854, %863 : vector<1x1xi32>
    %c8_i32_293 = arith.constant 8 : i32
    %865 = vector.broadcast %c8_i32_293 : i32 to vector<1x1xi32>
    %866 = arith.addi %854, %865 : vector<1x1xi32>
    %c8_i32_294 = arith.constant 8 : i32
    %867 = vector.broadcast %c8_i32_294 : i32 to vector<1x1xi32>
    %868 = arith.subi %854, %867 : vector<1x1xi32>
    %869 = arith.select %864, %866, %868 : vector<1x1xi1>, vector<1x1xi32>
    %870 = vector.broadcast %854 : vector<1x1xi32> to vector<17x1xi32>
    %871 = arith.cmpi eq, %39, %870 : vector<17x1xi32>
    %872 = vector.broadcast %869 : vector<1x1xi32> to vector<17x1xi32>
    %873 = arith.cmpi eq, %39, %872 : vector<17x1xi32>
    %874 = arith.ori %871, %873 : vector<17x1xi1>
    %875 = arith.extui %874 : vector<17x1xi1> to vector<17x1xi32>
    %876 = arith.sitofp %875 : vector<17x1xi32> to vector<17x1xf32>
    %877 = arith.maximumf %757, %876 : vector<17x1xf32>
    %c6_i32 = arith.constant 6 : i32
    %878 = vector.broadcast %c6_i32 : i32 to vector<1x128xi32>
    %879 = arith.cmpi eq, %41, %878 : vector<1x128xi32>
    %880 = vector.shape_cast %854 : vector<1x1xi32> to vector<1x1xi32>
    %881 = vector.broadcast %880 : vector<1x1xi32> to vector<1x128xi32>
    %882 = arith.select %879, %881, %762 : vector<1x128xi1>, vector<1x128xi32>
    %883 = vector.broadcast %854 : vector<1x1xi32> to vector<17x1xi32>
    %884 = arith.cmpi eq, %39, %883 : vector<17x1xi32>
    %885 = arith.extui %884 : vector<17x1xi1> to vector<17x1xi32>
    %886 = arith.sitofp %885 : vector<17x1xi32> to vector<17x1xf32>
    %887 = vector.broadcast %886 : vector<17x1xf32> to vector<17x128xf32>
    %888 = arith.mulf %887, %30 : vector<17x128xf32>
    %cst_295 = arith.constant dense<0.000000e+00> : vector<128xf32>
    %889 = vector.multi_reduction <add>, %888, %cst_295 [0] : vector<17x128xf32> to vector<128xf32>
    %890 = vector.shape_cast %889 : vector<128xf32> to vector<1x128xf32>
    %c0_296 = arith.constant 0 : index
    %c0_297 = arith.constant 0 : index
    %891 = vector.load %arg9[%c0_296, %c0_297] : memref<32x128xf32, #tpu.memory_space<vmem>>, vector<32x128xf32>
    %cst_298 = arith.constant dense<0.000000e+00> : vector<1x128xf32>
    %892 = tpu.matmul %798, %891, %cst_298 {dimension_numbers = #tpu.dot_dimension_numbers<[1], [0], [0], [1], [0, 0, 1, 1], [], []>} : vector<1x32xf32>, vector<32x128xf32>, vector<1x128xf32> -> vector<1x128xf32>
    %893 = arith.addf %890, %892 : vector<1x128xf32>
    %894 = vector.extract_strided_slice %893 {offsets = [0, 0], sizes = [1, 32], strides = [1, 1]} : vector<1x128xf32> to vector<1x32xf32>
    %895 = arith.negf %894 : vector<1x32xf32>
    %896 = math.exp %895 : vector<1x32xf32>
    %cst_299 = arith.constant 1.000000e+00 : f32
    %897 = vector.broadcast %cst_299 : f32 to vector<1x32xf32>
    %898 = arith.addf %897, %896 : vector<1x32xf32>
    %899 = arith.divf %897, %898 : vector<1x32xf32>
    %900 = vector.extract_strided_slice %893 {offsets = [0, 32], sizes = [1, 32], strides = [1, 1]} : vector<1x128xf32> to vector<1x32xf32>
    %901 = arith.negf %900 : vector<1x32xf32>
    %902 = math.exp %901 : vector<1x32xf32>
    %cst_300 = arith.constant 1.000000e+00 : f32
    %903 = vector.broadcast %cst_300 : f32 to vector<1x32xf32>
    %904 = arith.addf %903, %902 : vector<1x32xf32>
    %905 = arith.divf %903, %904 : vector<1x32xf32>
    %906 = vector.extract_strided_slice %893 {offsets = [0, 64], sizes = [1, 32], strides = [1, 1]} : vector<1x128xf32> to vector<1x32xf32>
    %907 = math.tanh %906 : vector<1x32xf32>
    %908 = vector.extract_strided_slice %893 {offsets = [0, 96], sizes = [1, 32], strides = [1, 1]} : vector<1x128xf32> to vector<1x32xf32>
    %909 = arith.negf %908 : vector<1x32xf32>
    %910 = math.exp %909 : vector<1x32xf32>
    %cst_301 = arith.constant 1.000000e+00 : f32
    %911 = vector.broadcast %cst_301 : f32 to vector<1x32xf32>
    %912 = arith.addf %911, %910 : vector<1x32xf32>
    %913 = arith.divf %911, %912 : vector<1x32xf32>
    %914 = arith.mulf %905, %796 : vector<1x32xf32>
    %915 = arith.mulf %899, %907 : vector<1x32xf32>
    %916 = arith.addf %914, %915 : vector<1x32xf32>
    %917 = math.tanh %916 : vector<1x32xf32>
    %918 = arith.mulf %913, %917 : vector<1x32xf32>
    %c0_302 = arith.constant 0 : index
    %c0_303 = arith.constant 0 : index
    %919 = vector.load %arg13[%c0_302, %c0_303] : memref<1x32xf32, #tpu.memory_space<vmem>>, vector<1x32xf32>
    %920 = vector.broadcast %862 : vector<17x1xf32> to vector<17x32xf32>
    %921 = vector.broadcast %919 : vector<1x32xf32> to vector<17x32xf32>
    %922 = arith.mulf %920, %921 : vector<17x32xf32>
    %c0_304 = arith.constant 0 : index
    %c0_305 = arith.constant 0 : index
    %923 = vector.load %arg11[%c0_304, %c0_305] : memref<32x32xf32, #tpu.memory_space<vmem>>, vector<32x32xf32>
    %cst_306 = arith.constant dense<0.000000e+00> : vector<1x32xf32>
    %924 = tpu.matmul %918, %923, %cst_306 {dimension_numbers = #tpu.dot_dimension_numbers<[1], [0], [0], [1], [0, 0, 1, 1], [], []>} : vector<1x32xf32>, vector<32x32xf32>, vector<1x32xf32> -> vector<1x32xf32>
    %925 = vector.broadcast %924 : vector<1x32xf32> to vector<17x32xf32>
    %926 = arith.addf %21, %925 : vector<17x32xf32>
    %927 = arith.addf %926, %922 : vector<17x32xf32>
    %928 = math.tanh %927 : vector<17x32xf32>
    %c0_307 = arith.constant 0 : index
    %c0_308 = arith.constant 0 : index
    %929 = vector.load %arg12[%c0_307, %c0_308] : memref<1x32xf32, #tpu.memory_space<vmem>>, vector<1x32xf32>
    %930 = vector.broadcast %929 : vector<1x32xf32> to vector<17x32xf32>
    %931 = arith.mulf %928, %930 : vector<17x32xf32>
    %cst_309 = arith.constant dense<0.000000e+00> : vector<17xf32>
    %932 = vector.multi_reduction <add>, %931, %cst_309 [1] : vector<17x32xf32> to vector<17xf32>
    %933 = vector.shape_cast %932 : vector<17xf32> to vector<17x1xf32>
    %cst_310 = arith.constant dense<0xFF800000> : vector<1xf32>
    %934 = vector.multi_reduction <maximumf>, %933, %cst_310 [0] : vector<17x1xf32> to vector<1xf32>
    %935 = vector.shape_cast %934 : vector<1xf32> to vector<1x1xf32>
    %936 = vector.broadcast %935 : vector<1x1xf32> to vector<17x1xf32>
    %937 = arith.subf %933, %936 : vector<17x1xf32>
    %938 = math.exp %937 : vector<17x1xf32>
    %cst_311 = arith.constant dense<0.000000e+00> : vector<1xf32>
    %939 = vector.multi_reduction <add>, %938, %cst_311 [0] : vector<17x1xf32> to vector<1xf32>
    %940 = vector.shape_cast %939 : vector<1xf32> to vector<1x1xf32>
    %941 = vector.broadcast %940 : vector<1x1xf32> to vector<17x1xf32>
    %942 = arith.divf %938, %941 : vector<17x1xf32>
    %943 = vector.broadcast %942 : vector<17x1xf32> to vector<17x32xf32>
    %944 = arith.mulf %943, %21 : vector<17x32xf32>
    %cst_312 = arith.constant dense<0.000000e+00> : vector<32xf32>
    %945 = vector.multi_reduction <add>, %944, %cst_312 [0] : vector<17x32xf32> to vector<32xf32>
    %946 = vector.shape_cast %945 : vector<32xf32> to vector<1x32xf32>
    %c0_313 = arith.constant 0 : index
    %c0_314 = arith.constant 0 : index
    %947 = vector.load %arg14[%c0_313, %c0_314] : memref<32x32xf32, #tpu.memory_space<vmem>>, vector<32x32xf32>
    %cst_315 = arith.constant dense<0.000000e+00> : vector<1x32xf32>
    %948 = tpu.matmul %946, %947, %cst_315 {dimension_numbers = #tpu.dot_dimension_numbers<[1], [0], [0], [1], [0, 0, 1, 1], [], []>} : vector<1x32xf32>, vector<32x32xf32>, vector<1x32xf32> -> vector<1x32xf32>
    %949 = vector.broadcast %948 : vector<1x32xf32> to vector<17x32xf32>
    %950 = arith.addf %19, %949 : vector<17x32xf32>
    %c0_316 = arith.constant 0 : index
    %c0_317 = arith.constant 0 : index
    %951 = vector.load %arg16[%c0_316, %c0_317] : memref<1x32xf32, #tpu.memory_space<vmem>>, vector<1x32xf32>
    %952 = vector.broadcast %862 : vector<17x1xf32> to vector<17x32xf32>
    %953 = vector.broadcast %951 : vector<1x32xf32> to vector<17x32xf32>
    %954 = arith.mulf %952, %953 : vector<17x32xf32>
    %955 = arith.addf %950, %954 : vector<17x32xf32>
    %956 = math.tanh %955 : vector<17x32xf32>
    %c0_318 = arith.constant 0 : index
    %c0_319 = arith.constant 0 : index
    %957 = vector.load %arg15[%c0_318, %c0_319] : memref<1x32xf32, #tpu.memory_space<vmem>>, vector<1x32xf32>
    %958 = vector.broadcast %957 : vector<1x32xf32> to vector<17x32xf32>
    %959 = arith.mulf %956, %958 : vector<17x32xf32>
    %cst_320 = arith.constant dense<0.000000e+00> : vector<17xf32>
    %960 = vector.multi_reduction <add>, %959, %cst_320 [1] : vector<17x32xf32> to vector<17xf32>
    %961 = vector.shape_cast %960 : vector<17xf32> to vector<17x1xf32>
    %cst_321 = arith.constant 0.000000e+00 : f32
    %962 = vector.broadcast %cst_321 : f32 to vector<17x1xf32>
    %963 = arith.cmpf ogt, %877, %962 : vector<17x1xf32>
    %cst_322 = arith.constant -9.99999984E+17 : f32
    %964 = vector.broadcast %cst_322 : f32 to vector<17x1xf32>
    %965 = arith.select %963, %964, %961 : vector<17x1xi1>, vector<17x1xf32>
    %cst_323 = arith.constant dense<0xFF800000> : vector<1xf32>
    %966 = vector.multi_reduction <maximumf>, %965, %cst_323 [0] : vector<17x1xf32> to vector<1xf32>
    %967 = vector.shape_cast %966 : vector<1xf32> to vector<1x1xf32>
    %968 = vector.broadcast %967 : vector<1x1xf32> to vector<17x1xf32>
    %969 = arith.cmpf oge, %965, %968 : vector<17x1xf32>
    %cst_324 = arith.constant 1.700000e+01 : f32
    %970 = vector.broadcast %cst_324 : f32 to vector<17x1xf32>
    %971 = arith.select %969, %40, %970 : vector<17x1xi1>, vector<17x1xf32>
    %cst_325 = arith.constant dense<0x7F800000> : vector<1xf32>
    %972 = vector.multi_reduction <minimumf>, %971, %cst_325 [0] : vector<17x1xf32> to vector<1xf32>
    %973 = vector.shape_cast %972 : vector<1xf32> to vector<1x1xf32>
    %974 = arith.fptosi %973 : vector<1x1xf32> to vector<1x1xi32>
    %975 = vector.broadcast %967 : vector<1x1xf32> to vector<17x1xf32>
    %976 = arith.subf %965, %975 : vector<17x1xf32>
    %977 = math.exp %976 : vector<17x1xf32>
    %cst_326 = arith.constant dense<0.000000e+00> : vector<1xf32>
    %978 = vector.multi_reduction <add>, %977, %cst_326 [0] : vector<17x1xf32> to vector<1xf32>
    %979 = vector.shape_cast %978 : vector<1xf32> to vector<1x1xf32>
    %980 = vector.broadcast %979 : vector<1x1xf32> to vector<17x1xf32>
    %981 = arith.divf %977, %980 : vector<17x1xf32>
    %982 = arith.addf %862, %981 : vector<17x1xf32>
    %c8_i32_327 = arith.constant 8 : i32
    %983 = vector.broadcast %c8_i32_327 : i32 to vector<1x1xi32>
    %984 = arith.cmpi slt, %974, %983 : vector<1x1xi32>
    %c8_i32_328 = arith.constant 8 : i32
    %985 = vector.broadcast %c8_i32_328 : i32 to vector<1x1xi32>
    %986 = arith.addi %974, %985 : vector<1x1xi32>
    %c8_i32_329 = arith.constant 8 : i32
    %987 = vector.broadcast %c8_i32_329 : i32 to vector<1x1xi32>
    %988 = arith.subi %974, %987 : vector<1x1xi32>
    %989 = arith.select %984, %986, %988 : vector<1x1xi1>, vector<1x1xi32>
    %990 = vector.broadcast %974 : vector<1x1xi32> to vector<17x1xi32>
    %991 = arith.cmpi eq, %39, %990 : vector<17x1xi32>
    %992 = vector.broadcast %989 : vector<1x1xi32> to vector<17x1xi32>
    %993 = arith.cmpi eq, %39, %992 : vector<17x1xi32>
    %994 = arith.ori %991, %993 : vector<17x1xi1>
    %995 = arith.extui %994 : vector<17x1xi1> to vector<17x1xi32>
    %996 = arith.sitofp %995 : vector<17x1xi32> to vector<17x1xf32>
    %997 = arith.maximumf %877, %996 : vector<17x1xf32>
    %c7_i32 = arith.constant 7 : i32
    %998 = vector.broadcast %c7_i32 : i32 to vector<1x128xi32>
    %999 = arith.cmpi eq, %41, %998 : vector<1x128xi32>
    %1000 = vector.shape_cast %974 : vector<1x1xi32> to vector<1x1xi32>
    %1001 = vector.broadcast %1000 : vector<1x1xi32> to vector<1x128xi32>
    %1002 = arith.select %999, %1001, %882 : vector<1x128xi1>, vector<1x128xi32>
    %1003 = vector.broadcast %974 : vector<1x1xi32> to vector<17x1xi32>
    %1004 = arith.cmpi eq, %39, %1003 : vector<17x1xi32>
    %1005 = arith.extui %1004 : vector<17x1xi1> to vector<17x1xi32>
    %1006 = arith.sitofp %1005 : vector<17x1xi32> to vector<17x1xf32>
    %1007 = vector.broadcast %1006 : vector<17x1xf32> to vector<17x128xf32>
    %1008 = arith.mulf %1007, %30 : vector<17x128xf32>
    %cst_330 = arith.constant dense<0.000000e+00> : vector<128xf32>
    %1009 = vector.multi_reduction <add>, %1008, %cst_330 [0] : vector<17x128xf32> to vector<128xf32>
    %1010 = vector.shape_cast %1009 : vector<128xf32> to vector<1x128xf32>
    %c0_331 = arith.constant 0 : index
    %c0_332 = arith.constant 0 : index
    %1011 = vector.load %arg9[%c0_331, %c0_332] : memref<32x128xf32, #tpu.memory_space<vmem>>, vector<32x128xf32>
    %cst_333 = arith.constant dense<0.000000e+00> : vector<1x128xf32>
    %1012 = tpu.matmul %918, %1011, %cst_333 {dimension_numbers = #tpu.dot_dimension_numbers<[1], [0], [0], [1], [0, 0, 1, 1], [], []>} : vector<1x32xf32>, vector<32x128xf32>, vector<1x128xf32> -> vector<1x128xf32>
    %1013 = arith.addf %1010, %1012 : vector<1x128xf32>
    %1014 = vector.extract_strided_slice %1013 {offsets = [0, 0], sizes = [1, 32], strides = [1, 1]} : vector<1x128xf32> to vector<1x32xf32>
    %1015 = arith.negf %1014 : vector<1x32xf32>
    %1016 = math.exp %1015 : vector<1x32xf32>
    %cst_334 = arith.constant 1.000000e+00 : f32
    %1017 = vector.broadcast %cst_334 : f32 to vector<1x32xf32>
    %1018 = arith.addf %1017, %1016 : vector<1x32xf32>
    %1019 = arith.divf %1017, %1018 : vector<1x32xf32>
    %1020 = vector.extract_strided_slice %1013 {offsets = [0, 32], sizes = [1, 32], strides = [1, 1]} : vector<1x128xf32> to vector<1x32xf32>
    %1021 = arith.negf %1020 : vector<1x32xf32>
    %1022 = math.exp %1021 : vector<1x32xf32>
    %cst_335 = arith.constant 1.000000e+00 : f32
    %1023 = vector.broadcast %cst_335 : f32 to vector<1x32xf32>
    %1024 = arith.addf %1023, %1022 : vector<1x32xf32>
    %1025 = arith.divf %1023, %1024 : vector<1x32xf32>
    %1026 = vector.extract_strided_slice %1013 {offsets = [0, 64], sizes = [1, 32], strides = [1, 1]} : vector<1x128xf32> to vector<1x32xf32>
    %1027 = math.tanh %1026 : vector<1x32xf32>
    %1028 = vector.extract_strided_slice %1013 {offsets = [0, 96], sizes = [1, 32], strides = [1, 1]} : vector<1x128xf32> to vector<1x32xf32>
    %1029 = arith.negf %1028 : vector<1x32xf32>
    %1030 = math.exp %1029 : vector<1x32xf32>
    %cst_336 = arith.constant 1.000000e+00 : f32
    %1031 = vector.broadcast %cst_336 : f32 to vector<1x32xf32>
    %1032 = arith.addf %1031, %1030 : vector<1x32xf32>
    %1033 = arith.divf %1031, %1032 : vector<1x32xf32>
    %1034 = arith.mulf %1025, %916 : vector<1x32xf32>
    %1035 = arith.mulf %1019, %1027 : vector<1x32xf32>
    %1036 = arith.addf %1034, %1035 : vector<1x32xf32>
    %1037 = math.tanh %1036 : vector<1x32xf32>
    %1038 = arith.mulf %1033, %1037 : vector<1x32xf32>
    %c0_337 = arith.constant 0 : index
    %c0_338 = arith.constant 0 : index
    %1039 = vector.load %arg13[%c0_337, %c0_338] : memref<1x32xf32, #tpu.memory_space<vmem>>, vector<1x32xf32>
    %1040 = vector.broadcast %982 : vector<17x1xf32> to vector<17x32xf32>
    %1041 = vector.broadcast %1039 : vector<1x32xf32> to vector<17x32xf32>
    %1042 = arith.mulf %1040, %1041 : vector<17x32xf32>
    %c0_339 = arith.constant 0 : index
    %c0_340 = arith.constant 0 : index
    %1043 = vector.load %arg11[%c0_339, %c0_340] : memref<32x32xf32, #tpu.memory_space<vmem>>, vector<32x32xf32>
    %cst_341 = arith.constant dense<0.000000e+00> : vector<1x32xf32>
    %1044 = tpu.matmul %1038, %1043, %cst_341 {dimension_numbers = #tpu.dot_dimension_numbers<[1], [0], [0], [1], [0, 0, 1, 1], [], []>} : vector<1x32xf32>, vector<32x32xf32>, vector<1x32xf32> -> vector<1x32xf32>
    %1045 = vector.broadcast %1044 : vector<1x32xf32> to vector<17x32xf32>
    %1046 = arith.addf %21, %1045 : vector<17x32xf32>
    %1047 = arith.addf %1046, %1042 : vector<17x32xf32>
    %1048 = math.tanh %1047 : vector<17x32xf32>
    %c0_342 = arith.constant 0 : index
    %c0_343 = arith.constant 0 : index
    %1049 = vector.load %arg12[%c0_342, %c0_343] : memref<1x32xf32, #tpu.memory_space<vmem>>, vector<1x32xf32>
    %1050 = vector.broadcast %1049 : vector<1x32xf32> to vector<17x32xf32>
    %1051 = arith.mulf %1048, %1050 : vector<17x32xf32>
    %cst_344 = arith.constant dense<0.000000e+00> : vector<17xf32>
    %1052 = vector.multi_reduction <add>, %1051, %cst_344 [1] : vector<17x32xf32> to vector<17xf32>
    %1053 = vector.shape_cast %1052 : vector<17xf32> to vector<17x1xf32>
    %cst_345 = arith.constant dense<0xFF800000> : vector<1xf32>
    %1054 = vector.multi_reduction <maximumf>, %1053, %cst_345 [0] : vector<17x1xf32> to vector<1xf32>
    %1055 = vector.shape_cast %1054 : vector<1xf32> to vector<1x1xf32>
    %1056 = vector.broadcast %1055 : vector<1x1xf32> to vector<17x1xf32>
    %1057 = arith.subf %1053, %1056 : vector<17x1xf32>
    %1058 = math.exp %1057 : vector<17x1xf32>
    %cst_346 = arith.constant dense<0.000000e+00> : vector<1xf32>
    %1059 = vector.multi_reduction <add>, %1058, %cst_346 [0] : vector<17x1xf32> to vector<1xf32>
    %1060 = vector.shape_cast %1059 : vector<1xf32> to vector<1x1xf32>
    %1061 = vector.broadcast %1060 : vector<1x1xf32> to vector<17x1xf32>
    %1062 = arith.divf %1058, %1061 : vector<17x1xf32>
    %1063 = vector.broadcast %1062 : vector<17x1xf32> to vector<17x32xf32>
    %1064 = arith.mulf %1063, %21 : vector<17x32xf32>
    %cst_347 = arith.constant dense<0.000000e+00> : vector<32xf32>
    %1065 = vector.multi_reduction <add>, %1064, %cst_347 [0] : vector<17x32xf32> to vector<32xf32>
    %1066 = vector.shape_cast %1065 : vector<32xf32> to vector<1x32xf32>
    %c0_348 = arith.constant 0 : index
    %c0_349 = arith.constant 0 : index
    %1067 = vector.load %arg14[%c0_348, %c0_349] : memref<32x32xf32, #tpu.memory_space<vmem>>, vector<32x32xf32>
    %cst_350 = arith.constant dense<0.000000e+00> : vector<1x32xf32>
    %1068 = tpu.matmul %1066, %1067, %cst_350 {dimension_numbers = #tpu.dot_dimension_numbers<[1], [0], [0], [1], [0, 0, 1, 1], [], []>} : vector<1x32xf32>, vector<32x32xf32>, vector<1x32xf32> -> vector<1x32xf32>
    %1069 = vector.broadcast %1068 : vector<1x32xf32> to vector<17x32xf32>
    %1070 = arith.addf %19, %1069 : vector<17x32xf32>
    %c0_351 = arith.constant 0 : index
    %c0_352 = arith.constant 0 : index
    %1071 = vector.load %arg16[%c0_351, %c0_352] : memref<1x32xf32, #tpu.memory_space<vmem>>, vector<1x32xf32>
    %1072 = vector.broadcast %982 : vector<17x1xf32> to vector<17x32xf32>
    %1073 = vector.broadcast %1071 : vector<1x32xf32> to vector<17x32xf32>
    %1074 = arith.mulf %1072, %1073 : vector<17x32xf32>
    %1075 = arith.addf %1070, %1074 : vector<17x32xf32>
    %1076 = math.tanh %1075 : vector<17x32xf32>
    %c0_353 = arith.constant 0 : index
    %c0_354 = arith.constant 0 : index
    %1077 = vector.load %arg15[%c0_353, %c0_354] : memref<1x32xf32, #tpu.memory_space<vmem>>, vector<1x32xf32>
    %1078 = vector.broadcast %1077 : vector<1x32xf32> to vector<17x32xf32>
    %1079 = arith.mulf %1076, %1078 : vector<17x32xf32>
    %cst_355 = arith.constant dense<0.000000e+00> : vector<17xf32>
    %1080 = vector.multi_reduction <add>, %1079, %cst_355 [1] : vector<17x32xf32> to vector<17xf32>
    %1081 = vector.shape_cast %1080 : vector<17xf32> to vector<17x1xf32>
    %cst_356 = arith.constant 0.000000e+00 : f32
    %1082 = vector.broadcast %cst_356 : f32 to vector<17x1xf32>
    %1083 = arith.cmpf ogt, %997, %1082 : vector<17x1xf32>
    %cst_357 = arith.constant -9.99999984E+17 : f32
    %1084 = vector.broadcast %cst_357 : f32 to vector<17x1xf32>
    %1085 = arith.select %1083, %1084, %1081 : vector<17x1xi1>, vector<17x1xf32>
    %cst_358 = arith.constant dense<0xFF800000> : vector<1xf32>
    %1086 = vector.multi_reduction <maximumf>, %1085, %cst_358 [0] : vector<17x1xf32> to vector<1xf32>
    %1087 = vector.shape_cast %1086 : vector<1xf32> to vector<1x1xf32>
    %1088 = vector.broadcast %1087 : vector<1x1xf32> to vector<17x1xf32>
    %1089 = arith.cmpf oge, %1085, %1088 : vector<17x1xf32>
    %cst_359 = arith.constant 1.700000e+01 : f32
    %1090 = vector.broadcast %cst_359 : f32 to vector<17x1xf32>
    %1091 = arith.select %1089, %40, %1090 : vector<17x1xi1>, vector<17x1xf32>
    %cst_360 = arith.constant dense<0x7F800000> : vector<1xf32>
    %1092 = vector.multi_reduction <minimumf>, %1091, %cst_360 [0] : vector<17x1xf32> to vector<1xf32>
    %1093 = vector.shape_cast %1092 : vector<1xf32> to vector<1x1xf32>
    %1094 = arith.fptosi %1093 : vector<1x1xf32> to vector<1x1xi32>
    %c8_i32_361 = arith.constant 8 : i32
    %1095 = vector.broadcast %c8_i32_361 : i32 to vector<1x128xi32>
    %1096 = arith.cmpi eq, %41, %1095 : vector<1x128xi32>
    %1097 = vector.shape_cast %1094 : vector<1x1xi32> to vector<1x1xi32>
    %1098 = vector.broadcast %1097 : vector<1x1xi32> to vector<1x128xi32>
    %1099 = arith.select %1096, %1098, %1002 : vector<1x128xi1>, vector<1x128xi32>
    %c0_362 = arith.constant 0 : index
    %c0_363 = arith.constant 0 : index
    %1100 = vector.load %arg22[%c0_362, %c0_363] : memref<1x128xi32, #tpu.memory_space<vmem>>, vector<1x128xi32>
    tpu.vector_store %arg22[%c0_362, %c0_363], %1099 {strides = array<i32>} : memref<1x128xi32, #tpu.memory_space<vmem>>, vector<1x128xi32>,
    %c0_364 = arith.constant 0 : index
    %c0_365 = arith.constant 0 : index
    %1101 = vector.load %arg19[%c0_364, %c0_365] : memref<1x32xf32, #tpu.memory_space<vmem>>, vector<1x32xf32>
    %cst_366 = arith.constant 0.000000e+00 : f32
    %1102 = vector.broadcast %cst_366 : f32 to vector<1x128xf32>
    %c0_367 = arith.constant 0 : index
    %c0_368 = arith.constant 0 : index
    %1103 = vector.load %arg8[%c0_367, %c0_368] : memref<32x128xf32, #tpu.memory_space<vmem>>, vector<32x128xf32>
    %cst_369 = arith.constant dense<0.000000e+00> : vector<1x128xf32>
    %1104 = tpu.matmul %1101, %1103, %cst_369 {dimension_numbers = #tpu.dot_dimension_numbers<[1], [0], [0], [1], [0, 0, 1, 1], [], []>} : vector<1x32xf32>, vector<32x128xf32>, vector<1x128xf32> -> vector<1x128xf32>
    %1105 = arith.addf %1104, %38 : vector<1x128xf32>
    %c0_370 = arith.constant 0 : index
    %c0_371 = arith.constant 0 : index
    %1106 = vector.load %arg18[%c0_370, %c0_371] : memref<1x32xf32, #tpu.memory_space<vmem>>, vector<1x32xf32>
    %1107 = vector.extract_strided_slice %1105 {offsets = [0, 0], sizes = [1, 32], strides = [1, 1]} : vector<1x128xf32> to vector<1x32xf32>
    %1108 = arith.negf %1107 : vector<1x32xf32>
    %1109 = math.exp %1108 : vector<1x32xf32>
    %cst_372 = arith.constant 1.000000e+00 : f32
    %1110 = vector.broadcast %cst_372 : f32 to vector<1x32xf32>
    %1111 = arith.addf %1110, %1109 : vector<1x32xf32>
    %1112 = arith.divf %1110, %1111 : vector<1x32xf32>
    %1113 = vector.extract_strided_slice %1105 {offsets = [0, 32], sizes = [1, 32], strides = [1, 1]} : vector<1x128xf32> to vector<1x32xf32>
    %1114 = arith.negf %1113 : vector<1x32xf32>
    %1115 = math.exp %1114 : vector<1x32xf32>
    %cst_373 = arith.constant 1.000000e+00 : f32
    %1116 = vector.broadcast %cst_373 : f32 to vector<1x32xf32>
    %1117 = arith.addf %1116, %1115 : vector<1x32xf32>
    %1118 = arith.divf %1116, %1117 : vector<1x32xf32>
    %1119 = vector.extract_strided_slice %1105 {offsets = [0, 64], sizes = [1, 32], strides = [1, 1]} : vector<1x128xf32> to vector<1x32xf32>
    %1120 = math.tanh %1119 : vector<1x32xf32>
    %1121 = vector.extract_strided_slice %1105 {offsets = [0, 96], sizes = [1, 32], strides = [1, 1]} : vector<1x128xf32> to vector<1x32xf32>
    %1122 = arith.negf %1121 : vector<1x32xf32>
    %1123 = math.exp %1122 : vector<1x32xf32>
    %cst_374 = arith.constant 1.000000e+00 : f32
    %1124 = vector.broadcast %cst_374 : f32 to vector<1x32xf32>
    %1125 = arith.addf %1124, %1123 : vector<1x32xf32>
    %1126 = arith.divf %1124, %1125 : vector<1x32xf32>
    %1127 = arith.mulf %1118, %1106 : vector<1x32xf32>
    %1128 = arith.mulf %1112, %1120 : vector<1x32xf32>
    %1129 = arith.addf %1127, %1128 : vector<1x32xf32>
    %1130 = math.tanh %1129 : vector<1x32xf32>
    %1131 = arith.mulf %1126, %1130 : vector<1x32xf32>
    %c0_375 = arith.constant 0 : index
    %c0_376 = arith.constant 0 : index
    %1132 = vector.load %arg11[%c0_375, %c0_376] : memref<32x32xf32, #tpu.memory_space<vmem>>, vector<32x32xf32>
    %cst_377 = arith.constant dense<0.000000e+00> : vector<1x32xf32>
    %1133 = tpu.matmul %1131, %1132, %cst_377 {dimension_numbers = #tpu.dot_dimension_numbers<[1], [0], [0], [1], [0, 0, 1, 1], [], []>} : vector<1x32xf32>, vector<32x32xf32>, vector<1x32xf32> -> vector<1x32xf32>
    %1134 = vector.broadcast %1133 : vector<1x32xf32> to vector<8x32xf32>
    %1135 = arith.addf %25, %1134 : vector<8x32xf32>
    %1136 = math.tanh %1135 : vector<8x32xf32>
    %c0_378 = arith.constant 0 : index
    %c0_379 = arith.constant 0 : index
    %1137 = vector.load %arg12[%c0_378, %c0_379] : memref<1x32xf32, #tpu.memory_space<vmem>>, vector<1x32xf32>
    %1138 = vector.broadcast %1137 : vector<1x32xf32> to vector<8x32xf32>
    %1139 = arith.mulf %1136, %1138 : vector<8x32xf32>
    %cst_380 = arith.constant dense<0.000000e+00> : vector<8xf32>
    %1140 = vector.multi_reduction <add>, %1139, %cst_380 [1] : vector<8x32xf32> to vector<8xf32>
    %1141 = vector.shape_cast %1140 : vector<8xf32> to vector<8x1xf32>
    %cst_381 = arith.constant dense<0xFF800000> : vector<1xf32>
    %1142 = vector.multi_reduction <maximumf>, %1141, %cst_381 [0] : vector<8x1xf32> to vector<1xf32>
    %1143 = vector.shape_cast %1142 : vector<1xf32> to vector<1x1xf32>
    %1144 = vector.broadcast %1143 : vector<1x1xf32> to vector<8x1xf32>
    %1145 = arith.subf %1141, %1144 : vector<8x1xf32>
    %1146 = math.exp %1145 : vector<8x1xf32>
    %cst_382 = arith.constant dense<0.000000e+00> : vector<1xf32>
    %1147 = vector.multi_reduction <add>, %1146, %cst_382 [0] : vector<8x1xf32> to vector<1xf32>
    %1148 = vector.shape_cast %1147 : vector<1xf32> to vector<1x1xf32>
    %1149 = vector.broadcast %1148 : vector<1x1xf32> to vector<8x1xf32>
    %1150 = arith.divf %1146, %1149 : vector<8x1xf32>
    %1151 = vector.broadcast %1150 : vector<8x1xf32> to vector<8x32xf32>
    %1152 = arith.mulf %1151, %25 : vector<8x32xf32>
    %cst_383 = arith.constant dense<0.000000e+00> : vector<32xf32>
    %1153 = vector.multi_reduction <add>, %1152, %cst_383 [0] : vector<8x32xf32> to vector<32xf32>
    %1154 = vector.shape_cast %1153 : vector<32xf32> to vector<1x32xf32>
    %c0_384 = arith.constant 0 : index
    %c0_385 = arith.constant 0 : index
    %1155 = vector.load %arg14[%c0_384, %c0_385] : memref<32x32xf32, #tpu.memory_space<vmem>>, vector<32x32xf32>
    %cst_386 = arith.constant dense<0.000000e+00> : vector<1x32xf32>
    %1156 = tpu.matmul %1154, %1155, %cst_386 {dimension_numbers = #tpu.dot_dimension_numbers<[1], [0], [0], [1], [0, 0, 1, 1], [], []>} : vector<1x32xf32>, vector<32x32xf32>, vector<1x32xf32> -> vector<1x32xf32>
    %1157 = vector.broadcast %1156 : vector<1x32xf32> to vector<8x32xf32>
    %1158 = arith.addf %23, %1157 : vector<8x32xf32>
    %1159 = math.tanh %1158 : vector<8x32xf32>
    %c0_387 = arith.constant 0 : index
    %c0_388 = arith.constant 0 : index
    %1160 = vector.load %arg15[%c0_387, %c0_388] : memref<1x32xf32, #tpu.memory_space<vmem>>, vector<1x32xf32>
    %1161 = vector.broadcast %1160 : vector<1x32xf32> to vector<8x32xf32>
    %1162 = arith.mulf %1159, %1161 : vector<8x32xf32>
    %cst_389 = arith.constant dense<0.000000e+00> : vector<8xf32>
    %1163 = vector.multi_reduction <add>, %1162, %cst_389 [1] : vector<8x32xf32> to vector<8xf32>
    %1164 = vector.shape_cast %1163 : vector<8xf32> to vector<8x1xf32>
    %cst_390 = arith.constant dense<0xFF800000> : vector<1xf32>
    %1165 = vector.multi_reduction <maximumf>, %1164, %cst_390 [0] : vector<8x1xf32> to vector<1xf32>
    %1166 = vector.shape_cast %1165 : vector<1xf32> to vector<1x1xf32>
    %1167 = vector.broadcast %1166 : vector<1x1xf32> to vector<8x1xf32>
    %1168 = arith.subf %1164, %1167 : vector<8x1xf32>
    %1169 = math.exp %1168 : vector<8x1xf32>
    %cst_391 = arith.constant dense<0.000000e+00> : vector<1xf32>
    %1170 = vector.multi_reduction <add>, %1169, %cst_391 [0] : vector<8x1xf32> to vector<1xf32>
    %1171 = vector.shape_cast %1170 : vector<1xf32> to vector<1x1xf32>
    %1172 = vector.broadcast %1171 : vector<1x1xf32> to vector<8x1xf32>
    %1173 = arith.divf %1169, %1172 : vector<8x1xf32>
    %1174 = vector.broadcast %1173 : vector<8x1xf32> to vector<8x32xf32>
    %1175 = arith.mulf %1174, %6 : vector<8x32xf32>
    %cst_392 = arith.constant dense<0.000000e+00> : vector<32xf32>
    %1176 = vector.multi_reduction <add>, %1175, %cst_392 [0] : vector<8x32xf32> to vector<32xf32>
    %1177 = vector.shape_cast %1176 : vector<32xf32> to vector<1x32xf32>
    %c0_393 = arith.constant 0 : index
    %c0_394 = arith.constant 0 : index
    %1178 = vector.load %arg20[%c0_393, %c0_394] : memref<1x32xf32, #tpu.memory_space<vmem>>, vector<1x32xf32>
    %1179 = arith.mulf %1177, %1178 : vector<1x32xf32>
    %cst_395 = arith.constant dense<0.000000e+00> : vector<1xf32>
    %1180 = vector.multi_reduction <add>, %1179, %cst_395 [1] : vector<1x32xf32> to vector<1xf32>
    %1181 = vector.shape_cast %1180 : vector<1xf32> to vector<1x1xf32>
    %c0_396 = arith.constant 0 : index
    %c0_397 = arith.constant 0 : index
    %1182 = vector.load %arg21[%c0_396, %c0_397] : memref<1x1xf32, #tpu.memory_space<vmem>>, vector<1x1xf32>
    %1183 = arith.addf %1181, %1182 : vector<1x1xf32>
    %c0_i32_398 = arith.constant 0 : i32
    %1184 = vector.broadcast %c0_i32_398 : i32 to vector<1x128xi32>
    %1185 = arith.cmpi eq, %41, %1184 : vector<1x128xi32>
    %1186 = vector.shape_cast %1183 : vector<1x1xf32> to vector<1x1xf32>
    %1187 = vector.broadcast %1186 : vector<1x1xf32> to vector<1x128xf32>
    %1188 = arith.select %1185, %1187, %1102 : vector<1x128xi1>, vector<1x128xf32>
    %c0_399 = arith.constant 0 : index
    %c0_400 = arith.constant 0 : index
    %1189 = vector.load %arg8[%c0_399, %c0_400] : memref<32x128xf32, #tpu.memory_space<vmem>>, vector<32x128xf32>
    %cst_401 = arith.constant dense<0.000000e+00> : vector<1x128xf32>
    %1190 = tpu.matmul %1177, %1189, %cst_401 {dimension_numbers = #tpu.dot_dimension_numbers<[1], [0], [0], [1], [0, 0, 1, 1], [], []>} : vector<1x32xf32>, vector<32x128xf32>, vector<1x128xf32> -> vector<1x128xf32>
    %1191 = arith.addf %1190, %38 : vector<1x128xf32>
    %c0_402 = arith.constant 0 : index
    %c0_403 = arith.constant 0 : index
    %1192 = vector.load %arg18[%c0_402, %c0_403] : memref<1x32xf32, #tpu.memory_space<vmem>>, vector<1x32xf32>
    %1193 = vector.extract_strided_slice %1191 {offsets = [0, 0], sizes = [1, 32], strides = [1, 1]} : vector<1x128xf32> to vector<1x32xf32>
    %1194 = arith.negf %1193 : vector<1x32xf32>
    %1195 = math.exp %1194 : vector<1x32xf32>
    %cst_404 = arith.constant 1.000000e+00 : f32
    %1196 = vector.broadcast %cst_404 : f32 to vector<1x32xf32>
    %1197 = arith.addf %1196, %1195 : vector<1x32xf32>
    %1198 = arith.divf %1196, %1197 : vector<1x32xf32>
    %1199 = vector.extract_strided_slice %1191 {offsets = [0, 32], sizes = [1, 32], strides = [1, 1]} : vector<1x128xf32> to vector<1x32xf32>
    %1200 = arith.negf %1199 : vector<1x32xf32>
    %1201 = math.exp %1200 : vector<1x32xf32>
    %cst_405 = arith.constant 1.000000e+00 : f32
    %1202 = vector.broadcast %cst_405 : f32 to vector<1x32xf32>
    %1203 = arith.addf %1202, %1201 : vector<1x32xf32>
    %1204 = arith.divf %1202, %1203 : vector<1x32xf32>
    %1205 = vector.extract_strided_slice %1191 {offsets = [0, 64], sizes = [1, 32], strides = [1, 1]} : vector<1x128xf32> to vector<1x32xf32>
    %1206 = math.tanh %1205 : vector<1x32xf32>
    %1207 = vector.extract_strided_slice %1191 {offsets = [0, 96], sizes = [1, 32], strides = [1, 1]} : vector<1x128xf32> to vector<1x32xf32>
    %1208 = arith.negf %1207 : vector<1x32xf32>
    %1209 = math.exp %1208 : vector<1x32xf32>
    %cst_406 = arith.constant 1.000000e+00 : f32
    %1210 = vector.broadcast %cst_406 : f32 to vector<1x32xf32>
    %1211 = arith.addf %1210, %1209 : vector<1x32xf32>
    %1212 = arith.divf %1210, %1211 : vector<1x32xf32>
    %1213 = arith.mulf %1204, %1192 : vector<1x32xf32>
    %1214 = arith.mulf %1198, %1206 : vector<1x32xf32>
    %1215 = arith.addf %1213, %1214 : vector<1x32xf32>
    %1216 = math.tanh %1215 : vector<1x32xf32>
    %1217 = arith.mulf %1212, %1216 : vector<1x32xf32>
    %c0_407 = arith.constant 0 : index
    %c0_408 = arith.constant 0 : index
    %1218 = vector.load %arg11[%c0_407, %c0_408] : memref<32x32xf32, #tpu.memory_space<vmem>>, vector<32x32xf32>
    %cst_409 = arith.constant dense<0.000000e+00> : vector<1x32xf32>
    %1219 = tpu.matmul %1217, %1218, %cst_409 {dimension_numbers = #tpu.dot_dimension_numbers<[1], [0], [0], [1], [0, 0, 1, 1], [], []>} : vector<1x32xf32>, vector<32x32xf32>, vector<1x32xf32> -> vector<1x32xf32>
    %1220 = vector.broadcast %1219 : vector<1x32xf32> to vector<8x32xf32>
    %1221 = arith.addf %25, %1220 : vector<8x32xf32>
    %1222 = math.tanh %1221 : vector<8x32xf32>
    %c0_410 = arith.constant 0 : index
    %c0_411 = arith.constant 0 : index
    %1223 = vector.load %arg12[%c0_410, %c0_411] : memref<1x32xf32, #tpu.memory_space<vmem>>, vector<1x32xf32>
    %1224 = vector.broadcast %1223 : vector<1x32xf32> to vector<8x32xf32>
    %1225 = arith.mulf %1222, %1224 : vector<8x32xf32>
    %cst_412 = arith.constant dense<0.000000e+00> : vector<8xf32>
    %1226 = vector.multi_reduction <add>, %1225, %cst_412 [1] : vector<8x32xf32> to vector<8xf32>
    %1227 = vector.shape_cast %1226 : vector<8xf32> to vector<8x1xf32>
    %cst_413 = arith.constant dense<0xFF800000> : vector<1xf32>
    %1228 = vector.multi_reduction <maximumf>, %1227, %cst_413 [0] : vector<8x1xf32> to vector<1xf32>
    %1229 = vector.shape_cast %1228 : vector<1xf32> to vector<1x1xf32>
    %1230 = vector.broadcast %1229 : vector<1x1xf32> to vector<8x1xf32>
    %1231 = arith.subf %1227, %1230 : vector<8x1xf32>
    %1232 = math.exp %1231 : vector<8x1xf32>
    %cst_414 = arith.constant dense<0.000000e+00> : vector<1xf32>
    %1233 = vector.multi_reduction <add>, %1232, %cst_414 [0] : vector<8x1xf32> to vector<1xf32>
    %1234 = vector.shape_cast %1233 : vector<1xf32> to vector<1x1xf32>
    %1235 = vector.broadcast %1234 : vector<1x1xf32> to vector<8x1xf32>
    %1236 = arith.divf %1232, %1235 : vector<8x1xf32>
    %1237 = vector.broadcast %1236 : vector<8x1xf32> to vector<8x32xf32>
    %1238 = arith.mulf %1237, %25 : vector<8x32xf32>
    %cst_415 = arith.constant dense<0.000000e+00> : vector<32xf32>
    %1239 = vector.multi_reduction <add>, %1238, %cst_415 [0] : vector<8x32xf32> to vector<32xf32>
    %1240 = vector.shape_cast %1239 : vector<32xf32> to vector<1x32xf32>
    %c0_416 = arith.constant 0 : index
    %c0_417 = arith.constant 0 : index
    %1241 = vector.load %arg14[%c0_416, %c0_417] : memref<32x32xf32, #tpu.memory_space<vmem>>, vector<32x32xf32>
    %cst_418 = arith.constant dense<0.000000e+00> : vector<1x32xf32>
    %1242 = tpu.matmul %1240, %1241, %cst_418 {dimension_numbers = #tpu.dot_dimension_numbers<[1], [0], [0], [1], [0, 0, 1, 1], [], []>} : vector<1x32xf32>, vector<32x32xf32>, vector<1x32xf32> -> vector<1x32xf32>
    %1243 = vector.broadcast %1242 : vector<1x32xf32> to vector<8x32xf32>
    %1244 = arith.addf %23, %1243 : vector<8x32xf32>
    %1245 = math.tanh %1244 : vector<8x32xf32>
    %c0_419 = arith.constant 0 : index
    %c0_420 = arith.constant 0 : index
    %1246 = vector.load %arg15[%c0_419, %c0_420] : memref<1x32xf32, #tpu.memory_space<vmem>>, vector<1x32xf32>
    %1247 = vector.broadcast %1246 : vector<1x32xf32> to vector<8x32xf32>
    %1248 = arith.mulf %1245, %1247 : vector<8x32xf32>
    %cst_421 = arith.constant dense<0.000000e+00> : vector<8xf32>
    %1249 = vector.multi_reduction <add>, %1248, %cst_421 [1] : vector<8x32xf32> to vector<8xf32>
    %1250 = vector.shape_cast %1249 : vector<8xf32> to vector<8x1xf32>
    %cst_422 = arith.constant dense<0xFF800000> : vector<1xf32>
    %1251 = vector.multi_reduction <maximumf>, %1250, %cst_422 [0] : vector<8x1xf32> to vector<1xf32>
    %1252 = vector.shape_cast %1251 : vector<1xf32> to vector<1x1xf32>
    %1253 = vector.broadcast %1252 : vector<1x1xf32> to vector<8x1xf32>
    %1254 = arith.subf %1250, %1253 : vector<8x1xf32>
    %1255 = math.exp %1254 : vector<8x1xf32>
    %cst_423 = arith.constant dense<0.000000e+00> : vector<1xf32>
    %1256 = vector.multi_reduction <add>, %1255, %cst_423 [0] : vector<8x1xf32> to vector<1xf32>
    %1257 = vector.shape_cast %1256 : vector<1xf32> to vector<1x1xf32>
    %1258 = vector.broadcast %1257 : vector<1x1xf32> to vector<8x1xf32>
    %1259 = arith.divf %1255, %1258 : vector<8x1xf32>
    %1260 = vector.broadcast %1259 : vector<8x1xf32> to vector<8x32xf32>
    %1261 = arith.mulf %1260, %6 : vector<8x32xf32>
    %cst_424 = arith.constant dense<0.000000e+00> : vector<32xf32>
    %1262 = vector.multi_reduction <add>, %1261, %cst_424 [0] : vector<8x32xf32> to vector<32xf32>
    %1263 = vector.shape_cast %1262 : vector<32xf32> to vector<1x32xf32>
    %c0_425 = arith.constant 0 : index
    %c0_426 = arith.constant 0 : index
    %1264 = vector.load %arg20[%c0_425, %c0_426] : memref<1x32xf32, #tpu.memory_space<vmem>>, vector<1x32xf32>
    %1265 = arith.mulf %1263, %1264 : vector<1x32xf32>
    %cst_427 = arith.constant dense<0.000000e+00> : vector<1xf32>
    %1266 = vector.multi_reduction <add>, %1265, %cst_427 [1] : vector<1x32xf32> to vector<1xf32>
    %1267 = vector.shape_cast %1266 : vector<1xf32> to vector<1x1xf32>
    %c0_428 = arith.constant 0 : index
    %c0_429 = arith.constant 0 : index
    %1268 = vector.load %arg21[%c0_428, %c0_429] : memref<1x1xf32, #tpu.memory_space<vmem>>, vector<1x1xf32>
    %1269 = arith.addf %1267, %1268 : vector<1x1xf32>
    %c1_i32_430 = arith.constant 1 : i32
    %1270 = vector.broadcast %c1_i32_430 : i32 to vector<1x128xi32>
    %1271 = arith.cmpi eq, %41, %1270 : vector<1x128xi32>
    %1272 = vector.shape_cast %1269 : vector<1x1xf32> to vector<1x1xf32>
    %1273 = vector.broadcast %1272 : vector<1x1xf32> to vector<1x128xf32>
    %1274 = arith.select %1271, %1273, %1188 : vector<1x128xi1>, vector<1x128xf32>
    %c0_431 = arith.constant 0 : index
    %c0_432 = arith.constant 0 : index
    %1275 = vector.load %arg8[%c0_431, %c0_432] : memref<32x128xf32, #tpu.memory_space<vmem>>, vector<32x128xf32>
    %cst_433 = arith.constant dense<0.000000e+00> : vector<1x128xf32>
    %1276 = tpu.matmul %1263, %1275, %cst_433 {dimension_numbers = #tpu.dot_dimension_numbers<[1], [0], [0], [1], [0, 0, 1, 1], [], []>} : vector<1x32xf32>, vector<32x128xf32>, vector<1x128xf32> -> vector<1x128xf32>
    %1277 = arith.addf %1276, %38 : vector<1x128xf32>
    %c0_434 = arith.constant 0 : index
    %c0_435 = arith.constant 0 : index
    %1278 = vector.load %arg18[%c0_434, %c0_435] : memref<1x32xf32, #tpu.memory_space<vmem>>, vector<1x32xf32>
    %1279 = vector.extract_strided_slice %1277 {offsets = [0, 0], sizes = [1, 32], strides = [1, 1]} : vector<1x128xf32> to vector<1x32xf32>
    %1280 = arith.negf %1279 : vector<1x32xf32>
    %1281 = math.exp %1280 : vector<1x32xf32>
    %cst_436 = arith.constant 1.000000e+00 : f32
    %1282 = vector.broadcast %cst_436 : f32 to vector<1x32xf32>
    %1283 = arith.addf %1282, %1281 : vector<1x32xf32>
    %1284 = arith.divf %1282, %1283 : vector<1x32xf32>
    %1285 = vector.extract_strided_slice %1277 {offsets = [0, 32], sizes = [1, 32], strides = [1, 1]} : vector<1x128xf32> to vector<1x32xf32>
    %1286 = arith.negf %1285 : vector<1x32xf32>
    %1287 = math.exp %1286 : vector<1x32xf32>
    %cst_437 = arith.constant 1.000000e+00 : f32
    %1288 = vector.broadcast %cst_437 : f32 to vector<1x32xf32>
    %1289 = arith.addf %1288, %1287 : vector<1x32xf32>
    %1290 = arith.divf %1288, %1289 : vector<1x32xf32>
    %1291 = vector.extract_strided_slice %1277 {offsets = [0, 64], sizes = [1, 32], strides = [1, 1]} : vector<1x128xf32> to vector<1x32xf32>
    %1292 = math.tanh %1291 : vector<1x32xf32>
    %1293 = vector.extract_strided_slice %1277 {offsets = [0, 96], sizes = [1, 32], strides = [1, 1]} : vector<1x128xf32> to vector<1x32xf32>
    %1294 = arith.negf %1293 : vector<1x32xf32>
    %1295 = math.exp %1294 : vector<1x32xf32>
    %cst_438 = arith.constant 1.000000e+00 : f32
    %1296 = vector.broadcast %cst_438 : f32 to vector<1x32xf32>
    %1297 = arith.addf %1296, %1295 : vector<1x32xf32>
    %1298 = arith.divf %1296, %1297 : vector<1x32xf32>
    %1299 = arith.mulf %1290, %1278 : vector<1x32xf32>
    %1300 = arith.mulf %1284, %1292 : vector<1x32xf32>
    %1301 = arith.addf %1299, %1300 : vector<1x32xf32>
    %1302 = math.tanh %1301 : vector<1x32xf32>
    %1303 = arith.mulf %1298, %1302 : vector<1x32xf32>
    %c0_439 = arith.constant 0 : index
    %c0_440 = arith.constant 0 : index
    %1304 = vector.load %arg11[%c0_439, %c0_440] : memref<32x32xf32, #tpu.memory_space<vmem>>, vector<32x32xf32>
    %cst_441 = arith.constant dense<0.000000e+00> : vector<1x32xf32>
    %1305 = tpu.matmul %1303, %1304, %cst_441 {dimension_numbers = #tpu.dot_dimension_numbers<[1], [0], [0], [1], [0, 0, 1, 1], [], []>} : vector<1x32xf32>, vector<32x32xf32>, vector<1x32xf32> -> vector<1x32xf32>
    %1306 = vector.broadcast %1305 : vector<1x32xf32> to vector<8x32xf32>
    %1307 = arith.addf %25, %1306 : vector<8x32xf32>
    %1308 = math.tanh %1307 : vector<8x32xf32>
    %c0_442 = arith.constant 0 : index
    %c0_443 = arith.constant 0 : index
    %1309 = vector.load %arg12[%c0_442, %c0_443] : memref<1x32xf32, #tpu.memory_space<vmem>>, vector<1x32xf32>
    %1310 = vector.broadcast %1309 : vector<1x32xf32> to vector<8x32xf32>
    %1311 = arith.mulf %1308, %1310 : vector<8x32xf32>
    %cst_444 = arith.constant dense<0.000000e+00> : vector<8xf32>
    %1312 = vector.multi_reduction <add>, %1311, %cst_444 [1] : vector<8x32xf32> to vector<8xf32>
    %1313 = vector.shape_cast %1312 : vector<8xf32> to vector<8x1xf32>
    %cst_445 = arith.constant dense<0xFF800000> : vector<1xf32>
    %1314 = vector.multi_reduction <maximumf>, %1313, %cst_445 [0] : vector<8x1xf32> to vector<1xf32>
    %1315 = vector.shape_cast %1314 : vector<1xf32> to vector<1x1xf32>
    %1316 = vector.broadcast %1315 : vector<1x1xf32> to vector<8x1xf32>
    %1317 = arith.subf %1313, %1316 : vector<8x1xf32>
    %1318 = math.exp %1317 : vector<8x1xf32>
    %cst_446 = arith.constant dense<0.000000e+00> : vector<1xf32>
    %1319 = vector.multi_reduction <add>, %1318, %cst_446 [0] : vector<8x1xf32> to vector<1xf32>
    %1320 = vector.shape_cast %1319 : vector<1xf32> to vector<1x1xf32>
    %1321 = vector.broadcast %1320 : vector<1x1xf32> to vector<8x1xf32>
    %1322 = arith.divf %1318, %1321 : vector<8x1xf32>
    %1323 = vector.broadcast %1322 : vector<8x1xf32> to vector<8x32xf32>
    %1324 = arith.mulf %1323, %25 : vector<8x32xf32>
    %cst_447 = arith.constant dense<0.000000e+00> : vector<32xf32>
    %1325 = vector.multi_reduction <add>, %1324, %cst_447 [0] : vector<8x32xf32> to vector<32xf32>
    %1326 = vector.shape_cast %1325 : vector<32xf32> to vector<1x32xf32>
    %c0_448 = arith.constant 0 : index
    %c0_449 = arith.constant 0 : index
    %1327 = vector.load %arg14[%c0_448, %c0_449] : memref<32x32xf32, #tpu.memory_space<vmem>>, vector<32x32xf32>
    %cst_450 = arith.constant dense<0.000000e+00> : vector<1x32xf32>
    %1328 = tpu.matmul %1326, %1327, %cst_450 {dimension_numbers = #tpu.dot_dimension_numbers<[1], [0], [0], [1], [0, 0, 1, 1], [], []>} : vector<1x32xf32>, vector<32x32xf32>, vector<1x32xf32> -> vector<1x32xf32>
    %1329 = vector.broadcast %1328 : vector<1x32xf32> to vector<8x32xf32>
    %1330 = arith.addf %23, %1329 : vector<8x32xf32>
    %1331 = math.tanh %1330 : vector<8x32xf32>
    %c0_451 = arith.constant 0 : index
    %c0_452 = arith.constant 0 : index
    %1332 = vector.load %arg15[%c0_451, %c0_452] : memref<1x32xf32, #tpu.memory_space<vmem>>, vector<1x32xf32>
    %1333 = vector.broadcast %1332 : vector<1x32xf32> to vector<8x32xf32>
    %1334 = arith.mulf %1331, %1333 : vector<8x32xf32>
    %cst_453 = arith.constant dense<0.000000e+00> : vector<8xf32>
    %1335 = vector.multi_reduction <add>, %1334, %cst_453 [1] : vector<8x32xf32> to vector<8xf32>
    %1336 = vector.shape_cast %1335 : vector<8xf32> to vector<8x1xf32>
    %cst_454 = arith.constant dense<0xFF800000> : vector<1xf32>
    %1337 = vector.multi_reduction <maximumf>, %1336, %cst_454 [0] : vector<8x1xf32> to vector<1xf32>
    %1338 = vector.shape_cast %1337 : vector<1xf32> to vector<1x1xf32>
    %1339 = vector.broadcast %1338 : vector<1x1xf32> to vector<8x1xf32>
    %1340 = arith.subf %1336, %1339 : vector<8x1xf32>
    %1341 = math.exp %1340 : vector<8x1xf32>
    %cst_455 = arith.constant dense<0.000000e+00> : vector<1xf32>
    %1342 = vector.multi_reduction <add>, %1341, %cst_455 [0] : vector<8x1xf32> to vector<1xf32>
    %1343 = vector.shape_cast %1342 : vector<1xf32> to vector<1x1xf32>
    %1344 = vector.broadcast %1343 : vector<1x1xf32> to vector<8x1xf32>
    %1345 = arith.divf %1341, %1344 : vector<8x1xf32>
    %1346 = vector.broadcast %1345 : vector<8x1xf32> to vector<8x32xf32>
    %1347 = arith.mulf %1346, %6 : vector<8x32xf32>
    %cst_456 = arith.constant dense<0.000000e+00> : vector<32xf32>
    %1348 = vector.multi_reduction <add>, %1347, %cst_456 [0] : vector<8x32xf32> to vector<32xf32>
    %1349 = vector.shape_cast %1348 : vector<32xf32> to vector<1x32xf32>
    %c0_457 = arith.constant 0 : index
    %c0_458 = arith.constant 0 : index
    %1350 = vector.load %arg20[%c0_457, %c0_458] : memref<1x32xf32, #tpu.memory_space<vmem>>, vector<1x32xf32>
    %1351 = arith.mulf %1349, %1350 : vector<1x32xf32>
    %cst_459 = arith.constant dense<0.000000e+00> : vector<1xf32>
    %1352 = vector.multi_reduction <add>, %1351, %cst_459 [1] : vector<1x32xf32> to vector<1xf32>
    %1353 = vector.shape_cast %1352 : vector<1xf32> to vector<1x1xf32>
    %c0_460 = arith.constant 0 : index
    %c0_461 = arith.constant 0 : index
    %1354 = vector.load %arg21[%c0_460, %c0_461] : memref<1x1xf32, #tpu.memory_space<vmem>>, vector<1x1xf32>
    %1355 = arith.addf %1353, %1354 : vector<1x1xf32>
    %c2_i32_462 = arith.constant 2 : i32
    %1356 = vector.broadcast %c2_i32_462 : i32 to vector<1x128xi32>
    %1357 = arith.cmpi eq, %41, %1356 : vector<1x128xi32>
    %1358 = vector.shape_cast %1355 : vector<1x1xf32> to vector<1x1xf32>
    %1359 = vector.broadcast %1358 : vector<1x1xf32> to vector<1x128xf32>
    %1360 = arith.select %1357, %1359, %1274 : vector<1x128xi1>, vector<1x128xf32>
    %c0_463 = arith.constant 0 : index
    %c0_464 = arith.constant 0 : index
    %1361 = vector.load %arg8[%c0_463, %c0_464] : memref<32x128xf32, #tpu.memory_space<vmem>>, vector<32x128xf32>
    %cst_465 = arith.constant dense<0.000000e+00> : vector<1x128xf32>
    %1362 = tpu.matmul %1349, %1361, %cst_465 {dimension_numbers = #tpu.dot_dimension_numbers<[1], [0], [0], [1], [0, 0, 1, 1], [], []>} : vector<1x32xf32>, vector<32x128xf32>, vector<1x128xf32> -> vector<1x128xf32>
    %1363 = arith.addf %1362, %38 : vector<1x128xf32>
    %c0_466 = arith.constant 0 : index
    %c0_467 = arith.constant 0 : index
    %1364 = vector.load %arg18[%c0_466, %c0_467] : memref<1x32xf32, #tpu.memory_space<vmem>>, vector<1x32xf32>
    %1365 = vector.extract_strided_slice %1363 {offsets = [0, 0], sizes = [1, 32], strides = [1, 1]} : vector<1x128xf32> to vector<1x32xf32>
    %1366 = arith.negf %1365 : vector<1x32xf32>
    %1367 = math.exp %1366 : vector<1x32xf32>
    %cst_468 = arith.constant 1.000000e+00 : f32
    %1368 = vector.broadcast %cst_468 : f32 to vector<1x32xf32>
    %1369 = arith.addf %1368, %1367 : vector<1x32xf32>
    %1370 = arith.divf %1368, %1369 : vector<1x32xf32>
    %1371 = vector.extract_strided_slice %1363 {offsets = [0, 32], sizes = [1, 32], strides = [1, 1]} : vector<1x128xf32> to vector<1x32xf32>
    %1372 = arith.negf %1371 : vector<1x32xf32>
    %1373 = math.exp %1372 : vector<1x32xf32>
    %cst_469 = arith.constant 1.000000e+00 : f32
    %1374 = vector.broadcast %cst_469 : f32 to vector<1x32xf32>
    %1375 = arith.addf %1374, %1373 : vector<1x32xf32>
    %1376 = arith.divf %1374, %1375 : vector<1x32xf32>
    %1377 = vector.extract_strided_slice %1363 {offsets = [0, 64], sizes = [1, 32], strides = [1, 1]} : vector<1x128xf32> to vector<1x32xf32>
    %1378 = math.tanh %1377 : vector<1x32xf32>
    %1379 = vector.extract_strided_slice %1363 {offsets = [0, 96], sizes = [1, 32], strides = [1, 1]} : vector<1x128xf32> to vector<1x32xf32>
    %1380 = arith.negf %1379 : vector<1x32xf32>
    %1381 = math.exp %1380 : vector<1x32xf32>
    %cst_470 = arith.constant 1.000000e+00 : f32
    %1382 = vector.broadcast %cst_470 : f32 to vector<1x32xf32>
    %1383 = arith.addf %1382, %1381 : vector<1x32xf32>
    %1384 = arith.divf %1382, %1383 : vector<1x32xf32>
    %1385 = arith.mulf %1376, %1364 : vector<1x32xf32>
    %1386 = arith.mulf %1370, %1378 : vector<1x32xf32>
    %1387 = arith.addf %1385, %1386 : vector<1x32xf32>
    %1388 = math.tanh %1387 : vector<1x32xf32>
    %1389 = arith.mulf %1384, %1388 : vector<1x32xf32>
    %c0_471 = arith.constant 0 : index
    %c0_472 = arith.constant 0 : index
    %1390 = vector.load %arg11[%c0_471, %c0_472] : memref<32x32xf32, #tpu.memory_space<vmem>>, vector<32x32xf32>
    %cst_473 = arith.constant dense<0.000000e+00> : vector<1x32xf32>
    %1391 = tpu.matmul %1389, %1390, %cst_473 {dimension_numbers = #tpu.dot_dimension_numbers<[1], [0], [0], [1], [0, 0, 1, 1], [], []>} : vector<1x32xf32>, vector<32x32xf32>, vector<1x32xf32> -> vector<1x32xf32>
    %1392 = vector.broadcast %1391 : vector<1x32xf32> to vector<8x32xf32>
    %1393 = arith.addf %25, %1392 : vector<8x32xf32>
    %1394 = math.tanh %1393 : vector<8x32xf32>
    %c0_474 = arith.constant 0 : index
    %c0_475 = arith.constant 0 : index
    %1395 = vector.load %arg12[%c0_474, %c0_475] : memref<1x32xf32, #tpu.memory_space<vmem>>, vector<1x32xf32>
    %1396 = vector.broadcast %1395 : vector<1x32xf32> to vector<8x32xf32>
    %1397 = arith.mulf %1394, %1396 : vector<8x32xf32>
    %cst_476 = arith.constant dense<0.000000e+00> : vector<8xf32>
    %1398 = vector.multi_reduction <add>, %1397, %cst_476 [1] : vector<8x32xf32> to vector<8xf32>
    %1399 = vector.shape_cast %1398 : vector<8xf32> to vector<8x1xf32>
    %cst_477 = arith.constant dense<0xFF800000> : vector<1xf32>
    %1400 = vector.multi_reduction <maximumf>, %1399, %cst_477 [0] : vector<8x1xf32> to vector<1xf32>
    %1401 = vector.shape_cast %1400 : vector<1xf32> to vector<1x1xf32>
    %1402 = vector.broadcast %1401 : vector<1x1xf32> to vector<8x1xf32>
    %1403 = arith.subf %1399, %1402 : vector<8x1xf32>
    %1404 = math.exp %1403 : vector<8x1xf32>
    %cst_478 = arith.constant dense<0.000000e+00> : vector<1xf32>
    %1405 = vector.multi_reduction <add>, %1404, %cst_478 [0] : vector<8x1xf32> to vector<1xf32>
    %1406 = vector.shape_cast %1405 : vector<1xf32> to vector<1x1xf32>
    %1407 = vector.broadcast %1406 : vector<1x1xf32> to vector<8x1xf32>
    %1408 = arith.divf %1404, %1407 : vector<8x1xf32>
    %1409 = vector.broadcast %1408 : vector<8x1xf32> to vector<8x32xf32>
    %1410 = arith.mulf %1409, %25 : vector<8x32xf32>
    %cst_479 = arith.constant dense<0.000000e+00> : vector<32xf32>
    %1411 = vector.multi_reduction <add>, %1410, %cst_479 [0] : vector<8x32xf32> to vector<32xf32>
    %1412 = vector.shape_cast %1411 : vector<32xf32> to vector<1x32xf32>
    %c0_480 = arith.constant 0 : index
    %c0_481 = arith.constant 0 : index
    %1413 = vector.load %arg14[%c0_480, %c0_481] : memref<32x32xf32, #tpu.memory_space<vmem>>, vector<32x32xf32>
    %cst_482 = arith.constant dense<0.000000e+00> : vector<1x32xf32>
    %1414 = tpu.matmul %1412, %1413, %cst_482 {dimension_numbers = #tpu.dot_dimension_numbers<[1], [0], [0], [1], [0, 0, 1, 1], [], []>} : vector<1x32xf32>, vector<32x32xf32>, vector<1x32xf32> -> vector<1x32xf32>
    %1415 = vector.broadcast %1414 : vector<1x32xf32> to vector<8x32xf32>
    %1416 = arith.addf %23, %1415 : vector<8x32xf32>
    %1417 = math.tanh %1416 : vector<8x32xf32>
    %c0_483 = arith.constant 0 : index
    %c0_484 = arith.constant 0 : index
    %1418 = vector.load %arg15[%c0_483, %c0_484] : memref<1x32xf32, #tpu.memory_space<vmem>>, vector<1x32xf32>
    %1419 = vector.broadcast %1418 : vector<1x32xf32> to vector<8x32xf32>
    %1420 = arith.mulf %1417, %1419 : vector<8x32xf32>
    %cst_485 = arith.constant dense<0.000000e+00> : vector<8xf32>
    %1421 = vector.multi_reduction <add>, %1420, %cst_485 [1] : vector<8x32xf32> to vector<8xf32>
    %1422 = vector.shape_cast %1421 : vector<8xf32> to vector<8x1xf32>
    %cst_486 = arith.constant dense<0xFF800000> : vector<1xf32>
    %1423 = vector.multi_reduction <maximumf>, %1422, %cst_486 [0] : vector<8x1xf32> to vector<1xf32>
    %1424 = vector.shape_cast %1423 : vector<1xf32> to vector<1x1xf32>
    %1425 = vector.broadcast %1424 : vector<1x1xf32> to vector<8x1xf32>
    %1426 = arith.subf %1422, %1425 : vector<8x1xf32>
    %1427 = math.exp %1426 : vector<8x1xf32>
    %cst_487 = arith.constant dense<0.000000e+00> : vector<1xf32>
    %1428 = vector.multi_reduction <add>, %1427, %cst_487 [0] : vector<8x1xf32> to vector<1xf32>
    %1429 = vector.shape_cast %1428 : vector<1xf32> to vector<1x1xf32>
    %1430 = vector.broadcast %1429 : vector<1x1xf32> to vector<8x1xf32>
    %1431 = arith.divf %1427, %1430 : vector<8x1xf32>
    %1432 = vector.broadcast %1431 : vector<8x1xf32> to vector<8x32xf32>
    %1433 = arith.mulf %1432, %6 : vector<8x32xf32>
    %cst_488 = arith.constant dense<0.000000e+00> : vector<32xf32>
    %1434 = vector.multi_reduction <add>, %1433, %cst_488 [0] : vector<8x32xf32> to vector<32xf32>
    %1435 = vector.shape_cast %1434 : vector<32xf32> to vector<1x32xf32>
    %c0_489 = arith.constant 0 : index
    %c0_490 = arith.constant 0 : index
    %1436 = vector.load %arg20[%c0_489, %c0_490] : memref<1x32xf32, #tpu.memory_space<vmem>>, vector<1x32xf32>
    %1437 = arith.mulf %1435, %1436 : vector<1x32xf32>
    %cst_491 = arith.constant dense<0.000000e+00> : vector<1xf32>
    %1438 = vector.multi_reduction <add>, %1437, %cst_491 [1] : vector<1x32xf32> to vector<1xf32>
    %1439 = vector.shape_cast %1438 : vector<1xf32> to vector<1x1xf32>
    %c0_492 = arith.constant 0 : index
    %c0_493 = arith.constant 0 : index
    %1440 = vector.load %arg21[%c0_492, %c0_493] : memref<1x1xf32, #tpu.memory_space<vmem>>, vector<1x1xf32>
    %1441 = arith.addf %1439, %1440 : vector<1x1xf32>
    %c3_i32_494 = arith.constant 3 : i32
    %1442 = vector.broadcast %c3_i32_494 : i32 to vector<1x128xi32>
    %1443 = arith.cmpi eq, %41, %1442 : vector<1x128xi32>
    %1444 = vector.shape_cast %1441 : vector<1x1xf32> to vector<1x1xf32>
    %1445 = vector.broadcast %1444 : vector<1x1xf32> to vector<1x128xf32>
    %1446 = arith.select %1443, %1445, %1360 : vector<1x128xi1>, vector<1x128xf32>
    %c0_495 = arith.constant 0 : index
    %c0_496 = arith.constant 0 : index
    %1447 = vector.load %arg8[%c0_495, %c0_496] : memref<32x128xf32, #tpu.memory_space<vmem>>, vector<32x128xf32>
    %cst_497 = arith.constant dense<0.000000e+00> : vector<1x128xf32>
    %1448 = tpu.matmul %1435, %1447, %cst_497 {dimension_numbers = #tpu.dot_dimension_numbers<[1], [0], [0], [1], [0, 0, 1, 1], [], []>} : vector<1x32xf32>, vector<32x128xf32>, vector<1x128xf32> -> vector<1x128xf32>
    %1449 = arith.addf %1448, %38 : vector<1x128xf32>
    %c0_498 = arith.constant 0 : index
    %c0_499 = arith.constant 0 : index
    %1450 = vector.load %arg18[%c0_498, %c0_499] : memref<1x32xf32, #tpu.memory_space<vmem>>, vector<1x32xf32>
    %1451 = vector.extract_strided_slice %1449 {offsets = [0, 0], sizes = [1, 32], strides = [1, 1]} : vector<1x128xf32> to vector<1x32xf32>
    %1452 = arith.negf %1451 : vector<1x32xf32>
    %1453 = math.exp %1452 : vector<1x32xf32>
    %cst_500 = arith.constant 1.000000e+00 : f32
    %1454 = vector.broadcast %cst_500 : f32 to vector<1x32xf32>
    %1455 = arith.addf %1454, %1453 : vector<1x32xf32>
    %1456 = arith.divf %1454, %1455 : vector<1x32xf32>
    %1457 = vector.extract_strided_slice %1449 {offsets = [0, 32], sizes = [1, 32], strides = [1, 1]} : vector<1x128xf32> to vector<1x32xf32>
    %1458 = arith.negf %1457 : vector<1x32xf32>
    %1459 = math.exp %1458 : vector<1x32xf32>
    %cst_501 = arith.constant 1.000000e+00 : f32
    %1460 = vector.broadcast %cst_501 : f32 to vector<1x32xf32>
    %1461 = arith.addf %1460, %1459 : vector<1x32xf32>
    %1462 = arith.divf %1460, %1461 : vector<1x32xf32>
    %1463 = vector.extract_strided_slice %1449 {offsets = [0, 64], sizes = [1, 32], strides = [1, 1]} : vector<1x128xf32> to vector<1x32xf32>
    %1464 = math.tanh %1463 : vector<1x32xf32>
    %1465 = vector.extract_strided_slice %1449 {offsets = [0, 96], sizes = [1, 32], strides = [1, 1]} : vector<1x128xf32> to vector<1x32xf32>
    %1466 = arith.negf %1465 : vector<1x32xf32>
    %1467 = math.exp %1466 : vector<1x32xf32>
    %cst_502 = arith.constant 1.000000e+00 : f32
    %1468 = vector.broadcast %cst_502 : f32 to vector<1x32xf32>
    %1469 = arith.addf %1468, %1467 : vector<1x32xf32>
    %1470 = arith.divf %1468, %1469 : vector<1x32xf32>
    %1471 = arith.mulf %1462, %1450 : vector<1x32xf32>
    %1472 = arith.mulf %1456, %1464 : vector<1x32xf32>
    %1473 = arith.addf %1471, %1472 : vector<1x32xf32>
    %1474 = math.tanh %1473 : vector<1x32xf32>
    %1475 = arith.mulf %1470, %1474 : vector<1x32xf32>
    %c0_503 = arith.constant 0 : index
    %c0_504 = arith.constant 0 : index
    %1476 = vector.load %arg11[%c0_503, %c0_504] : memref<32x32xf32, #tpu.memory_space<vmem>>, vector<32x32xf32>
    %cst_505 = arith.constant dense<0.000000e+00> : vector<1x32xf32>
    %1477 = tpu.matmul %1475, %1476, %cst_505 {dimension_numbers = #tpu.dot_dimension_numbers<[1], [0], [0], [1], [0, 0, 1, 1], [], []>} : vector<1x32xf32>, vector<32x32xf32>, vector<1x32xf32> -> vector<1x32xf32>
    %1478 = vector.broadcast %1477 : vector<1x32xf32> to vector<8x32xf32>
    %1479 = arith.addf %25, %1478 : vector<8x32xf32>
    %1480 = math.tanh %1479 : vector<8x32xf32>
    %c0_506 = arith.constant 0 : index
    %c0_507 = arith.constant 0 : index
    %1481 = vector.load %arg12[%c0_506, %c0_507] : memref<1x32xf32, #tpu.memory_space<vmem>>, vector<1x32xf32>
    %1482 = vector.broadcast %1481 : vector<1x32xf32> to vector<8x32xf32>
    %1483 = arith.mulf %1480, %1482 : vector<8x32xf32>
    %cst_508 = arith.constant dense<0.000000e+00> : vector<8xf32>
    %1484 = vector.multi_reduction <add>, %1483, %cst_508 [1] : vector<8x32xf32> to vector<8xf32>
    %1485 = vector.shape_cast %1484 : vector<8xf32> to vector<8x1xf32>
    %cst_509 = arith.constant dense<0xFF800000> : vector<1xf32>
    %1486 = vector.multi_reduction <maximumf>, %1485, %cst_509 [0] : vector<8x1xf32> to vector<1xf32>
    %1487 = vector.shape_cast %1486 : vector<1xf32> to vector<1x1xf32>
    %1488 = vector.broadcast %1487 : vector<1x1xf32> to vector<8x1xf32>
    %1489 = arith.subf %1485, %1488 : vector<8x1xf32>
    %1490 = math.exp %1489 : vector<8x1xf32>
    %cst_510 = arith.constant dense<0.000000e+00> : vector<1xf32>
    %1491 = vector.multi_reduction <add>, %1490, %cst_510 [0] : vector<8x1xf32> to vector<1xf32>
    %1492 = vector.shape_cast %1491 : vector<1xf32> to vector<1x1xf32>
    %1493 = vector.broadcast %1492 : vector<1x1xf32> to vector<8x1xf32>
    %1494 = arith.divf %1490, %1493 : vector<8x1xf32>
    %1495 = vector.broadcast %1494 : vector<8x1xf32> to vector<8x32xf32>
    %1496 = arith.mulf %1495, %25 : vector<8x32xf32>
    %cst_511 = arith.constant dense<0.000000e+00> : vector<32xf32>
    %1497 = vector.multi_reduction <add>, %1496, %cst_511 [0] : vector<8x32xf32> to vector<32xf32>
    %1498 = vector.shape_cast %1497 : vector<32xf32> to vector<1x32xf32>
    %c0_512 = arith.constant 0 : index
    %c0_513 = arith.constant 0 : index
    %1499 = vector.load %arg14[%c0_512, %c0_513] : memref<32x32xf32, #tpu.memory_space<vmem>>, vector<32x32xf32>
    %cst_514 = arith.constant dense<0.000000e+00> : vector<1x32xf32>
    %1500 = tpu.matmul %1498, %1499, %cst_514 {dimension_numbers = #tpu.dot_dimension_numbers<[1], [0], [0], [1], [0, 0, 1, 1], [], []>} : vector<1x32xf32>, vector<32x32xf32>, vector<1x32xf32> -> vector<1x32xf32>
    %1501 = vector.broadcast %1500 : vector<1x32xf32> to vector<8x32xf32>
    %1502 = arith.addf %23, %1501 : vector<8x32xf32>
    %1503 = math.tanh %1502 : vector<8x32xf32>
    %c0_515 = arith.constant 0 : index
    %c0_516 = arith.constant 0 : index
    %1504 = vector.load %arg15[%c0_515, %c0_516] : memref<1x32xf32, #tpu.memory_space<vmem>>, vector<1x32xf32>
    %1505 = vector.broadcast %1504 : vector<1x32xf32> to vector<8x32xf32>
    %1506 = arith.mulf %1503, %1505 : vector<8x32xf32>
    %cst_517 = arith.constant dense<0.000000e+00> : vector<8xf32>
    %1507 = vector.multi_reduction <add>, %1506, %cst_517 [1] : vector<8x32xf32> to vector<8xf32>
    %1508 = vector.shape_cast %1507 : vector<8xf32> to vector<8x1xf32>
    %cst_518 = arith.constant dense<0xFF800000> : vector<1xf32>
    %1509 = vector.multi_reduction <maximumf>, %1508, %cst_518 [0] : vector<8x1xf32> to vector<1xf32>
    %1510 = vector.shape_cast %1509 : vector<1xf32> to vector<1x1xf32>
    %1511 = vector.broadcast %1510 : vector<1x1xf32> to vector<8x1xf32>
    %1512 = arith.subf %1508, %1511 : vector<8x1xf32>
    %1513 = math.exp %1512 : vector<8x1xf32>
    %cst_519 = arith.constant dense<0.000000e+00> : vector<1xf32>
    %1514 = vector.multi_reduction <add>, %1513, %cst_519 [0] : vector<8x1xf32> to vector<1xf32>
    %1515 = vector.shape_cast %1514 : vector<1xf32> to vector<1x1xf32>
    %1516 = vector.broadcast %1515 : vector<1x1xf32> to vector<8x1xf32>
    %1517 = arith.divf %1513, %1516 : vector<8x1xf32>
    %1518 = vector.broadcast %1517 : vector<8x1xf32> to vector<8x32xf32>
    %1519 = arith.mulf %1518, %6 : vector<8x32xf32>
    %cst_520 = arith.constant dense<0.000000e+00> : vector<32xf32>
    %1520 = vector.multi_reduction <add>, %1519, %cst_520 [0] : vector<8x32xf32> to vector<32xf32>
    %1521 = vector.shape_cast %1520 : vector<32xf32> to vector<1x32xf32>
    %c0_521 = arith.constant 0 : index
    %c0_522 = arith.constant 0 : index
    %1522 = vector.load %arg20[%c0_521, %c0_522] : memref<1x32xf32, #tpu.memory_space<vmem>>, vector<1x32xf32>
    %1523 = arith.mulf %1521, %1522 : vector<1x32xf32>
    %cst_523 = arith.constant dense<0.000000e+00> : vector<1xf32>
    %1524 = vector.multi_reduction <add>, %1523, %cst_523 [1] : vector<1x32xf32> to vector<1xf32>
    %1525 = vector.shape_cast %1524 : vector<1xf32> to vector<1x1xf32>
    %c0_524 = arith.constant 0 : index
    %c0_525 = arith.constant 0 : index
    %1526 = vector.load %arg21[%c0_524, %c0_525] : memref<1x1xf32, #tpu.memory_space<vmem>>, vector<1x1xf32>
    %1527 = arith.addf %1525, %1526 : vector<1x1xf32>
    %c4_i32_526 = arith.constant 4 : i32
    %1528 = vector.broadcast %c4_i32_526 : i32 to vector<1x128xi32>
    %1529 = arith.cmpi eq, %41, %1528 : vector<1x128xi32>
    %1530 = vector.shape_cast %1527 : vector<1x1xf32> to vector<1x1xf32>
    %1531 = vector.broadcast %1530 : vector<1x1xf32> to vector<1x128xf32>
    %1532 = arith.select %1529, %1531, %1446 : vector<1x128xi1>, vector<1x128xf32>
    %c0_527 = arith.constant 0 : index
    %c0_528 = arith.constant 0 : index
    %1533 = vector.load %arg8[%c0_527, %c0_528] : memref<32x128xf32, #tpu.memory_space<vmem>>, vector<32x128xf32>
    %cst_529 = arith.constant dense<0.000000e+00> : vector<1x128xf32>
    %1534 = tpu.matmul %1521, %1533, %cst_529 {dimension_numbers = #tpu.dot_dimension_numbers<[1], [0], [0], [1], [0, 0, 1, 1], [], []>} : vector<1x32xf32>, vector<32x128xf32>, vector<1x128xf32> -> vector<1x128xf32>
    %1535 = arith.addf %1534, %38 : vector<1x128xf32>
    %c0_530 = arith.constant 0 : index
    %c0_531 = arith.constant 0 : index
    %1536 = vector.load %arg18[%c0_530, %c0_531] : memref<1x32xf32, #tpu.memory_space<vmem>>, vector<1x32xf32>
    %1537 = vector.extract_strided_slice %1535 {offsets = [0, 0], sizes = [1, 32], strides = [1, 1]} : vector<1x128xf32> to vector<1x32xf32>
    %1538 = arith.negf %1537 : vector<1x32xf32>
    %1539 = math.exp %1538 : vector<1x32xf32>
    %cst_532 = arith.constant 1.000000e+00 : f32
    %1540 = vector.broadcast %cst_532 : f32 to vector<1x32xf32>
    %1541 = arith.addf %1540, %1539 : vector<1x32xf32>
    %1542 = arith.divf %1540, %1541 : vector<1x32xf32>
    %1543 = vector.extract_strided_slice %1535 {offsets = [0, 32], sizes = [1, 32], strides = [1, 1]} : vector<1x128xf32> to vector<1x32xf32>
    %1544 = arith.negf %1543 : vector<1x32xf32>
    %1545 = math.exp %1544 : vector<1x32xf32>
    %cst_533 = arith.constant 1.000000e+00 : f32
    %1546 = vector.broadcast %cst_533 : f32 to vector<1x32xf32>
    %1547 = arith.addf %1546, %1545 : vector<1x32xf32>
    %1548 = arith.divf %1546, %1547 : vector<1x32xf32>
    %1549 = vector.extract_strided_slice %1535 {offsets = [0, 64], sizes = [1, 32], strides = [1, 1]} : vector<1x128xf32> to vector<1x32xf32>
    %1550 = math.tanh %1549 : vector<1x32xf32>
    %1551 = vector.extract_strided_slice %1535 {offsets = [0, 96], sizes = [1, 32], strides = [1, 1]} : vector<1x128xf32> to vector<1x32xf32>
    %1552 = arith.negf %1551 : vector<1x32xf32>
    %1553 = math.exp %1552 : vector<1x32xf32>
    %cst_534 = arith.constant 1.000000e+00 : f32
    %1554 = vector.broadcast %cst_534 : f32 to vector<1x32xf32>
    %1555 = arith.addf %1554, %1553 : vector<1x32xf32>
    %1556 = arith.divf %1554, %1555 : vector<1x32xf32>
    %1557 = arith.mulf %1548, %1536 : vector<1x32xf32>
    %1558 = arith.mulf %1542, %1550 : vector<1x32xf32>
    %1559 = arith.addf %1557, %1558 : vector<1x32xf32>
    %1560 = math.tanh %1559 : vector<1x32xf32>
    %1561 = arith.mulf %1556, %1560 : vector<1x32xf32>
    %c0_535 = arith.constant 0 : index
    %c0_536 = arith.constant 0 : index
    %1562 = vector.load %arg11[%c0_535, %c0_536] : memref<32x32xf32, #tpu.memory_space<vmem>>, vector<32x32xf32>
    %cst_537 = arith.constant dense<0.000000e+00> : vector<1x32xf32>
    %1563 = tpu.matmul %1561, %1562, %cst_537 {dimension_numbers = #tpu.dot_dimension_numbers<[1], [0], [0], [1], [0, 0, 1, 1], [], []>} : vector<1x32xf32>, vector<32x32xf32>, vector<1x32xf32> -> vector<1x32xf32>
    %1564 = vector.broadcast %1563 : vector<1x32xf32> to vector<8x32xf32>
    %1565 = arith.addf %25, %1564 : vector<8x32xf32>
    %1566 = math.tanh %1565 : vector<8x32xf32>
    %c0_538 = arith.constant 0 : index
    %c0_539 = arith.constant 0 : index
    %1567 = vector.load %arg12[%c0_538, %c0_539] : memref<1x32xf32, #tpu.memory_space<vmem>>, vector<1x32xf32>
    %1568 = vector.broadcast %1567 : vector<1x32xf32> to vector<8x32xf32>
    %1569 = arith.mulf %1566, %1568 : vector<8x32xf32>
    %cst_540 = arith.constant dense<0.000000e+00> : vector<8xf32>
    %1570 = vector.multi_reduction <add>, %1569, %cst_540 [1] : vector<8x32xf32> to vector<8xf32>
    %1571 = vector.shape_cast %1570 : vector<8xf32> to vector<8x1xf32>
    %cst_541 = arith.constant dense<0xFF800000> : vector<1xf32>
    %1572 = vector.multi_reduction <maximumf>, %1571, %cst_541 [0] : vector<8x1xf32> to vector<1xf32>
    %1573 = vector.shape_cast %1572 : vector<1xf32> to vector<1x1xf32>
    %1574 = vector.broadcast %1573 : vector<1x1xf32> to vector<8x1xf32>
    %1575 = arith.subf %1571, %1574 : vector<8x1xf32>
    %1576 = math.exp %1575 : vector<8x1xf32>
    %cst_542 = arith.constant dense<0.000000e+00> : vector<1xf32>
    %1577 = vector.multi_reduction <add>, %1576, %cst_542 [0] : vector<8x1xf32> to vector<1xf32>
    %1578 = vector.shape_cast %1577 : vector<1xf32> to vector<1x1xf32>
    %1579 = vector.broadcast %1578 : vector<1x1xf32> to vector<8x1xf32>
    %1580 = arith.divf %1576, %1579 : vector<8x1xf32>
    %1581 = vector.broadcast %1580 : vector<8x1xf32> to vector<8x32xf32>
    %1582 = arith.mulf %1581, %25 : vector<8x32xf32>
    %cst_543 = arith.constant dense<0.000000e+00> : vector<32xf32>
    %1583 = vector.multi_reduction <add>, %1582, %cst_543 [0] : vector<8x32xf32> to vector<32xf32>
    %1584 = vector.shape_cast %1583 : vector<32xf32> to vector<1x32xf32>
    %c0_544 = arith.constant 0 : index
    %c0_545 = arith.constant 0 : index
    %1585 = vector.load %arg14[%c0_544, %c0_545] : memref<32x32xf32, #tpu.memory_space<vmem>>, vector<32x32xf32>
    %cst_546 = arith.constant dense<0.000000e+00> : vector<1x32xf32>
    %1586 = tpu.matmul %1584, %1585, %cst_546 {dimension_numbers = #tpu.dot_dimension_numbers<[1], [0], [0], [1], [0, 0, 1, 1], [], []>} : vector<1x32xf32>, vector<32x32xf32>, vector<1x32xf32> -> vector<1x32xf32>
    %1587 = vector.broadcast %1586 : vector<1x32xf32> to vector<8x32xf32>
    %1588 = arith.addf %23, %1587 : vector<8x32xf32>
    %1589 = math.tanh %1588 : vector<8x32xf32>
    %c0_547 = arith.constant 0 : index
    %c0_548 = arith.constant 0 : index
    %1590 = vector.load %arg15[%c0_547, %c0_548] : memref<1x32xf32, #tpu.memory_space<vmem>>, vector<1x32xf32>
    %1591 = vector.broadcast %1590 : vector<1x32xf32> to vector<8x32xf32>
    %1592 = arith.mulf %1589, %1591 : vector<8x32xf32>
    %cst_549 = arith.constant dense<0.000000e+00> : vector<8xf32>
    %1593 = vector.multi_reduction <add>, %1592, %cst_549 [1] : vector<8x32xf32> to vector<8xf32>
    %1594 = vector.shape_cast %1593 : vector<8xf32> to vector<8x1xf32>
    %cst_550 = arith.constant dense<0xFF800000> : vector<1xf32>
    %1595 = vector.multi_reduction <maximumf>, %1594, %cst_550 [0] : vector<8x1xf32> to vector<1xf32>
    %1596 = vector.shape_cast %1595 : vector<1xf32> to vector<1x1xf32>
    %1597 = vector.broadcast %1596 : vector<1x1xf32> to vector<8x1xf32>
    %1598 = arith.subf %1594, %1597 : vector<8x1xf32>
    %1599 = math.exp %1598 : vector<8x1xf32>
    %cst_551 = arith.constant dense<0.000000e+00> : vector<1xf32>
    %1600 = vector.multi_reduction <add>, %1599, %cst_551 [0] : vector<8x1xf32> to vector<1xf32>
    %1601 = vector.shape_cast %1600 : vector<1xf32> to vector<1x1xf32>
    %1602 = vector.broadcast %1601 : vector<1x1xf32> to vector<8x1xf32>
    %1603 = arith.divf %1599, %1602 : vector<8x1xf32>
    %1604 = vector.broadcast %1603 : vector<8x1xf32> to vector<8x32xf32>
    %1605 = arith.mulf %1604, %6 : vector<8x32xf32>
    %cst_552 = arith.constant dense<0.000000e+00> : vector<32xf32>
    %1606 = vector.multi_reduction <add>, %1605, %cst_552 [0] : vector<8x32xf32> to vector<32xf32>
    %1607 = vector.shape_cast %1606 : vector<32xf32> to vector<1x32xf32>
    %c0_553 = arith.constant 0 : index
    %c0_554 = arith.constant 0 : index
    %1608 = vector.load %arg20[%c0_553, %c0_554] : memref<1x32xf32, #tpu.memory_space<vmem>>, vector<1x32xf32>
    %1609 = arith.mulf %1607, %1608 : vector<1x32xf32>
    %cst_555 = arith.constant dense<0.000000e+00> : vector<1xf32>
    %1610 = vector.multi_reduction <add>, %1609, %cst_555 [1] : vector<1x32xf32> to vector<1xf32>
    %1611 = vector.shape_cast %1610 : vector<1xf32> to vector<1x1xf32>
    %c0_556 = arith.constant 0 : index
    %c0_557 = arith.constant 0 : index
    %1612 = vector.load %arg21[%c0_556, %c0_557] : memref<1x1xf32, #tpu.memory_space<vmem>>, vector<1x1xf32>
    %1613 = arith.addf %1611, %1612 : vector<1x1xf32>
    %c5_i32_558 = arith.constant 5 : i32
    %1614 = vector.broadcast %c5_i32_558 : i32 to vector<1x128xi32>
    %1615 = arith.cmpi eq, %41, %1614 : vector<1x128xi32>
    %1616 = vector.shape_cast %1613 : vector<1x1xf32> to vector<1x1xf32>
    %1617 = vector.broadcast %1616 : vector<1x1xf32> to vector<1x128xf32>
    %1618 = arith.select %1615, %1617, %1532 : vector<1x128xi1>, vector<1x128xf32>
    %c0_559 = arith.constant 0 : index
    %c0_560 = arith.constant 0 : index
    %1619 = vector.load %arg8[%c0_559, %c0_560] : memref<32x128xf32, #tpu.memory_space<vmem>>, vector<32x128xf32>
    %cst_561 = arith.constant dense<0.000000e+00> : vector<1x128xf32>
    %1620 = tpu.matmul %1607, %1619, %cst_561 {dimension_numbers = #tpu.dot_dimension_numbers<[1], [0], [0], [1], [0, 0, 1, 1], [], []>} : vector<1x32xf32>, vector<32x128xf32>, vector<1x128xf32> -> vector<1x128xf32>
    %1621 = arith.addf %1620, %38 : vector<1x128xf32>
    %c0_562 = arith.constant 0 : index
    %c0_563 = arith.constant 0 : index
    %1622 = vector.load %arg18[%c0_562, %c0_563] : memref<1x32xf32, #tpu.memory_space<vmem>>, vector<1x32xf32>
    %1623 = vector.extract_strided_slice %1621 {offsets = [0, 0], sizes = [1, 32], strides = [1, 1]} : vector<1x128xf32> to vector<1x32xf32>
    %1624 = arith.negf %1623 : vector<1x32xf32>
    %1625 = math.exp %1624 : vector<1x32xf32>
    %cst_564 = arith.constant 1.000000e+00 : f32
    %1626 = vector.broadcast %cst_564 : f32 to vector<1x32xf32>
    %1627 = arith.addf %1626, %1625 : vector<1x32xf32>
    %1628 = arith.divf %1626, %1627 : vector<1x32xf32>
    %1629 = vector.extract_strided_slice %1621 {offsets = [0, 32], sizes = [1, 32], strides = [1, 1]} : vector<1x128xf32> to vector<1x32xf32>
    %1630 = arith.negf %1629 : vector<1x32xf32>
    %1631 = math.exp %1630 : vector<1x32xf32>
    %cst_565 = arith.constant 1.000000e+00 : f32
    %1632 = vector.broadcast %cst_565 : f32 to vector<1x32xf32>
    %1633 = arith.addf %1632, %1631 : vector<1x32xf32>
    %1634 = arith.divf %1632, %1633 : vector<1x32xf32>
    %1635 = vector.extract_strided_slice %1621 {offsets = [0, 64], sizes = [1, 32], strides = [1, 1]} : vector<1x128xf32> to vector<1x32xf32>
    %1636 = math.tanh %1635 : vector<1x32xf32>
    %1637 = vector.extract_strided_slice %1621 {offsets = [0, 96], sizes = [1, 32], strides = [1, 1]} : vector<1x128xf32> to vector<1x32xf32>
    %1638 = arith.negf %1637 : vector<1x32xf32>
    %1639 = math.exp %1638 : vector<1x32xf32>
    %cst_566 = arith.constant 1.000000e+00 : f32
    %1640 = vector.broadcast %cst_566 : f32 to vector<1x32xf32>
    %1641 = arith.addf %1640, %1639 : vector<1x32xf32>
    %1642 = arith.divf %1640, %1641 : vector<1x32xf32>
    %1643 = arith.mulf %1634, %1622 : vector<1x32xf32>
    %1644 = arith.mulf %1628, %1636 : vector<1x32xf32>
    %1645 = arith.addf %1643, %1644 : vector<1x32xf32>
    %1646 = math.tanh %1645 : vector<1x32xf32>
    %1647 = arith.mulf %1642, %1646 : vector<1x32xf32>
    %c0_567 = arith.constant 0 : index
    %c0_568 = arith.constant 0 : index
    %1648 = vector.load %arg11[%c0_567, %c0_568] : memref<32x32xf32, #tpu.memory_space<vmem>>, vector<32x32xf32>
    %cst_569 = arith.constant dense<0.000000e+00> : vector<1x32xf32>
    %1649 = tpu.matmul %1647, %1648, %cst_569 {dimension_numbers = #tpu.dot_dimension_numbers<[1], [0], [0], [1], [0, 0, 1, 1], [], []>} : vector<1x32xf32>, vector<32x32xf32>, vector<1x32xf32> -> vector<1x32xf32>
    %1650 = vector.broadcast %1649 : vector<1x32xf32> to vector<8x32xf32>
    %1651 = arith.addf %25, %1650 : vector<8x32xf32>
    %1652 = math.tanh %1651 : vector<8x32xf32>
    %c0_570 = arith.constant 0 : index
    %c0_571 = arith.constant 0 : index
    %1653 = vector.load %arg12[%c0_570, %c0_571] : memref<1x32xf32, #tpu.memory_space<vmem>>, vector<1x32xf32>
    %1654 = vector.broadcast %1653 : vector<1x32xf32> to vector<8x32xf32>
    %1655 = arith.mulf %1652, %1654 : vector<8x32xf32>
    %cst_572 = arith.constant dense<0.000000e+00> : vector<8xf32>
    %1656 = vector.multi_reduction <add>, %1655, %cst_572 [1] : vector<8x32xf32> to vector<8xf32>
    %1657 = vector.shape_cast %1656 : vector<8xf32> to vector<8x1xf32>
    %cst_573 = arith.constant dense<0xFF800000> : vector<1xf32>
    %1658 = vector.multi_reduction <maximumf>, %1657, %cst_573 [0] : vector<8x1xf32> to vector<1xf32>
    %1659 = vector.shape_cast %1658 : vector<1xf32> to vector<1x1xf32>
    %1660 = vector.broadcast %1659 : vector<1x1xf32> to vector<8x1xf32>
    %1661 = arith.subf %1657, %1660 : vector<8x1xf32>
    %1662 = math.exp %1661 : vector<8x1xf32>
    %cst_574 = arith.constant dense<0.000000e+00> : vector<1xf32>
    %1663 = vector.multi_reduction <add>, %1662, %cst_574 [0] : vector<8x1xf32> to vector<1xf32>
    %1664 = vector.shape_cast %1663 : vector<1xf32> to vector<1x1xf32>
    %1665 = vector.broadcast %1664 : vector<1x1xf32> to vector<8x1xf32>
    %1666 = arith.divf %1662, %1665 : vector<8x1xf32>
    %1667 = vector.broadcast %1666 : vector<8x1xf32> to vector<8x32xf32>
    %1668 = arith.mulf %1667, %25 : vector<8x32xf32>
    %cst_575 = arith.constant dense<0.000000e+00> : vector<32xf32>
    %1669 = vector.multi_reduction <add>, %1668, %cst_575 [0] : vector<8x32xf32> to vector<32xf32>
    %1670 = vector.shape_cast %1669 : vector<32xf32> to vector<1x32xf32>
    %c0_576 = arith.constant 0 : index
    %c0_577 = arith.constant 0 : index
    %1671 = vector.load %arg14[%c0_576, %c0_577] : memref<32x32xf32, #tpu.memory_space<vmem>>, vector<32x32xf32>
    %cst_578 = arith.constant dense<0.000000e+00> : vector<1x32xf32>
    %1672 = tpu.matmul %1670, %1671, %cst_578 {dimension_numbers = #tpu.dot_dimension_numbers<[1], [0], [0], [1], [0, 0, 1, 1], [], []>} : vector<1x32xf32>, vector<32x32xf32>, vector<1x32xf32> -> vector<1x32xf32>
    %1673 = vector.broadcast %1672 : vector<1x32xf32> to vector<8x32xf32>
    %1674 = arith.addf %23, %1673 : vector<8x32xf32>
    %1675 = math.tanh %1674 : vector<8x32xf32>
    %c0_579 = arith.constant 0 : index
    %c0_580 = arith.constant 0 : index
    %1676 = vector.load %arg15[%c0_579, %c0_580] : memref<1x32xf32, #tpu.memory_space<vmem>>, vector<1x32xf32>
    %1677 = vector.broadcast %1676 : vector<1x32xf32> to vector<8x32xf32>
    %1678 = arith.mulf %1675, %1677 : vector<8x32xf32>
    %cst_581 = arith.constant dense<0.000000e+00> : vector<8xf32>
    %1679 = vector.multi_reduction <add>, %1678, %cst_581 [1] : vector<8x32xf32> to vector<8xf32>
    %1680 = vector.shape_cast %1679 : vector<8xf32> to vector<8x1xf32>
    %cst_582 = arith.constant dense<0xFF800000> : vector<1xf32>
    %1681 = vector.multi_reduction <maximumf>, %1680, %cst_582 [0] : vector<8x1xf32> to vector<1xf32>
    %1682 = vector.shape_cast %1681 : vector<1xf32> to vector<1x1xf32>
    %1683 = vector.broadcast %1682 : vector<1x1xf32> to vector<8x1xf32>
    %1684 = arith.subf %1680, %1683 : vector<8x1xf32>
    %1685 = math.exp %1684 : vector<8x1xf32>
    %cst_583 = arith.constant dense<0.000000e+00> : vector<1xf32>
    %1686 = vector.multi_reduction <add>, %1685, %cst_583 [0] : vector<8x1xf32> to vector<1xf32>
    %1687 = vector.shape_cast %1686 : vector<1xf32> to vector<1x1xf32>
    %1688 = vector.broadcast %1687 : vector<1x1xf32> to vector<8x1xf32>
    %1689 = arith.divf %1685, %1688 : vector<8x1xf32>
    %1690 = vector.broadcast %1689 : vector<8x1xf32> to vector<8x32xf32>
    %1691 = arith.mulf %1690, %6 : vector<8x32xf32>
    %cst_584 = arith.constant dense<0.000000e+00> : vector<32xf32>
    %1692 = vector.multi_reduction <add>, %1691, %cst_584 [0] : vector<8x32xf32> to vector<32xf32>
    %1693 = vector.shape_cast %1692 : vector<32xf32> to vector<1x32xf32>
    %c0_585 = arith.constant 0 : index
    %c0_586 = arith.constant 0 : index
    %1694 = vector.load %arg20[%c0_585, %c0_586] : memref<1x32xf32, #tpu.memory_space<vmem>>, vector<1x32xf32>
    %1695 = arith.mulf %1693, %1694 : vector<1x32xf32>
    %cst_587 = arith.constant dense<0.000000e+00> : vector<1xf32>
    %1696 = vector.multi_reduction <add>, %1695, %cst_587 [1] : vector<1x32xf32> to vector<1xf32>
    %1697 = vector.shape_cast %1696 : vector<1xf32> to vector<1x1xf32>
    %c0_588 = arith.constant 0 : index
    %c0_589 = arith.constant 0 : index
    %1698 = vector.load %arg21[%c0_588, %c0_589] : memref<1x1xf32, #tpu.memory_space<vmem>>, vector<1x1xf32>
    %1699 = arith.addf %1697, %1698 : vector<1x1xf32>
    %c6_i32_590 = arith.constant 6 : i32
    %1700 = vector.broadcast %c6_i32_590 : i32 to vector<1x128xi32>
    %1701 = arith.cmpi eq, %41, %1700 : vector<1x128xi32>
    %1702 = vector.shape_cast %1699 : vector<1x1xf32> to vector<1x1xf32>
    %1703 = vector.broadcast %1702 : vector<1x1xf32> to vector<1x128xf32>
    %1704 = arith.select %1701, %1703, %1618 : vector<1x128xi1>, vector<1x128xf32>
    %c0_591 = arith.constant 0 : index
    %c0_592 = arith.constant 0 : index
    %1705 = vector.load %arg8[%c0_591, %c0_592] : memref<32x128xf32, #tpu.memory_space<vmem>>, vector<32x128xf32>
    %cst_593 = arith.constant dense<0.000000e+00> : vector<1x128xf32>
    %1706 = tpu.matmul %1693, %1705, %cst_593 {dimension_numbers = #tpu.dot_dimension_numbers<[1], [0], [0], [1], [0, 0, 1, 1], [], []>} : vector<1x32xf32>, vector<32x128xf32>, vector<1x128xf32> -> vector<1x128xf32>
    %1707 = arith.addf %1706, %38 : vector<1x128xf32>
    %c0_594 = arith.constant 0 : index
    %c0_595 = arith.constant 0 : index
    %1708 = vector.load %arg18[%c0_594, %c0_595] : memref<1x32xf32, #tpu.memory_space<vmem>>, vector<1x32xf32>
    %1709 = vector.extract_strided_slice %1707 {offsets = [0, 0], sizes = [1, 32], strides = [1, 1]} : vector<1x128xf32> to vector<1x32xf32>
    %1710 = arith.negf %1709 : vector<1x32xf32>
    %1711 = math.exp %1710 : vector<1x32xf32>
    %cst_596 = arith.constant 1.000000e+00 : f32
    %1712 = vector.broadcast %cst_596 : f32 to vector<1x32xf32>
    %1713 = arith.addf %1712, %1711 : vector<1x32xf32>
    %1714 = arith.divf %1712, %1713 : vector<1x32xf32>
    %1715 = vector.extract_strided_slice %1707 {offsets = [0, 32], sizes = [1, 32], strides = [1, 1]} : vector<1x128xf32> to vector<1x32xf32>
    %1716 = arith.negf %1715 : vector<1x32xf32>
    %1717 = math.exp %1716 : vector<1x32xf32>
    %cst_597 = arith.constant 1.000000e+00 : f32
    %1718 = vector.broadcast %cst_597 : f32 to vector<1x32xf32>
    %1719 = arith.addf %1718, %1717 : vector<1x32xf32>
    %1720 = arith.divf %1718, %1719 : vector<1x32xf32>
    %1721 = vector.extract_strided_slice %1707 {offsets = [0, 64], sizes = [1, 32], strides = [1, 1]} : vector<1x128xf32> to vector<1x32xf32>
    %1722 = math.tanh %1721 : vector<1x32xf32>
    %1723 = vector.extract_strided_slice %1707 {offsets = [0, 96], sizes = [1, 32], strides = [1, 1]} : vector<1x128xf32> to vector<1x32xf32>
    %1724 = arith.negf %1723 : vector<1x32xf32>
    %1725 = math.exp %1724 : vector<1x32xf32>
    %cst_598 = arith.constant 1.000000e+00 : f32
    %1726 = vector.broadcast %cst_598 : f32 to vector<1x32xf32>
    %1727 = arith.addf %1726, %1725 : vector<1x32xf32>
    %1728 = arith.divf %1726, %1727 : vector<1x32xf32>
    %1729 = arith.mulf %1720, %1708 : vector<1x32xf32>
    %1730 = arith.mulf %1714, %1722 : vector<1x32xf32>
    %1731 = arith.addf %1729, %1730 : vector<1x32xf32>
    %1732 = math.tanh %1731 : vector<1x32xf32>
    %1733 = arith.mulf %1728, %1732 : vector<1x32xf32>
    %c0_599 = arith.constant 0 : index
    %c0_600 = arith.constant 0 : index
    %1734 = vector.load %arg11[%c0_599, %c0_600] : memref<32x32xf32, #tpu.memory_space<vmem>>, vector<32x32xf32>
    %cst_601 = arith.constant dense<0.000000e+00> : vector<1x32xf32>
    %1735 = tpu.matmul %1733, %1734, %cst_601 {dimension_numbers = #tpu.dot_dimension_numbers<[1], [0], [0], [1], [0, 0, 1, 1], [], []>} : vector<1x32xf32>, vector<32x32xf32>, vector<1x32xf32> -> vector<1x32xf32>
    %1736 = vector.broadcast %1735 : vector<1x32xf32> to vector<8x32xf32>
    %1737 = arith.addf %25, %1736 : vector<8x32xf32>
    %1738 = math.tanh %1737 : vector<8x32xf32>
    %c0_602 = arith.constant 0 : index
    %c0_603 = arith.constant 0 : index
    %1739 = vector.load %arg12[%c0_602, %c0_603] : memref<1x32xf32, #tpu.memory_space<vmem>>, vector<1x32xf32>
    %1740 = vector.broadcast %1739 : vector<1x32xf32> to vector<8x32xf32>
    %1741 = arith.mulf %1738, %1740 : vector<8x32xf32>
    %cst_604 = arith.constant dense<0.000000e+00> : vector<8xf32>
    %1742 = vector.multi_reduction <add>, %1741, %cst_604 [1] : vector<8x32xf32> to vector<8xf32>
    %1743 = vector.shape_cast %1742 : vector<8xf32> to vector<8x1xf32>
    %cst_605 = arith.constant dense<0xFF800000> : vector<1xf32>
    %1744 = vector.multi_reduction <maximumf>, %1743, %cst_605 [0] : vector<8x1xf32> to vector<1xf32>
    %1745 = vector.shape_cast %1744 : vector<1xf32> to vector<1x1xf32>
    %1746 = vector.broadcast %1745 : vector<1x1xf32> to vector<8x1xf32>
    %1747 = arith.subf %1743, %1746 : vector<8x1xf32>
    %1748 = math.exp %1747 : vector<8x1xf32>
    %cst_606 = arith.constant dense<0.000000e+00> : vector<1xf32>
    %1749 = vector.multi_reduction <add>, %1748, %cst_606 [0] : vector<8x1xf32> to vector<1xf32>
    %1750 = vector.shape_cast %1749 : vector<1xf32> to vector<1x1xf32>
    %1751 = vector.broadcast %1750 : vector<1x1xf32> to vector<8x1xf32>
    %1752 = arith.divf %1748, %1751 : vector<8x1xf32>
    %1753 = vector.broadcast %1752 : vector<8x1xf32> to vector<8x32xf32>
    %1754 = arith.mulf %1753, %25 : vector<8x32xf32>
    %cst_607 = arith.constant dense<0.000000e+00> : vector<32xf32>
    %1755 = vector.multi_reduction <add>, %1754, %cst_607 [0] : vector<8x32xf32> to vector<32xf32>
    %1756 = vector.shape_cast %1755 : vector<32xf32> to vector<1x32xf32>
    %c0_608 = arith.constant 0 : index
    %c0_609 = arith.constant 0 : index
    %1757 = vector.load %arg14[%c0_608, %c0_609] : memref<32x32xf32, #tpu.memory_space<vmem>>, vector<32x32xf32>
    %cst_610 = arith.constant dense<0.000000e+00> : vector<1x32xf32>
    %1758 = tpu.matmul %1756, %1757, %cst_610 {dimension_numbers = #tpu.dot_dimension_numbers<[1], [0], [0], [1], [0, 0, 1, 1], [], []>} : vector<1x32xf32>, vector<32x32xf32>, vector<1x32xf32> -> vector<1x32xf32>
    %1759 = vector.broadcast %1758 : vector<1x32xf32> to vector<8x32xf32>
    %1760 = arith.addf %23, %1759 : vector<8x32xf32>
    %1761 = math.tanh %1760 : vector<8x32xf32>
    %c0_611 = arith.constant 0 : index
    %c0_612 = arith.constant 0 : index
    %1762 = vector.load %arg15[%c0_611, %c0_612] : memref<1x32xf32, #tpu.memory_space<vmem>>, vector<1x32xf32>
    %1763 = vector.broadcast %1762 : vector<1x32xf32> to vector<8x32xf32>
    %1764 = arith.mulf %1761, %1763 : vector<8x32xf32>
    %cst_613 = arith.constant dense<0.000000e+00> : vector<8xf32>
    %1765 = vector.multi_reduction <add>, %1764, %cst_613 [1] : vector<8x32xf32> to vector<8xf32>
    %1766 = vector.shape_cast %1765 : vector<8xf32> to vector<8x1xf32>
    %cst_614 = arith.constant dense<0xFF800000> : vector<1xf32>
    %1767 = vector.multi_reduction <maximumf>, %1766, %cst_614 [0] : vector<8x1xf32> to vector<1xf32>
    %1768 = vector.shape_cast %1767 : vector<1xf32> to vector<1x1xf32>
    %1769 = vector.broadcast %1768 : vector<1x1xf32> to vector<8x1xf32>
    %1770 = arith.subf %1766, %1769 : vector<8x1xf32>
    %1771 = math.exp %1770 : vector<8x1xf32>
    %cst_615 = arith.constant dense<0.000000e+00> : vector<1xf32>
    %1772 = vector.multi_reduction <add>, %1771, %cst_615 [0] : vector<8x1xf32> to vector<1xf32>
    %1773 = vector.shape_cast %1772 : vector<1xf32> to vector<1x1xf32>
    %1774 = vector.broadcast %1773 : vector<1x1xf32> to vector<8x1xf32>
    %1775 = arith.divf %1771, %1774 : vector<8x1xf32>
    %1776 = vector.broadcast %1775 : vector<8x1xf32> to vector<8x32xf32>
    %1777 = arith.mulf %1776, %6 : vector<8x32xf32>
    %cst_616 = arith.constant dense<0.000000e+00> : vector<32xf32>
    %1778 = vector.multi_reduction <add>, %1777, %cst_616 [0] : vector<8x32xf32> to vector<32xf32>
    %1779 = vector.shape_cast %1778 : vector<32xf32> to vector<1x32xf32>
    %c0_617 = arith.constant 0 : index
    %c0_618 = arith.constant 0 : index
    %1780 = vector.load %arg20[%c0_617, %c0_618] : memref<1x32xf32, #tpu.memory_space<vmem>>, vector<1x32xf32>
    %1781 = arith.mulf %1779, %1780 : vector<1x32xf32>
    %cst_619 = arith.constant dense<0.000000e+00> : vector<1xf32>
    %1782 = vector.multi_reduction <add>, %1781, %cst_619 [1] : vector<1x32xf32> to vector<1xf32>
    %1783 = vector.shape_cast %1782 : vector<1xf32> to vector<1x1xf32>
    %c0_620 = arith.constant 0 : index
    %c0_621 = arith.constant 0 : index
    %1784 = vector.load %arg21[%c0_620, %c0_621] : memref<1x1xf32, #tpu.memory_space<vmem>>, vector<1x1xf32>
    %1785 = arith.addf %1783, %1784 : vector<1x1xf32>
    %c7_i32_622 = arith.constant 7 : i32
    %1786 = vector.broadcast %c7_i32_622 : i32 to vector<1x128xi32>
    %1787 = arith.cmpi eq, %41, %1786 : vector<1x128xi32>
    %1788 = vector.shape_cast %1785 : vector<1x1xf32> to vector<1x1xf32>
    %1789 = vector.broadcast %1788 : vector<1x1xf32> to vector<1x128xf32>
    %1790 = arith.select %1787, %1789, %1704 : vector<1x128xi1>, vector<1x128xf32>
    %c0_623 = arith.constant 0 : index
    %c0_624 = arith.constant 0 : index
    %1791 = vector.load %arg8[%c0_623, %c0_624] : memref<32x128xf32, #tpu.memory_space<vmem>>, vector<32x128xf32>
    %cst_625 = arith.constant dense<0.000000e+00> : vector<1x128xf32>
    %1792 = tpu.matmul %1779, %1791, %cst_625 {dimension_numbers = #tpu.dot_dimension_numbers<[1], [0], [0], [1], [0, 0, 1, 1], [], []>} : vector<1x32xf32>, vector<32x128xf32>, vector<1x128xf32> -> vector<1x128xf32>
    %1793 = arith.addf %1792, %38 : vector<1x128xf32>
    %c0_626 = arith.constant 0 : index
    %c0_627 = arith.constant 0 : index
    %1794 = vector.load %arg18[%c0_626, %c0_627] : memref<1x32xf32, #tpu.memory_space<vmem>>, vector<1x32xf32>
    %1795 = vector.extract_strided_slice %1793 {offsets = [0, 0], sizes = [1, 32], strides = [1, 1]} : vector<1x128xf32> to vector<1x32xf32>
    %1796 = arith.negf %1795 : vector<1x32xf32>
    %1797 = math.exp %1796 : vector<1x32xf32>
    %cst_628 = arith.constant 1.000000e+00 : f32
    %1798 = vector.broadcast %cst_628 : f32 to vector<1x32xf32>
    %1799 = arith.addf %1798, %1797 : vector<1x32xf32>
    %1800 = arith.divf %1798, %1799 : vector<1x32xf32>
    %1801 = vector.extract_strided_slice %1793 {offsets = [0, 32], sizes = [1, 32], strides = [1, 1]} : vector<1x128xf32> to vector<1x32xf32>
    %1802 = arith.negf %1801 : vector<1x32xf32>
    %1803 = math.exp %1802 : vector<1x32xf32>
    %cst_629 = arith.constant 1.000000e+00 : f32
    %1804 = vector.broadcast %cst_629 : f32 to vector<1x32xf32>
    %1805 = arith.addf %1804, %1803 : vector<1x32xf32>
    %1806 = arith.divf %1804, %1805 : vector<1x32xf32>
    %1807 = vector.extract_strided_slice %1793 {offsets = [0, 64], sizes = [1, 32], strides = [1, 1]} : vector<1x128xf32> to vector<1x32xf32>
    %1808 = math.tanh %1807 : vector<1x32xf32>
    %1809 = vector.extract_strided_slice %1793 {offsets = [0, 96], sizes = [1, 32], strides = [1, 1]} : vector<1x128xf32> to vector<1x32xf32>
    %1810 = arith.negf %1809 : vector<1x32xf32>
    %1811 = math.exp %1810 : vector<1x32xf32>
    %cst_630 = arith.constant 1.000000e+00 : f32
    %1812 = vector.broadcast %cst_630 : f32 to vector<1x32xf32>
    %1813 = arith.addf %1812, %1811 : vector<1x32xf32>
    %1814 = arith.divf %1812, %1813 : vector<1x32xf32>
    %1815 = arith.mulf %1806, %1794 : vector<1x32xf32>
    %1816 = arith.mulf %1800, %1808 : vector<1x32xf32>
    %1817 = arith.addf %1815, %1816 : vector<1x32xf32>
    %1818 = math.tanh %1817 : vector<1x32xf32>
    %1819 = arith.mulf %1814, %1818 : vector<1x32xf32>
    %c0_631 = arith.constant 0 : index
    %c0_632 = arith.constant 0 : index
    %1820 = vector.load %arg11[%c0_631, %c0_632] : memref<32x32xf32, #tpu.memory_space<vmem>>, vector<32x32xf32>
    %cst_633 = arith.constant dense<0.000000e+00> : vector<1x32xf32>
    %1821 = tpu.matmul %1819, %1820, %cst_633 {dimension_numbers = #tpu.dot_dimension_numbers<[1], [0], [0], [1], [0, 0, 1, 1], [], []>} : vector<1x32xf32>, vector<32x32xf32>, vector<1x32xf32> -> vector<1x32xf32>
    %1822 = vector.broadcast %1821 : vector<1x32xf32> to vector<8x32xf32>
    %1823 = arith.addf %25, %1822 : vector<8x32xf32>
    %1824 = math.tanh %1823 : vector<8x32xf32>
    %c0_634 = arith.constant 0 : index
    %c0_635 = arith.constant 0 : index
    %1825 = vector.load %arg12[%c0_634, %c0_635] : memref<1x32xf32, #tpu.memory_space<vmem>>, vector<1x32xf32>
    %1826 = vector.broadcast %1825 : vector<1x32xf32> to vector<8x32xf32>
    %1827 = arith.mulf %1824, %1826 : vector<8x32xf32>
    %cst_636 = arith.constant dense<0.000000e+00> : vector<8xf32>
    %1828 = vector.multi_reduction <add>, %1827, %cst_636 [1] : vector<8x32xf32> to vector<8xf32>
    %1829 = vector.shape_cast %1828 : vector<8xf32> to vector<8x1xf32>
    %cst_637 = arith.constant dense<0xFF800000> : vector<1xf32>
    %1830 = vector.multi_reduction <maximumf>, %1829, %cst_637 [0] : vector<8x1xf32> to vector<1xf32>
    %1831 = vector.shape_cast %1830 : vector<1xf32> to vector<1x1xf32>
    %1832 = vector.broadcast %1831 : vector<1x1xf32> to vector<8x1xf32>
    %1833 = arith.subf %1829, %1832 : vector<8x1xf32>
    %1834 = math.exp %1833 : vector<8x1xf32>
    %cst_638 = arith.constant dense<0.000000e+00> : vector<1xf32>
    %1835 = vector.multi_reduction <add>, %1834, %cst_638 [0] : vector<8x1xf32> to vector<1xf32>
    %1836 = vector.shape_cast %1835 : vector<1xf32> to vector<1x1xf32>
    %1837 = vector.broadcast %1836 : vector<1x1xf32> to vector<8x1xf32>
    %1838 = arith.divf %1834, %1837 : vector<8x1xf32>
    %1839 = vector.broadcast %1838 : vector<8x1xf32> to vector<8x32xf32>
    %1840 = arith.mulf %1839, %25 : vector<8x32xf32>
    %cst_639 = arith.constant dense<0.000000e+00> : vector<32xf32>
    %1841 = vector.multi_reduction <add>, %1840, %cst_639 [0] : vector<8x32xf32> to vector<32xf32>
    %1842 = vector.shape_cast %1841 : vector<32xf32> to vector<1x32xf32>
    %c0_640 = arith.constant 0 : index
    %c0_641 = arith.constant 0 : index
    %1843 = vector.load %arg14[%c0_640, %c0_641] : memref<32x32xf32, #tpu.memory_space<vmem>>, vector<32x32xf32>
    %cst_642 = arith.constant dense<0.000000e+00> : vector<1x32xf32>
    %1844 = tpu.matmul %1842, %1843, %cst_642 {dimension_numbers = #tpu.dot_dimension_numbers<[1], [0], [0], [1], [0, 0, 1, 1], [], []>} : vector<1x32xf32>, vector<32x32xf32>, vector<1x32xf32> -> vector<1x32xf32>
    %1845 = vector.broadcast %1844 : vector<1x32xf32> to vector<8x32xf32>
    %1846 = arith.addf %23, %1845 : vector<8x32xf32>
    %1847 = math.tanh %1846 : vector<8x32xf32>
    %c0_643 = arith.constant 0 : index
    %c0_644 = arith.constant 0 : index
    %1848 = vector.load %arg15[%c0_643, %c0_644] : memref<1x32xf32, #tpu.memory_space<vmem>>, vector<1x32xf32>
    %1849 = vector.broadcast %1848 : vector<1x32xf32> to vector<8x32xf32>
    %1850 = arith.mulf %1847, %1849 : vector<8x32xf32>
    %cst_645 = arith.constant dense<0.000000e+00> : vector<8xf32>
    %1851 = vector.multi_reduction <add>, %1850, %cst_645 [1] : vector<8x32xf32> to vector<8xf32>
    %1852 = vector.shape_cast %1851 : vector<8xf32> to vector<8x1xf32>
    %cst_646 = arith.constant dense<0xFF800000> : vector<1xf32>
    %1853 = vector.multi_reduction <maximumf>, %1852, %cst_646 [0] : vector<8x1xf32> to vector<1xf32>
    %1854 = vector.shape_cast %1853 : vector<1xf32> to vector<1x1xf32>
    %1855 = vector.broadcast %1854 : vector<1x1xf32> to vector<8x1xf32>
    %1856 = arith.subf %1852, %1855 : vector<8x1xf32>
    %1857 = math.exp %1856 : vector<8x1xf32>
    %cst_647 = arith.constant dense<0.000000e+00> : vector<1xf32>
    %1858 = vector.multi_reduction <add>, %1857, %cst_647 [0] : vector<8x1xf32> to vector<1xf32>
    %1859 = vector.shape_cast %1858 : vector<1xf32> to vector<1x1xf32>
    %1860 = vector.broadcast %1859 : vector<1x1xf32> to vector<8x1xf32>
    %1861 = arith.divf %1857, %1860 : vector<8x1xf32>
    %1862 = vector.broadcast %1861 : vector<8x1xf32> to vector<8x32xf32>
    %1863 = arith.mulf %1862, %6 : vector<8x32xf32>
    %cst_648 = arith.constant dense<0.000000e+00> : vector<32xf32>
    %1864 = vector.multi_reduction <add>, %1863, %cst_648 [0] : vector<8x32xf32> to vector<32xf32>
    %1865 = vector.shape_cast %1864 : vector<32xf32> to vector<1x32xf32>
    %c0_649 = arith.constant 0 : index
    %c0_650 = arith.constant 0 : index
    %1866 = vector.load %arg20[%c0_649, %c0_650] : memref<1x32xf32, #tpu.memory_space<vmem>>, vector<1x32xf32>
    %1867 = arith.mulf %1865, %1866 : vector<1x32xf32>
    %cst_651 = arith.constant dense<0.000000e+00> : vector<1xf32>
    %1868 = vector.multi_reduction <add>, %1867, %cst_651 [1] : vector<1x32xf32> to vector<1xf32>
    %1869 = vector.shape_cast %1868 : vector<1xf32> to vector<1x1xf32>
    %c0_652 = arith.constant 0 : index
    %c0_653 = arith.constant 0 : index
    %1870 = vector.load %arg21[%c0_652, %c0_653] : memref<1x1xf32, #tpu.memory_space<vmem>>, vector<1x1xf32>
    %1871 = arith.addf %1869, %1870 : vector<1x1xf32>
    %c8_i32_654 = arith.constant 8 : i32
    %1872 = vector.broadcast %c8_i32_654 : i32 to vector<1x128xi32>
    %1873 = arith.cmpi eq, %41, %1872 : vector<1x128xi32>
    %1874 = vector.shape_cast %1871 : vector<1x1xf32> to vector<1x1xf32>
    %1875 = vector.broadcast %1874 : vector<1x1xf32> to vector<1x128xf32>
    %1876 = arith.select %1873, %1875, %1790 : vector<1x128xi1>, vector<1x128xf32>
    %c0_655 = arith.constant 0 : index
    %c0_656 = arith.constant 0 : index
    %1877 = vector.load %arg23[%c0_655, %c0_656] : memref<1x128xf32, #tpu.memory_space<vmem>>, vector<1x128xf32>
    tpu.vector_store %arg23[%c0_655, %c0_656], %1876 {strides = array<i32>} : memref<1x128xf32, #tpu.memory_space<vmem>>, vector<1x128xf32>,
    return
  }
}

</mosaic_0001>

<bundles_post_ra>
// kernel: forward.1
= control target key start
LH: loop header
LB: loop body
LE: loop exit
PB: predicated region body
PF: predicated region fallthrough
CT: control target
= control target key end

     0   :  { %s12868_s0 = inlined_call_operand.vmem [shape: f32[8,32], index: 0, kind: input, shape index: {}]   ;;  %s12869_s1 = inlined_call_operand.vmem [shape: f32[32,32], index: 1, kind: input, shape index: {}]   ;;  %s12870_s2 = inlined_call_operand.vmem [shape: f32[32,32], index: 2, kind: input, shape index: {}]   ;;  %s12871_s3 = inlined_call_operand.hbm [shape: f32[1,32], index: 3, kind: input, shape index: {}]   ;;  %s12872_s4 = inlined_call_operand.hbm [shape: f32[1,32], index: 4, kind: input, shape index: {}]   ;;  %s12873_s5 = inlined_call_operand.hbm [shape: f32[1,32], index: 5, kind: input, shape index: {}]   ;;  %s12874_s6 = inlined_call_operand.vmem [shape: f32[32,32], index: 6, kind: input, shape index: {}]   ;;  %s12875_s7 = inlined_call_operand.vmem [shape: f32[32,32], index: 7, kind: input, shape index: {}]   ;;  %s12876_s8 = inlined_call_operand.vmem [shape: f32[32,128], index: 8, kind: input, shape index: {}]   ;;  %s12877_s9 = inlined_call_operand.hbm [shape: f32[32,128], index: 9, kind: input, shape index: {}]   ;;  %s12878_s10 = inlined_call_operand.hbm [shape: f32[1,128], index: 10, kind: input, shape index: {}]   ;;  %s12879_s11 = inlined_call_operand.hbm [shape: f32[32,32], index: 11, kind: input, shape index: {}]   ;;  %s12880_s12 = inlined_call_operand.hbm [shape: f32[1,32], index: 12, kind: input, shape index: {}]   ;;  %s12881_s13 = inlined_call_operand.hbm [shape: f32[1,32], index: 13, kind: input, shape index: {}]   ;;  %s12882_s14 = inlined_call_operand.hbm [shape: f32[32,32], index: 14, kind: input, shape index: {}]   ;;  %s12883_s15 = inlined_call_operand.hbm [shape: f32[1,32], index: 15, kind: input, shape index: {}]   ;;  %s12884_s16 = inlined_call_operand.hbm [shape: f32[1,32], index: 16, kind: input, shape index: {}]   ;;  %s12885_s17 = inlined_call_operand.hbm [shape: f32[1,32], index: 17, kind: input, shape index: {}]   ;;  %s12886_s18 = inlined_call_operand.hbm [shape: f32[1,32], index: 18, kind: input, shape index: {}]   ;;  %s12887_s19 = inlined_call_operand.hbm [shape: f32[1,32], index: 19, kind: input, shape index: {}]   ;;  %s12888_s20 = inlined_call_operand.hbm [shape: f32[1,32], index: 20, kind: input, shape index: {}]   ;;  %s12889_s21 = inlined_call_operand.<no memory space> [shape: f32[1,1], index: 21, kind: input, shape index: {}]   ;;  %s12890_s22 = inlined_call_operand.hbm [shape: s32[1,128], index: 22, kind: output, shape index: {0}]   ;;  %s12891_s23 = inlined_call_operand.hbm [shape: f32[1,128], index: 23, kind: output, shape index: {1}]  }
   0x1   :  { %12915 = sst [smem:[#allocation44_spill]] %s12868_s0  ;;  %v29_v0 = vstv %s12889_s21 }
   0x2   :  { %12916 = sst [smem:[#allocation45_spill]] %s12869_s1  ;;  %30 = vst [vmem:[#allocation3] sm:$0x1] %v29_v0 }
   0x3   :  { %12917 = sst [smem:[#allocation46_spill]] %s12870_s2 }
   0x4   :  { %12918 = sst [smem:[#allocation47_spill]] %s12871_s3 }
   0x5   :  { %12919 = sst [smem:[#allocation48_spill]] %s12872_s4 }
   0x6   :  { %12920 = sst [smem:[#allocation49_spill]] %s12873_s5 }
   0x7   :  { %12921 = sst [smem:[#allocation50_spill]] %s12874_s6 }
   0x8   :  { %12922 = sst [smem:[#allocation51_spill]] %s12875_s7 }
   0x9   :  { %31 = vsyncpa [#allocation5], 0 }
   0xa   :  { %32 = vsyncpa [#allocation8], 0 }
   0xb   :  { %33 = vsyncpa [#allocation11], 0 }
   0xc   :  { %34 = vsyncpa [#allocation14], 0 }
   0xd   :  { %35 = vsyncpa [#allocation17], 0 }
   0xe   :  { %36 = vsyncpa [#allocation20], 0 }
   0xf   :  { %37 = vsyncpa [#allocation23], 0 }
  0x10   :  { %38 = vsyncpa [#allocation26], 0 }
  0x11   :  { %39 = vsyncpa [#allocation6], 0 }
  0x12   :  { %40 = vsyncpa [#allocation30], 0  ;;  %s10499_s24 = smov [#allocation7]   ;;  %s10500_s5 = smov [#allocation10]  }
  0x13   :  { %s63_s25 = sshll.u32 %s10499_s24, 4  ;;  %s88_s1 = sshll.u32 %s10500_s5, 4  ;;  %s64_s25 = int_to_ptr.vmem [resolvable:$true] %s63_s25  ;;  %s10647_s1 = int_to_ptr.vmem [resolvable:$true] %s88_s1 }
  0x14   :  { %s12923_s2 = sld [smem:[#allocation48_spill]] }
  0x1a   :  { %s10105_s6 = scalar_lea.hbm %s12923_s2, 16 }
  0x1b   :  { %p10106_p0 = scmp.ne.s32.totalorder %s12923_s2, %s10105_s6  ;;  %p10109_p1 = scmp.lt.u32.totalorder %s10105_s6, %s12923_s2 }
  0x1d   :  { %p10111_p2 = pnand %p10109_p1, %p10106_p0 }
  0x1f   :  { %10114 = shalt.err (!%p10111_p2)
}
  0x20   :  { %s10115_s3 = scalar_lea.vmem %s64_s25, 16  ;;  %s10119_s0 = scalar_lea.vmem %s64_s25, 32 }
  0x21   :  { %p10116_p3 = scmp.ne.s32.totalorder %s64_s25, %s10115_s3  ;;  %p10120_p4 = scmp.lt.s32.totalorder %s64_s25, %s64_s25 }
  0x22   :  { %p10121_p5 = scmp.lt.s32.totalorder %s10119_s0, %s10115_s3 }
  0x24   :  { %p10122_p6 = por %p10121_p5, %p10120_p4 }
  0x26   :  { %p10123_p7 = pnand %p10122_p6, %p10116_p3 }
  0x28   :  { %10126 = shalt.err (!%p10123_p7)
}
  0x29   :  { %66 = dma.hbm_to_vmem [thread:$0]  %s12923_s2, 16, %s64_s25, [#allocation8]  }
  0x2a   :  { %s10127_s26 = scalar_lea.hbm %s12877_s9, 512 }
  0x2b   :  { %p10128_p8 = scmp.ne.s32.totalorder %s12877_s9, %s10127_s26  ;;  %p10131_p9 = scmp.lt.u32.totalorder %s10127_s26, %s12877_s9 }
  0x2d   :  { %p10133_p10 = pnand %p10131_p9, %p10128_p8 }
  0x2f   :  { %10136 = shalt.err (!%p10133_p10)
}
  0x30   :  { %s10137_s28 = scalar_lea.vmem %s10647_s1, 512  ;;  %p10142_p12 = scmp.lt.s32.totalorder %s10647_s1, %s10647_s1 }
  0x31   :  { %p10138_p11 = scmp.ne.s32.totalorder %s10647_s1, %s10137_s28  ;;  %p10143_p13 = scmp.lt.s32.totalorder %s10137_s28, %s10137_s28 }
  0x33   :  { %p10144_p0 = por %p10143_p13, %p10142_p12 }
  0x35   :  { %p10145_p1 = pnand %p10144_p0, %p10138_p11 }
  0x37   :  { %10148 = shalt.err (!%p10145_p1)
}
  0x38   :  { %s10501_s25 = smov 128   ;;  %s10502_s2 = smov 8  }
  0x39   :  { %94 = dma.hbm_to_vmem [thread:$0]  %s12877_s9, 512, %s10647_s1, [#allocation11], %s10501_s25, %s10501_s25, %s10502_s2  }
  0x3a   :  { %s10503_s0 = smov [#allocation13]   ;;  %s10504_s30 = smov [#allocation16]  }
  0x3b   :  { %s110_s4 = sshll.u32 %s10503_s0, 4  ;;  %s133_s24 = sshll.u32 %s10504_s30, 4  ;;  %s111_s4 = int_to_ptr.vmem [resolvable:$true] %s110_s4  ;;  %s134_s24 = int_to_ptr.vmem [resolvable:$true] %s133_s24 }
  0x3c   :  { %s10149_s21 = scalar_lea.hbm %s12879_s11, 512 }
  0x3d   :  { %p10150_p2 = scmp.ne.s32.totalorder %s12879_s11, %s10149_s21  ;;  %p10153_p3 = scmp.lt.u32.totalorder %s10149_s21, %s12879_s11 }
  0x3f   :  { %p10155_p4 = pnand %p10153_p3, %p10150_p2 }
  0x41   :  { %10158 = shalt.err (!%p10155_p4)
}
  0x42   :  { %s10159_s9 = scalar_lea.vmem %s111_s4, 512  ;;  %p10164_p6 = scmp.lt.s32.totalorder %s111_s4, %s111_s4 }
  0x43   :  { %p10160_p5 = scmp.ne.s32.totalorder %s111_s4, %s10159_s9  ;;  %p10165_p7 = scmp.lt.s32.totalorder %s10159_s9, %s10159_s9 }
  0x45   :  { %p10166_p8 = por %p10165_p7, %p10164_p6 }
  0x47   :  { %p10167_p9 = pnand %p10166_p8, %p10160_p5 }
  0x49   :  { %10170 = shalt.err (!%p10167_p9)
}
  0x4a   :  { %116 = dma.hbm_to_vmem [thread:$0]  %s12879_s11, 512, %s111_s4, [#allocation14], %s10501_s25, %s10501_s25, %s10502_s2  }
  0x4b   :  { %s10171_s30 = scalar_lea.hbm %s12881_s13, 16 }
  0x4c   :  { %p10172_p10 = scmp.ne.s32.totalorder %s12881_s13, %s10171_s30  ;;  %p10175_p11 = scmp.lt.u32.totalorder %s10171_s30, %s12881_s13 }
  0x4e   :  { %p10177_p12 = pnand %p10175_p11, %p10172_p10 }
  0x50   :  { %10180 = shalt.err (!%p10177_p12)
}
  0x51   :  { %s10181_s27 = scalar_lea.vmem %s134_s24, 16  ;;  %s10185_s7 = scalar_lea.vmem %s134_s24, 32 }
  0x52   :  { %p10182_p13 = scmp.ne.s32.totalorder %s134_s24, %s10181_s27  ;;  %p10186_p0 = scmp.lt.s32.totalorder %s134_s24, %s134_s24 }
  0x53   :  { %p10187_p1 = scmp.lt.s32.totalorder %s10185_s7, %s10181_s27 }
  0x55   :  { %p10188_p2 = por %p10187_p1, %p10186_p0 }
  0x57   :  { %p10189_p3 = pnand %p10188_p2, %p10182_p13 }
  0x59   :  { %10192 = shalt.err (!%p10189_p3)
}
  0x5a   :  { %136 = dma.hbm_to_vmem [thread:$0]  %s12881_s13, 16, %s134_s24, [#allocation17]  }
  0x5b   :  { %s10505_s28 = smov [#allocation19]   ;;  %s10506_s1 = smov [#allocation22]  }
  0x5c   :  { %s155_s9 = sshll.u32 %s10505_s28, 4  ;;  %s175_s29 = sshll.u32 %s10506_s1, 4  ;;  %s156_s9 = int_to_ptr.vmem [resolvable:$true] %s155_s9  ;;  %s176_s29 = int_to_ptr.vmem [resolvable:$true] %s175_s29 }
  0x5d   :  { %s10193_s30 = scalar_lea.hbm %s12883_s15, 16 }
  0x5e   :  { %p10194_p4 = scmp.ne.s32.totalorder %s12883_s15, %s10193_s30  ;;  %p10197_p5 = scmp.lt.u32.totalorder %s10193_s30, %s12883_s15 }
  0x60   :  { %p10199_p6 = pnand %p10197_p5, %p10194_p4 }
  0x62   :  { %10202 = shalt.err (!%p10199_p6)
}
  0x63   :  { %s10203_s13 = scalar_lea.vmem %s156_s9, 16  ;;  %s10207_s24 = scalar_lea.vmem %s156_s9, 32 }
  0x64   :  { %p10204_p7 = scmp.ne.s32.totalorder %s156_s9, %s10203_s13  ;;  %p10208_p8 = scmp.lt.s32.totalorder %s156_s9, %s156_s9 }
  0x65   :  { %p10209_p9 = scmp.lt.s32.totalorder %s10207_s24, %s10203_s13 }
  0x67   :  { %p10210_p10 = por %p10209_p9, %p10208_p8 }
  0x69   :  { %p10211_p11 = pnand %p10210_p10, %p10204_p7 }
  0x6b   :  { %10214 = shalt.err (!%p10211_p11)
}
  0x6c   :  { %158 = dma.hbm_to_vmem [thread:$0]  %s12883_s15, 16, %s156_s9, [#allocation20]  }
  0x6d   :  { %s10215_s28 = scalar_lea.hbm %s12885_s17, 16 }
  0x6e   :  { %p10216_p12 = scmp.ne.s32.totalorder %s12885_s17, %s10215_s28  ;;  %p10219_p13 = scmp.lt.u32.totalorder %s10215_s28, %s12885_s17 }
  0x70   :  { %p10221_p0 = pnand %p10219_p13, %p10216_p12 }
  0x72   :  { %10224 = shalt.err (!%p10221_p0)
}
  0x73   :  { %s10225_s5 = scalar_lea.vmem %s176_s29, 16  ;;  %s10229_s26 = scalar_lea.vmem %s176_s29, 32 }
  0x74   :  { %p10226_p1 = scmp.ne.s32.totalorder %s176_s29, %s10225_s5  ;;  %p10230_p2 = scmp.lt.s32.totalorder %s176_s29, %s176_s29 }
  0x75   :  { %p10231_p3 = scmp.lt.s32.totalorder %s10229_s26, %s10225_s5 }
  0x77   :  { %p10232_p4 = por %p10231_p3, %p10230_p2 }
  0x79   :  { %p10233_p5 = pnand %p10232_p4, %p10226_p1 }
  0x7b   :  { %10236 = shalt.err (!%p10233_p5)
}
  0x7c   :  { %178 = dma.hbm_to_vmem [thread:$0]  %s12885_s17, 16, %s176_s29, [#allocation23]  }
  0x7d   :  { %s10507_s21 = smov [#allocation25]   ;;  %s10508_s13 = smov [#allocation4]  }
  0x7e   :  { %s195_s6 = sshll.u32 %s10507_s21, 4  ;;  %s53_s24 = sshll.u32 %s10508_s13, 4  ;;  %s196_s6 = int_to_ptr.vmem [resolvable:$true] %s195_s6  ;;  %s54_s24 = int_to_ptr.vmem [resolvable:$true] %s53_s24 }
  0x7f   :  { %s10237_s11 = scalar_lea.hbm %s12887_s19, 16 }
  0x80   :  { %p10238_p6 = scmp.ne.s32.totalorder %s12887_s19, %s10237_s11  ;;  %p10241_p7 = scmp.lt.u32.totalorder %s10237_s11, %s12887_s19 }
  0x82   :  { %p10243_p8 = pnand %p10241_p7, %p10238_p6 }
  0x84   :  { %10246 = shalt.err (!%p10243_p8)
}
  0x85   :  { %s10247_s17 = scalar_lea.vmem %s196_s6, 16  ;;  %s10251_s29 = scalar_lea.vmem %s196_s6, 32 }
  0x86   :  { %p10248_p9 = scmp.ne.s32.totalorder %s196_s6, %s10247_s17  ;;  %p10252_p10 = scmp.lt.s32.totalorder %s196_s6, %s196_s6 }
  0x87   :  { %p10253_p11 = scmp.lt.s32.totalorder %s10251_s29, %s10247_s17 }
  0x89   :  { %p10254_p12 = por %p10253_p11, %p10252_p10 }
  0x8b   :  { %p10255_p13 = pnand %p10254_p12, %p10248_p9 }
  0x8d   :  { %10258 = shalt.err (!%p10255_p13)
}
  0x8e   :  { %198 = dma.hbm_to_vmem [thread:$0]  %s12887_s19, 16, %s196_s6, [#allocation26]  }
  0x8f   :  { %s12924_s15 = sld [smem:[#allocation47_spill]] }
  0x95   :  { %s10259_s9 = scalar_lea.hbm %s12924_s15, 16 }
  0x96   :  { %p10260_p0 = scmp.ne.s32.totalorder %s12924_s15, %s10259_s9  ;;  %p10263_p1 = scmp.lt.u32.totalorder %s10259_s9, %s12924_s15 }
  0x98   :  { %p10265_p2 = pnand %p10263_p1, %p10260_p0 }
  0x9a   :  { %10268 = shalt.err (!%p10265_p2)
}
  0x9b   :  { %s10269_s11 = scalar_lea.vmem %s54_s24, 16  ;;  %s10273_s4 = scalar_lea.vmem %s54_s24, 32 }
  0x9c   :  { %p10270_p3 = scmp.ne.s32.totalorder %s54_s24, %s10269_s11  ;;  %p10274_p4 = scmp.lt.s32.totalorder %s54_s24, %s54_s24 }
  0x9d   :  { %p10275_p5 = scmp.lt.s32.totalorder %s10273_s4, %s10269_s11 }
  0x9f   :  { %p10276_p6 = por %p10275_p5, %p10274_p4 }
  0xa1   :  { %p10277_p7 = pnand %p10276_p6, %p10270_p3 }
  0xa3   :  { %10280 = shalt.err (!%p10277_p7)
}
  0xa4   :  { %56 = dma.hbm_to_vmem [thread:$0]  %s12924_s15, 16, %s54_s24, [#allocation5]  }
  0xa5   :  { %s10509_s28 = smov [#allocation9]   ;;  %s10510_s3 = smov [#allocation12]  }
  0xa6   :  { %s73_s1 = sshll.u32 %s10509_s28, 4  ;;  %s101_s17 = sshll.u32 %s10510_s3, 4  ;;  %s74_s1 = int_to_ptr.vmem [resolvable:$true] %s73_s1  ;;  %s102_s17 = int_to_ptr.vmem [resolvable:$true] %s101_s17 }
  0xa7   :  { %s12925_s30 = sld [smem:[#allocation49_spill]] }
  0xad   :  { %s10281_s5 = scalar_lea.hbm %s12925_s30, 16 }
  0xae   :  { %p10282_p8 = scmp.ne.s32.totalorder %s12925_s30, %s10281_s5  ;;  %p10285_p9 = scmp.lt.u32.totalorder %s10281_s5, %s12925_s30 }
  0xb0   :  { %p10287_p10 = pnand %p10285_p9, %p10282_p8 }
  0xb2   :  { %10290 = shalt.err (!%p10287_p10)
}
  0xb3   :  { %s10291_s24 = scalar_lea.vmem %s74_s1, 16  ;;  %s10295_s15 = scalar_lea.vmem %s74_s1, 32 }
  0xb4   :  { %p10292_p11 = scmp.ne.s32.totalorder %s74_s1, %s10291_s24  ;;  %p10296_p12 = scmp.lt.s32.totalorder %s74_s1, %s74_s1 }
  0xb5   :  { %p10297_p13 = scmp.lt.s32.totalorder %s10295_s15, %s10291_s24 }
  0xb7   :  { %p10298_p0 = por %p10297_p13, %p10296_p12 }
  0xb9   :  { %p10299_p1 = pnand %p10298_p0, %p10292_p11 }
  0xbb   :  { %10302 = shalt.err (!%p10299_p1)
}
  0xbc   :  { %76 = dma.hbm_to_vmem [thread:$0]  %s12925_s30, 16, %s74_s1, [#allocation8]  }
  0xbd   :  { %s10303_s19 = scalar_lea.hbm %s12878_s10, 16 }
  0xbe   :  { %p10304_p2 = scmp.ne.s32.totalorder %s12878_s10, %s10303_s19  ;;  %p10307_p3 = scmp.lt.u32.totalorder %s10303_s19, %s12878_s10 }
  0xc0   :  { %p10309_p4 = pnand %p10307_p3, %p10304_p2 }
  0xc2   :  { %10312 = shalt.err (!%p10309_p4)
}
  0xc3   :  { %s10313_s0 = scalar_lea.vmem %s102_s17, 16  ;;  %s10317_s5 = scalar_lea.vmem %s102_s17, 32 }
  0xc4   :  { %p10314_p5 = scmp.ne.s32.totalorder %s102_s17, %s10313_s0  ;;  %p10318_p6 = scmp.lt.s32.totalorder %s102_s17, %s102_s17 }
  0xc5   :  { %p10319_p7 = scmp.lt.s32.totalorder %s10317_s5, %s10313_s0 }
  0xc7   :  { %p10320_p8 = por %p10319_p7, %p10318_p6 }
  0xc9   :  { %p10321_p9 = pnand %p10320_p8, %p10314_p5 }
  0xcb   :  { %10324 = shalt.err (!%p10321_p9)
}
  0xcc   :  { %104 = dma.hbm_to_vmem [thread:$0]  %s12878_s10, 16, %s102_s17, [#allocation11]  }
  0xcd   :  { %s10511_s26 = smov [#allocation15]   ;;  %s10512_s21 = smov [#allocation18]  }
  0xce   :  { %s123_s9 = sshll.u32 %s10511_s26, 4  ;;  %s142_s13 = sshll.u32 %s10512_s21, 4  ;;  %s124_s9 = int_to_ptr.vmem [resolvable:$true] %s123_s9  ;;  %s10780_s13 = int_to_ptr.vmem [resolvable:$true] %s142_s13 }
  0xcf   :  { %s10325_s27 = scalar_lea.hbm %s12880_s12, 16 }
  0xd0   :  { %p10326_p10 = scmp.ne.s32.totalorder %s12880_s12, %s10325_s27  ;;  %p10329_p11 = scmp.lt.u32.totalorder %s10325_s27, %s12880_s12 }
  0xd2   :  { %p10331_p12 = pnand %p10329_p11, %p10326_p10 }
  0xd4   :  { %10334 = shalt.err (!%p10331_p12)
}
  0xd5   :  { %s10335_s10 = scalar_lea.vmem %s124_s9, 16  ;;  %s10339_s17 = scalar_lea.vmem %s124_s9, 32 }
  0xd6   :  { %p10336_p13 = scmp.ne.s32.totalorder %s124_s9, %s10335_s10  ;;  %p10340_p0 = scmp.lt.s32.totalorder %s124_s9, %s124_s9 }
  0xd7   :  { %p10341_p1 = scmp.lt.s32.totalorder %s10339_s17, %s10335_s10 }
  0xd9   :  { %p10342_p2 = por %p10341_p1, %p10340_p0 }
  0xdb   :  { %p10343_p3 = pnand %p10342_p2, %p10336_p13 }
  0xdd   :  { %10346 = shalt.err (!%p10343_p3)
}
  0xde   :  { %126 = dma.hbm_to_vmem [thread:$0]  %s12880_s12, 16, %s124_s9, [#allocation14]  }
  0xdf   :  { %s10347_s0 = scalar_lea.hbm %s12882_s14, 512 }
  0xe0   :  { %p10348_p4 = scmp.ne.s32.totalorder %s12882_s14, %s10347_s0  ;;  %p10351_p5 = scmp.lt.u32.totalorder %s10347_s0, %s12882_s14 }
  0xe2   :  { %p10353_p6 = pnand %p10351_p5, %p10348_p4 }
  0xe4   :  { %10356 = shalt.err (!%p10353_p6)
}
  0xe5   :  { %s10357_s21 = scalar_lea.vmem %s10780_s13, 512  ;;  %p10362_p8 = scmp.lt.s32.totalorder %s10780_s13, %s10780_s13 }
  0xe6   :  { %p10358_p7 = scmp.ne.s32.totalorder %s10780_s13, %s10357_s21  ;;  %p10363_p9 = scmp.lt.s32.totalorder %s10357_s21, %s10357_s21 }
  0xe8   :  { %p10364_p10 = por %p10363_p9, %p10362_p8 }
  0xea   :  { %p10365_p11 = pnand %p10364_p10, %p10358_p7 }
  0xec   :  { %10368 = shalt.err (!%p10365_p11)
}
  0xed   :  { %148 = dma.hbm_to_vmem [thread:$0]  %s12882_s14, 512, %s10780_s13, [#allocation17], %s10501_s25, %s10501_s25, %s10502_s2  }
  0xee   :  { %s10513_s24 = smov [#allocation21]   ;;  %s10514_s27 = smov [#allocation24]  }
  0xef   :  { %s165_s15 = sshll.u32 %s10513_s24, 4  ;;  %s185_s7 = sshll.u32 %s10514_s27, 4  ;;  %s166_s15 = int_to_ptr.vmem [resolvable:$true] %s165_s15  ;;  %s186_s7 = int_to_ptr.vmem [resolvable:$true] %s185_s7 }
  0xf0   :  { %s10369_s19 = scalar_lea.hbm %s12884_s16, 16 }
  0xf1   :  { %p10370_p12 = scmp.ne.s32.totalorder %s12884_s16, %s10369_s19  ;;  %p10373_p13 = scmp.lt.u32.totalorder %s10369_s19, %s12884_s16 }
  0xf3   :  { %p10375_p0 = pnand %p10373_p13, %p10370_p12 }
  0xf5   :  { %10378 = shalt.err (!%p10375_p0)
}
  0xf6   :  { %s10379_s14 = scalar_lea.vmem %s166_s15, 16  ;;  %s10383_s25 = scalar_lea.vmem %s166_s15, 32 }
  0xf7   :  { %p10380_p1 = scmp.ne.s32.totalorder %s166_s15, %s10379_s14  ;;  %p10384_p2 = scmp.lt.s32.totalorder %s166_s15, %s166_s15 }
  0xf8   :  { %p10385_p3 = scmp.lt.s32.totalorder %s10383_s25, %s10379_s14 }
  0xfa   :  { %p10386_p4 = por %p10385_p3, %p10384_p2 }
  0xfc   :  { %p10387_p5 = pnand %p10386_p4, %p10380_p1 }
  0xfe   :  { %10390 = shalt.err (!%p10387_p5)
}
  0xff   :  { %168 = dma.hbm_to_vmem [thread:$0]  %s12884_s16, 16, %s166_s15, [#allocation20]  }
 0x100   :  { %s10391_s0 = scalar_lea.hbm %s12886_s18, 16 }
 0x101   :  { %p10392_p6 = scmp.ne.s32.totalorder %s12886_s18, %s10391_s0  ;;  %p10395_p7 = scmp.lt.u32.totalorder %s10391_s0, %s12886_s18 }
 0x103   :  { %p10397_p8 = pnand %p10395_p7, %p10392_p6 }
 0x105   :  { %10400 = shalt.err (!%p10397_p8)
}
 0x106   :  { %s10401_s21 = scalar_lea.vmem %s186_s7, 16  ;;  %s10405_s12 = scalar_lea.vmem %s186_s7, 32 }
 0x107   :  { %p10402_p9 = scmp.ne.s32.totalorder %s186_s7, %s10401_s21  ;;  %p10406_p10 = scmp.lt.s32.totalorder %s186_s7, %s186_s7 }
 0x108   :  { %p10407_p11 = scmp.lt.s32.totalorder %s10405_s12, %s10401_s21 }
 0x10a   :  { %p10408_p12 = por %p10407_p11, %p10406_p10 }
 0x10c   :  { %p10409_p13 = pnand %p10408_p12, %p10402_p9 }
 0x10e   :  { %10412 = shalt.err (!%p10409_p13)
}
 0x10f   :  { %188 = dma.hbm_to_vmem [thread:$0]  %s12886_s18, 16, %s186_s7, [#allocation23]  }
 0x110   :  { %s10515_s24 = smov [#allocation27]   ;;  %s10413_s4 = scalar_lea.hbm %s12888_s20, 16 }
 0x111   :  { %s205_s15 = sshll.u32 %s10515_s24, 4  ;;  %p10414_p0 = scmp.ne.s32.totalorder %s12888_s20, %s10413_s4  ;;  %s206_s15 = int_to_ptr.vmem [resolvable:$true] %s205_s15 }
 0x112   :  { %p10417_p1 = scmp.lt.u32.totalorder %s10413_s4, %s12888_s20 }
 0x114   :  { %p10419_p2 = pnand %p10417_p1, %p10414_p0 }
 0x116   :  { %10422 = shalt.err (!%p10419_p2)
}
 0x117   :  { %s10423_s28 = scalar_lea.vmem %s206_s15, 16  ;;  %s10427_s18 = scalar_lea.vmem %s206_s15, 32 }
 0x118   :  { %p10424_p3 = scmp.ne.s32.totalorder %s206_s15, %s10423_s28  ;;  %p10428_p4 = scmp.lt.s32.totalorder %s206_s15, %s206_s15 }
 0x119   :  { %p10429_p5 = scmp.lt.s32.totalorder %s10427_s18, %s10423_s28 }
 0x11b   :  { %p10430_p6 = por %p10429_p5, %p10428_p4 }
 0x11d   :  { %p10431_p7 = pnand %p10430_p6, %p10424_p3 }
 0x11f   :  { %10434 = shalt.err (!%p10431_p7)
}
 0x120   :  { %208 = dma.hbm_to_vmem [thread:$0]  %s12888_s20, 16, %s206_s15, [#allocation26]  }
 0x121   :  { %10479 = dma.done.wait [#allocation5], 16  }
 0x122   :  { %10480 = vsyncadd [#allocation5], 4294967280 }
 0x123   :  { %10481 = dma.done.wait [#allocation8], 32  }
 0x124   :  { %10482 = vsyncadd [#allocation8], 4294967264 }
 0x125   :  { %10483 = dma.done.wait [#allocation11], 528  }
 0x126   :  { %10484 = vsyncadd [#allocation11], 4294966768 }
 0x127   :  { %10485 = dma.done.wait [#allocation14], 528  }
 0x128   :  { %10486 = vsyncadd [#allocation14], 4294966768 }
 0x129   :  { %10487 = dma.done.wait [#allocation17], 528  }
 0x12a   :  { %10488 = vsyncadd [#allocation17], 4294966768 }
 0x12b   :  { %10489 = dma.done.wait [#allocation20], 32  }
 0x12c   :  { %10490 = vsyncadd [#allocation20], 4294967264 }
 0x12d   :  { %10491 = dma.done.wait [#allocation23], 32  }
 0x12e   :  { %10492 = vsyncadd [#allocation23], 4294967264 }
 0x12f   :  { %10493 = dma.done.wait [#allocation26], 32  }
 0x130   :  { %10494 = vsyncadd [#allocation26], 4294967264  ;;  %v12902_v1 = vmov 0.0|0.0   ;;  %vm10517_vm0 = vmmov 0   ;;  %v12904_v2 = vmov 0.0   ;;  %s12926_s2 = sld [smem:[#allocation45_spill]] }
 0x131   :  { %9164 = vmatprep.subr.bf16.mxu0 %v12902_v1  ;;  %8461 = vmatprep.mubr.msk.f32.mxu0 %vm10517_vm0, %v12904_v2  ;;  %s12927_s21 = sld [smem:[#allocation44_spill]]  ;;  %vm261_vm1 = vcmask 261120   ;;  %s12928_s9 = sld [smem:[#allocation46_spill]]  ;;  %v432_v31 = vld [vmem:[#allocation9] sm:$0x1]  ;;  %vm433_vm2 = vcmask 253952  }
 0x132   :  { %9170 = vmatprep.subr.bf16.mxu1 %v12902_v1  ;;  %8472 = vmatprep.mubr.msk.f32.mxu1 %vm10517_vm0, %v12904_v2  ;;  %s12929_s6 = sld [smem:[#allocation51_spill]]  ;;  %s12930_s20 = sld [smem:[#allocation50_spill]]  ;;  %434 = vst.msk [vmem:[#allocation2 + $0x10] sm:$0x1] %vm433_vm2, %v432_v31  ;;  %v7981_v34 = vld [vmem:[#allocation4] ss:$0 sm:$0xff] }
 0x133   :  { %v7982_v35 = vld [vmem:[#allocation7] ss:$0 sm:$0xff]  ;;  %v759_v42 = vld [vmem:[%s12876_s8] sm:$0xff]  ;;  %v760_v43 = vld [vmem:[%s12876_s8 + $0x8] sm:$0xff]  ;;  %s10519_s4 = smov 64   ;;  %s10520_s19 = smov 32  }
 0x134   :  { %v9201_v44 = vpack.c.bf16 %v760_v43, %v759_v42  ;;  %v761_v45 = vld [vmem:[%s12876_s8 + $0x10] sm:$0xff]  ;;  %v762_v46 = vld [vmem:[%s12876_s8 + $0x18] sm:$0xff]  ;;  %v925_v49 = vld [vmem:[#allocation10 + $0x8] sm:$0xff]  ;;  %vm1233_vm3 = vcmask 1040384  }
 0x135   :  { %v9204_v47 = vpack.c.bf16 %v762_v46, %v761_v45  ;;  %v924_v48 = vld [vmem:[#allocation10] sm:$0xff]  ;;  %v849_v50 = vld [vmem:[#allocation25] sm:$0x1]  ;;  %v926_v52 = vld [vmem:[#allocation10 + $0x10] sm:$0xff]  ;;  %v764_v45 = vlaneseq }
 0x136   :  { %v257_v3 = vld [vmem:[%s12926_s2] sm:$0xff]  ;;  %v258_v4 = vld [vmem:[%s12926_s2 + $0x8] sm:$0xff]  ;;  %v259_v5 = vld [vmem:[%s12926_s2 + $0x10] sm:$0xff]  ;;  %v10972_v51 = vpack.c.bf16 %v925_v49, %v924_v48 }
 0x137   :  { %v9165_v6 = vpack.c.bf16 %v258_v4, %v257_v3  ;;  %v260_v7 = vld [vmem:[%s12926_s2 + $0x18] sm:$0xff]  ;;  %v256_v9 = vld [vmem:[%s12927_s21] sm:$0xff]  ;;  %v337_v11 = vld [vmem:[%s12928_s9 + $0x8] sm:$0xff]  ;;  %v11058_v46 = vshrl.u32 %v764_v45, 7 }
 0x138   :  { %v9168_v8 = vpack.c.bf16 %v260_v7, %v259_v5  ;;  %v336_v10 = vld [vmem:[%s12928_s9] sm:$0xff]  ;;  %v338_v12 = vld [vmem:[%s12928_s9 + $0x10] sm:$0xff]  ;;  %v339_v14 = vld [vmem:[%s12928_s9 + $0x18] sm:$0xff] }
 0x139   :  { %9166 = vmatpush3.bf16.msra.mxu0 %v9165_v6  ;;  %v9171_v13 = vpack.c.bf16 %v337_v11, %v336_v10  ;;  %v9174_v15 = vpack.c.bf16 %v339_v14, %v338_v12  ;;  %v531_v19 = vld [vmem:[%s12929_s6] sm:$0xff]  ;;  %v532_v20 = vld [vmem:[%s12929_s6 + $0x8] sm:$0xff]  ;;  %v533_v24 = vld [vmem:[%s12929_s6 + $0x10] sm:$0xff]  ;;  %v11063_v48 = vsub.s32 0, %v11058_v46 }
 0x13a   :  { %9167 = vmatprep.subr.bf16.mxu0 %v12902_v1  ;;  %v438_v21 = vld [vmem:[%s12930_s20] sm:$0xff]  ;;  %v9183_v22 = vpack.c.bf16 %v532_v20, %v531_v19  ;;  %v439_v23 = vld [vmem:[%s12930_s20 + $0x8] sm:$0xff]  ;;  %v534_v25 = vld [vmem:[%s12929_s6 + $0x18] sm:$0xff] }
 0x13b   :  { %9172 = vmatpush3.bf16.msra.mxu1 %v9171_v13  ;;  %v9177_v26 = vpack.c.bf16 %v439_v23, %v438_v21  ;;  %v440_v27 = vld [vmem:[%s12930_s20 + $0x10] sm:$0xff]  ;;  %v441_v28 = vld [vmem:[%s12930_s20 + $0x18] sm:$0xff]  ;;  %v9186_v29 = vpack.c.bf16 %v534_v25, %v533_v24  ;;  %v923_v55 = vld [vmem:[#allocation22] sm:$0x1] }
 0x13c   :  { %9173 = vmatprep.subr.bf16.mxu1 %v12902_v1  ;;  %v9180_v30 = vpack.c.bf16 %v441_v28, %v440_v27  ;;  %v437_v41 = vld [vmem:[#allocation2 + $0x10] sm:$0x1]  ;;  %v927_v53 = vld [vmem:[#allocation10 + $0x18] sm:$0xff]  ;;  %v7998_v21 = vld [vmem:[#allocation24] ss:$0 sm:$0xff] }
 0x13d   :  { %9169 = vmatpush3.bf16.msra.mxu0 %v9168_v8  ;;  %v10981_v54 = vpack.c.bf16 %v927_v53, %v926_v52 }
 0x13e   :  { %9176 = vmatprep.subr.bf16.mxu0 %v12902_v1 }
 0x13f   :  { %9175 = vmatpush3.bf16.msra.mxu1 %v9174_v15 }
 0x140   :  { %8462 = vmatmul.mubr.msk.f32.vlgmr.msra.gmra.mrb[0].mxu0 %vm261_vm1, %v256_v9  ;;  %9182 = vmatprep.subr.bf16.mxu1 %v12902_v1 }
 0x141   :  { %8483 = vmatprep.mubr.msk.f32.mxu0 %vm10517_vm0, %v12904_v2  ;;  %9178 = vmatpush3.bf16.msra.mxu0 %v9177_v26 }
 0x142   :  { %9179 = vmatprep.subr.bf16.mxu0 %v12902_v1 }
 0x145   :  { %9181 = vmatpush3.bf16.msra.mxu0 %v9180_v30 }
 0x146   :  { %9188 = vmatprep.subr.bf16.mxu0 %v12902_v1 }
 0x213   :  { %v331_v16 = vpop.f32.mrb[0].mxu0 }
 0x214   :  { %9590 = vtanh.f32 %v331_v16  ;;  %v8463_v17 = vpop.f32.mrb[1].mxu0  ;;  %v11030_v16 = vld [vmem:[#allocation12] sm:$0x1] }
 0x21e   :  { %v9591_v18 = vpop.eup %9590 }
 0x21f   :  { %8473 = vmatmul.mubr.msk.f32.vlgmr.msra.gmra.mrb[0].mxu1 %vm261_vm1, %v9591_v18 }
 0x220   :  { %8500 = vmatprep.mubr.msk.f32.mxu1 %vm10517_vm0, %v12904_v2  ;;  %9184 = vmatpush3.bf16.msra.mxu1 %v9183_v22 }
 0x221   :  { %9185 = vmatprep.subr.bf16.mxu1 %v12902_v1 }
 0x224   :  { %9187 = vmatpush3.bf16.msra.mxu1 %v9186_v29 }
 0x225   :  { %9194 = vmatprep.subr.bf16.mxu1 %v12902_v1 }
 0x2f2   :  { %v409_v32 = vpop.f32.mrb[0].mxu1 }
 0x2f3   :  { %9592 = vtanh.f32 %v409_v32  ;;  %v8474_v33 = vpop.f32.mrb[1].mxu1  ;;  %v1122_v32 = vld [vmem:[#allocation13] sm:$0xff] }
 0x2f4   :  { %v1123_v33 = vld [vmem:[#allocation13 + $0x8] sm:$0xff] }
 0x2fd   :  { %v10922_v36 = vpop.eup %9592 }
 0x2fe   :  { %12931 = vst [vmem:[#allocation41_spill] sm:$0xff] %v10922_v36  ;;  %v421_v37 = vadd.f32 %v10922_v36, %v7981_v34  ;;  %v430_v38 = vadd.f32 %v10922_v36, %v7982_v35  ;;  %v1124_v34 = vld [vmem:[#allocation13 + $0x10] sm:$0xff]  ;;  %v11039_v35 = vpack.c.bf16 %v1123_v33, %v1122_v32 }
 0x300   :  { %422 = vst.msk [vmem:[#allocation2] sm:$0xff] %vm261_vm1, %v421_v37  ;;  %431 = vst.msk [vmem:[#allocation2 + $0x8] sm:$0xff] %vm261_vm1, %v430_v38  ;;  %v1125_v37 = vld [vmem:[#allocation13 + $0x18] sm:$0xff] }
 0x301   :  { %v11042_v38 = vpack.c.bf16 %v1125_v37, %v1124_v34 }
 0x307   :  { %v435_v39 = vld [vmem:[#allocation2] sm:$0xff]  ;;  %v436_v40 = vld [vmem:[#allocation2 + $0x8] sm:$0xff] }
 0x308   :  { %8484 = vmatmul.mubr.msk.f32.vlgmr.msra.gmra.mrb[2].mxu0 %vm261_vm1, %v435_v39  ;;  %8501 = vmatmul.mubr.msk.f32.vlgmr.msra.gmra.mrb[2].mxu1 %vm261_vm1, %v435_v39 }
 0x309   :  { %9196 = vmatpush3.bf16.msra.mxu1 %v9183_v22  ;;  %8486 = vmatprep.mubr.msk.f32.mxu0 %vm10517_vm0, %v12904_v2 }
 0x30a   :  { %8503 = vmatprep.mubr.msk.f32.mxu1 %vm10517_vm0, %v12904_v2  ;;  %9190 = vmatpush3.bf16.msra.mxu0 %v9177_v26 }
 0x30b   :  { %9197 = vmatprep.subr.bf16.mxu1 %v12902_v1  ;;  %9191 = vmatprep.subr.bf16.mxu0 %v12902_v1 }
 0x30c   :  { %8487 = vmatmul.mubr.msk.f32.gmra.mrb[4].mxu0 %vm261_vm1, %v436_v40  ;;  %8504 = vmatmul.mubr.msk.f32.gmra.mrb[4].mxu1 %vm261_vm1, %v436_v40 }
 0x30d   :  { %9199 = vmatpush3.bf16.msra.mxu1 %v9186_v29  ;;  %8489 = vmatprep.mubr.msk.f32.mxu0 %vm10517_vm0, %v12904_v2 }
 0x30e   :  { %8506 = vmatprep.mubr.msk.f32.mxu1 %vm10517_vm0, %v12904_v2  ;;  %9193 = vmatpush3.bf16.msra.mxu0 %v9180_v30 }
 0x30f   :  { %9200 = vmatprep.subr.bf16.mxu0 %v12902_v1  ;;  %9206 = vmatprep.subr.bf16.mxu1 %v12902_v1 }
 0x310   :  { %8490 = vmatmul.mubr.msk.f32.gmra.mrb[6].mxu0 %vm261_vm1, %v437_v41  ;;  %8507 = vmatmul.mubr.msk.f32.gmra.mrb[6].mxu1 %vm261_vm1, %v437_v41 }
 0x311   :  { %8517 = vmatprep.mubr.msk.f32.mxu0 %vm10517_vm0, %v12904_v2  ;;  %8528 = vmatprep.mubr.msk.f32.mxu1 %vm10517_vm0, %v12904_v2 }
 0x314   :  { %8518 = vmatmul.mubr.msk.f32.vlgmr.msra.gmra.mrb[8].mxu0 %vm261_vm1, %v10922_v36  ;;  %8529 = vmatmul.mubr.msk.f32.vlgmr.msra.gmra.mrb[8].mxu1 %vm261_vm1, %v10922_v36 }
 0x315   :  { %9202 = vmatpush3.bf16.msra.mxu0 %v9201_v44  ;;  %9208 = vmatpush3.bf16.msra.mxu1 %v9201_v44 }
 0x316   :  { %9203 = vmatprep.subr.bf16.mxu0 %v12902_v1  ;;  %9209 = vmatprep.subr.bf16.mxu1 %v12902_v1 }
 0x317   :  { %8539 = vmatprep.mubr.msk.f32.mxu0 %vm10517_vm0, %v12904_v2  ;;  %8556 = vmatprep.mubr.msk.f32.mxu1 %vm10517_vm0, %v12904_v2 }
 0x319   :  { %9205 = vmatpush3.bf16.msra.mxu0 %v9204_v47  ;;  %9211 = vmatpush3.bf16.msra.mxu1 %v9204_v47  ;;  %v11060_v47 = vld [vmem:[#allocation16] ss:$0 sm:$0xff] }
 0x31a   :  { %9212 = vmatprep.subr.bf16.mxu1 %v12902_v1  ;;  %9224 = vmatprep.subr.bf16.mxu0 %v12902_v1  ;;  %v1121_v52 = vmul.f32 0.0, %v11060_v47 }
 0x31c   :  { %8540 = vmatmul.mubr.msk.f32.vlgmr.msra.gmra.mrb[10].mxu0 %vm261_vm1, %v435_v39  ;;  %8557 = vmatmul.mubr.msk.f32.vlgmr.msra.gmra.mrb[10].mxu1 %vm261_vm1, %v849_v50 }
 0x31d   :  { %9214 = vmatpush3.bf16.msra.mxu1 %v10972_v51  ;;  %8542 = vmatprep.mubr.msk.f32.mxu0 %vm10517_vm0, %v12904_v2 }
 0x31e   :  { %9215 = vmatprep.subr.bf16.mxu1 %v12902_v1  ;;  %8567 = vmatprep.mubr.msk.f32.mxu1 %vm10517_vm0, %v12904_v2 }
 0x31f   :  { %9226 = vmatpush3.bf16.msra.mxu0 %v11039_v35 }
 0x320   :  { %8543 = vmatmul.mubr.msk.f32.gmra.mrb[12].mxu0 %vm261_vm1, %v436_v40  ;;  %9227 = vmatprep.subr.bf16.mxu0 %v12902_v1 }
 0x321   :  { %9217 = vmatpush3.bf16.msra.mxu1 %v10981_v54  ;;  %8545 = vmatprep.mubr.msk.f32.mxu0 %vm10517_vm0, %v12904_v2 }
 0x322   :  { %9218 = vmatprep.subr.bf16.mxu1 %v12902_v1 }
 0x323   :  { %9229 = vmatpush3.bf16.msra.mxu0 %v11042_v38 }
 0x324   :  { %8568 = vmatmul.mubr.msk.f32.vlgmr.msra.gmra.mrb[12].mxu1 %vm261_vm1, %v923_v55  ;;  %8546 = vmatmul.mubr.msk.f32.gmra.mrb[14].mxu0 %vm261_vm1, %v437_v41 }
 0x325   :  { %9220 = vmatpush3.bf16.msra.mxu1 %v10972_v51  ;;  %8578 = vmatprep.mubr.msk.f32.mxu1 %vm10517_vm0, %v12904_v2 }
 0x326   :  { %9221 = vmatprep.subr.bf16.mxu1 %v12902_v1  ;;  %8589 = vmatprep.mubr.msk.f32.mxu0 %vm10517_vm0, %v12904_v2 }
 0x327   :  { %9230 = vmatprep.subr.bf16.mxu0 %v12902_v1 }
 0x329   :  { %9223 = vmatpush3.bf16.msra.mxu1 %v10981_v54 }
 0x32a   :  { %9236 = vmatprep.subr.bf16.mxu1 %v12902_v1 }
 0x32c   :  { %8579 = vmatmul.mubr.msk.f32.vlgmr.msra.gmra.mrb[10].mxu1 %vm261_vm1, %v923_v55 }
 0x32d   :  { %9238 = vmatpush3.bf16.msra.mxu1 %v10972_v51  ;;  %8611 = vmatprep.mubr.msk.f32.mxu1 %vm10517_vm0, %v12904_v2 }
 0x32e   :  { %9239 = vmatprep.subr.bf16.mxu1 %v12902_v1 }
 0x331   :  { %9241 = vmatpush3.bf16.msra.mxu1 %v10981_v54 }
 0x332   :  { %9248 = vmatprep.subr.bf16.mxu1 %v12902_v1 }
 0x3db   :  { %v11008_v56 = vpop.f32.mrb[2].mxu0  ;;  %v11010_v57 = vpop.f32.mrb[2].mxu1 }
 0x3dc   :  { %v8485_v58 = vpop.f32.mrb[3].mxu0  ;;  %v8502_v59 = vpop.f32.mrb[3].mxu1 }
 0x3df   :  { %v11012_v60 = vpop.f32.mrb[4].mxu0  ;;  %v11014_v61 = vpop.f32.mrb[4].mxu1 }
 0x3e0   :  { %v8488_v62 = vpop.f32.mrb[5].mxu0  ;;  %v8505_v63 = vpop.f32.mrb[5].mxu1 }
 0x3e3   :  { %v11016_v0 = vpop.f32.mrb[6].mxu1  ;;  %v11018_v3 = vpop.f32.mrb[6].mxu0 }
 0x3e4   :  { %v8508_v4 = vpop.f32.mrb[7].mxu1  ;;  %v8491_v5 = vpop.f32.mrb[7].mxu0 }
 0x3e7   :  { %v11020_v6 = vpop.f32.mrb[8].mxu0  ;;  %v11022_v7 = vpop.f32.mrb[8].mxu1 }
 0x3e8   :  { %12932 = vst [vmem:[#allocation42_spill] sm:$0xff] %v11020_v6  ;;  %12933 = vst [vmem:[#allocation43_spill] sm:$0xff] %v11022_v7  ;;  %v8519_v8 = vpop.f32.mrb[9].mxu0  ;;  %v8530_v9 = vpop.f32.mrb[9].mxu1 }
 0x3e9   :  { %v11072_v9 = vld [vmem:[#allocation15] ss:$0 sm:$0xff] }
 0x3ef   :  { %v11024_v10 = vpop.f32.mrb[10].mxu0 }
 0x3f0   :  { %v8541_v11 = vpop.f32.mrb[11].mxu0 }
 0x3f3   :  { %v11026_v12 = vpop.f32.mrb[12].mxu0 }
 0x3f4   :  { %v8544_v13 = vpop.f32.mrb[13].mxu0 }
 0x3f7   :  { %v11028_v14 = vpop.f32.mrb[12].mxu1  ;;  %v11048_v40 = vpop.f32.mrb[14].mxu0 }
 0x3f8   :  { %v8569_v15 = vpop.f32.mrb[13].mxu1  ;;  %v8547_v41 = vpop.f32.mrb[15].mxu0 }
 0x3ff   :  { %v1077_v17 = vpop.f32.mrb[10].mxu1 }
 0x400   :  { %v9542_v18 = vadd.f32 %v1077_v17, %v11030_v16  ;;  %v8580_v19 = vpop.f32.mrb[11].mxu1 }
 0x402   :  { %9594 = vtanh.f32 %v9542_v18  ;;  %v7997_v22 = vmul.f32 -1.442695, %v9542_v18 }
 0x404   :  { %9596 = vpow2.f32 %v7997_v22 }
 0x40c   :  { %v9595_v20 = vpop.eup %9594 }
 0x40d   :  { %1099 = vrot.lane.b32.xlu0 %v9595_v20, %s10519_s4 }
 0x40e   :  { %v9597_v23 = vpop.eup %9596 }
 0x40f   :  { %v1085_v24 = vadd.f32 1.0, %v9597_v23  ;;  %v1279_v23 = vld [vmem:[#allocation18] sm:$0xff] }
 0x411   :  { %1094 = vrot.lane.b32.xlu0 %v7998_v21, %s10520_s19  ;;  %9598 = vrcp.f32 %v1085_v24  ;;  %v1280_v24 = vld [vmem:[#allocation18 + $0x8] sm:$0xff] }
 0x41b   :  { %v9599_v25 = vpop.eup %9598 }
 0x47f   :  { %v1100_v26 = vpop.permute.xlu0 %1099 }
 0x480   :  { %v1102_v27 = vmul.f32 %v9599_v25, %v1100_v26  ;;  %v11080_v26 = vpack.c.bf16 %v1280_v24, %v1279_v23 }
 0x482   :  { %1104 = vrot.lane.b32.xlu1 %v1102_v27, %s10520_s19  ;;  %v1282_v27 = vld [vmem:[#allocation18 + $0x18] sm:$0xff] }
 0x483   :  { %v1095_v28 = vpop.permute.xlu0 %1094 }
 0x484   :  { %v1097_v29 = vmul.f32 %v9599_v25, %v1095_v28 }
 0x4f4   :  { %v1105_v30 = vpop.permute.xlu1 %1104 }
 0x4f5   :  { %v11036_v31 = vadd.f32 %v1105_v30, %v1097_v29 }
 0x4f7   :  { %9600 = vtanh.f32 %v11036_v31 }
 0x501   :  { %v9601_v39 = vpop.eup %9600 }
 0x502   :  { %1110 = vrot.lane.b32.xlu1 %v9601_v39, %s10519_s4 }
 0x574   :  { %v1111_v42 = vpop.permute.xlu1 %1110 }
 0x575   :  { %v1113_v43 = vmul.f32 %v9599_v25, %v1111_v42  ;;  %v1281_v25 = vld [vmem:[#allocation18 + $0x10] sm:$0xff] }
 0x576   :  { %v11083_v28 = vpack.c.bf16 %v1282_v27, %v1281_v25 }
 0x577   :  { %1127 = vrot.lane.b32.xlu0 %v1113_v43, %s10520_s19 }
 0x5e9   :  { %v1128_v44 = vpop.permute.xlu0 %1127 }
 0x5ea   :  { %8590 = vmatmul.mubr.msk.f32.vlgmr.msra.gmra.mrb[16].mxu0 %vm261_vm1, %v1128_v44  ;;  %8612 = vmatmul.mubr.msk.f32.vlgmr.msra.gmra.mrb[14].mxu1 %vm261_vm1, %v1128_v44 }
 0x5eb   :  { %8600 = vmatprep.mubr.msk.f32.mxu0 %vm10517_vm0, %v12904_v2  ;;  %8633 = vmatprep.mubr.msk.f32.mxu1 %vm10517_vm0, %v12904_v2 }
 0x5ec   :  { %9232 = vmatpush3.bf16.msra.mxu0 %v11080_v26  ;;  %9250 = vmatpush3.bf16.msra.mxu1 %v11080_v26 }
 0x5ed   :  { %9233 = vmatprep.subr.bf16.mxu0 %v12902_v1  ;;  %9251 = vmatprep.subr.bf16.mxu1 %v12902_v1 }
 0x5f0   :  { %9235 = vmatpush3.bf16.msra.mxu0 %v11083_v28  ;;  %9253 = vmatpush3.bf16.msra.mxu1 %v11083_v28 }
 0x5f1   :  { %9242 = vmatprep.subr.bf16.mxu0 %v12902_v1  ;;  %9260 = vmatprep.subr.bf16.mxu1 %v12902_v1 }
 0x6bd   :  { %v1197_v49 = vpop.f32.mrb[16].mxu0  ;;  %v11065_v50 = vpop.f32.mrb[14].mxu1 }
 0x6be   :  { %v1204_v53 = vrot.slane %v1197_v49, %v11063_v48  ;;  %v8591_v55 = vpop.f32.mrb[17].mxu0  ;;  %v8613_v58 = vpop.f32.mrb[15].mxu1 }
 0x6c0   :  { %v1205_v59 = vadd.f32 %v1204_v53, %v11010_v57  ;;  %v1206_v62 = vadd.f32 %v1204_v53, %v11014_v61  ;;  %v1207_v63 = vadd.f32 %v1204_v53, %v11016_v0 }
 0x6c2   :  { %v1208_v4 = vadd.f32 %v1205_v59, %v1121_v52  ;;  %v1209_v5 = vadd.f32 %v1206_v62, %v1121_v52  ;;  %v1210_v8 = vadd.f32 %v1207_v63, %v1121_v52 }
 0x6c4   :  { %9602 = vtanh.f32 %v1208_v4 }
 0x6c5   :  { %9604 = vtanh.f32 %v1209_v5 }
 0x6c6   :  { %9606 = vtanh.f32 %v1210_v8 }
 0x6ce   :  { %v9603_v11 = vpop.eup %9602 }
 0x6cf   :  { %v9605_v13 = vpop.eup %9604  ;;  %v1221_v15 = vmul.f32 %v9603_v11, %v11072_v9 }
 0x6d0   :  { %v9607_v17 = vpop.eup %9606  ;;  %v1222_v18 = vmul.f32 %v9605_v13, %v11072_v9 }
 0x6d1   :  { %v1224_v19 = vsel %vm261_vm1, %v1221_v15, 0.0  ;;  %v1223_v21 = vmul.f32 %v9607_v17, %v11072_v9 }
 0x6d2   :  { %v1227_v20 = vsel %vm261_vm1, %v1222_v18, 0.0  ;;  %1225 = vadd.xlane.f32.xlu1 %v1224_v19 }
 0x6d3   :  { %1228 = vadd.xlane.f32.xlu0 %v1227_v20  ;;  %v1230_v22 = vsel %vm433_vm2, %v1223_v21, 0.0 }
 0x6d7   :  { %1231 = vadd.xlane.f32.xlu0 %v1230_v22 }
 0x75f   :  { %v1226_v30 = vpop.xlane.xlu1 %1225 }
 0x760   :  { %v1229_v29 = vpop.xlane.xlu0 %1228 }
 0x761   :  { %v1235_v32 = vmax.f32 %v1226_v30, %v1229_v29 }
 0x764   :  { %v1232_v33 = vpop.xlane.xlu0 %1231 }
 0x765   :  { %v1234_v34 = vsel %vm1233_vm3, %v1232_v33, -inf }
 0x766   :  { %v1236_v37 = vmax.f32 %v1235_v32, %v1234_v34 }
 0x768   :  { %v1237_v39 = vrot.slane %v1236_v37, 4 }
 0x76a   :  { %v1238_v41 = vmax.f32 %v1236_v37, %v1237_v39 }
 0x76c   :  { %v1239_v42 = vrot.slane %v1238_v41, 2 }
 0x76e   :  { %v1240_v43 = vmax.f32 %v1238_v41, %v1239_v42 }
 0x770   :  { %v1241_v44 = vrot.slane %v1240_v43, 1 }
 0x772   :  { %v1242_v49 = vmax.f32 %v1240_v43, %v1241_v44 }
 0x774   :  { %v1243_v52 = vsub.f32 %v1226_v30, %v1242_v49  ;;  %v1244_v53 = vsub.f32 %v1229_v29, %v1242_v49  ;;  %v1245_v55 = vsub.f32 %v1232_v33, %v1242_v49 }
 0x776   :  { %v1246_v58 = vmul.f32 1.442695, %v1243_v52  ;;  %v1248_v59 = vmul.f32 1.442695, %v1244_v53  ;;  %v1250_v62 = vmul.f32 1.442695, %v1245_v55 }
 0x777   :  { %v11107_v53 = vld [vmem:[#allocation21] ss:$0 sm:$0xff] }
 0x778   :  { %9608 = vpow2.f32 %v1246_v58 }
 0x779   :  { %9610 = vpow2.f32 %v1248_v59  ;;  %v1370_v59 = vmul.f32 0.0, %v11107_v53 }
 0x77a   :  { %9612 = vpow2.f32 %v1250_v62 }
 0x782   :  { %v9609_v63 = vpop.eup %9608 }
 0x783   :  { %v9611_v4 = vpop.eup %9610 }
 0x784   :  { %v9613_v5 = vpop.eup %9612  ;;  %v1252_v8 = vadd.f32 %v9611_v4, %v9609_v63 }
 0x785   :  { %v1253_v11 = vsel %vm1233_vm3, %v9613_v5, 0.0 }
 0x786   :  { %v1254_v13 = vadd.f32 %v1253_v11, %v1252_v8 }
 0x788   :  { %v1255_v15 = vrot.slane %v1254_v13, 4 }
 0x78a   :  { %v1256_v17 = vadd.f32 %v1255_v15, %v1254_v13  ;;  %v11114_v15 = vld [vmem:[#allocation19] ss:$0 sm:$0xff] }
 0x78c   :  { %v1257_v18 = vrot.slane %v1256_v17, 2 }
 0x78e   :  { %v1258_v19 = vadd.f32 %v1257_v18, %v1256_v17 }
 0x790   :  { %v1259_v20 = vrot.slane %v1258_v19, 1 }
 0x792   :  { %v1260_v21 = vadd.f32 %v1259_v20, %v1258_v19 }
 0x794   :  { %9614 = vrcp.f32 %v1260_v21 }
 0x79e   :  { %v9615_v22 = vpop.eup %9614 }
 0x79f   :  { %v1262_v23 = vmul.f32 %v9615_v22, %v9609_v63  ;;  %v1263_v24 = vmul.f32 %v9615_v22, %v9611_v4  ;;  %v1264_v25 = vmul.f32 %v9615_v22, %v9613_v5 }
 0x7a1   :  { %v1267_v27 = vmul.f32 %v1264_v25, %v11016_v0  ;;  %v1265_v29 = vmul.f32 %v1262_v23, %v11010_v57  ;;  %v1266_v30 = vmul.f32 %v1263_v24, %v11014_v61 }
 0x7a3   :  { %v1268_v32 = vsel %vm261_vm1, %v1265_v29, 0.0  ;;  %v1269_v33 = vsel %vm261_vm1, %v1266_v30, 0.0  ;;  %v1271_v37 = vsel %vm433_vm2, %v1267_v27, 0.0  ;;  %v11123_v27 = vadd.s32 16, %v11058_v46 }
 0x7a4   :  { %v1270_v34 = vadd.f32 %v1269_v33, %v1268_v32 }
 0x7a5   :  { %vm1402_vm4 = vcmp.eq.s32.totalorder %v11123_v27, 16 }
 0x7a6   :  { %v1272_v39 = vadd.f32 %v1271_v37, %v1270_v34 }
 0x7a8   :  { %v1273_v41 = vrot.slane %v1272_v39, 4 }
 0x7aa   :  { %v1274_v42 = vadd.f32 %v1273_v41, %v1272_v39 }
 0x7ac   :  { %v1275_v43 = vrot.slane %v1274_v42, 2 }
 0x7ae   :  { %v1276_v44 = vadd.f32 %v1275_v43, %v1274_v42 }
 0x7b0   :  { %v1277_v49 = vrot.slane %v1276_v44, 1 }
 0x7b2   :  { %v1278_v52 = vadd.f32 %v1277_v49, %v1276_v44  ;;  %v11128_v44 = vadd.s32 8, %v11058_v46 }
 0x7b4   :  { %8601 = vmatmul.mubr.msk.f32.vlgmr.msra.gmra.mrb[18].mxu0 %vm261_vm1, %v1278_v52 }
 0x7b5   :  { %9244 = vmatpush3.bf16.msra.mxu0 %v11039_v35  ;;  %8622 = vmatprep.mubr.msk.f32.mxu0 %vm10517_vm0, %v12904_v2 }
 0x7b6   :  { %9245 = vmatprep.subr.bf16.mxu0 %v12902_v1 }
 0x7b9   :  { %9247 = vmatpush3.bf16.msra.mxu0 %v11042_v38 }
 0x7ba   :  { %9254 = vmatprep.subr.bf16.mxu0 %v12902_v1 }
 0x887   :  { %v1352_v55 = vpop.f32.mrb[18].mxu0 }
 0x888   :  { %v1359_v58 = vrot.slane %v1352_v55, %v11063_v48  ;;  %v8602_v62 = vpop.f32.mrb[19].mxu0  ;;  %v11131_v55 = vcvt.s32.f32 %v11058_v46 }
 0x88a   :  { %v1360_v63 = vadd.f32 %v1359_v58, %v11008_v56  ;;  %v1361_v4 = vadd.f32 %v1359_v58, %v11012_v60  ;;  %v1362_v5 = vadd.f32 %v1359_v58, %v11018_v3  ;;  %v11134_v58 = vcvt.s32.f32 %v11128_v44 }
 0x88c   :  { %v1371_v8 = vadd.f32 %v1370_v59, %v1360_v63  ;;  %v1372_v11 = vadd.f32 %v1370_v59, %v1361_v4  ;;  %v1373_v13 = vadd.f32 %v1370_v59, %v1362_v5  ;;  %v11137_v59 = vcvt.s32.f32 %v11123_v27 }
 0x88e   :  { %9616 = vtanh.f32 %v1371_v8 }
 0x88f   :  { %9618 = vtanh.f32 %v1372_v11 }
 0x890   :  { %9620 = vtanh.f32 %v1373_v13 }
 0x898   :  { %v9617_v17 = vpop.eup %9616 }
 0x899   :  { %v9619_v18 = vpop.eup %9618  ;;  %v1384_v19 = vmul.f32 %v9617_v17, %v11114_v15 }
 0x89a   :  { %v9621_v20 = vpop.eup %9620  ;;  %v1385_v21 = vmul.f32 %v9619_v18, %v11114_v15 }
 0x89b   :  { %v1387_v22 = vsel %vm261_vm1, %v1384_v19, 0.0  ;;  %v1386_v23 = vmul.f32 %v9621_v20, %v11114_v15 }
 0x89c   :  { %v1390_v24 = vsel %vm261_vm1, %v1385_v21, 0.0  ;;  %1388 = vadd.xlane.f32.xlu1 %v1387_v22 }
 0x89d   :  { %1391 = vadd.xlane.f32.xlu0 %v1390_v24  ;;  %v1393_v25 = vsel %vm433_vm2, %v1386_v23, 0.0 }
 0x8a0   :  { %1394 = vadd.xlane.f32.xlu1 %v1393_v25 }
 0x929   :  { %v1389_v29 = vpop.xlane.xlu1 %1388 }
 0x92a   :  { %v1392_v30 = vpop.xlane.xlu0 %1391 }
 0x92b   :  { %v1407_v33 = vmax.f32 %v1389_v29, %v1392_v30 }
 0x92d   :  { %v1395_v32 = vpop.xlane.xlu1 %1394 }
 0x92e   :  { %v1405_v34 = vsel %vm1402_vm4, -1e+18, %v1395_v32 }
 0x92f   :  { %v1406_v37 = vsel %vm1233_vm3, %v1405_v34, -inf }
 0x930   :  { %v1408_v39 = vmax.f32 %v1407_v33, %v1406_v37 }
 0x932   :  { %v1409_v41 = vrot.slane %v1408_v39, 4 }
 0x934   :  { %v1410_v42 = vmax.f32 %v1408_v39, %v1409_v41 }
 0x936   :  { %v1411_v43 = vrot.slane %v1410_v42, 2 }
 0x938   :  { %v1412_v49 = vmax.f32 %v1410_v42, %v1411_v43 }
 0x93a   :  { %v1413_v52 = vrot.slane %v1412_v49, 1 }
 0x93c   :  { %v1414_v62 = vmax.f32 %v1412_v49, %v1413_v52 }
 0x93e   :  { %vm1415_vm5 = vcmp.ge.f32.partialorder %v1389_v29, %v1414_v62  ;;  %vm1416_vm6 = vcmp.ge.f32.partialorder %v1392_v30, %v1414_v62  ;;  %vm1417_vm7 = vcmp.ge.f32.partialorder %v1405_v34, %v1414_v62  ;;  %v1431_v63 = vsub.f32 %v1389_v29, %v1414_v62 }
 0x93f   :  { %v1418_v4 = vsel %vm1415_vm5, %v11131_v55, 17.0  ;;  %v1419_v5 = vsel %vm1416_vm6, %v11134_v58, 17.0  ;;  %v1420_v8 = vsel %vm1417_vm7, %v11137_v59, 17.0  ;;  %v1432_v11 = vsub.f32 %v1392_v30, %v1414_v62 }
 0x940   :  { %v1421_v13 = vsel %vm1233_vm3, %v1420_v8, inf  ;;  %v1422_v17 = vmin.f32 %v1418_v4, %v1419_v5  ;;  %v1433_v18 = vsub.f32 %v1405_v34, %v1414_v62  ;;  %v1434_v19 = vmul.f32 1.442695, %v1431_v63 }
 0x941   :  { %v1436_v20 = vmul.f32 1.442695, %v1432_v11  ;;  %v767_v34 = vrot.slane %v11030_v16, %v11063_v48 }
 0x942   :  { %v1423_v21 = vmin.f32 %v1422_v17, %v1421_v13  ;;  %9622 = vpow2.f32 %v1434_v19  ;;  %v1438_v22 = vmul.f32 1.442695, %v1433_v18 }
 0x943   :  { %9624 = vpow2.f32 %v1436_v20  ;;  %v11149_v63 = vadd.f32 %v11024_v10, %v767_v34  ;;  %v11152_v4 = vadd.f32 %v11026_v12, %v767_v34  ;;  %v11155_v5 = vadd.f32 %v11048_v40, %v767_v34 }
 0x944   :  { %v1424_v23 = vrot.slane %v1423_v21, 4  ;;  %9626 = vpow2.f32 %v1438_v22 }
 0x946   :  { %v1425_v24 = vmin.f32 %v1423_v21, %v1424_v23 }
 0x948   :  { %v1426_v25 = vrot.slane %v1425_v24, 2 }
 0x94a   :  { %v1427_v29 = vmin.f32 %v1425_v24, %v1426_v25 }
 0x94c   :  { %v9623_v32 = vpop.eup %9622  ;;  %v1428_v33 = vrot.slane %v1427_v29, 1 }
 0x94d   :  { %v9625_v37 = vpop.eup %9624 }
 0x94e   :  { %v9627_v39 = vpop.eup %9626  ;;  %v1429_v30 = vmin.f32 %v1427_v29, %v1428_v33  ;;  %v1440_v41 = vadd.f32 %v9625_v37, %v9623_v32 }
 0x94f   :  { %v1441_v42 = vsel %vm1233_vm3, %v9627_v39, 0.0 }
 0x950   :  { %v9545_v43 = vtrunc.f32 %v1429_v30  ;;  %v1442_v49 = vadd.f32 %v1441_v42, %v1440_v41 }
 0x952   :  { %v11146_v52 = vcvt.f32.s32 %v9545_v43  ;;  %v1443_v62 = vrot.slane %v1442_v49, 4 }
 0x954   :  { %v1444_v8 = vadd.f32 %v1443_v62, %v1442_v49  ;;  %vm1460_vm8 = vcmp.eq.s32.totalorder %v11058_v46, %v11146_v52  ;;  %vm1461_vm9 = vcmp.eq.s32.totalorder %v11128_v44, %v11146_v52  ;;  %vm1462_vm10 = vcmp.eq.s32.totalorder %v11123_v27, %v11146_v52 }
 0x955   :  { %v8009_v10 = vsel %vm1460_vm8, 1.0, %v12904_v2  ;;  %v8010_v12 = vsel %vm1461_vm9, 1.0, %v12904_v2  ;;  %v8011_v16 = vsel %vm1462_vm10, 1.0, %v12904_v2  ;;  %vm1456_vm11 = vcmp.lt.s32.totalorder %v11146_v52, 8 }
 0x956   :  { %v1445_v40 = vrot.slane %v1444_v8, 2  ;;  %v1486_v11 = vmul.f32 %v8009_v10, %v11149_v63  ;;  %v1487_v13 = vmul.f32 %v8010_v12, %v11152_v4  ;;  %v1488_v17 = vmul.f32 %v8011_v16, %v11155_v5 }
 0x957   :  { %v1457_v18 = vadd.s32 8, %v11146_v52  ;;  %v8005_v19 = vadd.s32 4294967288, %v11146_v52 }
 0x958   :  { %v1446_v20 = vadd.f32 %v1445_v40, %v1444_v8  ;;  %v1489_v21 = vadd.f32 %v1487_v13, %v1486_v11  ;;  %v1490_v22 = vsel %vm1233_vm3, %v1488_v17, 0.0 }
 0x959   :  { %v1459_v23 = vsel %vm1456_vm11, %v1457_v18, %v8005_v19 }
 0x95a   :  { %v1447_v24 = vrot.slane %v1446_v20, 1  ;;  %v1491_v25 = vadd.f32 %v1490_v22, %v1489_v21  ;;  %vm1464_vm12 = vcmp.eq.s32.totalorder %v11128_v44, %v1459_v23  ;;  %vm1463_vm13 = vcmp.eq.s32.totalorder %v11058_v46, %v1459_v23 }
 0x95b   :  { %vm11187_vm14 = vmor %vm1461_vm9, %vm1464_vm12  ;;  %vm1465_vm15 = vcmp.eq.s32.totalorder %v11123_v27, %v1459_v23 }
 0x95c   :  { %v1448_v33 = vadd.f32 %v1447_v24, %v1446_v20  ;;  %v1492_v30 = vrot.slane %v1491_v25, 4  ;;  %vm11195_vm4 = vmor %vm1460_vm8, %vm1463_vm13 }
 0x95d   :  { %vm11202_vm5 = vmor %vm1462_vm10, %vm1465_vm15 }
 0x95e   :  { %9628 = vrcp.f32 %v1448_v33  ;;  %v1493_v42 = vadd.f32 %v1492_v30, %v1491_v25 }
 0x960   :  { %v1494_v43 = vrot.slane %v1493_v42, 2 }
 0x962   :  { %v1495_v49 = vadd.f32 %v1494_v43, %v1493_v42 }
 0x964   :  { %v1496_v62 = vrot.slane %v1495_v49, 1 }
 0x966   :  { %v1497_v8 = vadd.f32 %v1496_v62, %v1495_v49 }
 0x968   :  { %v9629_v10 = vpop.eup %9628  ;;  %v1568_v12 = vadd.f32 %v11065_v50, %v1497_v8 }
 0x969   :  { %v11207_v16 = vmul.f32 %v9629_v10, %v9623_v32  ;;  %v11209_v40 = vmul.f32 %v9629_v10, %v9625_v37  ;;  %v11211_v11 = vmul.f32 %v9629_v10, %v9627_v39 }
 0x96a   :  { %9630 = vtanh.f32 %v1568_v12  ;;  %v8013_v17 = vmul.f32 -1.442695, %v1568_v12 }
 0x96b   :  { %v1593_v42 = vmul.f32 %v11060_v47, %v11207_v16  ;;  %v1594_v43 = vmul.f32 %v11060_v47, %v11209_v40  ;;  %v1595_v49 = vmul.f32 %v11060_v47, %v11211_v11 }
 0x96c   :  { %9632 = vpow2.f32 %v8013_v17 }
 0x974   :  { %v9631_v13 = vpop.eup %9630 }
 0x975   :  { %1578 = vrot.lane.b32.xlu0 %v9631_v13, %s10519_s4 }
 0x976   :  { %v9633_v18 = vpop.eup %9632 }
 0x977   :  { %v1572_v19 = vadd.f32 1.0, %v9633_v18 }
 0x979   :  { %9634 = vrcp.f32 %v1572_v19 }
 0x983   :  { %v9635_v20 = vpop.eup %9634 }
 0x984   :  { %v1576_v50 = vmul.f32 %v9635_v20, %v11036_v31 }
 0x9e7   :  { %v1579_v21 = vpop.permute.xlu0 %1578 }
 0x9e8   :  { %v1581_v22 = vmul.f32 %v9635_v20, %v1579_v21 }
 0x9ea   :  { %1583 = vrot.lane.b32.xlu1 %v1581_v22, %s10520_s19 }
 0xa5c   :  { %v1584_v32 = vpop.permute.xlu1 %1583 }
 0xa5d   :  { %v11216_v37 = vadd.f32 %v1584_v32, %v1576_v50 }
 0xa5f   :  { %9636 = vtanh.f32 %v11216_v37 }
 0xa69   :  { %v9637_v39 = vpop.eup %9636 }
 0xa6a   :  { %1589 = vrot.lane.b32.xlu1 %v9637_v39, %s10519_s4 }
 0xadc   :  { %v1590_v23 = vpop.permute.xlu1 %1589 }
 0xadd   :  { %v1592_v24 = vmul.f32 %v9635_v20, %v1590_v23 }
 0xadf   :  { %1597 = vrot.lane.b32.xlu0 %v1592_v24, %s10520_s19 }
 0xb51   :  { %v1598_v25 = vpop.permute.xlu0 %1597 }
 0xb52   :  { %8623 = vmatmul.mubr.msk.f32.vlgmr.msra.gmra.mrb[20].mxu0 %vm261_vm1, %v1598_v25 }
 0xb53   :  { %9256 = vmatpush3.bf16.msra.mxu0 %v10972_v51  ;;  %8644 = vmatprep.mubr.msk.f32.mxu0 %vm10517_vm0, %v12904_v2 }
 0xb54   :  { %9257 = vmatprep.subr.bf16.mxu0 %v12902_v1 }
 0xb57   :  { %9259 = vmatpush3.bf16.msra.mxu0 %v10981_v54 }
 0xb58   :  { %9266 = vmatprep.subr.bf16.mxu0 %v12902_v1 }
 0xb5a   :  { %8645 = vmatmul.mubr.msk.f32.vlgmr.msra.gmra.mrb[22].mxu0 %vm261_vm1, %v1598_v25 }
 0xb5b   :  { %9268 = vmatpush3.bf16.msra.mxu0 %v11080_v26  ;;  %8666 = vmatprep.mubr.msk.f32.mxu0 %vm10517_vm0, %v12904_v2 }
 0xb5c   :  { %9269 = vmatprep.subr.bf16.mxu0 %v12902_v1 }
 0xb5f   :  { %9271 = vmatpush3.bf16.msra.mxu0 %v11083_v28 }
 0xb60   :  { %9278 = vmatprep.subr.bf16.mxu0 %v12902_v1 }
 0xc25   :  { %v1667_v31 = vpop.f32.mrb[20].mxu0 }
 0xc26   :  { %v1674_v33 = vrot.slane %v1667_v31, %v11063_v48  ;;  %v8624_v30 = vpop.f32.mrb[21].mxu0 }
 0xc28   :  { %v1675_v62 = vadd.f32 %v1674_v33, %v11010_v57  ;;  %v1676_v8 = vadd.f32 %v1674_v33, %v11014_v61  ;;  %v1677_v10 = vadd.f32 %v1674_v33, %v11016_v0 }
 0xc2a   :  { %v1678_v12 = vadd.f32 %v1675_v62, %v1593_v42  ;;  %v1679_v13 = vadd.f32 %v1676_v8, %v1594_v43  ;;  %v1680_v17 = vadd.f32 %v1677_v10, %v1595_v49 }
 0xc2c   :  { %9638 = vtanh.f32 %v1678_v12 }
 0xc2d   :  { %9640 = vtanh.f32 %v1679_v13  ;;  %v11245_v18 = vpop.f32.mrb[22].mxu0 }
 0xc2e   :  { %9642 = vtanh.f32 %v1680_v17  ;;  %v8646_v19 = vpop.f32.mrb[23].mxu0 }
 0xc36   :  { %v9639_v20 = vpop.eup %9638 }
 0xc37   :  { %v9641_v21 = vpop.eup %9640  ;;  %v1684_v22 = vmul.f32 %v9639_v20, %v11072_v9 }
 0xc38   :  { %v9643_v47 = vpop.eup %9642  ;;  %v1685_v50 = vmul.f32 %v9641_v21, %v11072_v9 }
 0xc39   :  { %v1687_v32 = vsel %vm261_vm1, %v1684_v22, 0.0  ;;  %v1686_v23 = vmul.f32 %v9643_v47, %v11072_v9 }
 0xc3a   :  { %v1690_v39 = vsel %vm261_vm1, %v1685_v50, 0.0  ;;  %1688 = vadd.xlane.f32.xlu1 %v1687_v32 }
 0xc3b   :  { %1691 = vadd.xlane.f32.xlu0 %v1690_v39  ;;  %v1693_v24 = vsel %vm433_vm2, %v1686_v23, 0.0 }
 0xc3f   :  { %1694 = vadd.xlane.f32.xlu0 %v1693_v24 }
 0xcc7   :  { %v1689_v31 = vpop.xlane.xlu1 %1688 }
 0xcc8   :  { %v1692_v25 = vpop.xlane.xlu0 %1691 }
 0xcc9   :  { %v1697_v33 = vmax.f32 %v1689_v31, %v1692_v25 }
 0xccc   :  { %v1695_v30 = vpop.xlane.xlu0 %1694 }
 0xccd   :  { %v1696_v42 = vsel %vm1233_vm3, %v1695_v30, -inf }
 0xcce   :  { %v1698_v43 = vmax.f32 %v1697_v33, %v1696_v42 }
 0xcd0   :  { %v1699_v49 = vrot.slane %v1698_v43, 4 }
 0xcd2   :  { %v1700_v62 = vmax.f32 %v1698_v43, %v1699_v49 }
 0xcd4   :  { %v1701_v8 = vrot.slane %v1700_v62, 2 }
 0xcd6   :  { %v1702_v10 = vmax.f32 %v1700_v62, %v1701_v8 }
 0xcd8   :  { %v1703_v12 = vrot.slane %v1702_v10, 1 }
 0xcda   :  { %v1704_v13 = vmax.f32 %v1702_v10, %v1703_v12 }
 0xcdc   :  { %v1705_v17 = vsub.f32 %v1689_v31, %v1704_v13  ;;  %v1706_v19 = vsub.f32 %v1692_v25, %v1704_v13  ;;  %v1707_v9 = vsub.f32 %v1695_v30, %v1704_v13 }
 0xcde   :  { %v1708_v20 = vmul.f32 1.442695, %v1705_v17  ;;  %v1710_v21 = vmul.f32 1.442695, %v1706_v19  ;;  %v1712_v22 = vmul.f32 1.442695, %v1707_v9 }
 0xce0   :  { %9644 = vpow2.f32 %v1708_v20 }
 0xce1   :  { %9646 = vpow2.f32 %v1710_v21 }
 0xce2   :  { %9648 = vpow2.f32 %v1712_v22 }
 0xcea   :  { %v9645_v47 = vpop.eup %9644 }
 0xceb   :  { %v9647_v50 = vpop.eup %9646 }
 0xcec   :  { %v9649_v32 = vpop.eup %9648  ;;  %v1714_v39 = vadd.f32 %v9647_v50, %v9645_v47 }
 0xced   :  { %v1715_v23 = vsel %vm1233_vm3, %v9649_v32, 0.0 }
 0xcee   :  { %v1716_v24 = vadd.f32 %v1715_v23, %v1714_v39 }
 0xcf0   :  { %v1717_v33 = vrot.slane %v1716_v24, 4 }
 0xcf2   :  { %v1718_v42 = vadd.f32 %v1717_v33, %v1716_v24 }
 0xcf4   :  { %v1719_v43 = vrot.slane %v1718_v42, 2 }
 0xcf6   :  { %v1720_v49 = vadd.f32 %v1719_v43, %v1718_v42 }
 0xcf8   :  { %v1721_v31 = vrot.slane %v1720_v49, 1 }
 0xcfa   :  { %v1722_v25 = vadd.f32 %v1721_v31, %v1720_v49  ;;  %v1821_v49 = vmul.f32 %v11107_v53, %v11207_v16  ;;  %v1822_v31 = vmul.f32 %v11107_v53, %v11209_v40 }
 0xcfc   :  { %9650 = vrcp.f32 %v1722_v25 }
 0xd06   :  { %v9651_v30 = vpop.eup %9650 }
 0xd07   :  { %v1724_v62 = vmul.f32 %v9651_v30, %v9645_v47  ;;  %v1725_v8 = vmul.f32 %v9651_v30, %v9647_v50  ;;  %v1726_v10 = vmul.f32 %v9651_v30, %v9649_v32 }
 0xd09   :  { %v1729_v12 = vmul.f32 %v1726_v10, %v11016_v0  ;;  %v1727_v13 = vmul.f32 %v1724_v62, %v11010_v57  ;;  %v1728_v17 = vmul.f32 %v1725_v8, %v11014_v61  ;;  %v1823_v8 = vmul.f32 %v11107_v53, %v11211_v11 }
 0xd0b   :  { %v1730_v19 = vsel %vm261_vm1, %v1727_v13, 0.0  ;;  %v1731_v9 = vsel %vm261_vm1, %v1728_v17, 0.0  ;;  %v1733_v21 = vsel %vm433_vm2, %v1729_v12, 0.0 }
 0xd0c   :  { %v1732_v20 = vadd.f32 %v1731_v9, %v1730_v19 }
 0xd0e   :  { %v1734_v22 = vadd.f32 %v1733_v21, %v1732_v20 }
 0xd10   :  { %v1735_v39 = vrot.slane %v1734_v22, 4 }
 0xd12   :  { %v1736_v23 = vadd.f32 %v1735_v39, %v1734_v22 }
 0xd14   :  { %v1737_v24 = vrot.slane %v1736_v23, 2 }
 0xd16   :  { %v1738_v47 = vadd.f32 %v1737_v24, %v1736_v23 }
 0xd18   :  { %v1739_v50 = vrot.slane %v1738_v47, 1 }
 0xd1a   :  { %v1740_v32 = vadd.f32 %v1739_v50, %v1738_v47  ;;  %v11287_v47 = vsel %vm11187_vm14, 1.0, %v12904_v2  ;;  %v11292_v50 = vsel %vm11195_vm4, 1.0, %v12904_v2 }
 0xd1c   :  { %8634 = vmatmul.mubr.msk.f32.vlgmr.msra.gmra.mrb[16].mxu1 %vm261_vm1, %v1740_v32  ;;  %v12901_v32 = vmax.f32 %v11287_v47, 0.0 }
 0xd1d   :  { %9262 = vmatpush3.bf16.msra.mxu1 %v11039_v35  ;;  %8655 = vmatprep.mubr.msk.f32.mxu1 %vm10517_vm0, %v12904_v2 }
 0xd1e   :  { %9263 = vmatprep.subr.bf16.mxu1 %v12902_v1  ;;  %vm1843_vm6 = vcmp.gt.f32.partialorder %v12901_v32, 0.0 }
 0xd21   :  { %9265 = vmatpush3.bf16.msra.mxu1 %v11042_v38 }
 0xd22   :  { %9272 = vmatprep.subr.bf16.mxu1 %v12902_v1 }
 0xdef   :  { %v1810_v33 = vpop.f32.mrb[16].mxu1 }
 0xdf0   :  { %v1817_v42 = vrot.slane %v1810_v33, %v11063_v48  ;;  %v8635_v43 = vpop.f32.mrb[17].mxu1  ;;  %v12900_v33 = vmax.f32 %v11292_v50, 0.0 }
 0xdf2   :  { %v1818_v25 = vadd.f32 %v1817_v42, %v11008_v56  ;;  %v1819_v30 = vadd.f32 %v1817_v42, %v11012_v60  ;;  %v1820_v62 = vadd.f32 %v1817_v42, %v11018_v3  ;;  %v11299_v42 = vsel %vm11202_vm5, 1.0, %v12904_v2 }
 0xdf3   :  { %vm1842_vm7 = vcmp.gt.f32.partialorder %v12900_v33, 0.0 }
 0xdf4   :  { %v1824_v10 = vadd.f32 %v1821_v49, %v1818_v25  ;;  %v1825_v12 = vadd.f32 %v1822_v31, %v1819_v30  ;;  %v1826_v13 = vadd.f32 %v1823_v8, %v1820_v62  ;;  %v12899_v49 = vmax.f32 %v11299_v42, 0.0 }
 0xdf6   :  { %9652 = vtanh.f32 %v1824_v10  ;;  %vm1844_vm8 = vcmp.gt.f32.partialorder %v12899_v49, 0.0  ;;  %v11314_v49 = vand.u32 127, %v764_v45 }
 0xdf7   :  { %9654 = vtanh.f32 %v1825_v12 }
 0xdf8   :  { %9656 = vtanh.f32 %v1826_v13  ;;  %vm1478_vm12 = vcmp.eq.s32.totalorder %v11314_v49, 0  ;;  %vm1920_vm13 = vcmp.eq.s32.totalorder %v11314_v49, 1 }
 0xe00   :  { %v9653_v17 = vpop.eup %9652 }
 0xe01   :  { %v9655_v19 = vpop.eup %9654  ;;  %v1830_v9 = vmul.f32 %v9653_v17, %v11114_v15 }
 0xe02   :  { %v9657_v20 = vpop.eup %9656  ;;  %v1831_v21 = vmul.f32 %v9655_v19, %v11114_v15 }
 0xe03   :  { %v1833_v22 = vsel %vm261_vm1, %v1830_v9, 0.0  ;;  %v1832_v39 = vmul.f32 %v9657_v20, %v11114_v15 }
 0xe04   :  { %v1836_v23 = vsel %vm261_vm1, %v1831_v21, 0.0  ;;  %1834 = vadd.xlane.f32.xlu1 %v1833_v22 }
 0xe05   :  { %1837 = vadd.xlane.f32.xlu0 %v1836_v23  ;;  %v1839_v24 = vsel %vm433_vm2, %v1832_v39, 0.0 }
 0xe08   :  { %1840 = vadd.xlane.f32.xlu1 %v1839_v24 }
 0xe91   :  { %v1835_v43 = vpop.xlane.xlu1 %1834 }
 0xe92   :  { %v1838_v29 = vpop.xlane.xlu0 %1837  ;;  %v1845_v31 = vsel %vm1842_vm7, -1e+18, %v1835_v43 }
 0xe93   :  { %v1846_v41 = vsel %vm1843_vm6, -1e+18, %v1838_v29 }
 0xe94   :  { %v1849_v30 = vmax.f32 %v1845_v31, %v1846_v41 }
 0xe95   :  { %v1841_v25 = vpop.xlane.xlu1 %1840 }
 0xe96   :  { %v1847_v34 = vsel %vm1844_vm8, -1e+18, %v1841_v25 }
 0xe97   :  { %v1848_v62 = vsel %vm1233_vm3, %v1847_v34, -inf }
 0xe98   :  { %v1850_v8 = vmax.f32 %v1849_v30, %v1848_v62 }
 0xe9a   :  { %v1851_v10 = vrot.slane %v1850_v8, 4 }
 0xe9c   :  { %v1852_v12 = vmax.f32 %v1850_v8, %v1851_v10 }
 0xe9e   :  { %v1853_v13 = vrot.slane %v1852_v12, 2 }
 0xea0   :  { %v1854_v17 = vmax.f32 %v1852_v12, %v1853_v13 }
 0xea2   :  { %v1855_v19 = vrot.slane %v1854_v17, 1 }
 0xea4   :  { %v1856_v9 = vmax.f32 %v1854_v17, %v1855_v19 }
 0xea6   :  { %vm1857_vm9 = vcmp.ge.f32.partialorder %v1845_v31, %v1856_v9  ;;  %vm1858_vm10 = vcmp.ge.f32.partialorder %v1846_v41, %v1856_v9  ;;  %vm1859_vm11 = vcmp.ge.f32.partialorder %v1847_v34, %v1856_v9  ;;  %v1873_v20 = vsub.f32 %v1845_v31, %v1856_v9 }
 0xea7   :  { %v1860_v21 = vsel %vm1857_vm9, %v11131_v55, 17.0  ;;  %v1861_v22 = vsel %vm1858_vm10, %v11134_v58, 17.0  ;;  %v1862_v39 = vsel %vm1859_vm11, %v11137_v59, 17.0  ;;  %v1874_v23 = vsub.f32 %v1846_v41, %v1856_v9 }
 0xea8   :  { %v1863_v24 = vsel %vm1233_vm3, %v1862_v39, inf  ;;  %v1864_v43 = vmin.f32 %v1860_v21, %v1861_v22  ;;  %v1875_v29 = vsub.f32 %v1847_v34, %v1856_v9  ;;  %v1876_v25 = vmul.f32 1.442695, %v1873_v20 }
 0xea9   :  { %v1878_v30 = vmul.f32 1.442695, %v1874_v23 }
 0xeaa   :  { %v1865_v62 = vmin.f32 %v1864_v43, %v1863_v24  ;;  %9658 = vpow2.f32 %v1876_v25  ;;  %v1880_v8 = vmul.f32 1.442695, %v1875_v29  ;;  %v1479_v43 = vsel %vm1478_vm12, %v11146_v52, 4294967295 }
 0xeab   :  { %9660 = vpow2.f32 %v1878_v30 }
 0xeac   :  { %v1866_v10 = vrot.slane %v1865_v62, 4  ;;  %9662 = vpow2.f32 %v1880_v8 }
 0xeae   :  { %v1867_v31 = vmin.f32 %v1865_v62, %v1866_v10 }
 0xeb0   :  { %v1868_v12 = vrot.slane %v1867_v31, 2 }
 0xeb2   :  { %v1869_v13 = vmin.f32 %v1867_v31, %v1868_v12 }
 0xeb4   :  { %v9659_v17 = vpop.eup %9658  ;;  %v1870_v19 = vrot.slane %v1869_v13, 1 }
 0xeb5   :  { %v9661_v41 = vpop.eup %9660 }
 0xeb6   :  { %v9663_v39 = vpop.eup %9662  ;;  %v1871_v21 = vmin.f32 %v1869_v13, %v1870_v19  ;;  %v1882_v34 = vadd.f32 %v9661_v41, %v9659_v17 }
 0xeb7   :  { %v1883_v9 = vsel %vm1233_vm3, %v9663_v39, 0.0 }
 0xeb8   :  { %v9547_v20 = vtrunc.f32 %v1871_v21  ;;  %v1884_v22 = vadd.f32 %v1883_v9, %v1882_v34 }
 0xeba   :  { %v9548_v23 = vcvt.f32.s32 %v9547_v20  ;;  %v1885_v24 = vrot.slane %v1884_v22, 4 }
 0xebc   :  { %v1886_v45 = vadd.f32 %v1885_v24, %v1884_v22  ;;  %vm1902_vm14 = vcmp.eq.s32.totalorder %v11058_v46, %v9548_v23  ;;  %vm1903_vm15 = vcmp.eq.s32.totalorder %v11128_v44, %v9548_v23  ;;  %vm1904_vm4 = vcmp.eq.s32.totalorder %v11123_v27, %v9548_v23 }
 0xebd   :  { %v8020_v29 = vsel %vm1902_vm14, 1.0, %v12904_v2  ;;  %v8021_v25 = vsel %vm1903_vm15, 1.0, %v12904_v2  ;;  %v8022_v52 = vsel %vm1904_vm4, 1.0, %v12904_v2  ;;  %vm1898_vm5 = vcmp.lt.s32.totalorder %v9548_v23, 8 }
 0xebe   :  { %v1887_v30 = vrot.slane %v1886_v45, 2  ;;  %v1928_v62 = vmul.f32 %v8020_v29, %v11149_v63  ;;  %v1929_v8 = vmul.f32 %v8021_v25, %v11152_v4  ;;  %v1930_v10 = vmul.f32 %v8022_v52, %v11155_v5 }
 0xebf   :  { %v1899_v31 = vadd.s32 8, %v9548_v23  ;;  %v8016_v12 = vadd.s32 4294967288, %v9548_v23  ;;  %v11339_v13 = vsel %vm1920_vm13, %v9548_v23, %v1479_v43  ;;  %v12950_v24 = vmax.f32 %v11299_v42, 0.0 }
 0xec0   :  { %v1888_v19 = vadd.f32 %v1887_v30, %v1886_v45  ;;  %v1931_v21 = vadd.f32 %v1929_v8, %v1928_v62  ;;  %v1932_v34 = vsel %vm1233_vm3, %v1930_v10, 0.0 }
 0xec1   :  { %v1901_v9 = vsel %vm1898_vm5, %v1899_v31, %v8016_v12 }
 0xec2   :  { %v1889_v20 = vrot.slane %v1888_v19, 1  ;;  %v1933_v22 = vadd.f32 %v1932_v34, %v1931_v21  ;;  %vm1906_vm6 = vcmp.eq.s32.totalorder %v11128_v44, %v1901_v9  ;;  %vm1905_vm7 = vcmp.eq.s32.totalorder %v11058_v46, %v1901_v9 }
 0xec3   :  { %vm11346_vm8 = vmor %vm1903_vm15, %vm1906_vm6  ;;  %vm1907_vm9 = vcmp.eq.s32.totalorder %v11123_v27, %v1901_v9 }
 0xec4   :  { %v1890_v43 = vadd.f32 %v1889_v20, %v1888_v19  ;;  %v1934_v45 = vrot.slane %v1933_v22, 4  ;;  %vm11353_vm10 = vmor %vm1902_vm14, %vm1905_vm7 }
 0xec5   :  { %vm11359_vm11 = vmor %vm1904_vm4, %vm1907_vm9 }
 0xec6   :  { %9664 = vrcp.f32 %v1890_v43  ;;  %v1935_v52 = vadd.f32 %v1934_v45, %v1933_v22 }
 0xec8   :  { %v1936_v30 = vrot.slane %v1935_v52, 2 }
 0xeca   :  { %v1937_v62 = vadd.f32 %v1936_v30, %v1935_v52 }
 0xecc   :  { %v1938_v8 = vrot.slane %v1937_v62, 1 }
 0xece   :  { %v1939_v10 = vadd.f32 %v1938_v8, %v1937_v62 }
 0xed0   :  { %v9665_v31 = vpop.eup %9664  ;;  %v2010_v12 = vadd.f32 %v11245_v18, %v1939_v10 }
 0xed1   :  { %v1892_v19 = vmul.f32 %v9665_v31, %v9659_v17  ;;  %v1893_v21 = vmul.f32 %v9665_v31, %v9661_v41  ;;  %v1894_v34 = vmul.f32 %v9665_v31, %v9663_v39 }
 0xed2   :  { %9666 = vtanh.f32 %v2010_v12  ;;  %v8024_v23 = vmul.f32 -1.442695, %v2010_v12 }
 0xed3   :  { %v11390_v62 = vadd.f32 %v1893_v21, %v11209_v40  ;;  %v11393_v8 = vadd.f32 %v1894_v34, %v11211_v11 }
 0xed4   :  { %9668 = vpow2.f32 %v8024_v23 }
 0xedc   :  { %v9667_v9 = vpop.eup %9666 }
 0xedd   :  { %2020 = vrot.lane.b32.xlu0 %v9667_v9, %s10519_s4  ;;  %v11396_v9 = vld [vmem:[#allocation16] ss:$0 sm:$0xff] }
 0xede   :  { %v9669_v20 = vpop.eup %9668 }
 0xedf   :  { %v2014_v33 = vadd.f32 1.0, %v9669_v20  ;;  %v2036_v20 = vmul.f32 %v11396_v9, %v11390_v62 }
 0xee1   :  { %9670 = vrcp.f32 %v2014_v33 }
 0xeeb   :  { %v9671_v22 = vpop.eup %9670 }
 0xeec   :  { %v2018_v52 = vmul.f32 %v9671_v22, %v11216_v37  ;;  %v11387_v37 = vadd.f32 %v1892_v19, %v11207_v16  ;;  %v2037_v16 = vmul.f32 %v11396_v9, %v11393_v8 }
 0xeee   :  { %v2035_v23 = vmul.f32 %v11396_v9, %v11387_v37 }
 0xf4f   :  { %v2021_v43 = vpop.permute.xlu0 %2020 }
 0xf50   :  { %v2023_v45 = vmul.f32 %v9671_v22, %v2021_v43 }
 0xf52   :  { %2025 = vrot.lane.b32.xlu1 %v2023_v45, %s10520_s19 }
 0xfc4   :  { %v2026_v18 = vpop.permute.xlu1 %2025 }
 0xfc5   :  { %v11367_v17 = vadd.f32 %v2026_v18, %v2018_v52 }
 0xfc7   :  { %9672 = vtanh.f32 %v11367_v17 }
 0xfd1   :  { %v9673_v41 = vpop.eup %9672 }
 0xfd2   :  { %2031 = vrot.lane.b32.xlu1 %v9673_v41, %s10519_s4  ;;  %v11409_v41 = vld [vmem:[#allocation15] ss:$0 sm:$0xff] }
0x1044   :  { %v2032_v39 = vpop.permute.xlu1 %2031 }
0x1045   :  { %v2034_v30 = vmul.f32 %v9671_v22, %v2032_v39 }
0x1047   :  { %2039 = vrot.lane.b32.xlu0 %v2034_v30, %s10520_s19 }
0x10b9   :  { %v2040_v33 = vpop.permute.xlu0 %2039 }
0x10ba   :  { %8656 = vmatmul.mubr.msk.f32.vlgmr.msra.gmra.mrb[18].mxu1 %vm261_vm1, %v2040_v33 }
0x10bb   :  { %9274 = vmatpush3.bf16.msra.mxu1 %v10972_v51  ;;  %8677 = vmatprep.mubr.msk.f32.mxu1 %vm10517_vm0, %v12904_v2 }
0x10bc   :  { %9275 = vmatprep.subr.bf16.mxu1 %v12902_v1 }
0x10bf   :  { %9277 = vmatpush3.bf16.msra.mxu1 %v10981_v54 }
0x10c0   :  { %9284 = vmatprep.subr.bf16.mxu1 %v12902_v1 }
0x10c2   :  { %8678 = vmatmul.mubr.msk.f32.vlgmr.msra.gmra.mrb[20].mxu1 %vm261_vm1, %v2040_v33 }
0x10c3   :  { %9286 = vmatpush3.bf16.msra.mxu1 %v11080_v26  ;;  %8699 = vmatprep.mubr.msk.f32.mxu1 %vm10517_vm0, %v12904_v2 }
0x10c4   :  { %9287 = vmatprep.subr.bf16.mxu1 %v12902_v1 }
0x10c7   :  { %9289 = vmatpush3.bf16.msra.mxu1 %v11083_v28 }
0x10c8   :  { %9296 = vmatprep.subr.bf16.mxu1 %v12902_v1 }
0x118d   :  { %v2109_v10 = vpop.f32.mrb[18].mxu1 }
0x118e   :  { %v2116_v31 = vrot.slane %v2109_v10, %v11063_v48  ;;  %v8657_v12 = vpop.f32.mrb[19].mxu1 }
0x1190   :  { %v2117_v40 = vadd.f32 %v2116_v31, %v11010_v57  ;;  %v2118_v11 = vadd.f32 %v2116_v31, %v11014_v61  ;;  %v2119_v19 = vadd.f32 %v2116_v31, %v11016_v0 }
0x1192   :  { %v2120_v21 = vadd.f32 %v2117_v40, %v2035_v23  ;;  %v2121_v34 = vadd.f32 %v2118_v11, %v2036_v20  ;;  %v2122_v22 = vadd.f32 %v2119_v19, %v2037_v16 }
0x1194   :  { %9674 = vtanh.f32 %v2120_v21 }
0x1195   :  { %9676 = vtanh.f32 %v2121_v34  ;;  %v11407_v43 = vpop.f32.mrb[20].mxu1 }
0x1196   :  { %9678 = vtanh.f32 %v2122_v22  ;;  %v8679_v45 = vpop.f32.mrb[21].mxu1 }
0x119e   :  { %v9675_v52 = vpop.eup %9674 }
0x119f   :  { %v9677_v18 = vpop.eup %9676  ;;  %v2126_v39 = vmul.f32 %v11409_v41, %v9675_v52 }
0x11a0   :  { %v9679_v30 = vpop.eup %9678  ;;  %v2127_v33 = vmul.f32 %v11409_v41, %v9677_v18 }
0x11a1   :  { %v2129_v10 = vsel %vm261_vm1, %v2126_v39, 0.0  ;;  %v2128_v12 = vmul.f32 %v11409_v41, %v9679_v30 }
0x11a2   :  { %v2132_v31 = vsel %vm261_vm1, %v2127_v33, 0.0  ;;  %2130 = vadd.xlane.f32.xlu1 %v2129_v10 }
0x11a3   :  { %2133 = vadd.xlane.f32.xlu0 %v2132_v31  ;;  %v2135_v23 = vsel %vm433_vm2, %v2128_v12, 0.0 }
0x11a7   :  { %2136 = vadd.xlane.f32.xlu0 %v2135_v23 }
0x122f   :  { %v2131_v16 = vpop.xlane.xlu1 %2130 }
0x1230   :  { %v2134_v20 = vpop.xlane.xlu0 %2133 }
0x1231   :  { %v2139_v40 = vmax.f32 %v2131_v16, %v2134_v20 }
0x1234   :  { %v2137_v11 = vpop.xlane.xlu0 %2136 }
0x1235   :  { %v2138_v19 = vsel %vm1233_vm3, %v2137_v11, -inf }
0x1236   :  { %v2140_v21 = vmax.f32 %v2139_v40, %v2138_v19 }
0x1238   :  { %v2141_v34 = vrot.slane %v2140_v21, 4 }
0x123a   :  { %v2142_v22 = vmax.f32 %v2140_v21, %v2141_v34 }
0x123c   :  { %v2143_v45 = vrot.slane %v2142_v22, 2 }
0x123e   :  { %v2144_v52 = vmax.f32 %v2142_v22, %v2143_v45 }
0x1240   :  { %v2145_v18 = vrot.slane %v2144_v52, 1 }
0x1242   :  { %v2146_v39 = vmax.f32 %v2144_v52, %v2145_v18 }
0x1244   :  { %v2147_v33 = vsub.f32 %v2131_v16, %v2146_v39  ;;  %v2148_v10 = vsub.f32 %v2134_v20, %v2146_v39  ;;  %v2149_v30 = vsub.f32 %v2137_v11, %v2146_v39 }
0x1246   :  { %v2150_v31 = vmul.f32 1.442695, %v2147_v33  ;;  %v2152_v32 = vmul.f32 1.442695, %v2148_v10  ;;  %v2154_v12 = vmul.f32 1.442695, %v2149_v30 }
0x1248   :  { %9680 = vpow2.f32 %v2150_v31 }
0x1249   :  { %9682 = vpow2.f32 %v2152_v32 }
0x124a   :  { %9684 = vpow2.f32 %v2154_v12 }
0x1252   :  { %v9681_v23 = vpop.eup %9680 }
0x1253   :  { %v9683_v1 = vpop.eup %9682 }
0x1254   :  { %v9685_v2 = vpop.eup %9684  ;;  %v2156_v36 = vadd.f32 %v9683_v1, %v9681_v23 }
0x1255   :  { %v2157_v40 = vsel %vm1233_vm3, %v9685_v2, 0.0 }
0x1256   :  { %v2158_v19 = vadd.f32 %v2157_v40, %v2156_v36 }
0x1258   :  { %v2159_v21 = vrot.slane %v2158_v19, 4 }
0x125a   :  { %v2160_v34 = vadd.f32 %v2159_v21, %v2158_v19 }
0x125c   :  { %v2161_v22 = vrot.slane %v2160_v34, 2 }
0x125e   :  { %v2162_v45 = vadd.f32 %v2161_v22, %v2160_v34  ;;  %v12946_v22 = vmov 0.0  }
0x1260   :  { %v2163_v16 = vrot.slane %v2162_v45, 1 }
0x1262   :  { %v2164_v20 = vadd.f32 %v2163_v16, %v2162_v45  ;;  %v12947_v45 = vmov 0.0|0.0  }
0x1264   :  { %9686 = vrcp.f32 %v2164_v20 }
0x126e   :  { %v9687_v11 = vpop.eup %9686 }
0x126f   :  { %v2166_v52 = vmul.f32 %v9687_v11, %v9681_v23  ;;  %v2167_v18 = vmul.f32 %v9687_v11, %v9683_v1  ;;  %v2168_v39 = vmul.f32 %v9687_v11, %v9685_v2 }
0x1271   :  { %v2171_v32 = vmul.f32 %v2168_v39, %v11016_v0  ;;  %v2169_v33 = vmul.f32 %v2166_v52, %v11010_v57  ;;  %v2170_v10 = vmul.f32 %v2167_v18, %v11014_v61  ;;  %v2263_v52 = vmul.f32 %v11107_v53, %v11387_v37 }
0x1272   :  { %v2264_v18 = vmul.f32 %v11107_v53, %v11390_v62 }
0x1273   :  { %v2172_v30 = vsel %vm261_vm1, %v2169_v33, 0.0  ;;  %v2173_v36 = vsel %vm261_vm1, %v2170_v10, 0.0  ;;  %v2175_v12 = vsel %vm433_vm2, %v2171_v32, 0.0  ;;  %v2265_v10 = vmul.f32 %v11107_v53, %v11393_v8 }
0x1274   :  { %v2174_v31 = vadd.f32 %v2173_v36, %v2172_v30 }
0x1276   :  { %v2176_v40 = vadd.f32 %v2175_v12, %v2174_v31 }
0x1278   :  { %v2177_v19 = vrot.slane %v2176_v40, 4 }
0x127a   :  { %v2178_v21 = vadd.f32 %v2177_v19, %v2176_v40 }
0x127c   :  { %v2179_v34 = vrot.slane %v2178_v21, 2 }
0x127e   :  { %v2180_v23 = vadd.f32 %v2179_v34, %v2178_v21 }
0x1280   :  { %v2181_v1 = vrot.slane %v2180_v23, 1 }
0x1282   :  { %v2182_v2 = vadd.f32 %v2181_v1, %v2180_v23 }
0x1284   :  { %8667 = vmatmul.mubr.msk.f32.vlgmr.msra.gmra.mrb[24].mxu0 %vm261_vm1, %v2182_v2 }
0x1285   :  { %9280 = vmatpush3.bf16.msra.mxu0 %v11039_v35  ;;  %8688 = vmatprep.mubr.msk.f32.mxu0 %vm10517_vm0, %v12946_v22 }
0x1286   :  { %9281 = vmatprep.subr.bf16.mxu0 %v12947_v45 }
0x1289   :  { %9283 = vmatpush3.bf16.msra.mxu0 %v11042_v38 }
0x128a   :  { %9290 = vmatprep.subr.bf16.mxu0 %v12947_v45 }
0x1357   :  { %v2252_v16 = vpop.f32.mrb[24].mxu0 }
0x1358   :  { %v2259_v20 = vrot.slane %v2252_v16, %v11063_v48  ;;  %v8668_v11 = vpop.f32.mrb[25].mxu0  ;;  %v8018_v16 = vsel %vm11346_vm8, 1.0, %v12946_v22  ;;  %vm2362_vm8 = vcmp.eq.s32.totalorder %v11314_v49, 2 }
0x1359   :  { %v12948_v11 = vmax.f32 %v11287_v47, 0.0 }
0x135a   :  { %v2260_v39 = vadd.f32 %v2259_v20, %v11008_v56  ;;  %v2261_v32 = vadd.f32 %v2259_v20, %v11012_v60  ;;  %v2262_v33 = vadd.f32 %v2259_v20, %v11018_v3  ;;  %v8017_v20 = vsel %vm11353_vm10, 1.0, %v12946_v22 }
0x135c   :  { %v2266_v30 = vadd.f32 %v2263_v52, %v2260_v39  ;;  %v2267_v36 = vadd.f32 %v2264_v18, %v2261_v32  ;;  %v2268_v31 = vadd.f32 %v2265_v10, %v2262_v33  ;;  %v11456_v52 = vmax.f32 %v12948_v11, %v8018_v16 }
0x135d   :  { %v8019_v39 = vsel %vm11359_vm11, 1.0, %v12946_v22 }
0x135e   :  { %9688 = vtanh.f32 %v2266_v30  ;;  %v11467_v33 = vmax.f32 %v12950_v24, %v8019_v39  ;;  %vm2285_vm14 = vcmp.gt.f32.partialorder %v11456_v52, 0.0 }
0x135f   :  { %9690 = vtanh.f32 %v2267_v36 }
0x1360   :  { %9692 = vtanh.f32 %v2268_v31  ;;  %vm2286_vm4 = vcmp.gt.f32.partialorder %v11467_v33, 0.0 }
0x1368   :  { %v9689_v12 = vpop.eup %9688 }
0x1369   :  { %v9691_v40 = vpop.eup %9690  ;;  %v2272_v19 = vmul.f32 %v9689_v12, %v11114_v15 }
0x136a   :  { %v9693_v21 = vpop.eup %9692  ;;  %v2273_v34 = vmul.f32 %v9691_v40, %v11114_v15 }
0x136b   :  { %v2275_v23 = vsel %vm261_vm1, %v2272_v19, 0.0  ;;  %v2274_v1 = vmul.f32 %v9693_v21, %v11114_v15  ;;  %v12949_v15 = vmax.f32 %v11292_v50, 0.0 }
0x136c   :  { %v2278_v2 = vsel %vm261_vm1, %v2273_v34, 0.0  ;;  %2276 = vadd.xlane.f32.xlu1 %v2275_v23 }
0x136d   :  { %2279 = vadd.xlane.f32.xlu0 %v2278_v2  ;;  %v2281_v53 = vsel %vm433_vm2, %v2274_v1, 0.0  ;;  %v11460_v18 = vmax.f32 %v12949_v15, %v8017_v20 }
0x136f   :  { %vm2284_vm15 = vcmp.gt.f32.partialorder %v11460_v18, 0.0 }
0x1370   :  { %2282 = vadd.xlane.f32.xlu1 %v2281_v53 }
0x13f9   :  { %v2277_v32 = vpop.xlane.xlu1 %2276 }
0x13fa   :  { %v2280_v29 = vpop.xlane.xlu0 %2279  ;;  %v2287_v10 = vsel %vm2284_vm15, -1e+18, %v2277_v32 }
0x13fb   :  { %v2288_v47 = vsel %vm2285_vm14, -1e+18, %v2280_v29 }
0x13fc   :  { %v2291_v30 = vmax.f32 %v2287_v10, %v2288_v47 }
0x13fd   :  { %v2283_v50 = vpop.xlane.xlu1 %2282 }
0x13fe   :  { %v2289_v36 = vsel %vm2286_vm4, -1e+18, %v2283_v50 }
0x13ff   :  { %v2290_v25 = vsel %vm1233_vm3, %v2289_v36, -inf }
0x1400   :  { %v2292_v31 = vmax.f32 %v2291_v30, %v2290_v25 }
0x1402   :  { %v2293_v12 = vrot.slane %v2292_v31, 4 }
0x1404   :  { %v2294_v40 = vmax.f32 %v2292_v31, %v2293_v12 }
0x1406   :  { %v2295_v42 = vrot.slane %v2294_v40, 2 }
0x1408   :  { %v2296_v19 = vmax.f32 %v2294_v40, %v2295_v42 }
0x140a   :  { %v2297_v21 = vrot.slane %v2296_v19, 1 }
0x140c   :  { %v2298_v34 = vmax.f32 %v2296_v19, %v2297_v21 }
0x140e   :  { %vm2299_vm5 = vcmp.ge.f32.partialorder %v2287_v10, %v2298_v34  ;;  %vm2300_vm6 = vcmp.ge.f32.partialorder %v2288_v47, %v2298_v34  ;;  %vm2301_vm7 = vcmp.ge.f32.partialorder %v2289_v36, %v2298_v34  ;;  %v2315_v23 = vsub.f32 %v2287_v10, %v2298_v34 }
0x140f   :  { %v2302_v1 = vsel %vm2299_vm5, %v11131_v55, 17.0  ;;  %v2303_v2 = vsel %vm2300_vm6, %v11134_v58, 17.0  ;;  %v2304_v53 = vsel %vm2301_vm7, %v11137_v59, 17.0  ;;  %v2316_v16 = vsub.f32 %v2288_v47, %v2298_v34 }
0x1410   :  { %v2305_v20 = vsel %vm1233_vm3, %v2304_v53, inf  ;;  %v2306_v11 = vmin.f32 %v2302_v1, %v2303_v2  ;;  %v2317_v15 = vsub.f32 %v2289_v36, %v2298_v34  ;;  %v2318_v39 = vmul.f32 1.442695, %v2315_v23 }
0x1411   :  { %v2320_v32 = vmul.f32 1.442695, %v2316_v16 }
0x1412   :  { %v2307_v24 = vmin.f32 %v2306_v11, %v2305_v20  ;;  %9694 = vpow2.f32 %v2318_v39  ;;  %v2322_v29 = vmul.f32 1.442695, %v2317_v15 }
0x1413   :  { %9696 = vpow2.f32 %v2320_v32 }
0x1414   :  { %v2308_v50 = vrot.slane %v2307_v24, 4  ;;  %9698 = vpow2.f32 %v2322_v29 }
0x1416   :  { %v2309_v10 = vmin.f32 %v2307_v24, %v2308_v50 }
0x1418   :  { %v2310_v30 = vrot.slane %v2309_v10, 2 }
0x141a   :  { %v2311_v25 = vmin.f32 %v2309_v10, %v2310_v30 }
0x141c   :  { %v9695_v31 = vpop.eup %9694  ;;  %v2312_v12 = vrot.slane %v2311_v25, 1 }
0x141d   :  { %v9697_v40 = vpop.eup %9696 }
0x141e   :  { %v9699_v42 = vpop.eup %9698  ;;  %v2313_v47 = vmin.f32 %v2311_v25, %v2312_v12  ;;  %v2324_v19 = vadd.f32 %v9697_v40, %v9695_v31 }
0x141f   :  { %v2325_v21 = vsel %vm1233_vm3, %v9699_v42, 0.0 }
0x1420   :  { %v9549_v36 = vtrunc.f32 %v2313_v47  ;;  %v2326_v34 = vadd.f32 %v2325_v21, %v2324_v19 }
0x1422   :  { %v9550_v23 = vcvt.f32.s32 %v9549_v36  ;;  %v2327_v1 = vrot.slane %v2326_v34, 4 }
0x1424   :  { %v2328_v2 = vadd.f32 %v2327_v1, %v2326_v34  ;;  %vm2344_vm9 = vcmp.eq.s32.totalorder %v11058_v46, %v9550_v23  ;;  %vm2345_vm10 = vcmp.eq.s32.totalorder %v11128_v44, %v9550_v23  ;;  %vm2346_vm11 = vcmp.eq.s32.totalorder %v11123_v27, %v9550_v23 }
0x1425   :  { %v8031_v53 = vsel %vm2344_vm9, 1.0, %v12946_v22  ;;  %v8032_v16 = vsel %vm2345_vm10, 1.0, %v12946_v22  ;;  %v8033_v20 = vsel %vm2346_vm11, 1.0, %v12946_v22  ;;  %vm2340_vm14 = vcmp.lt.s32.totalorder %v9550_v23, 8 }
0x1426   :  { %v2329_v11 = vrot.slane %v2328_v2, 2  ;;  %v2370_v15 = vmul.f32 %v8031_v53, %v11149_v63  ;;  %v2371_v39 = vmul.f32 %v8032_v16, %v11152_v4  ;;  %v2372_v32 = vmul.f32 %v8033_v20, %v11155_v5 }
0x1427   :  { %v2341_v24 = vadd.s32 8, %v9550_v23  ;;  %v8027_v29 = vadd.s32 4294967288, %v9550_v23  ;;  %v11497_v50 = vsel %vm2362_vm8, %v9550_v23, %v11339_v13 }
0x1428   :  { %v2330_v10 = vadd.f32 %v2329_v11, %v2328_v2  ;;  %v2373_v30 = vadd.f32 %v2371_v39, %v2370_v15  ;;  %v2374_v25 = vsel %vm1233_vm3, %v2372_v32, 0.0 }
0x1429   :  { %v2343_v12 = vsel %vm2340_vm14, %v2341_v24, %v8027_v29 }
0x142a   :  { %v2331_v47 = vrot.slane %v2330_v10, 1  ;;  %v2375_v19 = vadd.f32 %v2374_v25, %v2373_v30  ;;  %vm2348_vm15 = vcmp.eq.s32.totalorder %v11128_v44, %v2343_v12  ;;  %vm2347_vm4 = vcmp.eq.s32.totalorder %v11058_v46, %v2343_v12 }
0x142b   :  { %vm11504_vm5 = vmor %vm2345_vm10, %vm2348_vm15  ;;  %vm2349_vm6 = vcmp.eq.s32.totalorder %v11123_v27, %v2343_v12 }
0x142c   :  { %v2332_v13 = vadd.f32 %v2331_v47, %v2330_v10  ;;  %v2376_v36 = vrot.slane %v2375_v19, 4  ;;  %vm11511_vm7 = vmor %vm2344_vm9, %vm2347_vm4 }
0x142d   :  { %vm11517_vm14 = vmor %vm2346_vm11, %vm2349_vm6  ;;  %vm12909_vm6 = vcmp.eq.s32.totalorder %v11314_v49, 3 }
0x142e   :  { %9700 = vrcp.f32 %v2332_v13  ;;  %v2377_v2 = vadd.f32 %v2376_v36, %v2375_v19 }
0x1430   :  { %v2378_v53 = vrot.slane %v2377_v2, 2 }
0x1432   :  { %v2379_v16 = vadd.f32 %v2378_v53, %v2377_v2 }
0x1434   :  { %v2380_v20 = vrot.slane %v2379_v16, 1 }
0x1436   :  { %v2381_v11 = vadd.f32 %v2380_v20, %v2379_v16 }
0x1438   :  { %v9701_v15 = vpop.eup %9700  ;;  %v2452_v39 = vadd.f32 %v11407_v43, %v2381_v11 }
0x1439   :  { %v2334_v32 = vmul.f32 %v9701_v15, %v9695_v31  ;;  %v2335_v24 = vmul.f32 %v9701_v15, %v9697_v40  ;;  %v2336_v29 = vmul.f32 %v9701_v15, %v9699_v42 }
0x143a   :  { %9702 = vtanh.f32 %v2452_v39  ;;  %v8035_v23 = vmul.f32 -1.442695, %v2452_v39 }
0x143b   :  { %v11548_v53 = vadd.f32 %v2335_v24, %v11390_v62  ;;  %v11551_v16 = vadd.f32 %v2336_v29, %v11393_v8 }
0x143c   :  { %9704 = vpow2.f32 %v8035_v23 }
0x1444   :  { %v9703_v10 = vpop.eup %9702 }
0x1445   :  { %2462 = vrot.lane.b32.xlu0 %v9703_v10, %s10519_s4  ;;  %v2478_v10 = vmul.f32 %v11396_v9, %v11548_v53 }
0x1446   :  { %v9705_v30 = vpop.eup %9704 }
0x1447   :  { %v2456_v25 = vadd.f32 1.0, %v9705_v30 }
0x1449   :  { %9706 = vrcp.f32 %v2456_v25 }
0x1453   :  { %v9707_v12 = vpop.eup %9706 }
0x1454   :  { %v2460_v13 = vmul.f32 %v9707_v12, %v11367_v17  ;;  %v11545_v17 = vadd.f32 %v2334_v32, %v11387_v37  ;;  %v2479_v37 = vmul.f32 %v11396_v9, %v11551_v16 }
0x1456   :  { %v2477_v39 = vmul.f32 %v11396_v9, %v11545_v17 }
0x14b7   :  { %v2463_v47 = vpop.permute.xlu0 %2462 }
0x14b8   :  { %v2465_v19 = vmul.f32 %v9707_v12, %v2463_v47 }
0x14ba   :  { %2467 = vrot.lane.b32.xlu1 %v2465_v19, %s10520_s19 }
0x152c   :  { %v2468_v43 = vpop.permute.xlu1 %2467 }
0x152d   :  { %v11525_v31 = vadd.f32 %v2468_v43, %v2460_v13 }
0x152f   :  { %9708 = vtanh.f32 %v11525_v31 }
0x1539   :  { %v9709_v40 = vpop.eup %9708 }
0x153a   :  { %2473 = vrot.lane.b32.xlu1 %v9709_v40, %s10519_s4 }
0x15ac   :  { %v2474_v42 = vpop.permute.xlu1 %2473 }
0x15ad   :  { %v2476_v36 = vmul.f32 %v9707_v12, %v2474_v42 }
0x15af   :  { %2481 = vrot.lane.b32.xlu0 %v2476_v36, %s10520_s19 }
0x1621   :  { %v2482_v2 = vpop.permute.xlu0 %2481 }
0x1622   :  { %8689 = vmatmul.mubr.msk.f32.vlgmr.msra.gmra.mrb[26].mxu0 %vm261_vm1, %v2482_v2 }
0x1623   :  { %9292 = vmatpush3.bf16.msra.mxu0 %v10972_v51  ;;  %8710 = vmatprep.mubr.msk.f32.mxu0 %vm10517_vm0, %v12946_v22 }
0x1624   :  { %9293 = vmatprep.subr.bf16.mxu0 %v12947_v45 }
0x1627   :  { %9295 = vmatpush3.bf16.msra.mxu0 %v10981_v54 }
0x1628   :  { %9302 = vmatprep.subr.bf16.mxu0 %v12947_v45 }
0x162a   :  { %8711 = vmatmul.mubr.msk.f32.vlgmr.msra.gmra.mrb[28].mxu0 %vm261_vm1, %v2482_v2 }
0x162b   :  { %9304 = vmatpush3.bf16.msra.mxu0 %v11080_v26  ;;  %8732 = vmatprep.mubr.msk.f32.mxu0 %vm10517_vm0, %v12946_v22 }
0x162c   :  { %9305 = vmatprep.subr.bf16.mxu0 %v12947_v45 }
0x162f   :  { %9307 = vmatpush3.bf16.msra.mxu0 %v11083_v28 }
0x1630   :  { %9314 = vmatprep.subr.bf16.mxu0 %v12947_v45 }
0x16f5   :  { %v2551_v20 = vpop.f32.mrb[26].mxu0 }
0x16f6   :  { %v2558_v11 = vrot.slane %v2551_v20, %v11063_v48  ;;  %v8690_v15 = vpop.f32.mrb[27].mxu0 }
0x16f8   :  { %v2559_v32 = vadd.f32 %v2558_v11, %v11010_v57  ;;  %v2560_v62 = vadd.f32 %v2558_v11, %v11014_v61  ;;  %v2561_v8 = vadd.f32 %v2558_v11, %v11016_v0 }
0x16fa   :  { %v2562_v24 = vadd.f32 %v2559_v32, %v2477_v39  ;;  %v2563_v29 = vadd.f32 %v2560_v62, %v2478_v10  ;;  %v2564_v23 = vadd.f32 %v2561_v8, %v2479_v37 }
0x16fc   :  { %9710 = vtanh.f32 %v2562_v24 }
0x16fd   :  { %9712 = vtanh.f32 %v2563_v29  ;;  %v11563_v30 = vpop.f32.mrb[28].mxu0 }
0x16fe   :  { %9714 = vtanh.f32 %v2564_v23  ;;  %v8712_v25 = vpop.f32.mrb[29].mxu0 }
0x1706   :  { %v9711_v12 = vpop.eup %9710 }
0x1707   :  { %v9713_v47 = vpop.eup %9712  ;;  %v2568_v19 = vmul.f32 %v11409_v41, %v9711_v12 }
0x1708   :  { %v9715_v13 = vpop.eup %9714  ;;  %v2569_v43 = vmul.f32 %v11409_v41, %v9713_v47 }
0x1709   :  { %v2571_v40 = vsel %vm261_vm1, %v2568_v19, 0.0  ;;  %v2570_v36 = vmul.f32 %v11409_v41, %v9715_v13 }
0x170a   :  { %v2574_v42 = vsel %vm261_vm1, %v2569_v43, 0.0  ;;  %2572 = vadd.xlane.f32.xlu1 %v2571_v40 }
0x170b   :  { %2575 = vadd.xlane.f32.xlu0 %v2574_v42  ;;  %v2577_v2 = vsel %vm433_vm2, %v2570_v36, 0.0 }
0x170f   :  { %2578 = vadd.xlane.f32.xlu0 %v2577_v2 }
0x1797   :  { %v2573_v11 = vpop.xlane.xlu1 %2572 }
0x1798   :  { %v2576_v20 = vpop.xlane.xlu0 %2575 }
0x1799   :  { %v2581_v15 = vmax.f32 %v2573_v11, %v2576_v20 }
0x179c   :  { %v2579_v39 = vpop.xlane.xlu0 %2578 }
0x179d   :  { %v2580_v10 = vsel %vm1233_vm3, %v2579_v39, -inf }
0x179e   :  { %v2582_v37 = vmax.f32 %v2581_v15, %v2580_v10 }
0x17a0   :  { %v2583_v32 = vrot.slane %v2582_v37, 4 }
0x17a2   :  { %v2584_v62 = vmax.f32 %v2582_v37, %v2583_v32 }
0x17a4   :  { %v2585_v8 = vrot.slane %v2584_v62, 2 }
0x17a6   :  { %v2586_v24 = vmax.f32 %v2584_v62, %v2585_v8 }
0x17a8   :  { %v2587_v29 = vrot.slane %v2586_v24, 1 }
0x17aa   :  { %v2588_v23 = vmax.f32 %v2586_v24, %v2587_v29 }
0x17ac   :  { %v2589_v25 = vsub.f32 %v2573_v11, %v2588_v23  ;;  %v2590_v12 = vsub.f32 %v2576_v20, %v2588_v23  ;;  %v2591_v47 = vsub.f32 %v2579_v39, %v2588_v23 }
0x17ae   :  { %v2592_v19 = vmul.f32 1.442695, %v2589_v25  ;;  %v2594_v13 = vmul.f32 1.442695, %v2590_v12  ;;  %v2596_v43 = vmul.f32 1.442695, %v2591_v47 }
0x17b0   :  { %9716 = vpow2.f32 %v2592_v19 }
0x17b1   :  { %9718 = vpow2.f32 %v2594_v13 }
0x17b2   :  { %9720 = vpow2.f32 %v2596_v43 }
0x17ba   :  { %v9717_v40 = vpop.eup %9716 }
0x17bb   :  { %v9719_v42 = vpop.eup %9718 }
0x17bc   :  { %v9721_v36 = vpop.eup %9720  ;;  %v2598_v2 = vadd.f32 %v9719_v42, %v9717_v40 }
0x17bd   :  { %v2599_v15 = vsel %vm1233_vm3, %v9721_v36, 0.0 }
0x17be   :  { %v2600_v10 = vadd.f32 %v2599_v15, %v2598_v2 }
0x17c0   :  { %v2601_v37 = vrot.slane %v2600_v10, 4 }
0x17c2   :  { %v2602_v32 = vadd.f32 %v2601_v37, %v2600_v10 }
0x17c4   :  { %v2603_v62 = vrot.slane %v2602_v32, 2 }
0x17c6   :  { %v2604_v8 = vadd.f32 %v2603_v62, %v2602_v32 }
0x17c8   :  { %v2605_v11 = vrot.slane %v2604_v8, 1 }
0x17ca   :  { %v2606_v20 = vadd.f32 %v2605_v11, %v2604_v8 }
0x17cc   :  { %9722 = vrcp.f32 %v2606_v20  ;;  %v11587_v20 = vld [vmem:[#allocation21] ss:$0 sm:$0xff] }
0x17d6   :  { %v9723_v39 = vpop.eup %9722 }
0x17d7   :  { %v2608_v24 = vmul.f32 %v9723_v39, %v9717_v40  ;;  %v2609_v29 = vmul.f32 %v9723_v39, %v9719_v42  ;;  %v2610_v23 = vmul.f32 %v9723_v39, %v9721_v36  ;;  %v2705_v39 = vmul.f32 %v11587_v20, %v11545_v17 }
0x17d9   :  { %v2613_v25 = vmul.f32 %v2610_v23, %v11016_v0  ;;  %v2611_v12 = vmul.f32 %v2608_v24, %v11010_v57  ;;  %v2612_v47 = vmul.f32 %v2609_v29, %v11014_v61  ;;  %v2706_v24 = vmul.f32 %v11587_v20, %v11548_v53 }
0x17db   :  { %v2614_v19 = vsel %vm261_vm1, %v2611_v12, 0.0  ;;  %v2615_v13 = vsel %vm261_vm1, %v2612_v47, 0.0  ;;  %v2617_v2 = vsel %vm433_vm2, %v2613_v25, 0.0  ;;  %v2707_v12 = vmul.f32 %v11587_v20, %v11551_v16 }
0x17dc   :  { %v2616_v43 = vadd.f32 %v2615_v13, %v2614_v19 }
0x17de   :  { %v2618_v15 = vadd.f32 %v2617_v2, %v2616_v43 }
0x17e0   :  { %v2619_v10 = vrot.slane %v2618_v15, 4 }
0x17e2   :  { %v2620_v37 = vadd.f32 %v2619_v10, %v2618_v15  ;;  %v11598_v15 = vld [vmem:[#allocation19] ss:$0 sm:$0xff] }
0x17e4   :  { %v2621_v32 = vrot.slane %v2620_v37, 2 }
0x17e6   :  { %v2622_v40 = vadd.f32 %v2621_v32, %v2620_v37 }
0x17e8   :  { %v2623_v42 = vrot.slane %v2622_v40, 1 }
0x17ea   :  { %v2624_v36 = vadd.f32 %v2623_v42, %v2622_v40 }
0x17ec   :  { %8700 = vmatmul.mubr.msk.f32.vlgmr.msra.gmra.mrb[22].mxu1 %vm261_vm1, %v2624_v36 }
0x17ed   :  { %9298 = vmatpush3.bf16.msra.mxu1 %v11039_v35  ;;  %8721 = vmatprep.mubr.msk.f32.mxu1 %vm10517_vm0, %v12946_v22 }
0x17ee   :  { %9299 = vmatprep.subr.bf16.mxu1 %v12947_v45 }
0x17f1   :  { %9301 = vmatpush3.bf16.msra.mxu1 %v11042_v38 }
0x17f2   :  { %9308 = vmatprep.subr.bf16.mxu1 %v12947_v45 }
0x18bf   :  { %v2694_v62 = vpop.f32.mrb[22].mxu1 }
0x18c0   :  { %v2701_v8 = vrot.slane %v2694_v62, %v11063_v48  ;;  %v8701_v11 = vpop.f32.mrb[23].mxu1 }
0x18c1   :  { %v8028_v11 = vsel %vm11511_vm7, 1.0, %v12946_v22 }
0x18c2   :  { %v2702_v29 = vadd.f32 %v2701_v8, %v11008_v56  ;;  %v2703_v23 = vadd.f32 %v2701_v8, %v11012_v60  ;;  %v2704_v25 = vadd.f32 %v2701_v8, %v11018_v3  ;;  %v8029_v8 = vsel %vm11504_vm5, 1.0, %v12946_v22 }
0x18c4   :  { %v2708_v47 = vadd.f32 %v2705_v39, %v2702_v29  ;;  %v2709_v19 = vadd.f32 %v2706_v24, %v2703_v23  ;;  %v2710_v13 = vadd.f32 %v2707_v12, %v2704_v25  ;;  %v11613_v39 = vmax.f32 %v11456_v52, %v8029_v8 }
0x18c5   :  { %v11616_v24 = vmax.f32 %v11460_v18, %v8028_v11  ;;  %v8030_v29 = vsel %vm11517_vm14, 1.0, %v12946_v22 }
0x18c6   :  { %9724 = vtanh.f32 %v2708_v47  ;;  %v11622_v25 = vmax.f32 %v11467_v33, %v8030_v29  ;;  %vm2727_vm9 = vcmp.gt.f32.partialorder %v11613_v39, 0.0 }
0x18c7   :  { %9726 = vtanh.f32 %v2709_v19  ;;  %vm2726_vm10 = vcmp.gt.f32.partialorder %v11616_v24, 0.0 }
0x18c8   :  { %9728 = vtanh.f32 %v2710_v13  ;;  %vm2728_vm11 = vcmp.gt.f32.partialorder %v11622_v25, 0.0 }
0x18d0   :  { %v9725_v43 = vpop.eup %9724 }
0x18d1   :  { %v9727_v2 = vpop.eup %9726  ;;  %v2714_v10 = vmul.f32 %v11598_v15, %v9725_v43 }
0x18d2   :  { %v9729_v37 = vpop.eup %9728  ;;  %v2715_v32 = vmul.f32 %v11598_v15, %v9727_v2 }
0x18d3   :  { %v2717_v40 = vsel %vm261_vm1, %v2714_v10, 0.0  ;;  %v2716_v42 = vmul.f32 %v11598_v15, %v9729_v37 }
0x18d4   :  { %v2720_v36 = vsel %vm261_vm1, %v2715_v32, 0.0  ;;  %2718 = vadd.xlane.f32.xlu1 %v2717_v40 }
0x18d5   :  { %2721 = vadd.xlane.f32.xlu0 %v2720_v36  ;;  %v2723_v62 = vsel %vm433_vm2, %v2716_v42, 0.0 }
0x18d8   :  { %2724 = vadd.xlane.f32.xlu1 %v2723_v62 }
0x1961   :  { %v2719_v23 = vpop.xlane.xlu1 %2718 }
0x1962   :  { %v2722_v21 = vpop.xlane.xlu0 %2721  ;;  %v2729_v12 = vsel %vm2726_vm10, -1e+18, %v2719_v23 }
0x1963   :  { %v2730_v34 = vsel %vm2727_vm9, -1e+18, %v2722_v21 }
0x1964   :  { %v2733_v18 = vmax.f32 %v2729_v12, %v2730_v34 }
0x1965   :  { %v2725_v52 = vpop.xlane.xlu1 %2724 }
0x1966   :  { %v2731_v47 = vsel %vm2728_vm11, -1e+18, %v2725_v52 }
0x1967   :  { %v2732_v19 = vsel %vm1233_vm3, %v2731_v47, -inf }
0x1968   :  { %v2734_v1 = vmax.f32 %v2733_v18, %v2732_v19 }
0x196a   :  { %v2735_v13 = vrot.slane %v2734_v1, 4 }
0x196c   :  { %v2736_v43 = vmax.f32 %v2734_v1, %v2735_v13 }
0x196e   :  { %v2737_v2 = vrot.slane %v2736_v43, 2 }
0x1970   :  { %v2738_v33 = vmax.f32 %v2736_v43, %v2737_v2 }
0x1972   :  { %v2739_v10 = vrot.slane %v2738_v33, 1 }
0x1974   :  { %v2740_v37 = vmax.f32 %v2738_v33, %v2739_v10 }
0x1976   :  { %vm2741_vm15 = vcmp.ge.f32.partialorder %v2729_v12, %v2740_v37  ;;  %vm2742_vm4 = vcmp.ge.f32.partialorder %v2730_v34, %v2740_v37  ;;  %vm2743_vm5 = vcmp.ge.f32.partialorder %v2731_v47, %v2740_v37  ;;  %v2757_v32 = vsub.f32 %v2729_v12, %v2740_v37 }
0x1977   :  { %v2744_v40 = vsel %vm2741_vm15, %v11131_v55, 17.0  ;;  %v2745_v42 = vsel %vm2742_vm4, %v11134_v58, 17.0  ;;  %v2746_v36 = vsel %vm2743_vm5, %v11137_v59, 17.0  ;;  %v2758_v62 = vsub.f32 %v2730_v34, %v2740_v37 }
0x1978   :  { %v2747_v8 = vsel %vm1233_vm3, %v2746_v36, inf  ;;  %v2748_v11 = vmin.f32 %v2744_v40, %v2745_v42  ;;  %v2759_v29 = vsub.f32 %v2731_v47, %v2740_v37  ;;  %v2760_v23 = vmul.f32 1.442695, %v2757_v32 }
0x1979   :  { %v2762_v21 = vmul.f32 1.442695, %v2758_v62 }
0x197a   :  { %v2749_v52 = vmin.f32 %v2748_v11, %v2747_v8  ;;  %9730 = vpow2.f32 %v2760_v23  ;;  %v2764_v18 = vmul.f32 1.442695, %v2759_v29 }
0x197b   :  { %9732 = vpow2.f32 %v2762_v21 }
0x197c   :  { %v2750_v19 = vrot.slane %v2749_v52, 4  ;;  %9734 = vpow2.f32 %v2764_v18 }
0x197e   :  { %v2751_v12 = vmin.f32 %v2749_v52, %v2750_v19 }
0x1980   :  { %v2752_v1 = vrot.slane %v2751_v12, 2 }
0x1982   :  { %v2753_v13 = vmin.f32 %v2751_v12, %v2752_v1 }
0x1984   :  { %v9731_v43 = vpop.eup %9730  ;;  %v2754_v2 = vrot.slane %v2753_v13, 1 }
0x1985   :  { %v9733_v33 = vpop.eup %9732 }
0x1986   :  { %v9735_v10 = vpop.eup %9734  ;;  %v2755_v34 = vmin.f32 %v2753_v13, %v2754_v2  ;;  %v2766_v6 = vadd.f32 %v9733_v33, %v9731_v43 }
0x1987   :  { %v2767_v40 = vsel %vm1233_vm3, %v9735_v10, 0.0 }
0x1988   :  { %v9551_v47 = vtrunc.f32 %v2755_v34  ;;  %v2768_v37 = vadd.f32 %v2767_v40, %v2766_v6 }
0x198a   :  { %v9552_v32 = vcvt.f32.s32 %v9551_v47  ;;  %v2769_v42 = vrot.slane %v2768_v37, 4 }
0x198c   :  { %v2770_v36 = vadd.f32 %v2769_v42, %v2768_v37  ;;  %vm2786_vm7 = vcmp.eq.s32.totalorder %v11058_v46, %v9552_v32  ;;  %vm2787_vm14 = vcmp.eq.s32.totalorder %v11128_v44, %v9552_v32  ;;  %vm2788_vm9 = vcmp.eq.s32.totalorder %v11123_v27, %v9552_v32 }
0x198d   :  { %v8042_v62 = vsel %vm2786_vm7, 1.0, %v12946_v22  ;;  %v8043_v8 = vsel %vm2787_vm14, 1.0, %v12946_v22  ;;  %v8044_v6 = vsel %vm2788_vm9, 1.0, %v12946_v22  ;;  %vm2782_vm10 = vcmp.lt.s32.totalorder %v9552_v32, 8 }
0x198e   :  { %v2771_v11 = vrot.slane %v2770_v36, 2  ;;  %v2812_v29 = vmul.f32 %v8042_v62, %v11149_v63  ;;  %v2813_v23 = vmul.f32 %v8043_v8, %v11152_v4  ;;  %v2814_v21 = vmul.f32 %v8044_v6, %v11155_v5 }
0x198f   :  { %v2783_v52 = vadd.s32 8, %v9552_v32  ;;  %v8038_v18 = vadd.s32 4294967288, %v9552_v32  ;;  %v11652_v19 = vsel %vm12909_vm6, %v9552_v32, %v11497_v50 }
0x1990   :  { %v2772_v12 = vadd.f32 %v2771_v11, %v2770_v36  ;;  %v2815_v1 = vadd.f32 %v2813_v23, %v2812_v29  ;;  %v2816_v13 = vsel %vm1233_vm3, %v2814_v21, 0.0 }
0x1991   :  { %v2785_v2 = vsel %vm2782_vm10, %v2783_v52, %v8038_v18 }
0x1992   :  { %v2773_v34 = vrot.slane %v2772_v12, 1  ;;  %v2817_v40 = vadd.f32 %v2816_v13, %v2815_v1  ;;  %vm2790_vm11 = vcmp.eq.s32.totalorder %v11128_v44, %v2785_v2  ;;  %vm2789_vm15 = vcmp.eq.s32.totalorder %v11058_v46, %v2785_v2 }
0x1993   :  { %vm11659_vm4 = vmor %vm2787_vm14, %vm2790_vm11  ;;  %vm2791_vm5 = vcmp.eq.s32.totalorder %v11123_v27, %v2785_v2 }
0x1994   :  { %v2774_v50 = vadd.f32 %v2773_v34, %v2772_v12  ;;  %v2818_v37 = vrot.slane %v2817_v40, 4  ;;  %vm11666_vm6 = vmor %vm2786_vm7, %vm2789_vm15 }
0x1995   :  { %vm11672_vm10 = vmor %vm2788_vm9, %vm2791_vm5 }
0x1996   :  { %9736 = vrcp.f32 %v2774_v50  ;;  %v2819_v62 = vadd.f32 %v2818_v37, %v2817_v40 }
0x1998   :  { %v2820_v8 = vrot.slane %v2819_v62, 2 }
0x199a   :  { %v2821_v6 = vadd.f32 %v2820_v8, %v2819_v62 }
0x199c   :  { %v2822_v11 = vrot.slane %v2821_v6, 1 }
0x199e   :  { %v2823_v29 = vadd.f32 %v2822_v11, %v2821_v6 }
0x19a0   :  { %v9737_v23 = vpop.eup %9736  ;;  %v2894_v21 = vadd.f32 %v11563_v30, %v2823_v29 }
0x19a1   :  { %v2776_v52 = vmul.f32 %v9737_v23, %v9731_v43  ;;  %v2777_v18 = vmul.f32 %v9737_v23, %v9733_v33  ;;  %v2778_v12 = vmul.f32 %v9737_v23, %v9735_v10 }
0x19a2   :  { %9738 = vtanh.f32 %v2894_v21  ;;  %v8046_v32 = vmul.f32 -1.442695, %v2894_v21 }
0x19a3   :  { %v11703_v6 = vadd.f32 %v2777_v18, %v11548_v53  ;;  %v11706_v11 = vadd.f32 %v2778_v12, %v11551_v16 }
0x19a4   :  { %9740 = vpow2.f32 %v8046_v32 }
0x19a5   :  { %v2920_v32 = vmul.f32 %v11396_v9, %v11703_v6 }
0x19ac   :  { %v9739_v1 = vpop.eup %9738 }
0x19ad   :  { %2904 = vrot.lane.b32.xlu0 %v9739_v1, %s10519_s4 }
0x19ae   :  { %v9741_v13 = vpop.eup %9740 }
0x19af   :  { %v2898_v2 = vadd.f32 1.0, %v9741_v13 }
0x19b1   :  { %9742 = vrcp.f32 %v2898_v2 }
0x19bb   :  { %v9743_v34 = vpop.eup %9742 }
0x19bc   :  { %v2902_v37 = vmul.f32 %v9743_v34, %v11525_v31  ;;  %v11700_v31 = vadd.f32 %v2776_v52, %v11545_v17  ;;  %v2921_v17 = vmul.f32 %v11396_v9, %v11706_v11 }
0x19be   :  { %v2919_v1 = vmul.f32 %v11396_v9, %v11700_v31 }
0x1a1f   :  { %v2905_v40 = vpop.permute.xlu0 %2904 }
0x1a20   :  { %v2907_v50 = vmul.f32 %v9743_v34, %v2905_v40 }
0x1a22   :  { %2909 = vrot.lane.b32.xlu1 %v2907_v50, %s10520_s19 }
0x1a94   :  { %v2910_v30 = vpop.permute.xlu1 %2909 }
0x1a95   :  { %v11680_v43 = vadd.f32 %v2910_v30, %v2902_v37 }
0x1a97   :  { %9744 = vtanh.f32 %v11680_v43 }
0x1aa1   :  { %v9745_v33 = vpop.eup %9744 }
0x1aa2   :  { %2915 = vrot.lane.b32.xlu1 %v9745_v33, %s10519_s4 }
0x1b14   :  { %v2916_v10 = vpop.permute.xlu1 %2915 }
0x1b15   :  { %v2918_v62 = vmul.f32 %v9743_v34, %v2916_v10 }
0x1b17   :  { %2923 = vrot.lane.b32.xlu0 %v2918_v62, %s10520_s19 }
0x1b89   :  { %v2924_v8 = vpop.permute.xlu0 %2923 }
0x1b8a   :  { %8722 = vmatmul.mubr.msk.f32.vlgmr.msra.gmra.mrb[24].mxu1 %vm261_vm1, %v2924_v8 }
0x1b8b   :  { %9310 = vmatpush3.bf16.msra.mxu1 %v10972_v51  ;;  %8743 = vmatprep.mubr.msk.f32.mxu1 %vm10517_vm0, %v12946_v22 }
0x1b8c   :  { %9311 = vmatprep.subr.bf16.mxu1 %v12947_v45 }
0x1b8f   :  { %9313 = vmatpush3.bf16.msra.mxu1 %v10981_v54 }
0x1b90   :  { %9320 = vmatprep.subr.bf16.mxu1 %v12947_v45 }
0x1b92   :  { %8744 = vmatmul.mubr.msk.f32.vlgmr.msra.gmra.mrb[26].mxu1 %vm261_vm1, %v2924_v8 }
0x1b93   :  { %9322 = vmatpush3.bf16.msra.mxu1 %v11080_v26  ;;  %8765 = vmatprep.mubr.msk.f32.mxu1 %vm10517_vm0, %v12946_v22 }
0x1b94   :  { %9323 = vmatprep.subr.bf16.mxu1 %v12947_v45 }
0x1b97   :  { %9325 = vmatpush3.bf16.msra.mxu1 %v11083_v28 }
0x1b98   :  { %9332 = vmatprep.subr.bf16.mxu1 %v12947_v45 }
0x1c5d   :  { %v2993_v29 = vpop.f32.mrb[24].mxu1 }
0x1c5e   :  { %v3000_v23 = vrot.slane %v2993_v29, %v11063_v48  ;;  %v8723_v21 = vpop.f32.mrb[25].mxu1 }
0x1c60   :  { %v3001_v52 = vadd.f32 %v3000_v23, %v11010_v57  ;;  %v3002_v53 = vadd.f32 %v3000_v23, %v11014_v61  ;;  %v3003_v16 = vadd.f32 %v3000_v23, %v11016_v0 }
0x1c62   :  { %v3004_v18 = vadd.f32 %v3001_v52, %v2919_v1  ;;  %v3005_v12 = vadd.f32 %v3002_v53, %v2920_v32  ;;  %v3006_v13 = vadd.f32 %v3003_v16, %v2921_v17 }
0x1c64   :  { %9746 = vtanh.f32 %v3004_v18 }
0x1c65   :  { %9748 = vtanh.f32 %v3005_v12  ;;  %v11718_v2 = vpop.f32.mrb[26].mxu1 }
0x1c66   :  { %9750 = vtanh.f32 %v3006_v13  ;;  %v8745_v34 = vpop.f32.mrb[27].mxu1 }
0x1c6e   :  { %v9747_v40 = vpop.eup %9746 }
0x1c6f   :  { %v9749_v50 = vpop.eup %9748  ;;  %v3010_v37 = vmul.f32 %v11409_v41, %v9747_v40 }
0x1c70   :  { %v9751_v9 = vpop.eup %9750  ;;  %v3011_v30 = vmul.f32 %v11409_v41, %v9749_v50 }
0x1c71   :  { %v3013_v33 = vsel %vm261_vm1, %v3010_v37, 0.0  ;;  %v3012_v62 = vmul.f32 %v11409_v41, %v9751_v9 }
0x1c72   :  { %v3016_v10 = vsel %vm261_vm1, %v3011_v30, 0.0  ;;  %3014 = vadd.xlane.f32.xlu1 %v3013_v33 }
0x1c73   :  { %3017 = vadd.xlane.f32.xlu0 %v3016_v10  ;;  %v3019_v8 = vsel %vm433_vm2, %v3012_v62, 0.0 }
0x1c77   :  { %3020 = vadd.xlane.f32.xlu0 %v3019_v8 }
0x1cff   :  { %v3015_v23 = vpop.xlane.xlu1 %3014 }
0x1d00   :  { %v3018_v29 = vpop.xlane.xlu0 %3017 }
0x1d01   :  { %v3023_v21 = vmax.f32 %v3015_v23, %v3018_v29 }
0x1d04   :  { %v3021_v1 = vpop.xlane.xlu0 %3020 }
0x1d05   :  { %v3022_v32 = vsel %vm1233_vm3, %v3021_v1, -inf }
0x1d06   :  { %v3024_v17 = vmax.f32 %v3023_v21, %v3022_v32 }
0x1d08   :  { %v3025_v52 = vrot.slane %v3024_v17, 4 }
0x1d0a   :  { %v3026_v53 = vmax.f32 %v3024_v17, %v3025_v52 }
0x1d0c   :  { %v3027_v16 = vrot.slane %v3026_v53, 2 }
0x1d0e   :  { %v3028_v18 = vmax.f32 %v3026_v53, %v3027_v16 }
0x1d10   :  { %v3029_v12 = vrot.slane %v3028_v18, 1 }
0x1d12   :  { %v3030_v13 = vmax.f32 %v3028_v18, %v3029_v12 }
0x1d14   :  { %v3031_v34 = vsub.f32 %v3015_v23, %v3030_v13  ;;  %v3032_v40 = vsub.f32 %v3018_v29, %v3030_v13  ;;  %v3033_v41 = vsub.f32 %v3021_v1, %v3030_v13 }
0x1d16   :  { %v3034_v50 = vmul.f32 1.442695, %v3031_v34  ;;  %v3036_v37 = vmul.f32 1.442695, %v3032_v40  ;;  %v3038_v9 = vmul.f32 1.442695, %v3033_v41 }
0x1d18   :  { %9752 = vpow2.f32 %v3034_v50 }
0x1d19   :  { %9754 = vpow2.f32 %v3036_v37 }
0x1d1a   :  { %9756 = vpow2.f32 %v3038_v9 }
0x1d22   :  { %v9753_v30 = vpop.eup %9752 }
0x1d23   :  { %v9755_v33 = vpop.eup %9754 }
0x1d24   :  { %v9757_v10 = vpop.eup %9756  ;;  %v3040_v62 = vadd.f32 %v9755_v33, %v9753_v30 }
0x1d25   :  { %v3041_v8 = vsel %vm1233_vm3, %v9757_v10, 0.0 }
0x1d26   :  { %v3042_v21 = vadd.f32 %v3041_v8, %v3040_v62 }
0x1d28   :  { %v3043_v32 = vrot.slane %v3042_v21, 4 }
0x1d2a   :  { %v3044_v17 = vadd.f32 %v3043_v32, %v3042_v21 }
0x1d2c   :  { %v3045_v52 = vrot.slane %v3044_v17, 2 }
0x1d2e   :  { %v3046_v53 = vadd.f32 %v3045_v52, %v3044_v17 }
0x1d30   :  { %v3047_v23 = vrot.slane %v3046_v53, 1 }
0x1d32   :  { %v3048_v29 = vadd.f32 %v3047_v23, %v3046_v53  ;;  %v3147_v23 = vmul.f32 %v11587_v20, %v11700_v31 }
0x1d34   :  { %9758 = vrcp.f32 %v3048_v29  ;;  %v3148_v29 = vmul.f32 %v11587_v20, %v11703_v6 }
0x1d3e   :  { %v9759_v1 = vpop.eup %9758 }
0x1d3f   :  { %v3050_v16 = vmul.f32 %v9759_v1, %v9753_v30  ;;  %v3051_v18 = vmul.f32 %v9759_v1, %v9755_v33  ;;  %v3052_v12 = vmul.f32 %v9759_v1, %v9757_v10 }
0x1d41   :  { %v3055_v13 = vmul.f32 %v3052_v12, %v11016_v0  ;;  %v3053_v34 = vmul.f32 %v3050_v16, %v11010_v57  ;;  %v3054_v40 = vmul.f32 %v3051_v18, %v11014_v61  ;;  %v3149_v12 = vmul.f32 %v11587_v20, %v11706_v11 }
0x1d43   :  { %v3056_v41 = vsel %vm261_vm1, %v3053_v34, 0.0  ;;  %v3057_v50 = vsel %vm261_vm1, %v3054_v40, 0.0  ;;  %v3059_v9 = vsel %vm433_vm2, %v3055_v13, 0.0 }
0x1d44   :  { %v3058_v37 = vadd.f32 %v3057_v50, %v3056_v41 }
0x1d46   :  { %v3060_v62 = vadd.f32 %v3059_v9, %v3058_v37 }
0x1d48   :  { %v3061_v8 = vrot.slane %v3060_v62, 4 }
0x1d4a   :  { %v3062_v21 = vadd.f32 %v3061_v8, %v3060_v62 }
0x1d4c   :  { %v3063_v32 = vrot.slane %v3062_v21, 2 }
0x1d4e   :  { %v3064_v30 = vadd.f32 %v3063_v32, %v3062_v21 }
0x1d50   :  { %v3065_v33 = vrot.slane %v3064_v30, 1 }
0x1d52   :  { %v3066_v10 = vadd.f32 %v3065_v33, %v3064_v30  ;;  %v8040_v33 = vsel %vm11659_vm4, 1.0, %v12946_v22  ;;  %vm12910_vm4 = vcmp.eq.s32.totalorder %v11314_v49, 4 }
0x1d54   :  { %8733 = vmatmul.mubr.msk.f32.vlgmr.msra.gmra.mrb[30].mxu0 %vm261_vm1, %v3066_v10  ;;  %v8039_v10 = vsel %vm11666_vm6, 1.0, %v12946_v22 }
0x1d55   :  { %9316 = vmatpush3.bf16.msra.mxu0 %v11039_v35  ;;  %8754 = vmatprep.mubr.msk.f32.mxu0 %vm10517_vm0, %v12946_v22 }
0x1d56   :  { %9317 = vmatprep.subr.bf16.mxu0 %v12947_v45 }
0x1d59   :  { %9319 = vmatpush3.bf16.msra.mxu0 %v11042_v38 }
0x1d5a   :  { %9326 = vmatprep.subr.bf16.mxu0 %v12947_v45 }
0x1e27   :  { %v3136_v17 = vpop.f32.mrb[30].mxu0 }
0x1e28   :  { %v3143_v52 = vrot.slane %v3136_v17, %v11063_v48  ;;  %v8734_v53 = vpop.f32.mrb[31].mxu0  ;;  %v11764_v17 = vmax.f32 %v11613_v39, %v8040_v33 }
0x1e29   :  { %v8041_v53 = vsel %vm11672_vm10, 1.0, %v12946_v22 }
0x1e2a   :  { %v3144_v1 = vadd.f32 %v3143_v52, %v11008_v56  ;;  %v3145_v16 = vadd.f32 %v3143_v52, %v11012_v60  ;;  %v3146_v18 = vadd.f32 %v3143_v52, %v11018_v3  ;;  %v11767_v52 = vmax.f32 %v11616_v24, %v8039_v10 }
0x1e2b   :  { %vm3169_vm7 = vcmp.gt.f32.partialorder %v11764_v17, 0.0 }
0x1e2c   :  { %v3150_v13 = vadd.f32 %v3147_v23, %v3144_v1  ;;  %v3151_v34 = vadd.f32 %v3148_v29, %v3145_v16  ;;  %v3152_v40 = vadd.f32 %v3149_v12, %v3146_v18  ;;  %v11773_v29 = vmax.f32 %v11622_v25, %v8041_v53 }
0x1e2d   :  { %vm3168_vm14 = vcmp.gt.f32.partialorder %v11767_v52, 0.0 }
0x1e2e   :  { %9760 = vtanh.f32 %v3150_v13  ;;  %vm3170_vm6 = vcmp.gt.f32.partialorder %v11773_v29, 0.0 }
0x1e2f   :  { %9762 = vtanh.f32 %v3151_v34 }
0x1e30   :  { %9764 = vtanh.f32 %v3152_v40 }
0x1e38   :  { %v9761_v41 = vpop.eup %9760 }
0x1e39   :  { %v9763_v50 = vpop.eup %9762  ;;  %v3156_v37 = vmul.f32 %v11598_v15, %v9761_v41 }
0x1e3a   :  { %v9765_v9 = vpop.eup %9764  ;;  %v3157_v62 = vmul.f32 %v11598_v15, %v9763_v50 }
0x1e3b   :  { %v3159_v8 = vsel %vm261_vm1, %v3156_v37, 0.0  ;;  %v3158_v21 = vmul.f32 %v11598_v15, %v9765_v9 }
0x1e3c   :  { %v3162_v32 = vsel %vm261_vm1, %v3157_v62, 0.0  ;;  %3160 = vadd.xlane.f32.xlu1 %v3159_v8 }
0x1e3d   :  { %3163 = vadd.xlane.f32.xlu0 %v3162_v32  ;;  %v3165_v30 = vsel %vm433_vm2, %v3158_v21, 0.0 }
0x1e40   :  { %3166 = vadd.xlane.f32.xlu1 %v3165_v30 }
0x1ec9   :  { %v3161_v23 = vpop.xlane.xlu1 %3160 }
0x1eca   :  { %v3164_v47 = vpop.xlane.xlu0 %3163  ;;  %v3171_v1 = vsel %vm3168_vm14, -1e+18, %v3161_v23 }
0x1ecb   :  { %v3172_v42 = vsel %vm3169_vm7, -1e+18, %v3164_v47 }
0x1ecc   :  { %v3175_v24 = vmax.f32 %v3171_v1, %v3172_v42 }
0x1ecd   :  { %v3167_v39 = vpop.xlane.xlu1 %3166 }
0x1ece   :  { %v3173_v16 = vsel %vm3170_vm6, -1e+18, %v3167_v39 }
0x1ecf   :  { %v3174_v18 = vsel %vm1233_vm3, %v3173_v16, -inf }
0x1ed0   :  { %v3176_v36 = vmax.f32 %v3175_v24, %v3174_v18 }
0x1ed2   :  { %v3177_v12 = vrot.slane %v3176_v36, 4 }
0x1ed4   :  { %v3178_v13 = vmax.f32 %v3176_v36, %v3177_v12 }
0x1ed6   :  { %v3179_v34 = vrot.slane %v3178_v13, 2 }
0x1ed8   :  { %v3180_v25 = vmax.f32 %v3178_v13, %v3179_v34 }
0x1eda   :  { %v3181_v40 = vrot.slane %v3180_v25, 1 }
0x1edc   :  { %v3182_v41 = vmax.f32 %v3180_v25, %v3181_v40 }
0x1ede   :  { %vm3183_vm9 = vcmp.ge.f32.partialorder %v3171_v1, %v3182_v41  ;;  %vm3184_vm11 = vcmp.ge.f32.partialorder %v3172_v42, %v3182_v41  ;;  %vm3185_vm15 = vcmp.ge.f32.partialorder %v3173_v16, %v3182_v41  ;;  %v3199_v50 = vsub.f32 %v3171_v1, %v3182_v41 }
0x1edf   :  { %v3186_v37 = vsel %vm3183_vm9, %v11131_v55, 17.0  ;;  %v3187_v9 = vsel %vm3184_vm11, %v11134_v58, 17.0  ;;  %v3188_v62 = vsel %vm3185_vm15, %v11137_v59, 17.0  ;;  %v3200_v8 = vsub.f32 %v3172_v42, %v3182_v41 }
0x1ee0   :  { %v3189_v21 = vsel %vm1233_vm3, %v3188_v62, inf  ;;  %v3190_v32 = vmin.f32 %v3186_v37, %v3187_v9  ;;  %v3201_v30 = vsub.f32 %v3173_v16, %v3182_v41  ;;  %v3202_v33 = vmul.f32 1.442695, %v3199_v50 }
0x1ee1   :  { %v3204_v10 = vmul.f32 1.442695, %v3200_v8 }
0x1ee2   :  { %v3191_v53 = vmin.f32 %v3190_v32, %v3189_v21  ;;  %9766 = vpow2.f32 %v3202_v33  ;;  %v3206_v23 = vmul.f32 1.442695, %v3201_v30 }
0x1ee3   :  { %9768 = vpow2.f32 %v3204_v10 }
0x1ee4   :  { %v3192_v47 = vrot.slane %v3191_v53, 4  ;;  %9770 = vpow2.f32 %v3206_v23 }
0x1ee6   :  { %v3193_v1 = vmin.f32 %v3191_v53, %v3192_v47 }
0x1ee8   :  { %v3194_v39 = vrot.slane %v3193_v1, 2 }
0x1eea   :  { %v3195_v24 = vmin.f32 %v3193_v1, %v3194_v39 }
0x1eec   :  { %v9767_v18 = vpop.eup %9766  ;;  %v3196_v36 = vrot.slane %v3195_v24, 1 }
0x1eed   :  { %v9769_v12 = vpop.eup %9768 }
0x1eee   :  { %v9771_v13 = vpop.eup %9770  ;;  %v3197_v42 = vmin.f32 %v3195_v24, %v3196_v36  ;;  %v3208_v34 = vadd.f32 %v9769_v12, %v9767_v18 }
0x1eef   :  { %v3209_v25 = vsel %vm1233_vm3, %v9771_v13, 0.0 }
0x1ef0   :  { %v9553_v16 = vtrunc.f32 %v3197_v42  ;;  %v3210_v40 = vadd.f32 %v3209_v25, %v3208_v34 }
0x1ef2   :  { %v9554_v41 = vcvt.f32.s32 %v9553_v16  ;;  %v3211_v50 = vrot.slane %v3210_v40, 4 }
0x1ef4   :  { %v3212_v37 = vadd.f32 %v3211_v50, %v3210_v40  ;;  %vm3228_vm5 = vcmp.eq.s32.totalorder %v11058_v46, %v9554_v41  ;;  %vm3229_vm10 = vcmp.eq.s32.totalorder %v11128_v44, %v9554_v41  ;;  %vm3230_vm7 = vcmp.eq.s32.totalorder %v11123_v27, %v9554_v41 }
0x1ef5   :  { %v8053_v9 = vsel %vm3228_vm5, 1.0, %v12946_v22  ;;  %v8054_v62 = vsel %vm3229_vm10, 1.0, %v12946_v22  ;;  %v8055_v8 = vsel %vm3230_vm7, 1.0, %v12946_v22  ;;  %vm3224_vm14 = vcmp.lt.s32.totalorder %v9554_v41, 8 }
0x1ef6   :  { %v3213_v21 = vrot.slane %v3212_v37, 2  ;;  %v3254_v32 = vmul.f32 %v8053_v9, %v11149_v63  ;;  %v3255_v30 = vmul.f32 %v8054_v62, %v11152_v4  ;;  %v3256_v33 = vmul.f32 %v8055_v8, %v11155_v5 }
0x1ef7   :  { %v3225_v10 = vadd.s32 8, %v9554_v41  ;;  %v8049_v53 = vadd.s32 4294967288, %v9554_v41  ;;  %v11803_v23 = vsel %vm12910_vm4, %v9554_v41, %v11652_v19 }
0x1ef8   :  { %v3214_v47 = vadd.f32 %v3213_v21, %v3212_v37  ;;  %v3257_v1 = vadd.f32 %v3255_v30, %v3254_v32  ;;  %v3258_v39 = vsel %vm1233_vm3, %v3256_v33, 0.0 }
0x1ef9   :  { %v3227_v24 = vsel %vm3224_vm14, %v3225_v10, %v8049_v53 }
0x1efa   :  { %v3215_v36 = vrot.slane %v3214_v47, 1  ;;  %v3259_v42 = vadd.f32 %v3258_v39, %v3257_v1  ;;  %vm3232_vm6 = vcmp.eq.s32.totalorder %v11128_v44, %v3227_v24  ;;  %vm3231_vm9 = vcmp.eq.s32.totalorder %v11058_v46, %v3227_v24 }
0x1efb   :  { %vm11810_vm11 = vmor %vm3229_vm10, %vm3232_vm6  ;;  %vm3233_vm15 = vcmp.eq.s32.totalorder %v11123_v27, %v3227_v24 }
0x1efc   :  { %v3216_v19 = vadd.f32 %v3215_v36, %v3214_v47  ;;  %v3260_v25 = vrot.slane %v3259_v42, 4  ;;  %vm11817_vm4 = vmor %vm3228_vm5, %vm3231_vm9 }
0x1efd   :  { %vm11823_vm14 = vmor %vm3230_vm7, %vm3233_vm15 }
0x1efe   :  { %9772 = vrcp.f32 %v3216_v19  ;;  %v3261_v50 = vadd.f32 %v3260_v25, %v3259_v42 }
0x1f00   :  { %v3262_v37 = vrot.slane %v3261_v50, 2 }
0x1f02   :  { %v3263_v9 = vadd.f32 %v3262_v37, %v3261_v50 }
0x1f04   :  { %v3264_v62 = vrot.slane %v3263_v9, 1 }
0x1f06   :  { %v3265_v8 = vadd.f32 %v3264_v62, %v3263_v9 }
0x1f08   :  { %v9773_v21 = vpop.eup %9772  ;;  %v3336_v32 = vadd.f32 %v11718_v2, %v3265_v8 }
0x1f09   :  { %v3218_v30 = vmul.f32 %v9773_v21, %v9767_v18  ;;  %v3219_v33 = vmul.f32 %v9773_v21, %v9769_v12  ;;  %v3220_v10 = vmul.f32 %v9773_v21, %v9771_v13  ;;  %v11860_v21 = vld [vmem:[#allocation16] ss:$0 sm:$0xff] }
0x1f0a   :  { %9774 = vtanh.f32 %v3336_v32  ;;  %v8057_v41 = vmul.f32 -1.442695, %v3336_v32 }
0x1f0b   :  { %v11854_v50 = vadd.f32 %v3219_v33, %v11703_v6  ;;  %v11857_v37 = vadd.f32 %v3220_v10, %v11706_v11 }
0x1f0c   :  { %9776 = vpow2.f32 %v8057_v41 }
0x1f14   :  { %v9775_v53 = vpop.eup %9774 }
0x1f15   :  { %3346 = vrot.lane.b32.xlu0 %v9775_v53, %s10519_s4  ;;  %v3362_v53 = vmul.f32 %v11860_v21, %v11854_v50 }
0x1f16   :  { %v9777_v47 = vpop.eup %9776 }
0x1f17   :  { %v3340_v1 = vadd.f32 1.0, %v9777_v47 }
0x1f19   :  { %9778 = vrcp.f32 %v3340_v1 }
0x1f23   :  { %v9779_v39 = vpop.eup %9778 }
0x1f24   :  { %v3344_v42 = vmul.f32 %v9779_v39, %v11680_v43  ;;  %v11851_v43 = vadd.f32 %v3218_v30, %v11700_v31  ;;  %v3363_v31 = vmul.f32 %v11860_v21, %v11857_v37 }
0x1f26   :  { %v3361_v32 = vmul.f32 %v11860_v21, %v11851_v43 }
0x1f87   :  { %v3347_v24 = vpop.permute.xlu0 %3346 }
0x1f88   :  { %v3349_v36 = vmul.f32 %v9779_v39, %v3347_v24 }
0x1f8a   :  { %3351 = vrot.lane.b32.xlu1 %v3349_v36, %s10520_s19  ;;  %v11873_v36 = vld [vmem:[#allocation15] ss:$0 sm:$0xff] }
0x1ffc   :  { %v3352_v2 = vpop.permute.xlu1 %3351 }
0x1ffd   :  { %v11831_v18 = vadd.f32 %v3352_v2, %v3344_v42 }
0x1fff   :  { %9780 = vtanh.f32 %v11831_v18 }
0x2009   :  { %v9781_v12 = vpop.eup %9780 }
0x200a   :  { %3357 = vrot.lane.b32.xlu1 %v9781_v12, %s10519_s4 }
0x207c   :  { %v3358_v13 = vpop.permute.xlu1 %3357 }
0x207d   :  { %v3360_v19 = vmul.f32 %v9779_v39, %v3358_v13 }
0x207f   :  { %3365 = vrot.lane.b32.xlu0 %v3360_v19, %s10520_s19 }
0x20f1   :  { %v3366_v25 = vpop.permute.xlu0 %3365 }
0x20f2   :  { %8755 = vmatmul.mubr.msk.f32.vlgmr.msra.gmra.mrb[32].mxu0 %vm261_vm1, %v3366_v25 }
0x20f3   :  { %9328 = vmatpush3.bf16.msra.mxu0 %v10972_v51  ;;  %8776 = vmatprep.mubr.msk.f32.mxu0 %vm10517_vm0, %v12946_v22 }
0x20f4   :  { %9329 = vmatprep.subr.bf16.mxu0 %v12947_v45 }
0x20f7   :  { %9331 = vmatpush3.bf16.msra.mxu0 %v10981_v54 }
0x20f8   :  { %9338 = vmatprep.subr.bf16.mxu0 %v12947_v45 }
0x20fa   :  { %8777 = vmatmul.mubr.msk.f32.vlgmr.msra.gmra.mrb[34].mxu0 %vm261_vm1, %v3366_v25 }
0x20fb   :  { %9340 = vmatpush3.bf16.msra.mxu0 %v11080_v26  ;;  %8798 = vmatprep.mubr.msk.f32.mxu0 %vm10517_vm0, %v12946_v22 }
0x20fc   :  { %9341 = vmatprep.subr.bf16.mxu0 %v12947_v45 }
0x20ff   :  { %9343 = vmatpush3.bf16.msra.mxu0 %v11083_v28 }
0x2100   :  { %9350 = vmatprep.subr.bf16.mxu0 %v12947_v45 }
0x21c5   :  { %v3435_v9 = vpop.f32.mrb[32].mxu0 }
0x21c6   :  { %v3442_v62 = vrot.slane %v3435_v9, %v11063_v48  ;;  %v8756_v8 = vpop.f32.mrb[33].mxu0 }
0x21c8   :  { %v3443_v6 = vadd.f32 %v3442_v62, %v11010_v57  ;;  %v3444_v11 = vadd.f32 %v3442_v62, %v11014_v61  ;;  %v3445_v30 = vadd.f32 %v3442_v62, %v11016_v0 }
0x21ca   :  { %v3446_v33 = vadd.f32 %v3443_v6, %v3361_v32  ;;  %v3447_v10 = vadd.f32 %v3444_v11, %v3362_v53  ;;  %v3448_v41 = vadd.f32 %v3445_v30, %v3363_v31 }
0x21cc   :  { %9782 = vtanh.f32 %v3446_v33 }
0x21cd   :  { %9784 = vtanh.f32 %v3447_v10  ;;  %v11871_v47 = vpop.f32.mrb[34].mxu0 }
0x21ce   :  { %9786 = vtanh.f32 %v3448_v41  ;;  %v8778_v1 = vpop.f32.mrb[35].mxu0 }
0x21d6   :  { %v9783_v39 = vpop.eup %9782 }
0x21d7   :  { %v9785_v24 = vpop.eup %9784  ;;  %v3452_v42 = vmul.f32 %v11873_v36, %v9783_v39 }
0x21d8   :  { %v9787_v2 = vpop.eup %9786  ;;  %v3453_v12 = vmul.f32 %v11873_v36, %v9785_v24 }
0x21d9   :  { %v3455_v13 = vsel %vm261_vm1, %v3452_v42, 0.0  ;;  %v3454_v25 = vmul.f32 %v11873_v36, %v9787_v2 }
0x21da   :  { %v3458_v19 = vsel %vm261_vm1, %v3453_v12, 0.0  ;;  %3456 = vadd.xlane.f32.xlu1 %v3455_v13 }
0x21db   :  { %3459 = vadd.xlane.f32.xlu0 %v3458_v19  ;;  %v3461_v9 = vsel %vm433_vm2, %v3454_v25, 0.0 }
0x21df   :  { %3462 = vadd.xlane.f32.xlu0 %v3461_v9 }
0x2267   :  { %v3457_v8 = vpop.xlane.xlu1 %3456 }
0x2268   :  { %v3460_v62 = vpop.xlane.xlu0 %3459 }
0x2269   :  { %v3465_v32 = vmax.f32 %v3457_v8, %v3460_v62 }
0x226c   :  { %v3463_v53 = vpop.xlane.xlu0 %3462 }
0x226d   :  { %v3464_v31 = vsel %vm1233_vm3, %v3463_v53, -inf }
0x226e   :  { %v3466_v6 = vmax.f32 %v3465_v32, %v3464_v31 }
0x2270   :  { %v3467_v11 = vrot.slane %v3466_v6, 4 }
0x2272   :  { %v3468_v30 = vmax.f32 %v3466_v6, %v3467_v11 }
0x2274   :  { %v3469_v33 = vrot.slane %v3468_v30, 2 }
0x2276   :  { %v3470_v10 = vmax.f32 %v3468_v30, %v3469_v33 }
0x2278   :  { %v3471_v41 = vrot.slane %v3470_v10, 1 }
0x227a   :  { %v3472_v1 = vmax.f32 %v3470_v10, %v3471_v41 }
0x227c   :  { %v3473_v39 = vsub.f32 %v3457_v8, %v3472_v1  ;;  %v3474_v24 = vsub.f32 %v3460_v62, %v3472_v1  ;;  %v3475_v42 = vsub.f32 %v3463_v53, %v3472_v1 }
0x227e   :  { %v3476_v2 = vmul.f32 1.442695, %v3473_v39  ;;  %v3478_v12 = vmul.f32 1.442695, %v3474_v24  ;;  %v3480_v13 = vmul.f32 1.442695, %v3475_v42 }
0x2280   :  { %9788 = vpow2.f32 %v3476_v2 }
0x2281   :  { %9790 = vpow2.f32 %v3478_v12 }
0x2282   :  { %9792 = vpow2.f32 %v3480_v13 }
0x228a   :  { %v9789_v19 = vpop.eup %9788 }
0x228b   :  { %v9791_v25 = vpop.eup %9790 }
0x228c   :  { %v9793_v9 = vpop.eup %9792  ;;  %v3482_v7 = vadd.f32 %v9791_v25, %v9789_v19 }
0x228d   :  { %v3483_v32 = vsel %vm1233_vm3, %v9793_v9, 0.0 }
0x228e   :  { %v3484_v31 = vadd.f32 %v3483_v32, %v3482_v7 }
0x2290   :  { %v3485_v6 = vrot.slane %v3484_v31, 4 }
0x2292   :  { %v3486_v11 = vadd.f32 %v3485_v6, %v3484_v31 }
0x2294   :  { %v3487_v30 = vrot.slane %v3486_v11, 2 }
0x2296   :  { %v3488_v33 = vadd.f32 %v3487_v30, %v3486_v11 }
0x2298   :  { %v3489_v8 = vrot.slane %v3488_v33, 1 }
0x229a   :  { %v3490_v62 = vadd.f32 %v3489_v8, %v3488_v33 }
0x229c   :  { %9794 = vrcp.f32 %v3490_v62  ;;  %v3589_v62 = vmul.f32 %v11587_v20, %v11851_v43 }
0x22a6   :  { %v9795_v53 = vpop.eup %9794 }
0x22a7   :  { %v3492_v10 = vmul.f32 %v9795_v53, %v9789_v19  ;;  %v3493_v41 = vmul.f32 %v9795_v53, %v9791_v25  ;;  %v3494_v1 = vmul.f32 %v9795_v53, %v9793_v9  ;;  %v3590_v53 = vmul.f32 %v11587_v20, %v11854_v50 }
0x22a9   :  { %v3497_v39 = vmul.f32 %v3494_v1, %v11016_v0  ;;  %v3495_v24 = vmul.f32 %v3492_v10, %v11010_v57  ;;  %v3496_v42 = vmul.f32 %v3493_v41, %v11014_v61 }
0x22ab   :  { %v3498_v2 = vsel %vm261_vm1, %v3495_v24, 0.0  ;;  %v3499_v7 = vsel %vm261_vm1, %v3496_v42, 0.0  ;;  %v3501_v13 = vsel %vm433_vm2, %v3497_v39, 0.0  ;;  %v3591_v39 = vmul.f32 %v11587_v20, %v11857_v37 }
0x22ac   :  { %v3500_v12 = vadd.f32 %v3499_v7, %v3498_v2 }
0x22ae   :  { %v3502_v32 = vadd.f32 %v3501_v13, %v3500_v12 }
0x22b0   :  { %v3503_v31 = vrot.slane %v3502_v32, 4 }
0x22b2   :  { %v3504_v6 = vadd.f32 %v3503_v31, %v3502_v32 }
0x22b4   :  { %v3505_v11 = vrot.slane %v3504_v6, 2 }
0x22b6   :  { %v3506_v19 = vadd.f32 %v3505_v11, %v3504_v6 }
0x22b8   :  { %v3507_v25 = vrot.slane %v3506_v19, 1 }
0x22ba   :  { %v3508_v9 = vadd.f32 %v3507_v25, %v3506_v19  ;;  %v8051_v25 = vsel %vm11810_vm11, 1.0, %v12946_v22  ;;  %vm12912_vm11 = vcmp.eq.s32.totalorder %v11314_v49, 5 }
0x22bc   :  { %8766 = vmatmul.mubr.msk.f32.vlgmr.msra.gmra.mrb[28].mxu1 %vm261_vm1, %v3508_v9  ;;  %v8050_v9 = vsel %vm11817_vm4, 1.0, %v12946_v22 }
0x22bd   :  { %9334 = vmatpush3.bf16.msra.mxu1 %v11039_v35  ;;  %8787 = vmatprep.mubr.msk.f32.mxu1 %vm10517_vm0, %v12946_v22 }
0x22be   :  { %9335 = vmatprep.subr.bf16.mxu1 %v12947_v45 }
0x22c1   :  { %9337 = vmatpush3.bf16.msra.mxu1 %v11042_v38 }
0x22c2   :  { %9344 = vmatprep.subr.bf16.mxu1 %v12947_v45 }
0x238f   :  { %v3578_v30 = vpop.f32.mrb[28].mxu1 }
0x2390   :  { %v3585_v33 = vrot.slane %v3578_v30, %v11063_v48  ;;  %v8767_v8 = vpop.f32.mrb[29].mxu1  ;;  %v11919_v30 = vmax.f32 %v11764_v17, %v8051_v25 }
0x2392   :  { %v3586_v10 = vadd.f32 %v3585_v33, %v11008_v56  ;;  %v3587_v41 = vadd.f32 %v3585_v33, %v11012_v60  ;;  %v3588_v1 = vadd.f32 %v3585_v33, %v11018_v3  ;;  %v8052_v33 = vsel %vm11823_vm14, 1.0, %v12946_v22 }
0x2393   :  { %vm3611_vm5 = vcmp.gt.f32.partialorder %v11919_v30, 0.0 }
0x2394   :  { %v3592_v24 = vadd.f32 %v3589_v62, %v3586_v10  ;;  %v3593_v42 = vadd.f32 %v3590_v53, %v3587_v41  ;;  %v3594_v2 = vadd.f32 %v3591_v39, %v3588_v1  ;;  %v11928_v62 = vmax.f32 %v11773_v29, %v8052_v33 }
0x2396   :  { %9796 = vtanh.f32 %v3592_v24  ;;  %vm3612_vm4 = vcmp.gt.f32.partialorder %v11928_v62, 0.0 }
0x2397   :  { %9798 = vtanh.f32 %v3593_v42 }
0x2398   :  { %9800 = vtanh.f32 %v3594_v2 }
0x23a0   :  { %v9797_v7 = vpop.eup %9796 }
0x23a1   :  { %v9799_v12 = vpop.eup %9798  ;;  %v3598_v13 = vmul.f32 %v11598_v15, %v9797_v7 }
0x23a2   :  { %v9801_v32 = vpop.eup %9800  ;;  %v3599_v31 = vmul.f32 %v11598_v15, %v9799_v12 }
0x23a3   :  { %v3601_v6 = vsel %vm261_vm1, %v3598_v13, 0.0  ;;  %v3600_v11 = vmul.f32 %v11598_v15, %v9801_v32  ;;  %v11922_v15 = vmax.f32 %v11767_v52, %v8050_v9 }
0x23a4   :  { %v3604_v19 = vsel %vm261_vm1, %v3599_v31, 0.0  ;;  %3602 = vadd.xlane.f32.xlu1 %v3601_v6 }
0x23a5   :  { %3605 = vadd.xlane.f32.xlu0 %v3604_v19  ;;  %v3607_v20 = vsel %vm433_vm2, %v3600_v11, 0.0  ;;  %vm3610_vm10 = vcmp.gt.f32.partialorder %v11922_v15, 0.0 }
0x23a8   :  { %3608 = vadd.xlane.f32.xlu1 %v3607_v20 }
0x2431   :  { %v3603_v8 = vpop.xlane.xlu1 %3602 }
0x2432   :  { %v3606_v34 = vpop.xlane.xlu0 %3605  ;;  %v3613_v53 = vsel %vm3610_vm10, -1e+18, %v3603_v8 }
0x2433   :  { %v3614_v16 = vsel %vm3611_vm5, -1e+18, %v3606_v34 }
0x2434   :  { %v3617_v52 = vmax.f32 %v3613_v53, %v3614_v16 }
0x2435   :  { %v3609_v17 = vpop.xlane.xlu1 %3608 }
0x2436   :  { %v3615_v10 = vsel %vm3612_vm4, -1e+18, %v3609_v17 }
0x2437   :  { %v3616_v41 = vsel %vm1233_vm3, %v3615_v10, -inf }
0x2438   :  { %v3618_v40 = vmax.f32 %v3617_v52, %v3616_v41 }
0x243a   :  { %v3619_v1 = vrot.slane %v3618_v40, 4 }
0x243c   :  { %v3620_v39 = vmax.f32 %v3618_v40, %v3619_v1 }
0x243e   :  { %v3621_v24 = vrot.slane %v3620_v39, 2 }
0x2440   :  { %v3622_v29 = vmax.f32 %v3620_v39, %v3621_v24 }
0x2442   :  { %v3623_v42 = vrot.slane %v3622_v29, 1 }
0x2444   :  { %v3624_v2 = vmax.f32 %v3622_v29, %v3623_v42 }
0x2446   :  { %vm3625_vm7 = vcmp.ge.f32.partialorder %v3613_v53, %v3624_v2  ;;  %vm3626_vm6 = vcmp.ge.f32.partialorder %v3614_v16, %v3624_v2  ;;  %vm3627_vm9 = vcmp.ge.f32.partialorder %v3615_v10, %v3624_v2  ;;  %v3641_v7 = vsub.f32 %v3613_v53, %v3624_v2 }
0x2447   :  { %v3628_v12 = vsel %vm3625_vm7, %v11131_v55, 17.0  ;;  %v3629_v13 = vsel %vm3626_vm6, %v11134_v58, 17.0  ;;  %v3630_v32 = vsel %vm3627_vm9, %v11137_v59, 17.0  ;;  %v3642_v31 = vsub.f32 %v3614_v16, %v3624_v2 }
0x2448   :  { %v3631_v6 = vsel %vm1233_vm3, %v3630_v32, inf  ;;  %v3632_v11 = vmin.f32 %v3628_v12, %v3629_v13  ;;  %v3643_v19 = vsub.f32 %v3615_v10, %v3624_v2  ;;  %v3644_v20 = vmul.f32 1.442695, %v3641_v7 }
0x2449   :  { %v3646_v25 = vmul.f32 1.442695, %v3642_v31 }
0x244a   :  { %v3633_v9 = vmin.f32 %v3632_v11, %v3631_v6  ;;  %9802 = vpow2.f32 %v3644_v20  ;;  %v3648_v33 = vmul.f32 1.442695, %v3643_v19 }
0x244b   :  { %9804 = vpow2.f32 %v3646_v25 }
0x244c   :  { %v3634_v8 = vrot.slane %v3633_v9, 4  ;;  %9806 = vpow2.f32 %v3648_v33 }
0x244e   :  { %v3635_v34 = vmin.f32 %v3633_v9, %v3634_v8 }
0x2450   :  { %v3636_v53 = vrot.slane %v3635_v34, 2 }
0x2452   :  { %v3637_v17 = vmin.f32 %v3635_v34, %v3636_v53 }
0x2454   :  { %v9803_v52 = vpop.eup %9802  ;;  %v3638_v41 = vrot.slane %v3637_v17, 1 }
0x2455   :  { %v9805_v40 = vpop.eup %9804 }
0x2456   :  { %v9807_v1 = vpop.eup %9806  ;;  %v3639_v16 = vmin.f32 %v3637_v17, %v3638_v41  ;;  %v3650_v39 = vadd.f32 %v9805_v40, %v9803_v52 }
0x2457   :  { %v3651_v24 = vsel %vm1233_vm3, %v9807_v1, 0.0 }
0x2458   :  { %v9555_v10 = vtrunc.f32 %v3639_v16  ;;  %v3652_v29 = vadd.f32 %v3651_v24, %v3650_v39 }
0x245a   :  { %v9556_v42 = vcvt.f32.s32 %v9555_v10  ;;  %v3653_v2 = vrot.slane %v3652_v29, 4 }
0x245c   :  { %v3654_v7 = vadd.f32 %v3653_v2, %v3652_v29  ;;  %vm3670_vm15 = vcmp.eq.s32.totalorder %v11058_v46, %v9556_v42  ;;  %vm3671_vm14 = vcmp.eq.s32.totalorder %v11128_v44, %v9556_v42  ;;  %vm3672_vm5 = vcmp.eq.s32.totalorder %v11123_v27, %v9556_v42 }
0x245d   :  { %v8064_v12 = vsel %vm3670_vm15, 1.0, %v12946_v22  ;;  %v8065_v13 = vsel %vm3671_vm14, 1.0, %v12946_v22  ;;  %v8066_v32 = vsel %vm3672_vm5, 1.0, %v12946_v22  ;;  %vm3666_vm10 = vcmp.lt.s32.totalorder %v9556_v42, 8 }
0x245e   :  { %v3655_v31 = vrot.slane %v3654_v7, 2  ;;  %v3696_v6 = vmul.f32 %v8064_v12, %v11149_v63  ;;  %v3697_v11 = vmul.f32 %v8065_v13, %v11152_v4  ;;  %v3698_v19 = vmul.f32 %v8066_v32, %v11155_v5 }
0x245f   :  { %v3667_v20 = vadd.s32 8, %v9556_v42  ;;  %v8060_v25 = vadd.s32 4294967288, %v9556_v42  ;;  %v11958_v9 = vsel %vm12912_vm11, %v9556_v42, %v11803_v23 }
0x2460   :  { %v3656_v33 = vadd.f32 %v3655_v31, %v3654_v7  ;;  %v3699_v8 = vadd.f32 %v3697_v11, %v3696_v6  ;;  %v3700_v34 = vsel %vm1233_vm3, %v3698_v19, 0.0 }
0x2461   :  { %v3669_v53 = vsel %vm3666_vm10, %v3667_v20, %v8060_v25 }
0x2462   :  { %v3657_v17 = vrot.slane %v3656_v33, 1  ;;  %v3701_v41 = vadd.f32 %v3700_v34, %v3699_v8  ;;  %vm3674_vm4 = vcmp.eq.s32.totalorder %v11128_v44, %v3669_v53  ;;  %vm3673_vm7 = vcmp.eq.s32.totalorder %v11058_v46, %v3669_v53 }
0x2463   :  { %vm11965_vm6 = vmor %vm3671_vm14, %vm3674_vm4  ;;  %vm3675_vm9 = vcmp.eq.s32.totalorder %v11123_v27, %v3669_v53 }
0x2464   :  { %v3658_v23 = vadd.f32 %v3657_v17, %v3656_v33  ;;  %v3702_v39 = vrot.slane %v3701_v41, 4  ;;  %vm11972_vm11 = vmor %vm3670_vm15, %vm3673_vm7 }
0x2465   :  { %vm11978_vm10 = vmor %vm3672_vm5, %vm3675_vm9 }
0x2466   :  { %9808 = vrcp.f32 %v3658_v23  ;;  %v3703_v29 = vadd.f32 %v3702_v39, %v3701_v41 }
0x2468   :  { %v3704_v2 = vrot.slane %v3703_v29, 2 }
0x246a   :  { %v3705_v7 = vadd.f32 %v3704_v2, %v3703_v29 }
0x246c   :  { %v3706_v12 = vrot.slane %v3705_v7, 1 }
0x246e   :  { %v3707_v13 = vadd.f32 %v3706_v12, %v3705_v7 }
0x2470   :  { %v9809_v32 = vpop.eup %9808  ;;  %v3778_v31 = vadd.f32 %v11871_v47, %v3707_v13 }
0x2471   :  { %v3660_v6 = vmul.f32 %v9809_v32, %v9803_v52  ;;  %v3661_v11 = vmul.f32 %v9809_v32, %v9805_v40  ;;  %v3662_v19 = vmul.f32 %v9809_v32, %v9807_v1 }
0x2472   :  { %9810 = vtanh.f32 %v3778_v31  ;;  %v8068_v42 = vmul.f32 -1.442695, %v3778_v31 }
0x2473   :  { %v12009_v39 = vadd.f32 %v3661_v11, %v11854_v50  ;;  %v12012_v29 = vadd.f32 %v3662_v19, %v11857_v37 }
0x2474   :  { %9812 = vpow2.f32 %v8068_v42 }
0x2475   :  { %v3804_v32 = vmul.f32 %v11860_v21, %v12009_v39 }
0x247c   :  { %v9811_v20 = vpop.eup %9810 }
0x247d   :  { %3788 = vrot.lane.b32.xlu0 %v9811_v20, %s10519_s4 }
0x247e   :  { %v9813_v25 = vpop.eup %9812 }
0x247f   :  { %v3782_v33 = vadd.f32 1.0, %v9813_v25 }
0x2481   :  { %9814 = vrcp.f32 %v3782_v33 }
0x248b   :  { %v9815_v8 = vpop.eup %9814 }
0x248c   :  { %v3786_v17 = vmul.f32 %v9815_v8, %v11831_v18  ;;  %v12006_v18 = vadd.f32 %v3660_v6, %v11851_v43  ;;  %v3805_v43 = vmul.f32 %v11860_v21, %v12012_v29 }
0x248e   :  { %v3803_v13 = vmul.f32 %v11860_v21, %v12006_v18 }
0x24ef   :  { %v3789_v34 = vpop.permute.xlu0 %3788 }
0x24f0   :  { %v3791_v53 = vmul.f32 %v9815_v8, %v3789_v34 }
0x24f2   :  { %3793 = vrot.lane.b32.xlu1 %v3791_v53, %s10520_s19 }
0x2564   :  { %v3794_v47 = vpop.permute.xlu1 %3793 }
0x2565   :  { %v11986_v52 = vadd.f32 %v3794_v47, %v3786_v17 }
0x2567   :  { %9816 = vtanh.f32 %v11986_v52 }
0x2571   :  { %v9817_v40 = vpop.eup %9816 }
0x2572   :  { %3799 = vrot.lane.b32.xlu1 %v9817_v40, %s10519_s4 }
0x25e4   :  { %v3800_v1 = vpop.permute.xlu1 %3799 }
0x25e5   :  { %v3802_v41 = vmul.f32 %v9815_v8, %v3800_v1 }
0x25e7   :  { %3807 = vrot.lane.b32.xlu0 %v3802_v41, %s10520_s19 }
0x2659   :  { %v3808_v23 = vpop.permute.xlu0 %3807 }
0x265a   :  { %8788 = vmatmul.mubr.msk.f32.vlgmr.msra.gmra.mrb[30].mxu1 %vm261_vm1, %v3808_v23 }
0x265b   :  { %9346 = vmatpush3.bf16.msra.mxu1 %v10972_v51  ;;  %8809 = vmatprep.mubr.msk.f32.mxu1 %vm10517_vm0, %v12946_v22 }
0x265c   :  { %9347 = vmatprep.subr.bf16.mxu1 %v12947_v45 }
0x265f   :  { %9349 = vmatpush3.bf16.msra.mxu1 %v10981_v54 }
0x2660   :  { %9356 = vmatprep.subr.bf16.mxu1 %v12947_v45 }
0x2662   :  { %8810 = vmatmul.mubr.msk.f32.vlgmr.msra.gmra.mrb[32].mxu1 %vm261_vm1, %v3808_v23 }
0x2663   :  { %9358 = vmatpush3.bf16.msra.mxu1 %v11080_v26  ;;  %8831 = vmatprep.mubr.msk.f32.mxu1 %vm10517_vm0, %v12946_v22 }
0x2664   :  { %9359 = vmatprep.subr.bf16.mxu1 %v12947_v45 }
0x2667   :  { %9361 = vmatpush3.bf16.msra.mxu1 %v11083_v28 }
0x2668   :  { %9368 = vmatprep.subr.bf16.mxu1 %v12947_v45 }
0x272d   :  { %v3877_v2 = vpop.f32.mrb[30].mxu1 }
0x272e   :  { %v3884_v7 = vrot.slane %v3877_v2, %v11063_v48  ;;  %v8789_v12 = vpop.f32.mrb[31].mxu1 }
0x2730   :  { %v3885_v31 = vadd.f32 %v3884_v7, %v11010_v57  ;;  %v3886_v50 = vadd.f32 %v3884_v7, %v11014_v61  ;;  %v3887_v37 = vadd.f32 %v3884_v7, %v11016_v0 }
0x2732   :  { %v3888_v6 = vadd.f32 %v3885_v31, %v3803_v13  ;;  %v3889_v11 = vadd.f32 %v3886_v50, %v3804_v32  ;;  %v3890_v19 = vadd.f32 %v3887_v37, %v3805_v43 }
0x2734   :  { %9818 = vtanh.f32 %v3888_v6 }
0x2735   :  { %9820 = vtanh.f32 %v3889_v11  ;;  %v12024_v20 = vpop.f32.mrb[32].mxu1 }
0x2736   :  { %9822 = vtanh.f32 %v3890_v19  ;;  %v8811_v42 = vpop.f32.mrb[33].mxu1 }
0x273e   :  { %v9819_v25 = vpop.eup %9818 }
0x273f   :  { %v9821_v33 = vpop.eup %9820  ;;  %v3894_v8 = vmul.f32 %v11873_v36, %v9819_v25 }
0x2740   :  { %v9823_v34 = vpop.eup %9822  ;;  %v3895_v53 = vmul.f32 %v11873_v36, %v9821_v33 }
0x2741   :  { %v3897_v17 = vsel %vm261_vm1, %v3894_v8, 0.0  ;;  %v3896_v40 = vmul.f32 %v11873_v36, %v9823_v34 }
0x2742   :  { %v3900_v47 = vsel %vm261_vm1, %v3895_v53, 0.0  ;;  %3898 = vadd.xlane.f32.xlu1 %v3897_v17 }
0x2743   :  { %3901 = vadd.xlane.f32.xlu0 %v3900_v47  ;;  %v3903_v1 = vsel %vm433_vm2, %v3896_v40, 0.0 }
0x2747   :  { %3904 = vadd.xlane.f32.xlu0 %v3903_v1 }
0x27cf   :  { %v3899_v23 = vpop.xlane.xlu1 %3898 }
0x27d0   :  { %v3902_v41 = vpop.xlane.xlu0 %3901 }
0x27d1   :  { %v3907_v2 = vmax.f32 %v3899_v23, %v3902_v41 }
0x27d4   :  { %v3905_v7 = vpop.xlane.xlu0 %3904 }
0x27d5   :  { %v3906_v12 = vsel %vm1233_vm3, %v3905_v7, -inf }
0x27d6   :  { %v3908_v13 = vmax.f32 %v3907_v2, %v3906_v12 }
0x27d8   :  { %v3909_v32 = vrot.slane %v3908_v13, 4 }
0x27da   :  { %v3910_v43 = vmax.f32 %v3908_v13, %v3909_v32 }
0x27dc   :  { %v3911_v31 = vrot.slane %v3910_v43, 2 }
0x27de   :  { %v3912_v50 = vmax.f32 %v3910_v43, %v3911_v31 }
0x27e0   :  { %v3913_v37 = vrot.slane %v3912_v50, 1 }
0x27e2   :  { %v3914_v6 = vmax.f32 %v3912_v50, %v3913_v37 }
0x27e4   :  { %v3915_v11 = vsub.f32 %v3899_v23, %v3914_v6  ;;  %v3916_v19 = vsub.f32 %v3902_v41, %v3914_v6  ;;  %v3917_v42 = vsub.f32 %v3905_v7, %v3914_v6 }
0x27e6   :  { %v3918_v25 = vmul.f32 1.442695, %v3915_v11  ;;  %v3920_v33 = vmul.f32 1.442695, %v3916_v19  ;;  %v3922_v8 = vmul.f32 1.442695, %v3917_v42 }
0x27e8   :  { %9824 = vpow2.f32 %v3918_v25 }
0x27e9   :  { %9826 = vpow2.f32 %v3920_v33 }
0x27ea   :  { %9828 = vpow2.f32 %v3922_v8 }
0x27f2   :  { %v9825_v34 = vpop.eup %9824 }
0x27f3   :  { %v9827_v53 = vpop.eup %9826 }
0x27f4   :  { %v9829_v17 = vpop.eup %9828  ;;  %v3924_v47 = vadd.f32 %v9827_v53, %v9825_v34 }
0x27f5   :  { %v3925_v40 = vsel %vm1233_vm3, %v9829_v17, 0.0 }
0x27f6   :  { %v3926_v1 = vadd.f32 %v3925_v40, %v3924_v47 }
0x27f8   :  { %v3927_v2 = vrot.slane %v3926_v1, 4 }
0x27fa   :  { %v3928_v12 = vadd.f32 %v3927_v2, %v3926_v1 }
0x27fc   :  { %v3929_v13 = vrot.slane %v3928_v12, 2 }
0x27fe   :  { %v3930_v32 = vadd.f32 %v3929_v13, %v3928_v12 }
0x2800   :  { %v3931_v23 = vrot.slane %v3930_v32, 1 }
0x2802   :  { %v3932_v41 = vadd.f32 %v3931_v23, %v3930_v32  ;;  %v12048_v32 = vld [vmem:[#allocation21] ss:$0 sm:$0xff] }
0x2803   :  { %v4031_v23 = vmul.f32 %v12048_v32, %v12006_v18 }
0x2804   :  { %9830 = vrcp.f32 %v3932_v41  ;;  %v4032_v41 = vmul.f32 %v12048_v32, %v12009_v39 }
0x280e   :  { %v9831_v7 = vpop.eup %9830 }
0x280f   :  { %v3934_v43 = vmul.f32 %v9831_v7, %v9825_v34  ;;  %v3935_v31 = vmul.f32 %v9831_v7, %v9827_v53  ;;  %v3936_v50 = vmul.f32 %v9831_v7, %v9829_v17 }
0x2811   :  { %v3939_v37 = vmul.f32 %v3936_v50, %v11016_v0  ;;  %v3937_v6 = vmul.f32 %v3934_v43, %v11010_v57  ;;  %v3938_v11 = vmul.f32 %v3935_v31, %v11014_v61  ;;  %v4033_v50 = vmul.f32 %v12048_v32, %v12012_v29 }
0x2813   :  { %v3940_v19 = vsel %vm261_vm1, %v3937_v6, 0.0  ;;  %v3941_v42 = vsel %vm261_vm1, %v3938_v11, 0.0  ;;  %v3943_v33 = vsel %vm433_vm2, %v3939_v37, 0.0 }
0x2814   :  { %v3942_v25 = vadd.f32 %v3941_v42, %v3940_v19 }
0x2816   :  { %v3944_v8 = vadd.f32 %v3943_v33, %v3942_v25  ;;  %v12059_v25 = vld [vmem:[#allocation19] ss:$0 sm:$0xff] }
0x2818   :  { %v3945_v47 = vrot.slane %v3944_v8, 4 }
0x281a   :  { %v3946_v40 = vadd.f32 %v3945_v47, %v3944_v8 }
0x281c   :  { %v3947_v1 = vrot.slane %v3946_v40, 2 }
0x281e   :  { %v3948_v34 = vadd.f32 %v3947_v1, %v3946_v40 }
0x2820   :  { %v3949_v53 = vrot.slane %v3948_v34, 1 }
0x2822   :  { %v3950_v17 = vadd.f32 %v3949_v53, %v3948_v34 }
0x2824   :  { %8799 = vmatmul.mubr.msk.f32.vlgmr.msra.gmra.mrb[36].mxu0 %vm261_vm1, %v3950_v17  ;;  %v8062_v17 = vsel %vm11965_vm6, 1.0, %v12946_v22  ;;  %vm12913_vm6 = vcmp.eq.s32.totalorder %v11314_v49, 6 }
0x2825   :  { %9352 = vmatpush3.bf16.msra.mxu0 %v11039_v35  ;;  %8820 = vmatprep.mubr.msk.f32.mxu0 %vm10517_vm0, %v12946_v22 }
0x2826   :  { %9353 = vmatprep.subr.bf16.mxu0 %v12947_v45 }
0x2829   :  { %9355 = vmatpush3.bf16.msra.mxu0 %v11042_v38 }
0x282a   :  { %9362 = vmatprep.subr.bf16.mxu0 %v12947_v45 }
0x28f7   :  { %v4020_v2 = vpop.f32.mrb[36].mxu0 }
0x28f8   :  { %v4027_v12 = vrot.slane %v4020_v2, %v11063_v48  ;;  %v8800_v13 = vpop.f32.mrb[37].mxu0  ;;  %v8061_v2 = vsel %vm11972_vm11, 1.0, %v12946_v22 }
0x28f9   :  { %v12077_v13 = vmax.f32 %v11922_v15, %v8061_v2 }
0x28fa   :  { %v4028_v7 = vadd.f32 %v4027_v12, %v11008_v56  ;;  %v4029_v43 = vadd.f32 %v4027_v12, %v11012_v60  ;;  %v4030_v31 = vadd.f32 %v4027_v12, %v11018_v3  ;;  %v12074_v12 = vmax.f32 %v11919_v30, %v8062_v17 }
0x28fb   :  { %vm4052_vm14 = vcmp.gt.f32.partialorder %v12077_v13, 0.0 }
0x28fc   :  { %v4034_v37 = vadd.f32 %v4031_v23, %v4028_v7  ;;  %v4035_v6 = vadd.f32 %v4032_v41, %v4029_v43  ;;  %v4036_v11 = vadd.f32 %v4033_v50, %v4030_v31  ;;  %v8063_v23 = vsel %vm11978_vm10, 1.0, %v12946_v22 }
0x28fd   :  { %v12083_v7 = vmax.f32 %v11928_v62, %v8063_v23  ;;  %vm4053_vm15 = vcmp.gt.f32.partialorder %v12074_v12, 0.0 }
0x28fe   :  { %9832 = vtanh.f32 %v4034_v37 }
0x28ff   :  { %9834 = vtanh.f32 %v4035_v6  ;;  %vm4054_vm11 = vcmp.gt.f32.partialorder %v12083_v7, 0.0 }
0x2900   :  { %9836 = vtanh.f32 %v4036_v11 }
0x2908   :  { %v9833_v19 = vpop.eup %9832 }
0x2909   :  { %v9835_v42 = vpop.eup %9834  ;;  %v4040_v33 = vmul.f32 %v12059_v25, %v9833_v19 }
0x290a   :  { %v9837_v8 = vpop.eup %9836  ;;  %v4041_v47 = vmul.f32 %v12059_v25, %v9835_v42 }
0x290b   :  { %v4043_v40 = vsel %vm261_vm1, %v4040_v33, 0.0  ;;  %v4042_v1 = vmul.f32 %v12059_v25, %v9837_v8 }
0x290c   :  { %v4046_v34 = vsel %vm261_vm1, %v4041_v47, 0.0  ;;  %4044 = vadd.xlane.f32.xlu1 %v4043_v40 }
0x290d   :  { %4047 = vadd.xlane.f32.xlu0 %v4046_v34  ;;  %v4049_v53 = vsel %vm433_vm2, %v4042_v1, 0.0 }
0x2910   :  { %4050 = vadd.xlane.f32.xlu1 %v4049_v53 }
0x2999   :  { %v4045_v41 = vpop.xlane.xlu1 %4044 }
0x299a   :  { %v4048_v16 = vpop.xlane.xlu0 %4047  ;;  %v4055_v43 = vsel %vm4052_vm14, -1e+18, %v4045_v41 }
0x299b   :  { %v4056_v24 = vsel %vm4053_vm15, -1e+18, %v4048_v16 }
0x299c   :  { %v4059_v15 = vmax.f32 %v4055_v43, %v4056_v24 }
0x299d   :  { %v4051_v30 = vpop.xlane.xlu1 %4050 }
0x299e   :  { %v4057_v31 = vsel %vm4054_vm11, -1e+18, %v4051_v30 }
0x299f   :  { %v4058_v50 = vsel %vm1233_vm3, %v4057_v31, -inf }
0x29a0   :  { %v4060_v10 = vmax.f32 %v4059_v15, %v4058_v50 }
0x29a2   :  { %v4061_v37 = vrot.slane %v4060_v10, 4 }
0x29a4   :  { %v4062_v6 = vmax.f32 %v4060_v10, %v4061_v37 }
0x29a6   :  { %v4063_v11 = vrot.slane %v4062_v6, 2 }
0x29a8   :  { %v4064_v62 = vmax.f32 %v4062_v6, %v4063_v11 }
0x29aa   :  { %v4065_v19 = vrot.slane %v4064_v62, 1 }
0x29ac   :  { %v4066_v42 = vmax.f32 %v4064_v62, %v4065_v19 }
0x29ae   :  { %vm4067_vm5 = vcmp.ge.f32.partialorder %v4055_v43, %v4066_v42  ;;  %vm4068_vm4 = vcmp.ge.f32.partialorder %v4056_v24, %v4066_v42  ;;  %vm4069_vm7 = vcmp.ge.f32.partialorder %v4057_v31, %v4066_v42  ;;  %v4083_v33 = vsub.f32 %v4055_v43, %v4066_v42 }
0x29af   :  { %v4070_v8 = vsel %vm4067_vm5, %v11131_v55, 17.0  ;;  %v4071_v47 = vsel %vm4068_vm4, %v11134_v58, 17.0  ;;  %v4072_v40 = vsel %vm4069_vm7, %v11137_v59, 17.0  ;;  %v4084_v1 = vsub.f32 %v4056_v24, %v4066_v42 }
0x29b0   :  { %v4073_v34 = vsel %vm1233_vm3, %v4072_v40, inf  ;;  %v4074_v53 = vmin.f32 %v4070_v8, %v4071_v47  ;;  %v4085_v17 = vsub.f32 %v4057_v31, %v4066_v42  ;;  %v4086_v2 = vmul.f32 1.442695, %v4083_v33 }
0x29b1   :  { %v4088_v23 = vmul.f32 1.442695, %v4084_v1 }
0x29b2   :  { %v4075_v41 = vmin.f32 %v4074_v53, %v4073_v34  ;;  %9838 = vpow2.f32 %v4086_v2  ;;  %v4090_v16 = vmul.f32 1.442695, %v4085_v17 }
0x29b3   :  { %9840 = vpow2.f32 %v4088_v23 }
0x29b4   :  { %v4076_v30 = vrot.slane %v4075_v41, 4  ;;  %9842 = vpow2.f32 %v4090_v16 }
0x29b6   :  { %v4077_v43 = vmin.f32 %v4075_v41, %v4076_v30 }
0x29b8   :  { %v4078_v15 = vrot.slane %v4077_v43, 2 }
0x29ba   :  { %v4079_v50 = vmin.f32 %v4077_v43, %v4078_v15 }
0x29bc   :  { %v9839_v10 = vpop.eup %9838  ;;  %v4080_v37 = vrot.slane %v4079_v50, 1 }
0x29bd   :  { %v9841_v6 = vpop.eup %9840 }
0x29be   :  { %v9843_v11 = vpop.eup %9842  ;;  %v4081_v24 = vmin.f32 %v4079_v50, %v4080_v37  ;;  %v4092_v62 = vadd.f32 %v9841_v6, %v9839_v10 }
0x29bf   :  { %v4093_v19 = vsel %vm1233_vm3, %v9843_v11, 0.0 }
0x29c0   :  { %v9557_v31 = vtrunc.f32 %v4081_v24  ;;  %v4094_v42 = vadd.f32 %v4093_v19, %v4092_v62 }
0x29c2   :  { %v9558_v33 = vcvt.f32.s32 %v9557_v31  ;;  %v4095_v8 = vrot.slane %v4094_v42, 4 }
0x29c4   :  { %v4096_v47 = vadd.f32 %v4095_v8, %v4094_v42  ;;  %vm4112_vm9 = vcmp.eq.s32.totalorder %v11058_v46, %v9558_v33  ;;  %vm4113_vm10 = vcmp.eq.s32.totalorder %v11128_v44, %v9558_v33  ;;  %vm4114_vm15 = vcmp.eq.s32.totalorder %v11123_v27, %v9558_v33 }
0x29c5   :  { %v8075_v40 = vsel %vm4112_vm9, 1.0, %v12946_v22  ;;  %v8076_v1 = vsel %vm4113_vm10, 1.0, %v12946_v22  ;;  %v8077_v34 = vsel %vm4114_vm15, 1.0, %v12946_v22  ;;  %vm4108_vm14 = vcmp.lt.s32.totalorder %v9558_v33, 8 }
0x29c6   :  { %v4097_v53 = vrot.slane %v4096_v47, 2  ;;  %v4138_v17 = vmul.f32 %v8075_v40, %v11149_v63  ;;  %v4139_v2 = vmul.f32 %v8076_v1, %v11152_v4  ;;  %v4140_v23 = vmul.f32 %v8077_v34, %v11155_v5 }
0x29c7   :  { %v4109_v41 = vadd.s32 8, %v9558_v33  ;;  %v8071_v16 = vadd.s32 4294967288, %v9558_v33  ;;  %v12113_v30 = vsel %vm12913_vm6, %v9558_v33, %v11958_v9 }
0x29c8   :  { %v4098_v43 = vadd.f32 %v4097_v53, %v4096_v47  ;;  %v4141_v15 = vadd.f32 %v4139_v2, %v4138_v17  ;;  %v4142_v50 = vsel %vm1233_vm3, %v4140_v23, 0.0 }
0x29c9   :  { %v4111_v37 = vsel %vm4108_vm14, %v4109_v41, %v8071_v16 }
0x29ca   :  { %v4099_v24 = vrot.slane %v4098_v43, 1  ;;  %v4143_v62 = vadd.f32 %v4142_v50, %v4141_v15  ;;  %vm4116_vm11 = vcmp.eq.s32.totalorder %v11128_v44, %v4111_v37  ;;  %vm4115_vm5 = vcmp.eq.s32.totalorder %v11058_v46, %v4111_v37 }
0x29cb   :  { %vm12120_vm4 = vmor %vm4113_vm10, %vm4116_vm11  ;;  %vm4117_vm7 = vcmp.eq.s32.totalorder %v11123_v27, %v4111_v37 }
0x29cc   :  { %v4100_v9 = vadd.f32 %v4099_v24, %v4098_v43  ;;  %v4144_v31 = vrot.slane %v4143_v62, 4  ;;  %vm12127_vm6 = vmor %vm4112_vm9, %vm4115_vm5 }
0x29cd   :  { %vm12133_vm14 = vmor %vm4114_vm15, %vm4117_vm7 }
0x29ce   :  { %9844 = vrcp.f32 %v4100_v9  ;;  %v4145_v47 = vadd.f32 %v4144_v31, %v4143_v62 }
0x29d0   :  { %v4146_v40 = vrot.slane %v4145_v47, 2 }
0x29d2   :  { %v4147_v1 = vadd.f32 %v4146_v40, %v4145_v47 }
0x29d4   :  { %v4148_v34 = vrot.slane %v4147_v1, 1 }
0x29d6   :  { %v4149_v53 = vadd.f32 %v4148_v34, %v4147_v1 }
0x29d8   :  { %v9845_v17 = vpop.eup %9844  ;;  %v4220_v2 = vadd.f32 %v12024_v20, %v4149_v53 }
0x29d9   :  { %v4102_v23 = vmul.f32 %v9845_v17, %v9839_v10  ;;  %v4103_v41 = vmul.f32 %v9845_v17, %v9841_v6  ;;  %v4104_v16 = vmul.f32 %v9845_v17, %v9843_v11 }
0x29da   :  { %9846 = vtanh.f32 %v4220_v2  ;;  %v8079_v33 = vmul.f32 -1.442695, %v4220_v2 }
0x29dc   :  { %9848 = vpow2.f32 %v8079_v33 }
0x29e4   :  { %v9847_v43 = vpop.eup %9846 }
0x29e5   :  { %4230 = vrot.lane.b32.xlu0 %v9847_v43, %s10519_s4 }
0x29e6   :  { %v9849_v15 = vpop.eup %9848 }
0x29e7   :  { %v4224_v50 = vadd.f32 1.0, %v9849_v15 }
0x29e9   :  { %9850 = vrcp.f32 %v4224_v50 }
0x29f3   :  { %v9851_v37 = vpop.eup %9850 }
0x29f4   :  { %v4228_v9 = vmul.f32 %v9851_v37, %v11986_v52  ;;  %v12167_v52 = vadd.f32 %v4104_v16, %v12012_v29 }
0x2a57   :  { %v4231_v24 = vpop.permute.xlu0 %4230 }
0x2a58   :  { %v4233_v62 = vmul.f32 %v9851_v37, %v4231_v24 }
0x2a5a   :  { %4235 = vrot.lane.b32.xlu1 %v4233_v62, %s10520_s19 }
0x2acc   :  { %v4236_v20 = vpop.permute.xlu1 %4235 }
0x2acd   :  { %v12141_v10 = vadd.f32 %v4236_v20, %v4228_v9 }
0x2acf   :  { %9852 = vtanh.f32 %v12141_v10 }
0x2ad9   :  { %v9853_v6 = vpop.eup %9852 }
0x2ada   :  { %4241 = vrot.lane.b32.xlu1 %v9853_v6, %s10519_s4 }
0x2b4c   :  { %v4242_v11 = vpop.permute.xlu1 %4241 }
0x2b4d   :  { %v4244_v31 = vmul.f32 %v9851_v37, %v4242_v11 }
0x2b4f   :  { %4249 = vrot.lane.b32.xlu0 %v4244_v31, %s10520_s19 }
0x2bc1   :  { %v4250_v47 = vpop.permute.xlu0 %4249 }
0x2bc2   :  { %8821 = vmatmul.mubr.msk.f32.vlgmr.msra.gmra.mrb[38].mxu0 %vm261_vm1, %v4250_v47 }
0x2bc3   :  { %9364 = vmatpush3.bf16.msra.mxu0 %v10972_v51  ;;  %8842 = vmatprep.mubr.msk.f32.mxu0 %vm10517_vm0, %v12946_v22  ;;  %v12161_v51 = vadd.f32 %v4102_v23, %v12006_v18  ;;  %v4247_v18 = vmul.f32 %v11860_v21, %v12167_v52 }
0x2bc4   :  { %9365 = vmatprep.subr.bf16.mxu0 %v12947_v45 }
0x2bc5   :  { %v4245_v34 = vmul.f32 %v11860_v21, %v12161_v51 }
0x2bc7   :  { %9367 = vmatpush3.bf16.msra.mxu0 %v10981_v54  ;;  %v12164_v54 = vadd.f32 %v4103_v41, %v12009_v39 }
0x2bc8   :  { %9374 = vmatprep.subr.bf16.mxu0 %v12947_v45 }
0x2bca   :  { %8843 = vmatmul.mubr.msk.f32.vlgmr.msra.gmra.mrb[40].mxu0 %vm261_vm1, %v4250_v47 }
0x2bcb   :  { %9376 = vmatpush3.bf16.msra.mxu0 %v11080_v26  ;;  %8864 = vmatprep.mubr.msk.f32.mxu0 %vm10517_vm0, %v12946_v22 }
0x2bcc   :  { %9377 = vmatprep.subr.bf16.mxu0 %v12947_v45 }
0x2bcf   :  { %9379 = vmatpush3.bf16.msra.mxu0 %v11083_v28  ;;  %v4246_v28 = vmul.f32 %v11860_v21, %v12164_v54 }
0x2bd0   :  { %9386 = vmatprep.subr.bf16.mxu0 %v12947_v45 }
0x2c95   :  { %v4319_v40 = vpop.f32.mrb[38].mxu0 }
0x2c96   :  { %v4326_v26 = vrot.slane %v4319_v40, %v11063_v48  ;;  %v8822_v1 = vpop.f32.mrb[39].mxu0 }
0x2c98   :  { %v4327_v53 = vadd.f32 %v4326_v26, %v11010_v57  ;;  %v4328_v39 = vadd.f32 %v4326_v26, %v11014_v61  ;;  %v4329_v29 = vadd.f32 %v4326_v26, %v11016_v0 }
0x2c9a   :  { %v4330_v17 = vadd.f32 %v4327_v53, %v4245_v34  ;;  %v4331_v2 = vadd.f32 %v4328_v39, %v4246_v28  ;;  %v4332_v23 = vadd.f32 %v4329_v29, %v4247_v18 }
0x2c9c   :  { %9854 = vtanh.f32 %v4330_v17 }
0x2c9d   :  { %9856 = vtanh.f32 %v4331_v2  ;;  %v12179_v41 = vpop.f32.mrb[40].mxu0 }
0x2c9e   :  { %9858 = vtanh.f32 %v4332_v23  ;;  %v8844_v16 = vpop.f32.mrb[41].mxu0 }
0x2ca6   :  { %v9855_v43 = vpop.eup %9854 }
0x2ca7   :  { %v9857_v33 = vpop.eup %9856  ;;  %v4336_v15 = vmul.f32 %v11873_v36, %v9855_v43 }
0x2ca8   :  { %v9859_v21 = vpop.eup %9858  ;;  %v4337_v50 = vmul.f32 %v11873_v36, %v9857_v33 }
0x2ca9   :  { %v4339_v37 = vsel %vm261_vm1, %v4336_v15, 0.0  ;;  %v4338_v62 = vmul.f32 %v11873_v36, %v9859_v21 }
0x2caa   :  { %v4342_v24 = vsel %vm261_vm1, %v4337_v50, 0.0  ;;  %4340 = vadd.xlane.f32.xlu1 %v4339_v37 }
0x2cab   :  { %4343 = vadd.xlane.f32.xlu0 %v4342_v24  ;;  %v4345_v9 = vsel %vm433_vm2, %v4338_v62, 0.0 }
0x2caf   :  { %4346 = vadd.xlane.f32.xlu0 %v4345_v9 }
0x2d37   :  { %v4341_v6 = vpop.xlane.xlu1 %4340 }
0x2d38   :  { %v4344_v20 = vpop.xlane.xlu0 %4343 }
0x2d39   :  { %v4349_v11 = vmax.f32 %v4341_v6, %v4344_v20 }
0x2d3c   :  { %v4347_v31 = vpop.xlane.xlu0 %4346 }
0x2d3d   :  { %v4348_v47 = vsel %vm1233_vm3, %v4347_v31, -inf }
0x2d3e   :  { %v4350_v40 = vmax.f32 %v4349_v11, %v4348_v47 }
0x2d40   :  { %v4351_v26 = vrot.slane %v4350_v40, 4 }
0x2d42   :  { %v4352_v1 = vmax.f32 %v4350_v40, %v4351_v26 }
0x2d44   :  { %v4353_v34 = vrot.slane %v4352_v1, 2 }
0x2d46   :  { %v4354_v28 = vmax.f32 %v4352_v1, %v4353_v34 }
0x2d48   :  { %v4355_v18 = vrot.slane %v4354_v28, 1 }
0x2d4a   :  { %v4356_v53 = vmax.f32 %v4354_v28, %v4355_v18 }
0x2d4c   :  { %v4357_v39 = vsub.f32 %v4341_v6, %v4356_v53  ;;  %v4358_v29 = vsub.f32 %v4344_v20, %v4356_v53  ;;  %v4359_v36 = vsub.f32 %v4347_v31, %v4356_v53 }
0x2d4e   :  { %v4360_v17 = vmul.f32 1.442695, %v4357_v39  ;;  %v4362_v2 = vmul.f32 1.442695, %v4358_v29  ;;  %v4364_v23 = vmul.f32 1.442695, %v4359_v36 }
0x2d50   :  { %9860 = vpow2.f32 %v4360_v17 }
0x2d51   :  { %9862 = vpow2.f32 %v4362_v2 }
0x2d52   :  { %9864 = vpow2.f32 %v4364_v23 }
0x2d5a   :  { %v9861_v16 = vpop.eup %9860 }
0x2d5b   :  { %v9863_v43 = vpop.eup %9862 }
0x2d5c   :  { %v9865_v33 = vpop.eup %9864  ;;  %v4366_v15 = vadd.f32 %v9863_v43, %v9861_v16 }
0x2d5d   :  { %v4367_v21 = vsel %vm1233_vm3, %v9865_v33, 0.0 }
0x2d5e   :  { %v4368_v50 = vadd.f32 %v4367_v21, %v4366_v15 }
0x2d60   :  { %v4369_v37 = vrot.slane %v4368_v50, 4 }
0x2d62   :  { %v4370_v24 = vadd.f32 %v4369_v37, %v4368_v50  ;;  %v4473_v50 = vmul.f32 %v12048_v32, %v12161_v51  ;;  %v4474_v37 = vmul.f32 %v12048_v32, %v12164_v54 }
0x2d64   :  { %v4371_v62 = vrot.slane %v4370_v24, 2 }
0x2d66   :  { %v4372_v9 = vadd.f32 %v4371_v62, %v4370_v24 }
0x2d68   :  { %v4373_v6 = vrot.slane %v4372_v9, 1 }
0x2d6a   :  { %v4374_v20 = vadd.f32 %v4373_v6, %v4372_v9 }
0x2d6c   :  { %9866 = vrcp.f32 %v4374_v20 }
0x2d76   :  { %v9867_v11 = vpop.eup %9866 }
0x2d77   :  { %v4376_v31 = vmul.f32 %v9867_v11, %v9861_v16  ;;  %v4377_v47 = vmul.f32 %v9867_v11, %v9863_v43  ;;  %v4378_v40 = vmul.f32 %v9867_v11, %v9865_v33 }
0x2d79   :  { %v4381_v26 = vmul.f32 %v4378_v40, %v11016_v0  ;;  %v4379_v1 = vmul.f32 %v4376_v31, %v11010_v57  ;;  %v4380_v34 = vmul.f32 %v4377_v47, %v11014_v61 }
0x2d7b   :  { %v4382_v28 = vsel %vm261_vm1, %v4379_v1, 0.0  ;;  %v4383_v18 = vsel %vm261_vm1, %v4380_v34, 0.0  ;;  %v4385_v39 = vsel %vm433_vm2, %v4381_v26, 0.0 }
0x2d7c   :  { %v4384_v53 = vadd.f32 %v4383_v18, %v4382_v28  ;;  %v8073_v18 = vsel %vm12120_vm4, 1.0, %v12946_v22  ;;  %vm12914_vm4 = vcmp.eq.s32.totalorder %v11314_v49, 7 }
0x2d7e   :  { %v4386_v29 = vadd.f32 %v4385_v39, %v4384_v53  ;;  %v8072_v53 = vsel %vm12127_vm6, 1.0, %v12946_v22  ;;  %v12225_v39 = vmax.f32 %v12074_v12, %v8073_v18 }
0x2d80   :  { %v4387_v36 = vrot.slane %v4386_v29, 4  ;;  %vm4495_vm9 = vcmp.gt.f32.partialorder %v12225_v39, 0.0 }
0x2d82   :  { %v4388_v17 = vadd.f32 %v4387_v36, %v4386_v29  ;;  %v8074_v29 = vsel %vm12133_vm14, 1.0, %v12946_v22 }
0x2d84   :  { %v4389_v2 = vrot.slane %v4388_v17, 2 }
0x2d86   :  { %v4390_v23 = vadd.f32 %v4389_v2, %v4388_v17  ;;  %v12234_v17 = vmax.f32 %v12083_v7, %v8074_v29 }
0x2d88   :  { %v4391_v16 = vrot.slane %v4390_v23, 1  ;;  %vm4496_vm6 = vcmp.gt.f32.partialorder %v12234_v17, 0.0 }
0x2d8a   :  { %v4392_v43 = vadd.f32 %v4391_v16, %v4390_v23 }
0x2d8c   :  { %8832 = vmatmul.mubr.msk.f32.vlgmr.msra.gmra.mrb[34].mxu1 %vm261_vm1, %v4392_v43 }
0x2d8d   :  { %9370 = vmatpush3.bf16.msra.mxu1 %v11039_v35  ;;  %8853 = vmatprep.mubr.msk.f32.mxu1 %vm10517_vm0, %v12946_v22 }
0x2d8e   :  { %9371 = vmatprep.subr.bf16.mxu1 %v12947_v45 }
0x2d91   :  { %9373 = vmatpush3.bf16.msra.mxu1 %v11042_v38  ;;  %v4475_v38 = vmul.f32 %v12048_v32, %v12167_v52 }
0x2d92   :  { %9380 = vmatprep.subr.bf16.mxu1 %v12947_v45 }
0x2e5f   :  { %v4462_v33 = vpop.f32.mrb[34].mxu1 }
0x2e60   :  { %v4469_v15 = vrot.slane %v4462_v33, %v11063_v48  ;;  %v8833_v21 = vpop.f32.mrb[35].mxu1 }
0x2e62   :  { %v4470_v35 = vadd.f32 %v4469_v15, %v11008_v56  ;;  %v4471_v24 = vadd.f32 %v4469_v15, %v11012_v60  ;;  %v4472_v62 = vadd.f32 %v4469_v15, %v11018_v3 }
0x2e64   :  { %v4476_v9 = vadd.f32 %v4473_v50, %v4470_v35  ;;  %v4477_v6 = vadd.f32 %v4474_v37, %v4471_v24  ;;  %v4478_v20 = vadd.f32 %v4475_v38, %v4472_v62 }
0x2e66   :  { %9868 = vtanh.f32 %v4476_v9 }
0x2e67   :  { %9870 = vtanh.f32 %v4477_v6 }
0x2e68   :  { %9872 = vtanh.f32 %v4478_v20 }
0x2e70   :  { %v9869_v11 = vpop.eup %9868 }
0x2e71   :  { %v9871_v31 = vpop.eup %9870  ;;  %v4482_v47 = vmul.f32 %v12059_v25, %v9869_v11 }
0x2e72   :  { %v9873_v40 = vpop.eup %9872  ;;  %v4483_v26 = vmul.f32 %v12059_v25, %v9871_v31 }
0x2e73   :  { %v4485_v1 = vsel %vm261_vm1, %v4482_v47, 0.0  ;;  %v4484_v34 = vmul.f32 %v12059_v25, %v9873_v40  ;;  %v12228_v25 = vmax.f32 %v12077_v13, %v8072_v53 }
0x2e74   :  { %v4488_v28 = vsel %vm261_vm1, %v4483_v26, 0.0  ;;  %4486 = vadd.xlane.f32.xlu1 %v4485_v1 }
0x2e75   :  { %4489 = vadd.xlane.f32.xlu0 %v4488_v28  ;;  %v4491_v32 = vsel %vm433_vm2, %v4484_v34, 0.0  ;;  %vm4494_vm10 = vcmp.gt.f32.partialorder %v12228_v25, 0.0 }
0x2e78   :  { %4492 = vadd.xlane.f32.xlu1 %v4491_v32 }
0x2f01   :  { %v4487_v36 = vpop.xlane.xlu1 %4486 }
0x2f02   :  { %v4490_v19 = vpop.xlane.xlu0 %4489  ;;  %v4497_v2 = vsel %vm4494_vm10, -1e+18, %v4487_v36 }
0x2f03   :  { %v4498_v42 = vsel %vm4495_vm9, -1e+18, %v4490_v19 }
0x2f04   :  { %v4501_v13 = vmax.f32 %v4497_v2, %v4498_v42 }
0x2f05   :  { %v4493_v12 = vpop.xlane.xlu1 %4492 }
0x2f06   :  { %v4499_v23 = vsel %vm4496_vm6, -1e+18, %v4493_v12 }
0x2f07   :  { %v4500_v16 = vsel %vm1233_vm3, %v4499_v23, -inf }
0x2f08   :  { %v4502_v8 = vmax.f32 %v4501_v13, %v4500_v16 }
0x2f0a   :  { %v4503_v43 = vrot.slane %v4502_v8, 4 }
0x2f0c   :  { %v4504_v33 = vmax.f32 %v4502_v8, %v4503_v43 }
0x2f0e   :  { %v4505_v15 = vrot.slane %v4504_v33, 2 }
0x2f10   :  { %v4506_v7 = vmax.f32 %v4504_v33, %v4505_v15 }
0x2f12   :  { %v4507_v21 = vrot.slane %v4506_v7, 1 }
0x2f14   :  { %v4508_v50 = vmax.f32 %v4506_v7, %v4507_v21 }
0x2f16   :  { %vm4509_vm15 = vcmp.ge.f32.partialorder %v4497_v2, %v4508_v50  ;;  %vm4510_vm11 = vcmp.ge.f32.partialorder %v4498_v42, %v4508_v50  ;;  %vm4511_vm5 = vcmp.ge.f32.partialorder %v4499_v23, %v4508_v50  ;;  %v4525_v37 = vsub.f32 %v4497_v2, %v4508_v50 }
0x2f17   :  { %v4512_v35 = vsel %vm4509_vm15, %v11131_v55, 17.0  ;;  %v4513_v24 = vsel %vm4510_vm11, %v11134_v58, 17.0  ;;  %v4514_v62 = vsel %vm4511_vm5, %v11137_v59, 17.0  ;;  %v4526_v38 = vsub.f32 %v4498_v42, %v4508_v50 }
0x2f18   :  { %v4515_v9 = vsel %vm1233_vm3, %v4514_v62, inf  ;;  %v4516_v6 = vmin.f32 %v4512_v35, %v4513_v24  ;;  %v4527_v20 = vsub.f32 %v4499_v23, %v4508_v50  ;;  %v4528_v11 = vmul.f32 1.442695, %v4525_v37 }
0x2f19   :  { %v4530_v31 = vmul.f32 1.442695, %v4526_v38 }
0x2f1a   :  { %v4517_v47 = vmin.f32 %v4516_v6, %v4515_v9  ;;  %9874 = vpow2.f32 %v4528_v11  ;;  %v4532_v40 = vmul.f32 1.442695, %v4527_v20 }
0x2f1b   :  { %9876 = vpow2.f32 %v4530_v31 }
0x2f1c   :  { %v4518_v26 = vrot.slane %v4517_v47, 4  ;;  %9878 = vpow2.f32 %v4532_v40 }
0x2f1e   :  { %v4519_v1 = vmin.f32 %v4517_v47, %v4518_v26 }
0x2f20   :  { %v4520_v34 = vrot.slane %v4519_v1, 2 }
0x2f22   :  { %v4521_v28 = vmin.f32 %v4519_v1, %v4520_v34 }
0x2f24   :  { %v9875_v32 = vpop.eup %9874  ;;  %v4522_v18 = vrot.slane %v4521_v28, 1 }
0x2f25   :  { %v9877_v53 = vpop.eup %9876 }
0x2f26   :  { %v9879_v29 = vpop.eup %9878  ;;  %v4523_v36 = vmin.f32 %v4521_v28, %v4522_v18  ;;  %v4534_v19 = vadd.f32 %v9877_v53, %v9875_v32 }
0x2f27   :  { %v4535_v42 = vsel %vm1233_vm3, %v9879_v29, 0.0 }
0x2f28   :  { %v9559_v2 = vtrunc.f32 %v4523_v36  ;;  %v4536_v12 = vadd.f32 %v4535_v42, %v4534_v19 }
0x2f2a   :  { %v9560_v13 = vcvt.f32.s32 %v9559_v2  ;;  %v4537_v23 = vrot.slane %v4536_v12, 4 }
0x2f2c   :  { %v4538_v16 = vadd.f32 %v4537_v23, %v4536_v12  ;;  %vm4554_vm7 = vcmp.eq.s32.totalorder %v11058_v46, %v9560_v13  ;;  %vm4555_vm14 = vcmp.eq.s32.totalorder %v11128_v44, %v9560_v13  ;;  %vm4556_vm9 = vcmp.eq.s32.totalorder %v11123_v27, %v9560_v13 }
0x2f2d   :  { %v8086_v8 = vsel %vm4554_vm7, 1.0, %v12946_v22  ;;  %v8087_v43 = vsel %vm4555_vm14, 1.0, %v12946_v22  ;;  %v8088_v33 = vsel %vm4556_vm9, 1.0, %v12946_v22  ;;  %vm4550_vm10 = vcmp.lt.s32.totalorder %v9560_v13, 8 }
0x2f2e   :  { %v4539_v15 = vrot.slane %v4538_v16, 2  ;;  %v4580_v7 = vmul.f32 %v8086_v8, %v11149_v63  ;;  %v4581_v21 = vmul.f32 %v8087_v43, %v11152_v4  ;;  %v4582_v50 = vmul.f32 %v8088_v33, %v11155_v5  ;;  %v8095_v43 = vld [vmem:[#allocation24] ss:$0 sm:$0xff]  ;;  %v4971_v33 = vld [vmem:[%s12876_s8] sm:$0xff] }
0x2f2f   :  { %v4551_v37 = vadd.s32 8, %v9560_v13  ;;  %v8082_v35 = vadd.s32 4294967288, %v9560_v13  ;;  %v12264_v24 = vsel %vm12914_vm4, %v9560_v13, %v12113_v30 }
0x2f30   :  { %v4540_v62 = vadd.f32 %v4539_v15, %v4538_v16  ;;  %v4583_v38 = vadd.f32 %v4581_v21, %v4580_v7  ;;  %v4584_v9 = vsel %vm1233_vm3, %v4582_v50, 0.0  ;;  %v4973_v7 = vld [vmem:[%s12876_s8 + $0x10] sm:$0xff]  ;;  %v4974_v21 = vld [vmem:[%s12876_s8 + $0x18] sm:$0xff] }
0x2f31   :  { %v4553_v6 = vsel %vm4550_vm10, %v4551_v37, %v8082_v35  ;;  %v12311_v37 = vpack.c.bf16 %v4974_v21, %v4973_v7  ;;  %v4970_v35 = vld [vmem:[#allocation25] sm:$0x1] }
0x2f32   :  { %v4541_v20 = vrot.slane %v4540_v62, 1  ;;  %v4585_v11 = vadd.f32 %v4584_v9, %v4583_v38  ;;  %vm4557_vm6 = vcmp.eq.s32.totalorder %v11058_v46, %v4553_v6  ;;  %vm4558_vm15 = vcmp.eq.s32.totalorder %v11128_v44, %v4553_v6 }
0x2f33   :  { %vm12271_vm11 = vmor %vm4554_vm7, %vm4557_vm6  ;;  %vm4559_vm5 = vcmp.eq.s32.totalorder %v11123_v27, %v4553_v6 }
0x2f34   :  { %v4542_v4 = vadd.f32 %v4541_v20, %v4540_v62  ;;  %v4586_v5 = vrot.slane %v4585_v11, 4  ;;  %vm12278_vm4 = vmor %vm4555_vm14, %vm4558_vm15 }
0x2f35   :  { %vm12284_vm10 = vmor %vm4556_vm9, %vm4559_vm5  ;;  %vm4967_vm9 = vcmp.eq.s32.totalorder %v11314_v49, 8 }
0x2f36   :  { %9880 = vrcp.f32 %v4542_v4  ;;  %v4587_v46 = vadd.f32 %v4586_v5, %v4585_v11  ;;  %v10098_v4 = vld [vmem:[#allocation16] ss:$0 sm:$0xff] }
0x2f38   :  { %v4588_v47 = vrot.slane %v4587_v46, 2 }
0x2f3a   :  { %v4589_v40 = vadd.f32 %v4588_v47, %v4587_v46 }
0x2f3c   :  { %v4590_v26 = vrot.slane %v4589_v40, 1 }
0x2f3e   :  { %v4591_v1 = vadd.f32 %v4590_v26, %v4589_v40 }
0x2f40   :  { %v9881_v34 = vpop.eup %9880  ;;  %v4662_v28 = vadd.f32 %v12179_v41, %v4591_v1 }
0x2f41   :  { %v4544_v44 = vmul.f32 %v9881_v34, %v9875_v32  ;;  %v4545_v18 = vmul.f32 %v9881_v34, %v9877_v53  ;;  %v4546_v36 = vmul.f32 %v9881_v34, %v9879_v29  ;;  %v10099_v34 = vld [vmem:[#allocation12] sm:$0x1] }
0x2f42   :  { %9882 = vtanh.f32 %v4662_v28  ;;  %v8090_v27 = vmul.f32 -1.442695, %v4662_v28  ;;  %v12338_v28 = vadd.f32 %v10099_v34, %v11028_v14 }
0x2f43   :  { %v12322_v62 = vadd.f32 %v4544_v44, %v12161_v51  ;;  %v12325_v38 = vadd.f32 %v4545_v18, %v12164_v54  ;;  %v12328_v9 = vadd.f32 %v4546_v36, %v12167_v52 }
0x2f44   :  { %9884 = vpow2.f32 %v8090_v27  ;;  %v10100_v27 = vld [vmem:[#allocation15] ss:$0 sm:$0xff] }
0x2f45   :  { %v4687_v5 = vmul.f32 %v10098_v4, %v12322_v62  ;;  %v4688_v46 = vmul.f32 %v10098_v4, %v12325_v38  ;;  %v4689_v47 = vmul.f32 %v10098_v4, %v12328_v9 }
0x2f4c   :  { %v9883_v19 = vpop.eup %9882 }
0x2f4d   :  { %4672 = vrot.lane.b32.xlu0 %v9883_v19, %s10519_s4 }
0x2f4e   :  { %v9885_v42 = vpop.eup %9884 }
0x2f4f   :  { %v4666_v2 = vadd.f32 1.0, %v9885_v42 }
0x2f51   :  { %9886 = vrcp.f32 %v4666_v2 }
0x2f5b   :  { %v9887_v12 = vpop.eup %9886 }
0x2f5c   :  { %v4670_v16 = vmul.f32 %v9887_v12, %v12141_v10  ;;  %v4972_v10 = vld [vmem:[%s12876_s8 + $0x8] sm:$0xff]  ;;  %s10522_s8 = smov [#allocation28]  }
0x2f5d   :  { %v12301_v15 = vpack.c.bf16 %v4972_v10, %v4971_v33  ;;  %s7949_s25 = sshll.u32 %s10522_s8, 4  ;;  %s7950_s25 = int_to_ptr.vmem [resolvable:$true] %s7949_s25 }
0x2f5e   :  { %s10435_s2 = scalar_lea.vmem %s7950_s25, 16  ;;  %s10439_s13 = scalar_lea.vmem %s7950_s25, 32 }
0x2f5f   :  { %p10436_p8 = scmp.ne.s32.totalorder %s7950_s25, %s10435_s2  ;;  %p10440_p9 = scmp.lt.s32.totalorder %s7950_s25, %s7950_s25 }
0x2f60   :  { %p10441_p10 = scmp.lt.s32.totalorder %s10439_s13, %s10435_s2 }
0x2f62   :  { %p10442_p11 = por %p10441_p10, %p10440_p9 }
0x2f64   :  { %p10443_p12 = pnand %p10442_p11, %p10436_p8 }
0x2fbf   :  { %v4673_v13 = vpop.permute.xlu0 %4672 }
0x2fc0   :  { %v4675_v23 = vmul.f32 %v9887_v12, %v4673_v13 }
0x2fc2   :  { %4677 = vrot.lane.b32.xlu1 %v4675_v23, %s10520_s19 }
0x3034   :  { %v4678_v41 = vpop.permute.xlu1 %4677 }
0x3035   :  { %v4680_v32 = vadd.f32 %v4678_v41, %v4670_v16 }
0x3037   :  { %9888 = vtanh.f32 %v4680_v32 }
0x3041   :  { %v9889_v53 = vpop.eup %9888 }
0x3042   :  { %4683 = vrot.lane.b32.xlu1 %v9889_v53, %s10519_s4 }
0x30b4   :  { %v4684_v29 = vpop.permute.xlu1 %4683 }
0x30b5   :  { %v4686_v8 = vmul.f32 %v9887_v12, %v4684_v29 }
0x30b7   :  { %4691 = vrot.lane.b32.xlu0 %v4686_v8, %s10520_s19 }
0x30bb   :  { %5061 = vrot.lane.b32.xlu0 %v8095_v43, %s10520_s19 }
0x3129   :  { %v4692_v50 = vpop.permute.xlu0 %4691 }
0x312a   :  { %8854 = vmatmul.mubr.msk.f32.vlgmr.msra.gmra.mrb[36].mxu1 %vm261_vm1, %v4692_v50 }
0x312b   :  { %9382 = vmatpush3.bf16.msra.mxu1 %v12301_v15  ;;  %8875 = vmatprep.mubr.msk.f32.mxu1 %vm10517_vm0, %v12946_v22 }
0x312c   :  { %9383 = vmatprep.subr.bf16.mxu1 %v12947_v45 }
0x312d   :  { %v12346_v7 = vpop.permute.xlu0 %5061 }
0x312f   :  { %9385 = vmatpush3.bf16.msra.mxu1 %v12311_v37 }
0x3130   :  { %9392 = vmatprep.subr.bf16.mxu1 %v12947_v45 }
0x3132   :  { %8876 = vmatmul.mubr.msk.f32.vlgmr.msra.gmra.mrb[38].mxu1 %vm261_vm1, %v4970_v35 }
0x3133   :  { %8897 = vmatprep.mubr.msk.f32.mxu1 %vm10517_vm0, %v12946_v22 }
0x31fd   :  { %v4761_v6 = vpop.f32.mrb[36].mxu1 }
0x31fe   :  { %v4768_v20 = vrot.slane %v4761_v6, %v11063_v48  ;;  %v8855_v11 = vpop.f32.mrb[37].mxu1 }
0x3200   :  { %v4769_v51 = vadd.f32 %v4768_v20, %v11010_v57  ;;  %v4770_v40 = vadd.f32 %v4768_v20, %v11014_v61  ;;  %v4771_v54 = vadd.f32 %v4768_v20, %v11016_v0 }
0x3202   :  { %v4772_v26 = vadd.f32 %v4769_v51, %v4687_v5  ;;  %v4773_v52 = vadd.f32 %v4770_v40, %v4688_v46  ;;  %v4774_v1 = vadd.f32 %v4771_v54, %v4689_v47 }
0x3204   :  { %9890 = vtanh.f32 %v4772_v26 }
0x3205   :  { %v5044_v44 = vpop.f32.mrb[38].mxu1  ;;  %9892 = vtanh.f32 %v4774_v1 }
0x3206   :  { %v5045_v18 = vadd.f32 %v5044_v44, %v12338_v28  ;;  %v8877_v36 = vpop.f32.mrb[39].mxu1 }
0x3208   :  { %9894 = vtanh.f32 %v5045_v18  ;;  %v8094_v16 = vmul.f32 -1.442695, %v5045_v18 }
0x320a   :  { %9896 = vpow2.f32 %v8094_v16 }
0x320e   :  { %v9891_v19 = vpop.eup %9890 }
0x320f   :  { %v4778_v42 = vmul.f32 %v10100_v27, %v9891_v19  ;;  %v9893_v2 = vpop.eup %9892 }
0x3210   :  { %v4780_v13 = vmul.f32 %v10100_v27, %v9893_v2 }
0x3211   :  { %v4781_v12 = vsel %vm261_vm1, %v4778_v42, 0.0 }
0x3212   :  { %v9895_v23 = vpop.eup %9894  ;;  %4782 = vadd.xlane.f32.xlu0 %v4781_v12  ;;  %v4787_v14 = vsel %vm433_vm2, %v4780_v13, 0.0 }
0x3213   :  { %5066 = vrot.lane.b32.xlu1 %v9895_v23, %s10519_s4 }
0x3214   :  { %v9897_v41 = vpop.eup %9896 }
0x3215   :  { %v5052_v32 = vadd.f32 1.0, %v9897_v41 }
0x3216   :  { %4788 = vadd.xlane.f32.xlu0 %v4787_v14 }
0x3217   :  { %9898 = vrcp.f32 %v5052_v32 }
0x3218   :  { %9900 = vtanh.f32 %v4773_v52 }
0x3221   :  { %v9899_v53 = vpop.eup %9898 }
0x3222   :  { %v9901_v43 = vpop.eup %9900  ;;  %v5064_v21 = vmul.f32 %v9899_v53, %v12346_v7 }
0x3223   :  { %v4779_v33 = vmul.f32 %v10100_v27, %v9901_v43 }
0x3225   :  { %v4784_v10 = vsel %vm261_vm1, %v4779_v33, 0.0 }
0x3285   :  { %v5067_v29 = vpop.permute.xlu1 %5066 }
0x3286   :  { %v5069_v8 = vmul.f32 %v9899_v53, %v5067_v29 }
0x3288   :  { %5071 = vrot.lane.b32.xlu1 %v5069_v8, %s10520_s19 }
0x329f   :  { %v4783_v20 = vpop.xlane.xlu0 %4782 }
0x32a3   :  { %v4789_v11 = vpop.xlane.xlu0 %4788 }
0x32a4   :  { %v4790_v46 = vsel %vm1233_vm3, %v4789_v11, -inf }
0x32ac   :  { %4785 = vadd.xlane.f32.xlu1 %v4784_v10 }
0x32fa   :  { %v5072_v50 = vpop.permute.xlu1 %5071 }
0x32fb   :  { %v5074_v35 = vadd.f32 %v5072_v50, %v5064_v21 }
0x32fd   :  { %9902 = vtanh.f32 %v5074_v35 }
0x3307   :  { %v9903_v6 = vpop.eup %9902 }
0x3308   :  { %5077 = vrot.lane.b32.xlu0 %v9903_v6, %s10519_s4 }
0x3339   :  { %v4786_v4 = vpop.xlane.xlu1 %4785 }
0x333a   :  { %v4791_v5 = vmax.f32 %v4783_v20, %v4786_v4 }
0x333c   :  { %v4792_v47 = vmax.f32 %v4791_v5, %v4790_v46 }
0x333e   :  { %v4793_v51 = vrot.slane %v4792_v47, 4 }
0x3340   :  { %v4794_v40 = vmax.f32 %v4792_v47, %v4793_v51 }
0x3342   :  { %v4795_v54 = vrot.slane %v4794_v40, 2 }
0x3344   :  { %v4796_v26 = vmax.f32 %v4794_v40, %v4795_v54 }
0x3346   :  { %v4797_v52 = vrot.slane %v4796_v26, 1 }
0x3348   :  { %v4798_v1 = vmax.f32 %v4796_v26, %v4797_v52 }
0x334a   :  { %v4799_v34 = vsub.f32 %v4783_v20, %v4798_v1  ;;  %v4800_v44 = vsub.f32 %v4786_v4, %v4798_v1  ;;  %v4801_v18 = vsub.f32 %v4789_v11, %v4798_v1  ;;  %v5081_v1 = vld [vmem:[#allocation13] sm:$0xff] }
0x334c   :  { %v4802_v36 = vmul.f32 1.442695, %v4799_v34  ;;  %v4804_v19 = vmul.f32 1.442695, %v4800_v44  ;;  %v4806_v27 = vmul.f32 1.442695, %v4801_v18 }
0x334d   :  { %v5083_v18 = vld [vmem:[#allocation13 + $0x10] sm:$0xff] }
0x334e   :  { %9904 = vpow2.f32 %v4802_v36  ;;  %v5084_v36 = vld [vmem:[#allocation13 + $0x18] sm:$0xff] }
0x334f   :  { %9906 = vpow2.f32 %v4804_v19 }
0x3350   :  { %9908 = vpow2.f32 %v4806_v27 }
0x3358   :  { %v9905_v42 = vpop.eup %9904 }
0x3359   :  { %v9907_v2 = vpop.eup %9906 }
0x335a   :  { %v9909_v12 = vpop.eup %9908  ;;  %v4808_v13 = vadd.f32 %v9907_v2, %v9905_v42 }
0x335b   :  { %v4809_v23 = vsel %vm1233_vm3, %v9909_v12, 0.0 }
0x335c   :  { %v4810_v14 = vadd.f32 %v4809_v23, %v4808_v13 }
0x335e   :  { %v4811_v16 = vrot.slane %v4810_v14, 4 }
0x3360   :  { %v4812_v41 = vadd.f32 %v4811_v16, %v4810_v14 }
0x3362   :  { %v4813_v32 = vrot.slane %v4812_v41, 2 }
0x3364   :  { %v4814_v29 = vadd.f32 %v4813_v32, %v4812_v41 }
0x3366   :  { %v4815_v8 = vrot.slane %v4814_v29, 1 }
0x3368   :  { %v4816_v43 = vadd.f32 %v4815_v8, %v4814_v29 }
0x336a   :  { %9910 = vrcp.f32 %v4816_v43 }
0x3374   :  { %v9911_v33 = vpop.eup %9910 }
0x3375   :  { %v4818_v10 = vmul.f32 %v9911_v33, %v9905_v42  ;;  %v4819_v21 = vmul.f32 %v9911_v33, %v9907_v2  ;;  %v4820_v50 = vmul.f32 %v9911_v33, %v9909_v12  ;;  %v10101_v12 = vld [vmem:[#allocation21] ss:$0 sm:$0xff] }
0x3376   :  { %v4915_v13 = vmul.f32 %v10101_v12, %v12322_v62  ;;  %v4916_v23 = vmul.f32 %v10101_v12, %v12325_v38  ;;  %v4917_v32 = vmul.f32 %v10101_v12, %v12328_v9 }
0x3377   :  { %v4821_v35 = vmul.f32 %v4818_v10, %v11010_v57  ;;  %v4822_v6 = vmul.f32 %v4819_v21, %v11014_v61  ;;  %v4823_v20 = vmul.f32 %v4820_v50, %v11016_v0  ;;  %v5082_v61 = vld [vmem:[#allocation13 + $0x8] sm:$0xff] }
0x3378   :  { %v12359_v0 = vpack.c.bf16 %v5082_v61, %v5081_v1  ;;  %v12987_v21 = vld [vmem:[#allocation43_spill] sm:$0xff] }
0x3379   :  { %v4824_v11 = vsel %vm261_vm1, %v4821_v35, 0.0  ;;  %v4825_v4 = vsel %vm261_vm1, %v4822_v6, 0.0  ;;  %v4827_v51 = vsel %vm433_vm2, %v4823_v20, 0.0  ;;  %v5202_v50 = vld [vmem:[#allocation18] sm:$0xff]  ;;  %v5203_v35 = vld [vmem:[#allocation18 + $0x8] sm:$0xff]  ;;  %v5204_v6 = vld [vmem:[#allocation18 + $0x10] sm:$0xff] }
0x337a   :  { %v4826_v5 = vadd.f32 %v4825_v4, %v4824_v11  ;;  %v5078_v46 = vpop.permute.xlu0 %5077  ;;  %v12396_v20 = vpack.c.bf16 %v5203_v35, %v5202_v50  ;;  %v5205_v11 = vld [vmem:[#allocation18 + $0x18] sm:$0xff] }
0x337b   :  { %v5080_v47 = vmul.f32 %v9899_v53, %v5078_v46  ;;  %v12363_v53 = vpack.c.bf16 %v5084_v36, %v5083_v18  ;;  %v12399_v4 = vpack.c.bf16 %v5205_v11, %v5204_v6 }
0x337c   :  { %v4828_v40 = vadd.f32 %v4827_v51, %v4826_v5  ;;  %9394 = vmatpush3.bf16.msra.mxu1 %v12396_v20 }
0x337d   :  { %5086 = vrot.lane.b32.xlu1 %v5080_v47, %s10520_s19  ;;  %9395 = vmatprep.subr.bf16.mxu1 %v12947_v45 }
0x337e   :  { %v4829_v54 = vrot.slane %v4828_v40, 4 }
0x3380   :  { %v4830_v26 = vadd.f32 %v4829_v54, %v4828_v40  ;;  %9397 = vmatpush3.bf16.msra.mxu1 %v12399_v4 }
0x3381   :  { %9404 = vmatprep.subr.bf16.mxu1 %v12947_v45 }
0x3382   :  { %v4831_v52 = vrot.slane %v4830_v26, 2 }
0x3384   :  { %v4832_v57 = vadd.f32 %v4831_v52, %v4830_v26 }
0x3386   :  { %v4833_v34 = vrot.slane %v4832_v57, 1 }
0x3388   :  { %v4834_v44 = vadd.f32 %v4833_v34, %v4832_v57 }
0x338a   :  { %8865 = vmatmul.mubr.msk.f32.vlgmr.msra.gmra.mrb[42].mxu0 %vm261_vm1, %v4834_v44 }
0x338b   :  { %9388 = vmatpush3.bf16.msra.mxu0 %v12359_v0  ;;  %8886 = vmatprep.mubr.msk.f32.mxu0 %vm10517_vm0, %v12946_v22 }
0x338c   :  { %9389 = vmatprep.subr.bf16.mxu0 %v12947_v45 }
0x338f   :  { %9391 = vmatpush3.bf16.msra.mxu0 %v12363_v53 }
0x3390   :  { %9398 = vmatprep.subr.bf16.mxu0 %v12947_v45 }
0x33ef   :  { %v5087_v19 = vpop.permute.xlu1 %5086 }
0x33f0   :  { %8887 = vmatmul.mubr.msk.f32.vlgmr.msra.gmra.mrb[44].mxu0 %vm261_vm1, %v5087_v19 }
0x33f1   :  { %9400 = vmatpush3.bf16.msra.mxu0 %v12301_v15  ;;  %8908 = vmatprep.mubr.msk.f32.mxu0 %vm10517_vm0, %v12946_v22 }
0x33f2   :  { %9401 = vmatprep.subr.bf16.mxu0 %v12947_v45 }
0x33f5   :  { %9403 = vmatpush3.bf16.msra.mxu0 %v12311_v37 }
0x33f6   :  { %9410 = vmatprep.subr.bf16.mxu0 %v12947_v45 }
0x345d   :  { %v4904_v27 = vpop.f32.mrb[42].mxu0 }
0x345e   :  { %v4911_v42 = vrot.slane %v4904_v27, %v11063_v48  ;;  %v8866_v2 = vpop.f32.mrb[43].mxu0 }
0x3460   :  { %v4912_v14 = vadd.f32 %v4911_v42, %v11008_v56  ;;  %v4913_v16 = vadd.f32 %v4911_v42, %v11012_v60  ;;  %v4914_v41 = vadd.f32 %v4911_v42, %v11018_v3  ;;  %v12392_v56 = vld [vmem:[#allocation15] ss:$0 sm:$0xff] }
0x3462   :  { %v12384_v29 = vadd.f32 %v4915_v13, %v4912_v14  ;;  %v12386_v8 = vadd.f32 %v4916_v23, %v4913_v16  ;;  %v12388_v43 = vadd.f32 %v4917_v32, %v4914_v41 }
0x34c3   :  { %v5156_v33 = vpop.f32.mrb[44].mxu0 }
0x34c4   :  { %v5163_v10 = vrot.slane %v5156_v33, %v11063_v48  ;;  %v8888_v62 = vpop.f32.mrb[45].mxu0 }
0x34c6   :  { %v5164_v38 = vadd.f32 %v5163_v10, %v12987_v21 }
0x34c8   :  { %9912 = vtanh.f32 %v5164_v38  ;;  %v12988_v38 = vld [vmem:[#allocation42_spill] sm:$0xff] }
0x34d2   :  { %v9913_v60 = vpop.eup %9912 }
0x34d3   :  { %v5173_v3 = vmul.f32 %v9913_v60, %v12392_v56 }
0x34d5   :  { %v5174_v9 = vsel %vm261_vm1, %v5173_v3, 0.0  ;;  %v12415_v3 = vld [vmem:[#allocation19] ss:$0 sm:$0xff] }
0x34d6   :  { %5175 = vadd.xlane.f32.xlu1 %v5174_v9 }
0x3563   :  { %v5176_v5 = vpop.xlane.xlu1 %5175 }
0x3564   :  { %v5177_v46 = vrot.slane %v5176_v5, 4 }
0x3566   :  { %v5178_v47 = vmax.f32 %v5176_v5, %v5177_v46 }
0x3568   :  { %v5179_v51 = vrot.slane %v5178_v47, 2 }
0x356a   :  { %v5180_v40 = vmax.f32 %v5178_v47, %v5179_v51 }
0x356c   :  { %v5181_v54 = vrot.slane %v5180_v40, 1 }
0x356e   :  { %v5182_v26 = vmax.f32 %v5180_v40, %v5181_v54 }
0x3570   :  { %v5183_v52 = vsub.f32 %v5176_v5, %v5182_v26 }
0x3572   :  { %v5184_v57 = vmul.f32 1.442695, %v5183_v52 }
0x3574   :  { %9914 = vpow2.f32 %v5184_v57 }
0x357e   :  { %v9915_v1 = vpop.eup %9914 }
0x357f   :  { %v5186_v61 = vrot.slane %v9915_v1, 4 }
0x3581   :  { %v5187_v34 = vadd.f32 %v9915_v1, %v5186_v61 }
0x3583   :  { %v5188_v44 = vrot.slane %v5187_v34, 2 }
0x3585   :  { %v5189_v18 = vadd.f32 %v5188_v44, %v5187_v34 }
0x3587   :  { %v5190_v36 = vrot.slane %v5189_v18, 1 }
0x3589   :  { %v5191_v19 = vadd.f32 %v5190_v36, %v5189_v18 }
0x358b   :  { %9916 = vrcp.f32 %v5191_v19 }
0x3595   :  { %v9917_v27 = vpop.eup %9916 }
0x3596   :  { %v5193_v42 = vmul.f32 %v9917_v27, %v9915_v1  ;;  %v12989_v27 = vld [vmem:[#allocation41_spill] sm:$0xff] }
0x3598   :  { %v5194_v2 = vmul.f32 %v5193_v42, %v12987_v21 }
0x359a   :  { %v5195_v12 = vsel %vm261_vm1, %v5194_v2, 0.0 }
0x359b   :  { %v5196_v13 = vrot.slane %v5195_v12, 4 }
0x359d   :  { %v5197_v23 = vadd.f32 %v5196_v13, %v5195_v12 }
0x359f   :  { %v5198_v14 = vrot.slane %v5197_v23, 2 }
0x35a1   :  { %v5199_v16 = vadd.f32 %v5198_v14, %v5197_v23 }
0x35a3   :  { %v5200_v41 = vrot.slane %v5199_v16, 1 }
0x35a5   :  { %v5201_v32 = vadd.f32 %v5200_v41, %v5199_v16 }
0x35a7   :  { %8898 = vmatmul.mubr.msk.f32.vlgmr.msra.gmra.mrb[40].mxu1 %vm261_vm1, %v5201_v32 }
0x35a8   :  { %9406 = vmatpush3.bf16.msra.mxu1 %v12359_v0  ;;  %8919 = vmatprep.mubr.msk.f32.mxu1 %vm10517_vm0, %v12946_v22 }
0x35a9   :  { %9407 = vmatprep.subr.bf16.mxu1 %v12947_v45 }
0x35ac   :  { %9409 = vmatpush3.bf16.msra.mxu1 %v12363_v53 }
0x35ad   :  { %9416 = vmatprep.subr.bf16.mxu1 %v12947_v45 }
0x367a   :  { %v5275_v33 = vpop.f32.mrb[40].mxu1 }
0x367b   :  { %v5282_v10 = vrot.slane %v5275_v33, %v11063_v48  ;;  %v8899_v62 = vpop.f32.mrb[41].mxu1 }
0x367d   :  { %v5283_v60 = vadd.f32 %v5282_v10, %v12988_v38 }
0x367f   :  { %9918 = vtanh.f32 %v5283_v60 }
0x3689   :  { %v9919_v9 = vpop.eup %9918 }
0x368a   :  { %v5292_v50 = vmul.f32 %v9919_v9, %v12415_v3 }
0x368c   :  { %v5293_v35 = vsel %vm261_vm1, %v5292_v50, 0.0 }
0x368d   :  { %5294 = vadd.xlane.f32.xlu0 %v5293_v35 }
0x371a   :  { %v5295_v6 = vpop.xlane.xlu0 %5294 }
0x371b   :  { %v5296_v11 = vrot.slane %v5295_v6, 4 }
0x371d   :  { %v5297_v5 = vmax.f32 %v5295_v6, %v5296_v11 }
0x371f   :  { %v5298_v46 = vrot.slane %v5297_v5, 2 }
0x3721   :  { %v5299_v47 = vmax.f32 %v5297_v5, %v5298_v46 }
0x3723   :  { %v5300_v51 = vrot.slane %v5299_v47, 1 }
0x3725   :  { %v5301_v40 = vmax.f32 %v5299_v47, %v5300_v51 }
0x3727   :  { %v5302_v54 = vsub.f32 %v5295_v6, %v5301_v40 }
0x3729   :  { %v5303_v26 = vmul.f32 1.442695, %v5302_v54 }
0x372b   :  { %9920 = vpow2.f32 %v5303_v26 }
0x3735   :  { %v9921_v52 = vpop.eup %9920 }
0x3736   :  { %v5305_v57 = vrot.slane %v9921_v52, 4 }
0x3738   :  { %v5306_v1 = vadd.f32 %v9921_v52, %v5305_v57 }
0x373a   :  { %v5307_v61 = vrot.slane %v5306_v1, 2 }
0x373c   :  { %v5308_v34 = vadd.f32 %v5307_v61, %v5306_v1 }
0x373e   :  { %v5309_v44 = vrot.slane %v5308_v34, 1 }
0x3740   :  { %v5310_v18 = vadd.f32 %v5309_v44, %v5308_v34 }
0x3742   :  { %9922 = vrcp.f32 %v5310_v18 }
0x374c   :  { %v9923_v36 = vpop.eup %9922 }
0x374d   :  { %v5312_v19 = vmul.f32 %v9923_v36, %v9921_v52 }
0x374f   :  { %v5313_v42 = vmul.f32 %v12989_v27, %v5312_v19 }
0x3751   :  { %v5314_v2 = vsel %vm261_vm1, %v5313_v42, 0.0 }
0x3752   :  { %v5315_v12 = vrot.slane %v5314_v2, 4 }
0x3754   :  { %v5316_v13 = vadd.f32 %v5315_v12, %v5314_v2 }
0x3756   :  { %v5317_v23 = vrot.slane %v5316_v13, 2 }
0x3758   :  { %v5318_v14 = vadd.f32 %v5317_v23, %v5316_v13 }
0x375a   :  { %v5319_v16 = vrot.slane %v5318_v14, 1 }
0x375c   :  { %v12421_v41 = vadd.f32 %v5319_v16, %v5318_v14 }
0x375e   :  { %8909 = vmatmul.mubr.msk.f32.vlgmr.msra.gmra.mrb[46].mxu0 %vm261_vm1, %v12421_v41 }
0x375f   :  { %9412 = vmatpush3.bf16.msra.mxu0 %v12396_v20  ;;  %8930 = vmatprep.mubr.msk.f32.mxu0 %vm10517_vm0, %v12946_v22 }
0x3760   :  { %9413 = vmatprep.subr.bf16.mxu0 %v12947_v45 }
0x3763   :  { %9415 = vmatpush3.bf16.msra.mxu0 %v12399_v4 }
0x3764   :  { %9422 = vmatprep.subr.bf16.mxu0 %v12947_v45 }
0x3831   :  { %v5403_v32 = vpop.f32.mrb[46].mxu0 }
0x3832   :  { %v5404_v33 = vadd.f32 %v5403_v32, %v12338_v28  ;;  %v8910_v10 = vpop.f32.mrb[47].mxu0 }
0x3834   :  { %9924 = vtanh.f32 %v5404_v33  ;;  %v8101_v60 = vmul.f32 -1.442695, %v5404_v33 }
0x3836   :  { %9926 = vpow2.f32 %v8101_v60 }
0x383e   :  { %v9925_v62 = vpop.eup %9924 }
0x383f   :  { %5416 = vrot.lane.b32.xlu0 %v9925_v62, %s10519_s4 }
0x3840   :  { %v9927_v9 = vpop.eup %9926 }
0x3841   :  { %v5410_v50 = vadd.f32 1.0, %v9927_v9 }
0x3843   :  { %9928 = vrcp.f32 %v5410_v50 }
0x384d   :  { %v9929_v35 = vpop.eup %9928 }
0x384e   :  { %v5414_v5 = vmul.f32 %v9929_v35, %v12346_v7 }
0x38b1   :  { %v5417_v6 = vpop.permute.xlu0 %5416 }
0x38b2   :  { %v5419_v11 = vmul.f32 %v9929_v35, %v5417_v6 }
0x38b4   :  { %5421 = vrot.lane.b32.xlu1 %v5419_v11, %s10520_s19 }
0x3926   :  { %v5422_v46 = vpop.permute.xlu1 %5421 }
0x3927   :  { %v5424_v47 = vadd.f32 %v5422_v46, %v5414_v5 }
0x3929   :  { %9930 = vtanh.f32 %v5424_v47 }
0x3933   :  { %v9931_v51 = vpop.eup %9930 }
0x3934   :  { %5427 = vrot.lane.b32.xlu1 %v9931_v51, %s10519_s4 }
0x39a6   :  { %v5428_v40 = vpop.permute.xlu1 %5427 }
0x39a7   :  { %v5430_v54 = vmul.f32 %v9929_v35, %v5428_v40 }
0x39a9   :  { %5432 = vrot.lane.b32.xlu0 %v5430_v54, %s10520_s19 }
0x3a1b   :  { %v5433_v26 = vpop.permute.xlu0 %5432 }
0x3a1c   :  { %8920 = vmatmul.mubr.msk.f32.vlgmr.msra.gmra.mrb[42].mxu1 %vm261_vm1, %v5433_v26 }
0x3a1d   :  { %9418 = vmatpush3.bf16.msra.mxu1 %v12301_v15  ;;  %8941 = vmatprep.mubr.msk.f32.mxu1 %vm10517_vm0, %v12946_v22 }
0x3a1e   :  { %9419 = vmatprep.subr.bf16.mxu1 %v12947_v45 }
0x3a21   :  { %9421 = vmatpush3.bf16.msra.mxu1 %v12311_v37 }
0x3a22   :  { %9428 = vmatprep.subr.bf16.mxu1 %v12947_v45 }
0x3aef   :  { %v5502_v52 = vpop.f32.mrb[42].mxu1 }
0x3af0   :  { %v5509_v57 = vrot.slane %v5502_v52, %v11063_v48  ;;  %v8921_v1 = vpop.f32.mrb[43].mxu1 }
0x3af2   :  { %v5510_v61 = vadd.f32 %v5509_v57, %v12987_v21 }
0x3af4   :  { %9932 = vtanh.f32 %v5510_v61 }
0x3afe   :  { %v9933_v34 = vpop.eup %9932 }
0x3aff   :  { %v5512_v44 = vmul.f32 %v9933_v34, %v12392_v56 }
0x3b01   :  { %v5513_v18 = vsel %vm261_vm1, %v5512_v44, 0.0 }
0x3b02   :  { %5514 = vadd.xlane.f32.xlu1 %v5513_v18 }
0x3b8f   :  { %v5515_v36 = vpop.xlane.xlu1 %5514 }
0x3b90   :  { %v5516_v19 = vrot.slane %v5515_v36, 4 }
0x3b92   :  { %v5517_v42 = vmax.f32 %v5515_v36, %v5516_v19 }
0x3b94   :  { %v5518_v2 = vrot.slane %v5517_v42, 2 }
0x3b96   :  { %v5519_v12 = vmax.f32 %v5517_v42, %v5518_v2 }
0x3b98   :  { %v5520_v13 = vrot.slane %v5519_v12, 1 }
0x3b9a   :  { %v5521_v23 = vmax.f32 %v5519_v12, %v5520_v13 }
0x3b9c   :  { %v5522_v14 = vsub.f32 %v5515_v36, %v5521_v23 }
0x3b9e   :  { %v5523_v16 = vmul.f32 1.442695, %v5522_v14 }
0x3ba0   :  { %9934 = vpow2.f32 %v5523_v16 }
0x3baa   :  { %v9935_v32 = vpop.eup %9934 }
0x3bab   :  { %v5525_v33 = vrot.slane %v9935_v32, 4 }
0x3bad   :  { %v5526_v10 = vadd.f32 %v9935_v32, %v5525_v33 }
0x3baf   :  { %v5527_v62 = vrot.slane %v5526_v10, 2 }
0x3bb1   :  { %v5528_v60 = vadd.f32 %v5527_v62, %v5526_v10 }
0x3bb3   :  { %v5529_v9 = vrot.slane %v5528_v60, 1 }
0x3bb5   :  { %v5530_v50 = vadd.f32 %v5529_v9, %v5528_v60 }
0x3bb7   :  { %9936 = vrcp.f32 %v5530_v50 }
0x3bc1   :  { %v9937_v35 = vpop.eup %9936 }
0x3bc2   :  { %v5532_v6 = vmul.f32 %v9937_v35, %v9935_v32 }
0x3bc4   :  { %v5533_v11 = vmul.f32 %v5532_v6, %v12987_v21 }
0x3bc6   :  { %v5534_v5 = vsel %vm261_vm1, %v5533_v11, 0.0 }
0x3bc7   :  { %v5535_v46 = vrot.slane %v5534_v5, 4 }
0x3bc9   :  { %v5536_v47 = vadd.f32 %v5535_v46, %v5534_v5 }
0x3bcb   :  { %v5537_v51 = vrot.slane %v5536_v47, 2 }
0x3bcd   :  { %v5538_v40 = vadd.f32 %v5537_v51, %v5536_v47 }
0x3bcf   :  { %v5539_v54 = vrot.slane %v5538_v40, 1 }
0x3bd1   :  { %v5540_v26 = vadd.f32 %v5539_v54, %v5538_v40 }
0x3bd3   :  { %8931 = vmatmul.mubr.msk.f32.vlgmr.msra.gmra.mrb[48].mxu0 %vm261_vm1, %v5540_v26 }
0x3bd4   :  { %9424 = vmatpush3.bf16.msra.mxu0 %v12359_v0  ;;  %8952 = vmatprep.mubr.msk.f32.mxu0 %vm10517_vm0, %v12946_v22 }
0x3bd5   :  { %9425 = vmatprep.subr.bf16.mxu0 %v12947_v45 }
0x3bd8   :  { %9427 = vmatpush3.bf16.msra.mxu0 %v12363_v53 }
0x3bd9   :  { %9434 = vmatprep.subr.bf16.mxu0 %v12947_v45 }
0x3ca6   :  { %v5610_v52 = vpop.f32.mrb[48].mxu0 }
0x3ca7   :  { %v5617_v57 = vrot.slane %v5610_v52, %v11063_v48  ;;  %v8932_v1 = vpop.f32.mrb[49].mxu0 }
0x3ca9   :  { %v5618_v61 = vadd.f32 %v5617_v57, %v12988_v38 }
0x3cab   :  { %9938 = vtanh.f32 %v5618_v61 }
0x3cb5   :  { %v9939_v34 = vpop.eup %9938 }
0x3cb6   :  { %v5620_v44 = vmul.f32 %v9939_v34, %v12415_v3 }
0x3cb8   :  { %v5621_v18 = vsel %vm261_vm1, %v5620_v44, 0.0 }
0x3cb9   :  { %5622 = vadd.xlane.f32.xlu0 %v5621_v18 }
0x3d46   :  { %v5623_v36 = vpop.xlane.xlu0 %5622 }
0x3d47   :  { %v5624_v19 = vrot.slane %v5623_v36, 4 }
0x3d49   :  { %v5625_v42 = vmax.f32 %v5623_v36, %v5624_v19 }
0x3d4b   :  { %v5626_v2 = vrot.slane %v5625_v42, 2 }
0x3d4d   :  { %v5627_v12 = vmax.f32 %v5625_v42, %v5626_v2 }
0x3d4f   :  { %v5628_v13 = vrot.slane %v5627_v12, 1 }
0x3d51   :  { %v5629_v23 = vmax.f32 %v5627_v12, %v5628_v13 }
0x3d53   :  { %v5630_v14 = vsub.f32 %v5623_v36, %v5629_v23 }
0x3d55   :  { %v5631_v16 = vmul.f32 1.442695, %v5630_v14 }
0x3d57   :  { %9940 = vpow2.f32 %v5631_v16 }
0x3d61   :  { %v9941_v32 = vpop.eup %9940 }
0x3d62   :  { %v5633_v33 = vrot.slane %v9941_v32, 4 }
0x3d64   :  { %v5634_v10 = vadd.f32 %v9941_v32, %v5633_v33 }
0x3d66   :  { %v5635_v62 = vrot.slane %v5634_v10, 2 }
0x3d68   :  { %v5636_v60 = vadd.f32 %v5635_v62, %v5634_v10 }
0x3d6a   :  { %v5637_v9 = vrot.slane %v5636_v60, 1 }
0x3d6c   :  { %v5638_v50 = vadd.f32 %v5637_v9, %v5636_v60 }
0x3d6e   :  { %9942 = vrcp.f32 %v5638_v50 }
0x3d78   :  { %v9943_v35 = vpop.eup %9942 }
0x3d79   :  { %v5640_v6 = vmul.f32 %v9943_v35, %v9941_v32 }
0x3d7b   :  { %v5641_v11 = vmul.f32 %v12989_v27, %v5640_v6 }
0x3d7d   :  { %v5642_v5 = vsel %vm261_vm1, %v5641_v11, 0.0 }
0x3d7e   :  { %v5643_v46 = vrot.slane %v5642_v5, 4 }
0x3d80   :  { %v5644_v47 = vadd.f32 %v5643_v46, %v5642_v5 }
0x3d82   :  { %v5645_v51 = vrot.slane %v5644_v47, 2 }
0x3d84   :  { %v5646_v40 = vadd.f32 %v5645_v51, %v5644_v47 }
0x3d86   :  { %v5647_v54 = vrot.slane %v5646_v40, 1 }
0x3d88   :  { %v12463_v26 = vadd.f32 %v5647_v54, %v5646_v40 }
0x3d8a   :  { %8942 = vmatmul.mubr.msk.f32.vlgmr.msra.gmra.mrb[44].mxu1 %vm261_vm1, %v12463_v26 }
0x3d8b   :  { %9430 = vmatpush3.bf16.msra.mxu1 %v12396_v20  ;;  %8963 = vmatprep.mubr.msk.f32.mxu1 %vm10517_vm0, %v12946_v22 }
0x3d8c   :  { %9431 = vmatprep.subr.bf16.mxu1 %v12947_v45 }
0x3d8f   :  { %9433 = vmatpush3.bf16.msra.mxu1 %v12399_v4 }
0x3d90   :  { %9440 = vmatprep.subr.bf16.mxu1 %v12947_v45 }
0x3e5d   :  { %v5729_v52 = vpop.f32.mrb[44].mxu1 }
0x3e5e   :  { %v5730_v57 = vadd.f32 %v5729_v52, %v12338_v28  ;;  %v8943_v1 = vpop.f32.mrb[45].mxu1 }
0x3e60   :  { %9944 = vtanh.f32 %v5730_v57  ;;  %v8105_v34 = vmul.f32 -1.442695, %v5730_v57 }
0x3e62   :  { %9946 = vpow2.f32 %v8105_v34 }
0x3e6a   :  { %v9945_v61 = vpop.eup %9944 }
0x3e6b   :  { %5742 = vrot.lane.b32.xlu0 %v9945_v61, %s10519_s4 }
0x3e6c   :  { %v9947_v44 = vpop.eup %9946 }
0x3e6d   :  { %v5736_v18 = vadd.f32 1.0, %v9947_v44 }
0x3e6f   :  { %9948 = vrcp.f32 %v5736_v18 }
0x3e79   :  { %v9949_v36 = vpop.eup %9948 }
0x3e7a   :  { %v5740_v2 = vmul.f32 %v9949_v36, %v12346_v7 }
0x3edd   :  { %v5743_v19 = vpop.permute.xlu0 %5742 }
0x3ede   :  { %v5745_v42 = vmul.f32 %v9949_v36, %v5743_v19 }
0x3ee0   :  { %5747 = vrot.lane.b32.xlu1 %v5745_v42, %s10520_s19 }
0x3f52   :  { %v5748_v12 = vpop.permute.xlu1 %5747 }
0x3f53   :  { %v5750_v13 = vadd.f32 %v5748_v12, %v5740_v2 }
0x3f55   :  { %9950 = vtanh.f32 %v5750_v13 }
0x3f5f   :  { %v9951_v23 = vpop.eup %9950 }
0x3f60   :  { %5753 = vrot.lane.b32.xlu1 %v9951_v23, %s10519_s4 }
0x3fd2   :  { %v5754_v14 = vpop.permute.xlu1 %5753 }
0x3fd3   :  { %v5756_v16 = vmul.f32 %v9949_v36, %v5754_v14 }
0x3fd5   :  { %5758 = vrot.lane.b32.xlu0 %v5756_v16, %s10520_s19 }
0x4047   :  { %v5759_v32 = vpop.permute.xlu0 %5758 }
0x4048   :  { %8953 = vmatmul.mubr.msk.f32.vlgmr.msra.gmra.mrb[50].mxu0 %vm261_vm1, %v5759_v32 }
0x4049   :  { %9436 = vmatpush3.bf16.msra.mxu0 %v12301_v15  ;;  %8974 = vmatprep.mubr.msk.f32.mxu0 %vm10517_vm0, %v12946_v22 }
0x404a   :  { %9437 = vmatprep.subr.bf16.mxu0 %v12947_v45 }
0x404d   :  { %9439 = vmatpush3.bf16.msra.mxu0 %v12311_v37 }
0x404e   :  { %9446 = vmatprep.subr.bf16.mxu0 %v12947_v45 }
0x411b   :  { %v5828_v33 = vpop.f32.mrb[50].mxu0 }
0x411c   :  { %v5835_v10 = vrot.slane %v5828_v33, %v11063_v48  ;;  %v8954_v62 = vpop.f32.mrb[51].mxu0 }
0x411e   :  { %v5836_v60 = vadd.f32 %v5835_v10, %v12987_v21 }
0x4120   :  { %9952 = vtanh.f32 %v5836_v60 }
0x412a   :  { %v9953_v9 = vpop.eup %9952 }
0x412b   :  { %v5838_v50 = vmul.f32 %v9953_v9, %v12392_v56 }
0x412d   :  { %v5839_v35 = vsel %vm261_vm1, %v5838_v50, 0.0 }
0x412e   :  { %5840 = vadd.xlane.f32.xlu1 %v5839_v35 }
0x41bb   :  { %v5841_v6 = vpop.xlane.xlu1 %5840 }
0x41bc   :  { %v5842_v11 = vrot.slane %v5841_v6, 4 }
0x41be   :  { %v5843_v5 = vmax.f32 %v5841_v6, %v5842_v11 }
0x41c0   :  { %v5844_v46 = vrot.slane %v5843_v5, 2 }
0x41c2   :  { %v5845_v47 = vmax.f32 %v5843_v5, %v5844_v46 }
0x41c4   :  { %v5846_v51 = vrot.slane %v5845_v47, 1 }
0x41c6   :  { %v5847_v40 = vmax.f32 %v5845_v47, %v5846_v51 }
0x41c8   :  { %v5848_v54 = vsub.f32 %v5841_v6, %v5847_v40 }
0x41ca   :  { %v5849_v52 = vmul.f32 1.442695, %v5848_v54 }
0x41cc   :  { %9954 = vpow2.f32 %v5849_v52 }
0x41d6   :  { %v9955_v57 = vpop.eup %9954 }
0x41d7   :  { %v5851_v1 = vrot.slane %v9955_v57, 4 }
0x41d9   :  { %v5852_v61 = vadd.f32 %v9955_v57, %v5851_v1 }
0x41db   :  { %v5853_v34 = vrot.slane %v5852_v61, 2 }
0x41dd   :  { %v5854_v44 = vadd.f32 %v5853_v34, %v5852_v61 }
0x41df   :  { %v5855_v18 = vrot.slane %v5854_v44, 1 }
0x41e1   :  { %v5856_v36 = vadd.f32 %v5855_v18, %v5854_v44 }
0x41e3   :  { %9956 = vrcp.f32 %v5856_v36 }
0x41ed   :  { %v9957_v19 = vpop.eup %9956 }
0x41ee   :  { %v5858_v42 = vmul.f32 %v9957_v19, %v9955_v57 }
0x41f0   :  { %v5859_v2 = vmul.f32 %v5858_v42, %v12987_v21 }
0x41f2   :  { %v5860_v12 = vsel %vm261_vm1, %v5859_v2, 0.0 }
0x41f3   :  { %v5861_v13 = vrot.slane %v5860_v12, 4 }
0x41f5   :  { %v5862_v23 = vadd.f32 %v5861_v13, %v5860_v12 }
0x41f7   :  { %v5863_v14 = vrot.slane %v5862_v23, 2 }
0x41f9   :  { %v5864_v16 = vadd.f32 %v5863_v14, %v5862_v23 }
0x41fb   :  { %v5865_v32 = vrot.slane %v5864_v16, 1 }
0x41fd   :  { %v5866_v33 = vadd.f32 %v5865_v32, %v5864_v16 }
0x41ff   :  { %8964 = vmatmul.mubr.msk.f32.vlgmr.msra.gmra.mrb[46].mxu1 %vm261_vm1, %v5866_v33 }
0x4200   :  { %9442 = vmatpush3.bf16.msra.mxu1 %v12359_v0  ;;  %8985 = vmatprep.mubr.msk.f32.mxu1 %vm10517_vm0, %v12946_v22 }
0x4201   :  { %9443 = vmatprep.subr.bf16.mxu1 %v12947_v45 }
0x4204   :  { %9445 = vmatpush3.bf16.msra.mxu1 %v12363_v53 }
0x4205   :  { %9452 = vmatprep.subr.bf16.mxu1 %v12947_v45 }
0x42d2   :  { %v5936_v10 = vpop.f32.mrb[46].mxu1 }
0x42d3   :  { %v5943_v62 = vrot.slane %v5936_v10, %v11063_v48  ;;  %v8965_v60 = vpop.f32.mrb[47].mxu1 }
0x42d5   :  { %v5944_v9 = vadd.f32 %v5943_v62, %v12988_v38 }
0x42d7   :  { %9958 = vtanh.f32 %v5944_v9 }
0x42e1   :  { %v9959_v50 = vpop.eup %9958 }
0x42e2   :  { %v5946_v35 = vmul.f32 %v9959_v50, %v12415_v3 }
0x42e4   :  { %v5947_v6 = vsel %vm261_vm1, %v5946_v35, 0.0 }
0x42e5   :  { %5948 = vadd.xlane.f32.xlu0 %v5947_v6 }
0x4372   :  { %v5949_v11 = vpop.xlane.xlu0 %5948 }
0x4373   :  { %v5950_v5 = vrot.slane %v5949_v11, 4 }
0x4375   :  { %v5951_v46 = vmax.f32 %v5949_v11, %v5950_v5 }
0x4377   :  { %v5952_v47 = vrot.slane %v5951_v46, 2 }
0x4379   :  { %v5953_v51 = vmax.f32 %v5951_v46, %v5952_v47 }
0x437b   :  { %v5954_v40 = vrot.slane %v5953_v51, 1 }
0x437d   :  { %v5955_v54 = vmax.f32 %v5953_v51, %v5954_v40 }
0x437f   :  { %v5956_v52 = vsub.f32 %v5949_v11, %v5955_v54 }
0x4381   :  { %v5957_v57 = vmul.f32 1.442695, %v5956_v52 }
0x4383   :  { %9960 = vpow2.f32 %v5957_v57 }
0x438d   :  { %v9961_v1 = vpop.eup %9960 }
0x438e   :  { %v5959_v61 = vrot.slane %v9961_v1, 4 }
0x4390   :  { %v5960_v34 = vadd.f32 %v9961_v1, %v5959_v61 }
0x4392   :  { %v5961_v44 = vrot.slane %v5960_v34, 2 }
0x4394   :  { %v5962_v18 = vadd.f32 %v5961_v44, %v5960_v34 }
0x4396   :  { %v5963_v36 = vrot.slane %v5962_v18, 1 }
0x4398   :  { %v5964_v19 = vadd.f32 %v5963_v36, %v5962_v18 }
0x439a   :  { %9962 = vrcp.f32 %v5964_v19 }
0x43a4   :  { %v9963_v42 = vpop.eup %9962 }
0x43a5   :  { %v5966_v2 = vmul.f32 %v9963_v42, %v9961_v1 }
0x43a7   :  { %v5967_v12 = vmul.f32 %v12989_v27, %v5966_v2 }
0x43a9   :  { %v5968_v13 = vsel %vm261_vm1, %v5967_v12, 0.0 }
0x43aa   :  { %v5969_v23 = vrot.slane %v5968_v13, 4 }
0x43ac   :  { %v5970_v14 = vadd.f32 %v5969_v23, %v5968_v13 }
0x43ae   :  { %v5971_v16 = vrot.slane %v5970_v14, 2 }
0x43b0   :  { %v5972_v32 = vadd.f32 %v5971_v16, %v5970_v14 }
0x43b2   :  { %v5973_v33 = vrot.slane %v5972_v32, 1 }
0x43b4   :  { %v12505_v10 = vadd.f32 %v5973_v33, %v5972_v32 }
0x43b6   :  { %8975 = vmatmul.mubr.msk.f32.vlgmr.msra.gmra.mrb[52].mxu0 %vm261_vm1, %v12505_v10 }
0x43b7   :  { %9448 = vmatpush3.bf16.msra.mxu0 %v12396_v20  ;;  %8996 = vmatprep.mubr.msk.f32.mxu0 %vm10517_vm0, %v12946_v22 }
0x43b8   :  { %9449 = vmatprep.subr.bf16.mxu0 %v12947_v45 }
0x43bb   :  { %9451 = vmatpush3.bf16.msra.mxu0 %v12399_v4 }
0x43bc   :  { %9458 = vmatprep.subr.bf16.mxu0 %v12947_v45 }
0x4489   :  { %v6055_v62 = vpop.f32.mrb[52].mxu0 }
0x448a   :  { %v6056_v60 = vadd.f32 %v6055_v62, %v12338_v28  ;;  %v8976_v9 = vpop.f32.mrb[53].mxu0 }
0x448c   :  { %9964 = vtanh.f32 %v6056_v60  ;;  %v8109_v35 = vmul.f32 -1.442695, %v6056_v60 }
0x448e   :  { %9966 = vpow2.f32 %v8109_v35 }
0x4496   :  { %v9965_v50 = vpop.eup %9964 }
0x4497   :  { %6068 = vrot.lane.b32.xlu0 %v9965_v50, %s10519_s4 }
0x4498   :  { %v9967_v6 = vpop.eup %9966 }
0x4499   :  { %v6062_v11 = vadd.f32 1.0, %v9967_v6 }
0x449b   :  { %9968 = vrcp.f32 %v6062_v11 }
0x44a5   :  { %v9969_v5 = vpop.eup %9968 }
0x44a6   :  { %v6066_v51 = vmul.f32 %v9969_v5, %v12346_v7 }
0x4509   :  { %v6069_v46 = vpop.permute.xlu0 %6068 }
0x450a   :  { %v6071_v47 = vmul.f32 %v9969_v5, %v6069_v46 }
0x450c   :  { %6073 = vrot.lane.b32.xlu1 %v6071_v47, %s10520_s19 }
0x457e   :  { %v6074_v40 = vpop.permute.xlu1 %6073 }
0x457f   :  { %v6076_v54 = vadd.f32 %v6074_v40, %v6066_v51 }
0x4581   :  { %9970 = vtanh.f32 %v6076_v54 }
0x458b   :  { %v9971_v52 = vpop.eup %9970 }
0x458c   :  { %6079 = vrot.lane.b32.xlu1 %v9971_v52, %s10519_s4 }
0x45fe   :  { %v6080_v57 = vpop.permute.xlu1 %6079 }
0x45ff   :  { %v6082_v1 = vmul.f32 %v9969_v5, %v6080_v57 }
0x4601   :  { %6084 = vrot.lane.b32.xlu0 %v6082_v1, %s10520_s19 }
0x4673   :  { %v6085_v61 = vpop.permute.xlu0 %6084 }
0x4674   :  { %8986 = vmatmul.mubr.msk.f32.vlgmr.msra.gmra.mrb[48].mxu1 %vm261_vm1, %v6085_v61 }
0x4675   :  { %9454 = vmatpush3.bf16.msra.mxu1 %v12301_v15  ;;  %9007 = vmatprep.mubr.msk.f32.mxu1 %vm10517_vm0, %v12946_v22 }
0x4676   :  { %9455 = vmatprep.subr.bf16.mxu1 %v12947_v45 }
0x4679   :  { %9457 = vmatpush3.bf16.msra.mxu1 %v12311_v37 }
0x467a   :  { %9464 = vmatprep.subr.bf16.mxu1 %v12947_v45 }
0x4747   :  { %v6154_v34 = vpop.f32.mrb[48].mxu1 }
0x4748   :  { %v6161_v44 = vrot.slane %v6154_v34, %v11063_v48  ;;  %v8987_v18 = vpop.f32.mrb[49].mxu1 }
0x474a   :  { %v6162_v36 = vadd.f32 %v6161_v44, %v12987_v21 }
0x474c   :  { %9972 = vtanh.f32 %v6162_v36 }
0x4756   :  { %v9973_v19 = vpop.eup %9972 }
0x4757   :  { %v6164_v42 = vmul.f32 %v9973_v19, %v12392_v56 }
0x4759   :  { %v6165_v2 = vsel %vm261_vm1, %v6164_v42, 0.0 }
0x475a   :  { %6166 = vadd.xlane.f32.xlu1 %v6165_v2 }
0x47e7   :  { %v6167_v12 = vpop.xlane.xlu1 %6166 }
0x47e8   :  { %v6168_v13 = vrot.slane %v6167_v12, 4 }
0x47ea   :  { %v6169_v23 = vmax.f32 %v6167_v12, %v6168_v13 }
0x47ec   :  { %v6170_v14 = vrot.slane %v6169_v23, 2 }
0x47ee   :  { %v6171_v16 = vmax.f32 %v6169_v23, %v6170_v14 }
0x47f0   :  { %v6172_v32 = vrot.slane %v6171_v16, 1 }
0x47f2   :  { %v6173_v33 = vmax.f32 %v6171_v16, %v6172_v32 }
0x47f4   :  { %v6174_v62 = vsub.f32 %v6167_v12, %v6173_v33 }
0x47f6   :  { %v6175_v60 = vmul.f32 1.442695, %v6174_v62 }
0x47f8   :  { %9974 = vpow2.f32 %v6175_v60 }
0x4802   :  { %v9975_v9 = vpop.eup %9974 }
0x4803   :  { %v6177_v50 = vrot.slane %v9975_v9, 4 }
0x4805   :  { %v6178_v35 = vadd.f32 %v9975_v9, %v6177_v50 }
0x4807   :  { %v6179_v6 = vrot.slane %v6178_v35, 2 }
0x4809   :  { %v6180_v11 = vadd.f32 %v6179_v6, %v6178_v35 }
0x480b   :  { %v6181_v5 = vrot.slane %v6180_v11, 1 }
0x480d   :  { %v6182_v46 = vadd.f32 %v6181_v5, %v6180_v11 }
0x480f   :  { %9976 = vrcp.f32 %v6182_v46 }
0x4819   :  { %v9977_v47 = vpop.eup %9976 }
0x481a   :  { %v6184_v51 = vmul.f32 %v9977_v47, %v9975_v9 }
0x481c   :  { %v6185_v40 = vmul.f32 %v6184_v51, %v12987_v21 }
0x481e   :  { %v6186_v54 = vsel %vm261_vm1, %v6185_v40, 0.0 }
0x481f   :  { %v6187_v52 = vrot.slane %v6186_v54, 4 }
0x4821   :  { %v6188_v57 = vadd.f32 %v6187_v52, %v6186_v54 }
0x4823   :  { %v6189_v1 = vrot.slane %v6188_v57, 2 }
0x4825   :  { %v6190_v61 = vadd.f32 %v6189_v1, %v6188_v57 }
0x4827   :  { %v6191_v34 = vrot.slane %v6190_v61, 1 }
0x4829   :  { %v6192_v44 = vadd.f32 %v6191_v34, %v6190_v61 }
0x482b   :  { %8997 = vmatmul.mubr.msk.f32.vlgmr.msra.gmra.mrb[54].mxu0 %vm261_vm1, %v6192_v44 }
0x482c   :  { %9460 = vmatpush3.bf16.msra.mxu0 %v12359_v0  ;;  %9018 = vmatprep.mubr.msk.f32.mxu0 %vm10517_vm0, %v12946_v22 }
0x482d   :  { %9461 = vmatprep.subr.bf16.mxu0 %v12947_v45 }
0x4830   :  { %9463 = vmatpush3.bf16.msra.mxu0 %v12363_v53 }
0x4831   :  { %9470 = vmatprep.subr.bf16.mxu0 %v12947_v45 }
0x48fe   :  { %v6262_v18 = vpop.f32.mrb[54].mxu0 }
0x48ff   :  { %v6269_v36 = vrot.slane %v6262_v18, %v11063_v48  ;;  %v8998_v19 = vpop.f32.mrb[55].mxu0 }
0x4901   :  { %v6270_v42 = vadd.f32 %v6269_v36, %v12988_v38 }
0x4903   :  { %9978 = vtanh.f32 %v6270_v42 }
0x490d   :  { %v9979_v2 = vpop.eup %9978 }
0x490e   :  { %v6272_v12 = vmul.f32 %v9979_v2, %v12415_v3 }
0x4910   :  { %v6273_v13 = vsel %vm261_vm1, %v6272_v12, 0.0 }
0x4911   :  { %6274 = vadd.xlane.f32.xlu0 %v6273_v13 }
0x499e   :  { %v6275_v23 = vpop.xlane.xlu0 %6274 }
0x499f   :  { %v6276_v14 = vrot.slane %v6275_v23, 4 }
0x49a1   :  { %v6277_v16 = vmax.f32 %v6275_v23, %v6276_v14 }
0x49a3   :  { %v6278_v32 = vrot.slane %v6277_v16, 2 }
0x49a5   :  { %v6279_v33 = vmax.f32 %v6277_v16, %v6278_v32 }
0x49a7   :  { %v6280_v62 = vrot.slane %v6279_v33, 1 }
0x49a9   :  { %v6281_v60 = vmax.f32 %v6279_v33, %v6280_v62 }
0x49ab   :  { %v6282_v9 = vsub.f32 %v6275_v23, %v6281_v60 }
0x49ad   :  { %v6283_v50 = vmul.f32 1.442695, %v6282_v9 }
0x49af   :  { %9980 = vpow2.f32 %v6283_v50 }
0x49b9   :  { %v9981_v35 = vpop.eup %9980 }
0x49ba   :  { %v6285_v6 = vrot.slane %v9981_v35, 4 }
0x49bc   :  { %v6286_v11 = vadd.f32 %v9981_v35, %v6285_v6 }
0x49be   :  { %v6287_v5 = vrot.slane %v6286_v11, 2 }
0x49c0   :  { %v6288_v46 = vadd.f32 %v6287_v5, %v6286_v11 }
0x49c2   :  { %v6289_v47 = vrot.slane %v6288_v46, 1 }
0x49c4   :  { %v6290_v51 = vadd.f32 %v6289_v47, %v6288_v46 }
0x49c6   :  { %9982 = vrcp.f32 %v6290_v51 }
0x49d0   :  { %v9983_v40 = vpop.eup %9982 }
0x49d1   :  { %v6292_v54 = vmul.f32 %v9983_v40, %v9981_v35 }
0x49d3   :  { %v6293_v52 = vmul.f32 %v12989_v27, %v6292_v54 }
0x49d5   :  { %v6294_v57 = vsel %vm261_vm1, %v6293_v52, 0.0 }
0x49d6   :  { %v6295_v1 = vrot.slane %v6294_v57, 4 }
0x49d8   :  { %v6296_v61 = vadd.f32 %v6295_v1, %v6294_v57 }
0x49da   :  { %v6297_v34 = vrot.slane %v6296_v61, 2 }
0x49dc   :  { %v6298_v44 = vadd.f32 %v6297_v34, %v6296_v61 }
0x49de   :  { %v6299_v18 = vrot.slane %v6298_v44, 1 }
0x49e0   :  { %v12547_v36 = vadd.f32 %v6299_v18, %v6298_v44 }
0x49e2   :  { %9008 = vmatmul.mubr.msk.f32.vlgmr.msra.gmra.mrb[50].mxu1 %vm261_vm1, %v12547_v36 }
0x49e3   :  { %9466 = vmatpush3.bf16.msra.mxu1 %v12396_v20  ;;  %9029 = vmatprep.mubr.msk.f32.mxu1 %vm10517_vm0, %v12946_v22 }
0x49e4   :  { %9467 = vmatprep.subr.bf16.mxu1 %v12947_v45 }
0x49e7   :  { %9469 = vmatpush3.bf16.msra.mxu1 %v12399_v4 }
0x49e8   :  { %9476 = vmatprep.subr.bf16.mxu1 %v12947_v45 }
0x4ab5   :  { %v6381_v19 = vpop.f32.mrb[50].mxu1 }
0x4ab6   :  { %v6382_v42 = vadd.f32 %v6381_v19, %v12338_v28  ;;  %v9009_v2 = vpop.f32.mrb[51].mxu1 }
0x4ab8   :  { %9984 = vtanh.f32 %v6382_v42  ;;  %v8113_v13 = vmul.f32 -1.442695, %v6382_v42 }
0x4aba   :  { %9986 = vpow2.f32 %v8113_v13 }
0x4ac2   :  { %v9985_v12 = vpop.eup %9984 }
0x4ac3   :  { %6394 = vrot.lane.b32.xlu0 %v9985_v12, %s10519_s4 }
0x4ac4   :  { %v9987_v23 = vpop.eup %9986 }
0x4ac5   :  { %v6388_v14 = vadd.f32 1.0, %v9987_v23 }
0x4ac7   :  { %9988 = vrcp.f32 %v6388_v14 }
0x4ad1   :  { %v9989_v16 = vpop.eup %9988 }
0x4ad2   :  { %v6392_v62 = vmul.f32 %v9989_v16, %v12346_v7 }
0x4b35   :  { %v6395_v32 = vpop.permute.xlu0 %6394 }
0x4b36   :  { %v6397_v33 = vmul.f32 %v9989_v16, %v6395_v32 }
0x4b38   :  { %6399 = vrot.lane.b32.xlu1 %v6397_v33, %s10520_s19 }
0x4baa   :  { %v6400_v60 = vpop.permute.xlu1 %6399 }
0x4bab   :  { %v6402_v9 = vadd.f32 %v6400_v60, %v6392_v62 }
0x4bad   :  { %9990 = vtanh.f32 %v6402_v9 }
0x4bb7   :  { %v9991_v50 = vpop.eup %9990 }
0x4bb8   :  { %6405 = vrot.lane.b32.xlu1 %v9991_v50, %s10519_s4 }
0x4c2a   :  { %v6406_v35 = vpop.permute.xlu1 %6405 }
0x4c2b   :  { %v6408_v6 = vmul.f32 %v9989_v16, %v6406_v35 }
0x4c2d   :  { %6410 = vrot.lane.b32.xlu0 %v6408_v6, %s10520_s19 }
0x4c9f   :  { %v6411_v11 = vpop.permute.xlu0 %6410 }
0x4ca0   :  { %9019 = vmatmul.mubr.msk.f32.vlgmr.msra.gmra.mrb[56].mxu0 %vm261_vm1, %v6411_v11 }
0x4ca1   :  { %9472 = vmatpush3.bf16.msra.mxu0 %v12301_v15  ;;  %9040 = vmatprep.mubr.msk.f32.mxu0 %vm10517_vm0, %v12946_v22 }
0x4ca2   :  { %9473 = vmatprep.subr.bf16.mxu0 %v12947_v45 }
0x4ca5   :  { %9475 = vmatpush3.bf16.msra.mxu0 %v12311_v37 }
0x4ca6   :  { %9482 = vmatprep.subr.bf16.mxu0 %v12947_v45 }
0x4d73   :  { %v6480_v5 = vpop.f32.mrb[56].mxu0 }
0x4d74   :  { %v6487_v46 = vrot.slane %v6480_v5, %v11063_v48  ;;  %v9020_v47 = vpop.f32.mrb[57].mxu0 }
0x4d76   :  { %v6488_v51 = vadd.f32 %v6487_v46, %v12987_v21 }
0x4d78   :  { %9992 = vtanh.f32 %v6488_v51 }
0x4d82   :  { %v9993_v40 = vpop.eup %9992 }
0x4d83   :  { %v6490_v54 = vmul.f32 %v9993_v40, %v12392_v56 }
0x4d85   :  { %v6491_v52 = vsel %vm261_vm1, %v6490_v54, 0.0 }
0x4d86   :  { %6492 = vadd.xlane.f32.xlu1 %v6491_v52 }
0x4e13   :  { %v6493_v57 = vpop.xlane.xlu1 %6492 }
0x4e14   :  { %v6494_v1 = vrot.slane %v6493_v57, 4 }
0x4e16   :  { %v6495_v61 = vmax.f32 %v6493_v57, %v6494_v1 }
0x4e18   :  { %v6496_v34 = vrot.slane %v6495_v61, 2 }
0x4e1a   :  { %v6497_v44 = vmax.f32 %v6495_v61, %v6496_v34 }
0x4e1c   :  { %v6498_v18 = vrot.slane %v6497_v44, 1 }
0x4e1e   :  { %v6499_v19 = vmax.f32 %v6497_v44, %v6498_v18 }
0x4e20   :  { %v6500_v42 = vsub.f32 %v6493_v57, %v6499_v19 }
0x4e22   :  { %v6501_v2 = vmul.f32 1.442695, %v6500_v42 }
0x4e24   :  { %9994 = vpow2.f32 %v6501_v2 }
0x4e2e   :  { %v9995_v12 = vpop.eup %9994 }
0x4e2f   :  { %v6503_v13 = vrot.slane %v9995_v12, 4 }
0x4e31   :  { %v6504_v23 = vadd.f32 %v9995_v12, %v6503_v13 }
0x4e33   :  { %v6505_v14 = vrot.slane %v6504_v23, 2 }
0x4e35   :  { %v6506_v16 = vadd.f32 %v6505_v14, %v6504_v23 }
0x4e37   :  { %v6507_v32 = vrot.slane %v6506_v16, 1 }
0x4e39   :  { %v6508_v56 = vadd.f32 %v6507_v32, %v6506_v16 }
0x4e3b   :  { %9996 = vrcp.f32 %v6508_v56 }
0x4e45   :  { %v9997_v33 = vpop.eup %9996 }
0x4e46   :  { %v6510_v62 = vmul.f32 %v9997_v33, %v9995_v12 }
0x4e48   :  { %v6511_v60 = vmul.f32 %v6510_v62, %v12987_v21 }
0x4e4a   :  { %v6512_v9 = vsel %vm261_vm1, %v6511_v60, 0.0 }
0x4e4b   :  { %v6513_v50 = vrot.slane %v6512_v9, 4 }
0x4e4d   :  { %v6514_v35 = vadd.f32 %v6513_v50, %v6512_v9 }
0x4e4f   :  { %v6515_v6 = vrot.slane %v6514_v35, 2 }
0x4e51   :  { %v6516_v11 = vadd.f32 %v6515_v6, %v6514_v35 }
0x4e53   :  { %v6517_v5 = vrot.slane %v6516_v11, 1 }
0x4e55   :  { %v6518_v46 = vadd.f32 %v6517_v5, %v6516_v11 }
0x4e57   :  { %9030 = vmatmul.mubr.msk.f32.vlgmr.msra.gmra.mrb[52].mxu1 %vm261_vm1, %v6518_v46 }
0x4e58   :  { %9478 = vmatpush3.bf16.msra.mxu1 %v12359_v0  ;;  %9051 = vmatprep.mubr.msk.f32.mxu1 %vm10517_vm0, %v12946_v22 }
0x4e59   :  { %9479 = vmatprep.subr.bf16.mxu1 %v12947_v45 }
0x4e5c   :  { %9481 = vmatpush3.bf16.msra.mxu1 %v12363_v53 }
0x4e5d   :  { %9488 = vmatprep.subr.bf16.mxu1 %v12947_v45 }
0x4f2a   :  { %v6588_v47 = vpop.f32.mrb[52].mxu1 }
0x4f2b   :  { %v6595_v51 = vrot.slane %v6588_v47, %v11063_v48  ;;  %v9031_v40 = vpop.f32.mrb[53].mxu1 }
0x4f2d   :  { %v6596_v54 = vadd.f32 %v6595_v51, %v12988_v38 }
0x4f2f   :  { %9998 = vtanh.f32 %v6596_v54 }
0x4f39   :  { %v9999_v52 = vpop.eup %9998 }
0x4f3a   :  { %v6598_v57 = vmul.f32 %v9999_v52, %v12415_v3 }
0x4f3c   :  { %v6599_v1 = vsel %vm261_vm1, %v6598_v57, 0.0 }
0x4f3d   :  { %6600 = vadd.xlane.f32.xlu0 %v6599_v1 }
0x4fca   :  { %v6601_v61 = vpop.xlane.xlu0 %6600 }
0x4fcb   :  { %v6602_v34 = vrot.slane %v6601_v61, 4 }
0x4fcd   :  { %v6603_v44 = vmax.f32 %v6601_v61, %v6602_v34 }
0x4fcf   :  { %v6604_v18 = vrot.slane %v6603_v44, 2 }
0x4fd1   :  { %v6605_v19 = vmax.f32 %v6603_v44, %v6604_v18 }
0x4fd3   :  { %v6606_v42 = vrot.slane %v6605_v19, 1 }
0x4fd5   :  { %v6607_v2 = vmax.f32 %v6605_v19, %v6606_v42 }
0x4fd7   :  { %v6608_v12 = vsub.f32 %v6601_v61, %v6607_v2 }
0x4fd9   :  { %v6609_v13 = vmul.f32 1.442695, %v6608_v12 }
0x4fdb   :  { %10000 = vpow2.f32 %v6609_v13 }
0x4fe5   :  { %v10001_v23 = vpop.eup %10000 }
0x4fe6   :  { %v6611_v14 = vrot.slane %v10001_v23, 4 }
0x4fe8   :  { %v6612_v16 = vadd.f32 %v10001_v23, %v6611_v14 }
0x4fea   :  { %v6613_v32 = vrot.slane %v6612_v16, 2 }
0x4fec   :  { %v6614_v56 = vadd.f32 %v6613_v32, %v6612_v16 }
0x4fee   :  { %v6615_v33 = vrot.slane %v6614_v56, 1 }
0x4ff0   :  { %v6616_v3 = vadd.f32 %v6615_v33, %v6614_v56 }
0x4ff2   :  { %10002 = vrcp.f32 %v6616_v3 }
0x4ffc   :  { %v10003_v62 = vpop.eup %10002 }
0x4ffd   :  { %v6618_v60 = vmul.f32 %v10003_v62, %v10001_v23  ;;  %v12614_v62 = vld [vmem:[#allocation15] ss:$0 sm:$0xff] }
0x4fff   :  { %v6619_v9 = vmul.f32 %v12989_v27, %v6618_v60 }
0x5001   :  { %v6620_v50 = vsel %vm261_vm1, %v6619_v9, 0.0 }
0x5002   :  { %v6621_v35 = vrot.slane %v6620_v50, 4 }
0x5004   :  { %v6622_v6 = vadd.f32 %v6621_v35, %v6620_v50 }
0x5006   :  { %v6623_v11 = vrot.slane %v6622_v6, 2 }
0x5008   :  { %v6624_v5 = vadd.f32 %v6623_v11, %v6622_v6 }
0x500a   :  { %v6625_v46 = vrot.slane %v6624_v5, 1 }
0x500c   :  { %v12589_v47 = vadd.f32 %v6625_v46, %v6624_v5 }
0x500e   :  { %9041 = vmatmul.mubr.msk.f32.vlgmr.msra.gmra.mrb[58].mxu0 %vm261_vm1, %v12589_v47 }
0x500f   :  { %9484 = vmatpush3.bf16.msra.mxu0 %v12396_v20  ;;  %9062 = vmatprep.mubr.msk.f32.mxu0 %vm10517_vm0, %v12946_v22 }
0x5010   :  { %9485 = vmatprep.subr.bf16.mxu0 %v12947_v45 }
0x5013   :  { %9487 = vmatpush3.bf16.msra.mxu0 %v12399_v4 }
0x5014   :  { %9494 = vmatprep.subr.bf16.mxu0 %v12947_v45 }
0x50e1   :  { %v6707_v51 = vpop.f32.mrb[58].mxu0 }
0x50e2   :  { %v6708_v40 = vadd.f32 %v6707_v51, %v12338_v28  ;;  %v9042_v54 = vpop.f32.mrb[59].mxu0 }
0x50e4   :  { %10004 = vtanh.f32 %v6708_v40  ;;  %v8117_v57 = vmul.f32 -1.442695, %v6708_v40 }
0x50e6   :  { %10006 = vpow2.f32 %v8117_v57 }
0x50ee   :  { %v10005_v52 = vpop.eup %10004 }
0x50ef   :  { %6720 = vrot.lane.b32.xlu0 %v10005_v52, %s10519_s4 }
0x50f0   :  { %v10007_v1 = vpop.eup %10006 }
0x50f1   :  { %v6714_v61 = vadd.f32 1.0, %v10007_v1 }
0x50f3   :  { %10008 = vrcp.f32 %v6714_v61 }
0x50fd   :  { %v10009_v34 = vpop.eup %10008 }
0x50fe   :  { %v6718_v19 = vmul.f32 %v10009_v34, %v12346_v7 }
0x5161   :  { %v6721_v44 = vpop.permute.xlu0 %6720 }
0x5162   :  { %v6723_v18 = vmul.f32 %v10009_v34, %v6721_v44 }
0x5164   :  { %6725 = vrot.lane.b32.xlu1 %v6723_v18, %s10520_s19 }
0x51d6   :  { %v6726_v42 = vpop.permute.xlu1 %6725 }
0x51d7   :  { %v6728_v2 = vadd.f32 %v6726_v42, %v6718_v19 }
0x51d9   :  { %10010 = vtanh.f32 %v6728_v2 }
0x51e3   :  { %v10011_v12 = vpop.eup %10010 }
0x51e4   :  { %6731 = vrot.lane.b32.xlu1 %v10011_v12, %s10519_s4 }
0x5256   :  { %v6732_v13 = vpop.permute.xlu1 %6731 }
0x5257   :  { %v6734_v23 = vmul.f32 %v10009_v34, %v6732_v13 }
0x5259   :  { %6736 = vrot.lane.b32.xlu0 %v6734_v23, %s10520_s19 }
0x52cb   :  { %v6737_v14 = vpop.permute.xlu0 %6736 }
0x52cc   :  { %9052 = vmatmul.mubr.msk.f32.vlgmr.msra.gmra.mrb[54].mxu1 %vm261_vm1, %v6737_v14 }
0x52cd   :  { %9490 = vmatpush3.bf16.msra.mxu1 %v12301_v15  ;;  %9073 = vmatprep.mubr.msk.f32.mxu1 %vm10517_vm0, %v12946_v22 }
0x52ce   :  { %9491 = vmatprep.subr.bf16.mxu1 %v12947_v45 }
0x52d1   :  { %9493 = vmatpush3.bf16.msra.mxu1 %v12311_v37 }
0x52d2   :  { %9500 = vmatprep.subr.bf16.mxu1 %v12947_v45 }
0x539f   :  { %v6806_v16 = vpop.f32.mrb[54].mxu1 }
0x53a0   :  { %v6813_v32 = vrot.slane %v6806_v16, %v11063_v48  ;;  %v9053_v56 = vpop.f32.mrb[55].mxu1 }
0x53a2   :  { %v6814_v33 = vadd.f32 %v6813_v32, %v12987_v21 }
0x53a4   :  { %10012 = vtanh.f32 %v6814_v33 }
0x53ae   :  { %v10013_v3 = vpop.eup %10012 }
0x53af   :  { %v6816_v60 = vmul.f32 %v12614_v62, %v10013_v3 }
0x53b1   :  { %v6817_v9 = vsel %vm261_vm1, %v6816_v60, 0.0 }
0x53b2   :  { %6818 = vadd.xlane.f32.xlu1 %v6817_v9 }
0x543f   :  { %v6819_v50 = vpop.xlane.xlu1 %6818 }
0x5440   :  { %v6820_v35 = vrot.slane %v6819_v50, 4 }
0x5442   :  { %v6821_v6 = vmax.f32 %v6819_v50, %v6820_v35  ;;  %v12629_v35 = vld [vmem:[#allocation19] ss:$0 sm:$0xff] }
0x5444   :  { %v6822_v11 = vrot.slane %v6821_v6, 2 }
0x5446   :  { %v6823_v5 = vmax.f32 %v6821_v6, %v6822_v11 }
0x5448   :  { %v6824_v46 = vrot.slane %v6823_v5, 1 }
0x544a   :  { %v6825_v51 = vmax.f32 %v6823_v5, %v6824_v46 }
0x544c   :  { %v6826_v40 = vsub.f32 %v6819_v50, %v6825_v51 }
0x544e   :  { %v6827_v54 = vmul.f32 1.442695, %v6826_v40 }
0x5450   :  { %10014 = vpow2.f32 %v6827_v54 }
0x545a   :  { %v10015_v52 = vpop.eup %10014 }
0x545b   :  { %v6829_v57 = vrot.slane %v10015_v52, 4 }
0x545d   :  { %v6830_v1 = vadd.f32 %v10015_v52, %v6829_v57 }
0x545f   :  { %v6831_v61 = vrot.slane %v6830_v1, 2 }
0x5461   :  { %v6832_v34 = vadd.f32 %v6831_v61, %v6830_v1 }
0x5463   :  { %v6833_v44 = vrot.slane %v6832_v34, 1 }
0x5465   :  { %v6834_v18 = vadd.f32 %v6833_v44, %v6832_v34 }
0x5467   :  { %10016 = vrcp.f32 %v6834_v18 }
0x5471   :  { %v10017_v19 = vpop.eup %10016 }
0x5472   :  { %v6836_v42 = vmul.f32 %v10017_v19, %v10015_v52 }
0x5474   :  { %v6837_v2 = vmul.f32 %v6836_v42, %v12987_v21 }
0x5476   :  { %v6838_v12 = vsel %vm261_vm1, %v6837_v2, 0.0 }
0x5477   :  { %v6839_v13 = vrot.slane %v6838_v12, 4 }
0x5479   :  { %v6840_v23 = vadd.f32 %v6839_v13, %v6838_v12 }
0x547b   :  { %v6841_v14 = vrot.slane %v6840_v23, 2 }
0x547d   :  { %v6842_v16 = vadd.f32 %v6841_v14, %v6840_v23 }
0x547f   :  { %v6843_v32 = vrot.slane %v6842_v16, 1 }
0x5481   :  { %v6844_v56 = vadd.f32 %v6843_v32, %v6842_v16 }
0x5483   :  { %9063 = vmatmul.mubr.msk.f32.vlgmr.msra.gmra.mrb[60].mxu0 %vm261_vm1, %v6844_v56 }
0x5484   :  { %9496 = vmatpush3.bf16.msra.mxu0 %v12359_v0  ;;  %9084 = vmatprep.mubr.msk.f32.mxu0 %vm10517_vm0, %v12946_v22 }
0x5485   :  { %9497 = vmatprep.subr.bf16.mxu0 %v12947_v45 }
0x5488   :  { %9499 = vmatpush3.bf16.msra.mxu0 %v12363_v53 }
0x5489   :  { %9506 = vmatprep.subr.bf16.mxu0 %v12947_v45 }
0x5556   :  { %v6914_v33 = vpop.f32.mrb[60].mxu0 }
0x5557   :  { %v6921_v3 = vrot.slane %v6914_v33, %v11063_v48  ;;  %v9064_v60 = vpop.f32.mrb[61].mxu0 }
0x5559   :  { %v6922_v9 = vadd.f32 %v6921_v3, %v12988_v38 }
0x555b   :  { %10018 = vtanh.f32 %v6922_v9 }
0x5565   :  { %v10019_v50 = vpop.eup %10018 }
0x5566   :  { %v6924_v6 = vmul.f32 %v12629_v35, %v10019_v50 }
0x5568   :  { %v6925_v11 = vsel %vm261_vm1, %v6924_v6, 0.0 }
0x5569   :  { %6926 = vadd.xlane.f32.xlu0 %v6925_v11 }
0x55f6   :  { %v6927_v5 = vpop.xlane.xlu0 %6926 }
0x55f7   :  { %v6928_v46 = vrot.slane %v6927_v5, 4 }
0x55f9   :  { %v6929_v51 = vmax.f32 %v6927_v5, %v6928_v46 }
0x55fb   :  { %v6930_v40 = vrot.slane %v6929_v51, 2 }
0x55fd   :  { %v6931_v54 = vmax.f32 %v6929_v51, %v6930_v40 }
0x55ff   :  { %v6932_v52 = vrot.slane %v6931_v54, 1 }
0x5601   :  { %v6933_v57 = vmax.f32 %v6931_v54, %v6932_v52 }
0x5603   :  { %v6934_v1 = vsub.f32 %v6927_v5, %v6933_v57 }
0x5605   :  { %v6935_v61 = vmul.f32 1.442695, %v6934_v1 }
0x5607   :  { %10020 = vpow2.f32 %v6935_v61 }
0x5611   :  { %v10021_v34 = vpop.eup %10020 }
0x5612   :  { %v6937_v44 = vrot.slane %v10021_v34, 4 }
0x5614   :  { %v6938_v18 = vadd.f32 %v10021_v34, %v6937_v44 }
0x5616   :  { %v6939_v19 = vrot.slane %v6938_v18, 2 }
0x5618   :  { %v6940_v42 = vadd.f32 %v6939_v19, %v6938_v18 }
0x561a   :  { %v6941_v2 = vrot.slane %v6940_v42, 1 }
0x561c   :  { %v6942_v12 = vadd.f32 %v6941_v2, %v6940_v42 }
0x561e   :  { %10022 = vrcp.f32 %v6942_v12 }
0x5628   :  { %v10023_v13 = vpop.eup %10022 }
0x5629   :  { %v6944_v23 = vmul.f32 %v10023_v13, %v10021_v34 }
0x562b   :  { %v6945_v14 = vmul.f32 %v12989_v27, %v6944_v23 }
0x562d   :  { %v6946_v16 = vsel %vm261_vm1, %v6945_v14, 0.0 }
0x562e   :  { %v6947_v32 = vrot.slane %v6946_v16, 4 }
0x5630   :  { %v6948_v56 = vadd.f32 %v6947_v32, %v6946_v16 }
0x5632   :  { %v6949_v33 = vrot.slane %v6948_v56, 2 }
0x5634   :  { %v6950_v3 = vadd.f32 %v6949_v33, %v6948_v56 }
0x5636   :  { %v6951_v60 = vrot.slane %v6950_v3, 1 }
0x5638   :  { %v12635_v9 = vadd.f32 %v6951_v60, %v6950_v3 }
0x563a   :  { %9074 = vmatmul.mubr.msk.f32.vlgmr.msra.gmra.mrb[56].mxu1 %vm261_vm1, %v12635_v9 }
0x563b   :  { %9502 = vmatpush3.bf16.msra.mxu1 %v12396_v20  ;;  %9095 = vmatprep.mubr.msk.f32.mxu1 %vm10517_vm0, %v12946_v22 }
0x563c   :  { %9503 = vmatprep.subr.bf16.mxu1 %v12947_v45 }
0x563f   :  { %9505 = vmatpush3.bf16.msra.mxu1 %v12399_v4 }
0x5640   :  { %9512 = vmatprep.subr.bf16.mxu1 %v12947_v45 }
0x570d   :  { %v7033_v50 = vpop.f32.mrb[56].mxu1 }
0x570e   :  { %v7034_v6 = vadd.f32 %v7033_v50, %v12338_v28  ;;  %v9075_v11 = vpop.f32.mrb[57].mxu1 }
0x5710   :  { %10024 = vtanh.f32 %v7034_v6  ;;  %v8121_v46 = vmul.f32 -1.442695, %v7034_v6 }
0x5712   :  { %10026 = vpow2.f32 %v8121_v46 }
0x571a   :  { %v10025_v5 = vpop.eup %10024 }
0x571b   :  { %7046 = vrot.lane.b32.xlu0 %v10025_v5, %s10519_s4 }
0x571c   :  { %v10027_v51 = vpop.eup %10026 }
0x571d   :  { %v7040_v40 = vadd.f32 1.0, %v10027_v51 }
0x571f   :  { %10028 = vrcp.f32 %v7040_v40 }
0x5729   :  { %v10029_v54 = vpop.eup %10028 }
0x572a   :  { %v7044_v1 = vmul.f32 %v10029_v54, %v12346_v7 }
0x578d   :  { %v7047_v52 = vpop.permute.xlu0 %7046 }
0x578e   :  { %v7049_v57 = vmul.f32 %v10029_v54, %v7047_v52 }
0x5790   :  { %7051 = vrot.lane.b32.xlu1 %v7049_v57, %s10520_s19 }
0x5802   :  { %v7052_v61 = vpop.permute.xlu1 %7051 }
0x5803   :  { %v7054_v34 = vadd.f32 %v7052_v61, %v7044_v1 }
0x5805   :  { %10030 = vtanh.f32 %v7054_v34 }
0x580f   :  { %v10031_v44 = vpop.eup %10030 }
0x5810   :  { %7057 = vrot.lane.b32.xlu1 %v10031_v44, %s10519_s4 }
0x5882   :  { %v7058_v18 = vpop.permute.xlu1 %7057 }
0x5883   :  { %v7060_v19 = vmul.f32 %v10029_v54, %v7058_v18 }
0x5885   :  { %7062 = vrot.lane.b32.xlu0 %v7060_v19, %s10520_s19 }
0x58f7   :  { %v7063_v42 = vpop.permute.xlu0 %7062 }
0x58f8   :  { %9085 = vmatmul.mubr.msk.f32.vlgmr.msra.gmra.mrb[62].mxu0 %vm261_vm1, %v7063_v42 }
0x58f9   :  { %9508 = vmatpush3.bf16.msra.mxu0 %v12301_v15  ;;  %9106 = vmatprep.mubr.msk.f32.mxu0 %vm10517_vm0, %v12946_v22 }
0x58fa   :  { %9509 = vmatprep.subr.bf16.mxu0 %v12947_v45 }
0x58fd   :  { %9511 = vmatpush3.bf16.msra.mxu0 %v12311_v37 }
0x58fe   :  { %9518 = vmatprep.subr.bf16.mxu0 %v12947_v45 }
0x59cb   :  { %v7132_v2 = vpop.f32.mrb[62].mxu0 }
0x59cc   :  { %v7139_v12 = vrot.slane %v7132_v2, %v11063_v48  ;;  %v9086_v13 = vpop.f32.mrb[63].mxu0 }
0x59ce   :  { %v7140_v23 = vadd.f32 %v7139_v12, %v12987_v21 }
0x59d0   :  { %10032 = vtanh.f32 %v7140_v23 }
0x59da   :  { %v10033_v14 = vpop.eup %10032 }
0x59db   :  { %v7142_v16 = vmul.f32 %v12614_v62, %v10033_v14 }
0x59dd   :  { %v7143_v32 = vsel %vm261_vm1, %v7142_v16, 0.0 }
0x59de   :  { %7144 = vadd.xlane.f32.xlu1 %v7143_v32 }
0x5a6b   :  { %v7145_v56 = vpop.xlane.xlu1 %7144 }
0x5a6c   :  { %v7146_v33 = vrot.slane %v7145_v56, 4 }
0x5a6e   :  { %v7147_v3 = vmax.f32 %v7145_v56, %v7146_v33 }
0x5a70   :  { %v7148_v60 = vrot.slane %v7147_v3, 2 }
0x5a72   :  { %v7149_v50 = vmax.f32 %v7147_v3, %v7148_v60 }
0x5a74   :  { %v7150_v6 = vrot.slane %v7149_v50, 1 }
0x5a76   :  { %v7151_v11 = vmax.f32 %v7149_v50, %v7150_v6 }
0x5a78   :  { %v7152_v5 = vsub.f32 %v7145_v56, %v7151_v11 }
0x5a7a   :  { %v7153_v46 = vmul.f32 1.442695, %v7152_v5 }
0x5a7c   :  { %10034 = vpow2.f32 %v7153_v46 }
0x5a86   :  { %v10035_v51 = vpop.eup %10034 }
0x5a87   :  { %v7155_v40 = vrot.slane %v10035_v51, 4 }
0x5a89   :  { %v7156_v54 = vadd.f32 %v10035_v51, %v7155_v40 }
0x5a8b   :  { %v7157_v52 = vrot.slane %v7156_v54, 2 }
0x5a8d   :  { %v7158_v57 = vadd.f32 %v7157_v52, %v7156_v54 }
0x5a8f   :  { %v7159_v1 = vrot.slane %v7158_v57, 1 }
0x5a91   :  { %v7160_v61 = vadd.f32 %v7159_v1, %v7158_v57 }
0x5a93   :  { %10036 = vrcp.f32 %v7160_v61 }
0x5a9d   :  { %v10037_v34 = vpop.eup %10036 }
0x5a9e   :  { %v7162_v44 = vmul.f32 %v10037_v34, %v10035_v51 }
0x5aa0   :  { %v7163_v18 = vmul.f32 %v7162_v44, %v12987_v21 }
0x5aa2   :  { %v7164_v19 = vsel %vm261_vm1, %v7163_v18, 0.0 }
0x5aa3   :  { %v7165_v42 = vrot.slane %v7164_v19, 4 }
0x5aa5   :  { %v7166_v2 = vadd.f32 %v7165_v42, %v7164_v19 }
0x5aa7   :  { %v7167_v12 = vrot.slane %v7166_v2, 2 }
0x5aa9   :  { %v7168_v13 = vadd.f32 %v7167_v12, %v7166_v2 }
0x5aab   :  { %v7169_v23 = vrot.slane %v7168_v13, 1 }
0x5aad   :  { %v7170_v14 = vadd.f32 %v7169_v23, %v7168_v13 }
0x5aaf   :  { %9096 = vmatmul.mubr.msk.f32.vlgmr.msra.gmra.mrb[58].mxu1 %vm261_vm1, %v7170_v14 }
0x5ab0   :  { %9514 = vmatpush3.bf16.msra.mxu1 %v12359_v0  ;;  %9117 = vmatprep.mubr.msk.f32.mxu1 %vm10517_vm0, %v12946_v22 }
0x5ab1   :  { %9515 = vmatprep.subr.bf16.mxu1 %v12947_v45 }
0x5ab4   :  { %9517 = vmatpush3.bf16.msra.mxu1 %v12363_v53 }
0x5ab5   :  { %9524 = vmatprep.subr.bf16.mxu1 %v12947_v45 }
0x5b82   :  { %v7240_v16 = vpop.f32.mrb[58].mxu1 }
0x5b83   :  { %v7247_v32 = vrot.slane %v7240_v16, %v11063_v48  ;;  %v9097_v56 = vpop.f32.mrb[59].mxu1 }
0x5b85   :  { %v7248_v33 = vadd.f32 %v7247_v32, %v12988_v38 }
0x5b87   :  { %10038 = vtanh.f32 %v7248_v33 }
0x5b91   :  { %v10039_v3 = vpop.eup %10038 }
0x5b92   :  { %v7250_v60 = vmul.f32 %v12629_v35, %v10039_v3 }
0x5b94   :  { %v7251_v50 = vsel %vm261_vm1, %v7250_v60, 0.0 }
0x5b95   :  { %7252 = vadd.xlane.f32.xlu0 %v7251_v50 }
0x5c22   :  { %v7253_v6 = vpop.xlane.xlu0 %7252 }
0x5c23   :  { %v7254_v11 = vrot.slane %v7253_v6, 4 }
0x5c25   :  { %v7255_v5 = vmax.f32 %v7253_v6, %v7254_v11 }
0x5c27   :  { %v7256_v46 = vrot.slane %v7255_v5, 2 }
0x5c29   :  { %v7257_v51 = vmax.f32 %v7255_v5, %v7256_v46 }
0x5c2b   :  { %v7258_v40 = vrot.slane %v7257_v51, 1 }
0x5c2d   :  { %v7259_v54 = vmax.f32 %v7257_v51, %v7258_v40 }
0x5c2f   :  { %v7260_v52 = vsub.f32 %v7253_v6, %v7259_v54 }
0x5c31   :  { %v7261_v57 = vmul.f32 1.442695, %v7260_v52 }
0x5c33   :  { %10040 = vpow2.f32 %v7261_v57 }
0x5c3d   :  { %v10041_v1 = vpop.eup %10040 }
0x5c3e   :  { %v7263_v61 = vrot.slane %v10041_v1, 4 }
0x5c40   :  { %v7264_v34 = vadd.f32 %v10041_v1, %v7263_v61 }
0x5c42   :  { %v7265_v44 = vrot.slane %v7264_v34, 2 }
0x5c44   :  { %v7266_v18 = vadd.f32 %v7265_v44, %v7264_v34 }
0x5c46   :  { %v7267_v19 = vrot.slane %v7266_v18, 1 }
0x5c48   :  { %v7268_v42 = vadd.f32 %v7267_v19, %v7266_v18 }
0x5c4a   :  { %10042 = vrcp.f32 %v7268_v42 }
0x5c54   :  { %v10043_v2 = vpop.eup %10042 }
0x5c55   :  { %v7270_v12 = vmul.f32 %v10043_v2, %v10041_v1 }
0x5c57   :  { %v7271_v13 = vmul.f32 %v12989_v27, %v7270_v12 }
0x5c59   :  { %v7272_v23 = vsel %vm261_vm1, %v7271_v13, 0.0 }
0x5c5a   :  { %v7273_v14 = vrot.slane %v7272_v23, 4 }
0x5c5c   :  { %v7274_v16 = vadd.f32 %v7273_v14, %v7272_v23 }
0x5c5e   :  { %v7275_v32 = vrot.slane %v7274_v16, 2 }
0x5c60   :  { %v7276_v56 = vadd.f32 %v7275_v32, %v7274_v16 }
0x5c62   :  { %v7277_v33 = vrot.slane %v7276_v56, 1 }
0x5c64   :  { %v12677_v3 = vadd.f32 %v7277_v33, %v7276_v56 }
0x5c66   :  { %9107 = vmatmul.mubr.msk.f32.vlgmr.msra.gmra.mrb[64].mxu0 %vm261_vm1, %v12677_v3 }
0x5c67   :  { %9520 = vmatpush3.bf16.msra.mxu0 %v12396_v20  ;;  %9128 = vmatprep.mubr.msk.f32.mxu0 %vm10517_vm0, %v12946_v22 }
0x5c68   :  { %9521 = vmatprep.subr.bf16.mxu0 %v12947_v45 }
0x5c6b   :  { %9523 = vmatpush3.bf16.msra.mxu0 %v12399_v4 }
0x5c6c   :  { %9530 = vmatprep.subr.bf16.mxu0 %v12947_v45 }
0x5d39   :  { %v7359_v60 = vpop.f32.mrb[64].mxu0 }
0x5d3a   :  { %v7360_v50 = vadd.f32 %v7359_v60, %v12338_v28  ;;  %v9108_v6 = vpop.f32.mrb[65].mxu0 }
0x5d3c   :  { %10044 = vtanh.f32 %v7360_v50  ;;  %v8125_v5 = vmul.f32 -1.442695, %v7360_v50 }
0x5d3e   :  { %10046 = vpow2.f32 %v8125_v5 }
0x5d46   :  { %v10045_v11 = vpop.eup %10044 }
0x5d47   :  { %7372 = vrot.lane.b32.xlu0 %v10045_v11, %s10519_s4 }
0x5d48   :  { %v10047_v46 = vpop.eup %10046 }
0x5d49   :  { %v7366_v51 = vadd.f32 1.0, %v10047_v46 }
0x5d4b   :  { %10048 = vrcp.f32 %v7366_v51 }
0x5d55   :  { %v10049_v40 = vpop.eup %10048 }
0x5d56   :  { %v7370_v57 = vmul.f32 %v10049_v40, %v12346_v7 }
0x5db9   :  { %v7373_v54 = vpop.permute.xlu0 %7372 }
0x5dba   :  { %v7375_v52 = vmul.f32 %v10049_v40, %v7373_v54 }
0x5dbc   :  { %7377 = vrot.lane.b32.xlu1 %v7375_v52, %s10520_s19 }
0x5e2e   :  { %v7378_v1 = vpop.permute.xlu1 %7377 }
0x5e2f   :  { %v7380_v61 = vadd.f32 %v7378_v1, %v7370_v57 }
0x5e31   :  { %10050 = vtanh.f32 %v7380_v61 }
0x5e3b   :  { %v10051_v34 = vpop.eup %10050 }
0x5e3c   :  { %7383 = vrot.lane.b32.xlu1 %v10051_v34, %s10519_s4 }
0x5eae   :  { %v7384_v44 = vpop.permute.xlu1 %7383 }
0x5eaf   :  { %v7386_v18 = vmul.f32 %v10049_v40, %v7384_v44 }
0x5eb1   :  { %7388 = vrot.lane.b32.xlu0 %v7386_v18, %s10520_s19 }
0x5f23   :  { %v7389_v19 = vpop.permute.xlu0 %7388 }
0x5f24   :  { %9118 = vmatmul.mubr.msk.f32.vlgmr.msra.gmra.mrb[60].mxu1 %vm261_vm1, %v7389_v19 }
0x5f25   :  { %9526 = vmatpush3.bf16.msra.mxu1 %v12301_v15  ;;  %9139 = vmatprep.mubr.msk.f32.mxu1 %vm10517_vm0, %v12946_v22 }
0x5f26   :  { %9527 = vmatprep.subr.bf16.mxu1 %v12947_v45 }
0x5f29   :  { %9529 = vmatpush3.bf16.msra.mxu1 %v12311_v37 }
0x5f2a   :  { %9536 = vmatprep.subr.bf16.mxu1 %v12947_v45 }
0x5ff7   :  { %v7458_v42 = vpop.f32.mrb[60].mxu1 }
0x5ff8   :  { %v7465_v2 = vrot.slane %v7458_v42, %v11063_v48  ;;  %v9119_v12 = vpop.f32.mrb[61].mxu1 }
0x5ffa   :  { %v7466_v13 = vadd.f32 %v7465_v2, %v12987_v21 }
0x5ffc   :  { %10052 = vtanh.f32 %v7466_v13 }
0x6006   :  { %v10053_v23 = vpop.eup %10052 }
0x6007   :  { %v7468_v14 = vmul.f32 %v12614_v62, %v10053_v23 }
0x6009   :  { %v7469_v15 = vsel %vm261_vm1, %v7468_v14, 0.0 }
0x600a   :  { %7470 = vadd.xlane.f32.xlu1 %v7469_v15 }
0x6097   :  { %v7471_v16 = vpop.xlane.xlu1 %7470 }
0x6098   :  { %v7472_v32 = vrot.slane %v7471_v16, 4 }
0x609a   :  { %v7473_v56 = vmax.f32 %v7471_v16, %v7472_v32 }
0x609c   :  { %v7474_v33 = vrot.slane %v7473_v56, 2 }
0x609e   :  { %v7475_v37 = vmax.f32 %v7473_v56, %v7474_v33 }
0x60a0   :  { %v7476_v60 = vrot.slane %v7475_v37, 1 }
0x60a2   :  { %v7477_v50 = vmax.f32 %v7475_v37, %v7476_v60 }
0x60a4   :  { %v7478_v6 = vsub.f32 %v7471_v16, %v7477_v50 }
0x60a6   :  { %v7479_v11 = vmul.f32 1.442695, %v7478_v6 }
0x60a8   :  { %10054 = vpow2.f32 %v7479_v11 }
0x60b2   :  { %v10055_v5 = vpop.eup %10054 }
0x60b3   :  { %v7481_v46 = vrot.slane %v10055_v5, 4 }
0x60b5   :  { %v7482_v51 = vadd.f32 %v10055_v5, %v7481_v46 }
0x60b7   :  { %v7483_v40 = vrot.slane %v7482_v51, 2 }
0x60b9   :  { %v7484_v54 = vadd.f32 %v7483_v40, %v7482_v51 }
0x60bb   :  { %v7485_v52 = vrot.slane %v7484_v54, 1 }
0x60bd   :  { %v7486_v57 = vadd.f32 %v7485_v52, %v7484_v54 }
0x60bf   :  { %10056 = vrcp.f32 %v7486_v57 }
0x60c9   :  { %v10057_v1 = vpop.eup %10056 }
0x60ca   :  { %v7488_v61 = vmul.f32 %v10057_v1, %v10055_v5 }
0x60cc   :  { %v7489_v34 = vmul.f32 %v7488_v61, %v12987_v21 }
0x60ce   :  { %v7490_v44 = vsel %vm261_vm1, %v7489_v34, 0.0 }
0x60cf   :  { %v7491_v18 = vrot.slane %v7490_v44, 4 }
0x60d1   :  { %v7492_v19 = vadd.f32 %v7491_v18, %v7490_v44 }
0x60d3   :  { %v7493_v42 = vrot.slane %v7492_v19, 2 }
0x60d5   :  { %v7494_v2 = vadd.f32 %v7493_v42, %v7492_v19 }
0x60d7   :  { %v7495_v12 = vrot.slane %v7494_v2, 1 }
0x60d9   :  { %v7496_v13 = vadd.f32 %v7495_v12, %v7494_v2 }
0x60db   :  { %9129 = vmatmul.mubr.msk.f32.vlgmr.msra.gmra.mrb[66].mxu0 %vm261_vm1, %v7496_v13 }
0x60dc   :  { %9532 = vmatpush3.bf16.msra.mxu0 %v12359_v0  ;;  %9150 = vmatprep.mubr.msk.f32.mxu0 %vm10517_vm0, %v12946_v22 }
0x60dd   :  { %9533 = vmatprep.subr.bf16.mxu0 %v12947_v45 }
0x60e0   :  { %9535 = vmatpush3.bf16.msra.mxu0 %v12363_v53 }
0x61ae   :  { %v7566_v23 = vpop.f32.mrb[66].mxu0 }
0x61af   :  { %v7573_v14 = vrot.slane %v7566_v23, %v11063_v48  ;;  %v9130_v15 = vpop.f32.mrb[67].mxu0 }
0x61b1   :  { %v7574_v16 = vadd.f32 %v7573_v14, %v12988_v38 }
0x61b3   :  { %10058 = vtanh.f32 %v7574_v16 }
0x61bd   :  { %v10059_v32 = vpop.eup %10058 }
0x61be   :  { %v7576_v56 = vmul.f32 %v12629_v35, %v10059_v32 }
0x61c0   :  { %v7577_v33 = vsel %vm261_vm1, %v7576_v56, 0.0 }
0x61c1   :  { %7578 = vadd.xlane.f32.xlu0 %v7577_v33 }
0x624e   :  { %v7579_v0 = vpop.xlane.xlu0 %7578 }
0x624f   :  { %v7580_v37 = vrot.slane %v7579_v0, 4 }
0x6251   :  { %v7581_v60 = vmax.f32 %v7579_v0, %v7580_v37 }
0x6253   :  { %v7582_v50 = vrot.slane %v7581_v60, 2 }
0x6255   :  { %v7583_v6 = vmax.f32 %v7581_v60, %v7582_v50 }
0x6257   :  { %v7584_v11 = vrot.slane %v7583_v6, 1 }
0x6259   :  { %v7585_v53 = vmax.f32 %v7583_v6, %v7584_v11 }
0x625b   :  { %v7586_v5 = vsub.f32 %v7579_v0, %v7585_v53 }
0x625d   :  { %v7587_v46 = vmul.f32 1.442695, %v7586_v5 }
0x625f   :  { %10060 = vpow2.f32 %v7587_v46 }
0x6269   :  { %v10061_v51 = vpop.eup %10060 }
0x626a   :  { %v7589_v40 = vrot.slane %v10061_v51, 4 }
0x626c   :  { %v7590_v54 = vadd.f32 %v10061_v51, %v7589_v40 }
0x626e   :  { %v7591_v52 = vrot.slane %v7590_v54, 2 }
0x6270   :  { %v7592_v57 = vadd.f32 %v7591_v52, %v7590_v54  ;;  %v12736_v52 = vld [vmem:[#allocation27] sm:$0x1] }
0x6272   :  { %v7593_v1 = vrot.slane %v7592_v57, 1 }
0x6274   :  { %v7594_v61 = vadd.f32 %v7593_v1, %v7592_v57 }
0x6276   :  { %10062 = vrcp.f32 %v7594_v61  ;;  %v5322_v61 = vmul.f32 %v12736_v52, %v12421_v41 }
0x6280   :  { %v10063_v34 = vpop.eup %10062 }
0x6281   :  { %v7596_v44 = vmul.f32 %v10063_v34, %v10061_v51  ;;  %v5323_v34 = vsel %vm433_vm2, %v5322_v61, 0.0 }
0x6283   :  { %v7597_v18 = vmul.f32 %v12989_v27, %v7596_v44  ;;  %v5975_v44 = vmul.f32 %v12505_v10, %v12736_v52 }
0x6285   :  { %v7598_v19 = vsel %vm261_vm1, %v7597_v18, 0.0  ;;  %v5976_v18 = vsel %vm433_vm2, %v5975_v44, 0.0 }
0x6286   :  { %v7599_v42 = vrot.slane %v7598_v19, 4 }
0x6288   :  { %v7600_v2 = vadd.f32 %v7599_v42, %v7598_v19  ;;  %v6627_v19 = vmul.f32 %v12589_v47, %v12736_v52  ;;  %v7279_v42 = vmul.f32 %v12677_v3, %v12736_v52 }
0x628a   :  { %v7601_v12 = vrot.slane %v7600_v2, 2  ;;  %v7280_v41 = vsel %vm433_vm2, %v7279_v42, 0.0  ;;  %v6953_v42 = vmul.f32 %v12635_v9, %v12736_v52 }
0x628c   :  { %v7602_v13 = vadd.f32 %v7601_v12, %v7600_v2 }
0x628e   :  { %v7603_v23 = vrot.slane %v7602_v13, 1 }
0x6290   :  { %v12718_v14 = vadd.f32 %v7603_v23, %v7602_v13 }
0x6292   :  { %9140 = vmatmul.mubr.msk.f32.vlgmr.msra.gmra.mrb[62].mxu1 %vm261_vm1, %v12718_v14 }
0x6293   :  { %9538 = vmatpush3.bf16.msra.mxu1 %v12396_v20  ;;  %9161 = vmatprep.mubr.msk.f32.mxu1 %vm10517_vm0, %v12946_v22 }
0x6294   :  { %9539 = vmatprep.subr.bf16.mxu1 %v12947_v45 }
0x6297   :  { %9541 = vmatpush3.bf16.msra.mxu1 %v12399_v4 }
0x6365   :  { %v7685_v15 = vpop.f32.mrb[62].mxu1 }
0x6366   :  { %v7686_v16 = vadd.f32 %v7685_v15, %v12338_v28  ;;  %v9141_v32 = vpop.f32.mrb[63].mxu1 }
0x6368   :  { %10064 = vtanh.f32 %v7686_v16  ;;  %v8129_v33 = vmul.f32 -1.442695, %v7686_v16 }
0x636a   :  { %10066 = vpow2.f32 %v8129_v33 }
0x6372   :  { %v10065_v56 = vpop.eup %10064 }
0x6373   :  { %7698 = vrot.lane.b32.xlu0 %v10065_v56, %s10519_s4 }
0x6374   :  { %v10067_v0 = vpop.eup %10066 }
0x6375   :  { %v7692_v37 = vadd.f32 1.0, %v10067_v0 }
0x6377   :  { %10068 = vrcp.f32 %v7692_v37 }
0x6381   :  { %v10069_v20 = vpop.eup %10068 }
0x6382   :  { %v7696_v45 = vmul.f32 %v10069_v20, %v12346_v7 }
0x63e5   :  { %v7699_v60 = vpop.permute.xlu0 %7698 }
0x63e6   :  { %v7701_v50 = vmul.f32 %v10069_v20, %v7699_v60 }
0x63e8   :  { %7703 = vrot.lane.b32.xlu1 %v7701_v50, %s10520_s19 }
0x645a   :  { %v7704_v4 = vpop.permute.xlu1 %7703 }
0x645b   :  { %v7706_v6 = vadd.f32 %v7704_v4, %v7696_v45 }
0x645d   :  { %10070 = vtanh.f32 %v7706_v6 }
0x6467   :  { %v10071_v28 = vpop.eup %10070 }
0x6468   :  { %7709 = vrot.lane.b32.xlu1 %v10071_v28, %s10519_s4 }
0x64da   :  { %v7710_v11 = vpop.permute.xlu1 %7709 }
0x64db   :  { %v7712_v53 = vmul.f32 %v10069_v20, %v7710_v11 }
0x64dd   :  { %7714 = vrot.lane.b32.xlu0 %v7712_v53, %s10520_s19 }
0x654f   :  { %v7715_v5 = vpop.permute.xlu0 %7714 }
0x6550   :  { %9151 = vmatmul.mubr.msk.f32.vlgmr.msra.gmra.mrb[68].mxu0 %vm261_vm1, %v7715_v5 }
0x6623   :  { %v7784_v46 = vpop.f32.mrb[68].mxu0 }
0x6624   :  { %v7791_v51 = vrot.slane %v7784_v46, %v11063_v48  ;;  %v9152_v40 = vpop.f32.mrb[69].mxu0 }
0x6625   :  { %v10521_v40 = vmov 0  }
0x6626   :  { %v7792_v54 = vadd.f32 %v7791_v51, %v12987_v21  ;;  %9588 = vset.pattern.permute.xlu0 %v10521_v40  ;;  %9589 = vset.pattern.permute.xlu1 %v10521_v40 }
0x6628   :  { %10072 = vtanh.f32 %v7792_v54 }
0x6632   :  { %v10073_v7 = vpop.eup %10072 }
0x6633   :  { %v7794_v57 = vmul.f32 %v12614_v62, %v10073_v7  ;;  %v6628_v62 = vsel %vm433_vm2, %v6627_v19, 0.0 }
0x6635   :  { %v7795_v1 = vsel %vm261_vm1, %v7794_v57, 0.0 }
0x6636   :  { %7796 = vadd.xlane.f32.xlu1 %v7795_v1 }
0x663a   :  { %5324 = vadd.xlane.f32.xlu1 %v5323_v34 }
0x663e   :  { %5977 = vadd.xlane.f32.xlu1 %v5976_v18  ;;  %v12760_v18 = vld [vmem:[#allocation19] ss:$0 sm:$0xff] }
0x6642   :  { %6629 = vadd.xlane.f32.xlu1 %v6628_v62 }
0x6646   :  { %7281 = vadd.xlane.f32.xlu1 %v7280_v41  ;;  %v6954_v41 = vsel %vm433_vm2, %v6953_v42, 0.0 }
0x66c3   :  { %v7797_v2 = vpop.xlane.xlu1 %7796 }
0x66c4   :  { %v7798_v12 = vrot.slane %v7797_v2, 4 }
0x66c6   :  { %v7799_v13 = vmax.f32 %v7797_v2, %v7798_v12 }
0x66c8   :  { %v7800_v10 = vrot.slane %v7799_v13, 2 }
0x66ca   :  { %v7801_v23 = vmax.f32 %v7799_v13, %v7800_v10  ;;  %v12779_v13 = vld [vmem:[#allocation3] sm:$0x1]  ;;  %v5325_v10 = vpop.xlane.xlu1 %5324 }
0x66cb   :  { %v5327_v9 = vadd.f32 %v12779_v13, %v5325_v10 }
0x66cc   :  { %v7802_v15 = vrot.slane %v7801_v23, 1 }
0x66ce   :  { %v7803_v16 = vmax.f32 %v7801_v23, %v7802_v15 }
0x66d0   :  { %v7804_v32 = vsub.f32 %v7797_v2, %v7803_v16 }
0x66d2   :  { %v7805_v56 = vmul.f32 1.442695, %v7804_v32 }
0x66d4   :  { %10074 = vpow2.f32 %v7805_v56 }
0x66de   :  { %v10075_v47 = vpop.eup %10074 }
0x66df   :  { %v7807_v33 = vrot.slane %v10075_v47, 4 }
0x66e1   :  { %v7808_v0 = vadd.f32 %v10075_v47, %v7807_v33 }
0x66e3   :  { %v7809_v37 = vrot.slane %v7808_v0, 2 }
0x66e5   :  { %v7810_v20 = vadd.f32 %v7809_v37, %v7808_v0 }
0x66e7   :  { %v7811_v3 = vrot.slane %v7810_v20, 1 }
0x66e9   :  { %v7812_v60 = vadd.f32 %v7811_v3, %v7810_v20 }
0x66eb   :  { %10076 = vrcp.f32 %v7812_v60 }
0x66ec   :  { %10078 = vtanh.f32 %v12384_v29 }
0x66f5   :  { %v10077_v50 = vpop.eup %10076 }
0x66f6   :  { %v7814_v45 = vmul.f32 %v10077_v50, %v10075_v47 }
0x66f8   :  { %v7815_v4 = vmul.f32 %v7814_v45, %v12987_v21  ;;  %v10079_v21 = vpop.eup %10078 }
0x66f9   :  { %v4924_v19 = vmul.f32 %v12760_v18, %v10079_v21 }
0x66fa   :  { %v7816_v6 = vsel %vm261_vm1, %v7815_v4, 0.0 }
0x66fb   :  { %v7817_v28 = vrot.slane %v7816_v6, 4  ;;  %v4927_v62 = vsel %vm261_vm1, %v4924_v19, 0.0 }
0x66fd   :  { %v7818_v11 = vadd.f32 %v7817_v28, %v7816_v6 }
0x66ff   :  { %v7819_v53 = vrot.slane %v7818_v11, 2 }
0x6701   :  { %v7820_v5 = vadd.f32 %v7819_v53, %v7818_v11 }
0x6703   :  { %v7821_v46 = vrot.slane %v7820_v5, 1 }
0x6705   :  { %v7822_v51 = vadd.f32 %v7821_v46, %v7820_v5 }
0x6707   :  { %9162 = vmatmul.mubr.msk.f32.vlgmr.msra.gmra.mrb[64].mxu1 %vm261_vm1, %v7822_v51 }
0x67da   :  { %v7892_v54 = vpop.f32.mrb[64].mxu1 }
0x67db   :  { %v7899_v7 = vrot.slane %v7892_v54, %v11063_v48  ;;  %v9163_v57 = vpop.f32.mrb[65].mxu1  ;;  %v5649_v48 = vmul.f32 %v12463_v26, %v12736_v52  ;;  %v7605_v26 = vmul.f32 %v12718_v14, %v12736_v52  ;;  %v8083_v14 = vsel %vm12271_vm11, 1.0, %v12946_v22 }
0x67dc   :  { %v4569_v15 = vmax.f32 %v12228_v25, %v8083_v14  ;;  %v8084_v25 = vsel %vm12278_vm4, 1.0, %v12946_v22 }
0x67dd   :  { %v7900_v1 = vadd.f32 %v7899_v7, %v12988_v38  ;;  %v5650_v29 = vsel %vm433_vm2, %v5649_v48, 0.0  ;;  %v6301_v38 = vmul.f32 %v12547_v36, %v12736_v52  ;;  %v4570_v6 = vmax.f32 %v12225_v39, %v8084_v25 }
0x67de   :  { %vm4936_vm0 = vcmp.gt.f32.partialorder %v4569_v15, 0.0 }
0x67df   :  { %10080 = vtanh.f32 %v7900_v1  ;;  %vm4937_vm7 = vcmp.gt.f32.partialorder %v4570_v6, 0.0 }
0x67e0   :  { %10082 = vtanh.f32 %v12386_v8  ;;  %v7606_v8 = vsel %vm433_vm2, %v7605_v26, 0.0  ;;  %v5978_v26 = vpop.xlane.xlu1 %5977 }
0x67e9   :  { %v10081_v61 = vpop.eup %10080 }
0x67ea   :  { %v7902_v34 = vmul.f32 %v12629_v35, %v10081_v61  ;;  %v6302_v35 = vsel %vm433_vm2, %v6301_v38, 0.0  ;;  %v10083_v2 = vpop.eup %10082 }
0x67eb   :  { %v4925_v12 = vmul.f32 %v12760_v18, %v10083_v2 }
0x67ec   :  { %v7903_v44 = vsel %vm261_vm1, %v7902_v34, 0.0 }
0x67ed   :  { %7904 = vadd.xlane.f32.xlu0 %v7903_v44  ;;  %v4930_v36 = vsel %vm261_vm1, %v4925_v12, 0.0 }
0x67f1   :  { %4928 = vadd.xlane.f32.xlu0 %v4927_v62 }
0x67f5   :  { %5651 = vadd.xlane.f32.xlu0 %v5650_v29 }
0x67f9   :  { %6303 = vadd.xlane.f32.xlu0 %v6302_v35 }
0x67fd   :  { %6955 = vadd.xlane.f32.xlu0 %v6954_v41 }
0x6801   :  { %7607 = vadd.xlane.f32.xlu0 %v7606_v8  ;;  %v6630_v8 = vpop.xlane.xlu1 %6629 }
0x6805   :  { %4931 = vadd.xlane.f32.xlu0 %v4930_v36  ;;  %v7282_v12 = vpop.xlane.xlu1 %7281 }
0x6806   :  { %v7283_v36 = vadd.f32 %v7282_v12, %v12779_v13 }
0x681b   :  { %5330 = vperm.xlu0 %9588, %v5327_v9   ;;  %v8085_v9 = vsel %vm12284_vm10, 1.0, %v12946_v22 }
0x687a   :  { %v7905_v23 = vpop.xlane.xlu0 %7904 }
0x687b   :  { %v7906_v16 = vrot.slane %v7905_v23, 4 }
0x687d   :  { %v7907_v32 = vmax.f32 %v7905_v23, %v7906_v16 }
0x687e   :  { %v4929_v56 = vpop.xlane.xlu0 %4928 }
0x687f   :  { %v7908_v47 = vrot.slane %v7907_v32, 2  ;;  %v12786_v33 = vsel %vm4936_vm0, -1e+18, %v4929_v56 }
0x6881   :  { %v7909_v0 = vmax.f32 %v7907_v32, %v7908_v47 }
0x6882   :  { %v5652_v37 = vpop.xlane.xlu0 %5651 }
0x6883   :  { %v7910_v20 = vrot.slane %v7909_v0, 1  ;;  %v5653_v41 = vadd.f32 %v5652_v37, %v12779_v13 }
0x6885   :  { %v7911_v3 = vmax.f32 %v7909_v0, %v7910_v20 }
0x6886   :  { %v6304_v60 = vpop.xlane.xlu0 %6303 }
0x6887   :  { %v7912_v50 = vsub.f32 %v7905_v23, %v7911_v3  ;;  %v6305_v2 = vadd.f32 %v6304_v60, %v12779_v13  ;;  %v4571_v23 = vmax.f32 %v12234_v17, %v8085_v9 }
0x6889   :  { %v7913_v45 = vmul.f32 1.442695, %v7912_v50 }
0x688a   :  { %v6956_v4 = vpop.xlane.xlu0 %6955 }
0x688b   :  { %10084 = vpow2.f32 %v7913_v45 }
0x688e   :  { %v7608_v63 = vpop.xlane.xlu0 %7607 }
0x688f   :  { %v7609_v10 = vadd.f32 %v7608_v63, %v12779_v13 }
0x6892   :  { %v4932_v28 = vpop.xlane.xlu0 %4931 }
0x6893   :  { %v12792_v11 = vsel %vm4937_vm7, -1e+18, %v4932_v28 }
0x6894   :  { %v4943_v53 = vmax.f32 %v12786_v33, %v12792_v11 }
0x6895   :  { %v10085_v5 = vpop.eup %10084 }
0x6896   :  { %v7915_v46 = vrot.slane %v10085_v5, 4 }
0x6898   :  { %v7916_v51 = vadd.f32 %v10085_v5, %v7915_v46 }
0x689a   :  { %v7917_v40 = vrot.slane %v7916_v51, 2 }
0x689c   :  { %v7918_v54 = vadd.f32 %v7917_v40, %v7916_v51 }
0x689e   :  { %v7919_v7 = vrot.slane %v7918_v54, 1 }
0x68a0   :  { %v7920_v57 = vadd.f32 %v7919_v7, %v7918_v54 }
0x68a2   :  { %10086 = vrcp.f32 %v7920_v57 }
0x68a3   :  { %10088 = vtanh.f32 %v12388_v43  ;;  %v5979_v43 = vadd.f32 %v5978_v26, %v12779_v13 }
0x68ac   :  { %v10087_v30 = vpop.eup %10086 }
0x68ad   :  { %v7922_v1 = vmul.f32 %v10087_v30, %v10085_v5  ;;  %v10089_v29 = vpop.eup %10088 }
0x68ae   :  { %v4926_v42 = vmul.f32 %v12760_v18, %v10089_v29  ;;  %v6957_v18 = vadd.f32 %v6956_v4, %v12779_v13 }
0x68af   :  { %v7923_v21 = vmul.f32 %v12989_v27, %v7922_v1 }
0x68b0   :  { %v4933_v27 = vsel %vm433_vm2, %v4926_v42, 0.0 }
0x68b1   :  { %v7924_v39 = vsel %vm261_vm1, %v7923_v21, 0.0  ;;  %vm4938_vm1 = vcmp.gt.f32.partialorder %v4571_v23, 0.0 }
0x68b2   :  { %v7925_v61 = vrot.slane %v7924_v39, 4 }
0x68b4   :  { %v7926_v34 = vadd.f32 %v7925_v61, %v7924_v39 }
0x68b6   :  { %v7927_v44 = vrot.slane %v7926_v34, 2 }
0x68b8   :  { %v7928_v19 = vadd.f32 %v7927_v44, %v7926_v34 }
0x68ba   :  { %v7929_v62 = vrot.slane %v7928_v19, 1 }
0x68bc   :  { %v7930_v48 = vadd.f32 %v7929_v62, %v7928_v19 }
0x68be   :  { %v7931_v38 = vmul.f32 %v7930_v48, %v12736_v52  ;;  %v6631_v52 = vadd.f32 %v6630_v8, %v12779_v13 }
0x68c0   :  { %v7932_v35 = vsel %vm433_vm2, %v7931_v38, 0.0 }
0x68c1   :  { %7933 = vadd.xlane.f32.xlu1 %v7932_v35 }
0x68c5   :  { %4934 = vadd.xlane.f32.xlu1 %v4933_v27 }
0x68d6   :  { %5656 = vperm.xlu1 %9589, %v5653_v41  }
0x68da   :  { %5982 = vperm.xlu1 %9589, %v5979_v43  }
0x68de   :  { %6308 = vperm.xlu1 %9589, %v6305_v2  }
0x68e2   :  { %6634 = vperm.xlu1 %9589, %v6631_v52  }
0x68e6   :  { %6960 = vperm.xlu1 %9589, %v6957_v18  }
0x68ea   :  { %7286 = vperm.xlu1 %9589, %v7283_v36  }
0x68ee   :  { %7612 = vperm.xlu1 %9589, %v7609_v10  }
0x694e   :  { %v7934_v14 = vpop.xlane.xlu1 %7933 }
0x694f   :  { %v7935_v15 = vadd.f32 %v7934_v14, %v12779_v13 }
0x6951   :  { %7938 = vperm.xlu1 %9589, %v7935_v15  }
0x6952   :  { %v4935_v16 = vpop.xlane.xlu1 %4934 }
0x6953   :  { %v4941_v32 = vsel %vm4938_vm1, -1e+18, %v4935_v16 }
0x6954   :  { %v4942_v56 = vsel %vm1233_vm3, %v4941_v32, -inf }
0x6955   :  { %v4944_v47 = vmax.f32 %v4943_v53, %v4942_v56 }
0x6957   :  { %v4945_v0 = vrot.slane %v4944_v47, 4 }
0x6959   :  { %v4946_v37 = vmax.f32 %v4944_v47, %v4945_v0 }
0x695b   :  { %v4947_v20 = vrot.slane %v4946_v37, 2 }
0x695d   :  { %v4948_v3 = vmax.f32 %v4946_v37, %v4947_v20 }
0x695f   :  { %v4949_v60 = vrot.slane %v4948_v3, 1 }
0x6961   :  { %v4950_v50 = vmax.f32 %v4948_v3, %v4949_v60 }
0x6963   :  { %vm4951_vm2 = vcmp.ge.f32.partialorder %v12786_v33, %v4950_v50  ;;  %vm4952_vm4 = vcmp.ge.f32.partialorder %v12792_v11, %v4950_v50  ;;  %vm4953_vm14 = vcmp.ge.f32.partialorder %v4941_v32, %v4950_v50 }
0x6964   :  { %v4954_v22 = vsel %vm4951_vm2, %v11131_v55, 17.0  ;;  %v4955_v17 = vsel %vm4952_vm4, %v11134_v58, 17.0  ;;  %v4956_v31 = vsel %vm4953_vm14, %v11137_v59, 17.0 }
0x6965   :  { %v4957_v13 = vsel %vm1233_vm3, %v4956_v31, inf  ;;  %v4958_v45 = vmin.f32 %v4954_v22, %v4955_v17 }
0x6967   :  { %v4959_v4 = vmin.f32 %v4958_v45, %v4957_v13 }
0x6969   :  { %v4960_v25 = vrot.slane %v4959_v4, 4 }
0x696b   :  { %v4961_v63 = vmin.f32 %v4959_v4, %v4960_v25 }
0x696d   :  { %v4962_v6 = vrot.slane %v4961_v63, 2 }
0x696f   :  { %v4963_v28 = vmin.f32 %v4961_v63, %v4962_v6 }
0x6971   :  { %v4964_v53 = vrot.slane %v4963_v28, 1 }
0x6973   :  { %v4965_v5 = vmin.f32 %v4963_v28, %v4964_v53 }
0x6975   :  { %v9561_v33 = vtrunc.f32 %v4965_v5 }
0x6977   :  { %v9562_v55 = vcvt.f32.s32 %v9561_v33 }
0x6979   :  { %v4968_v58 = vsel %vm4967_vm9, %v9562_v55, %v12264_v24 }
0x697a   :  { %4969 = vst [vmem:[#allocation28] sm:$0x1] %v4968_v58 }
0x697b   :  { %10446 = shalt.err (!%p10443_p12)
}
0x697c   :  { %s10447_s0 = scalar_lea.hbm %s12890_s22, 16 }
0x697d   :  { %p10448_p13 = scmp.ne.s32.totalorder %s12890_s22, %s10447_s0  ;;  %p10451_p0 = scmp.lt.u32.totalorder %s10447_s0, %s12890_s22 }
0x697f   :  { %p10453_p1 = pnand %p10451_p0, %p10448_p13 }
0x6981   :  { %10456 = shalt.err (!%p10453_p1)
}
0x6982   :  { %7952 = dma.vmem_to_hbm [thread:$0]  %s7950_s25, 16, %s12890_s22, [#allocation6]   ;;  %v5657_v59 = vpop.permute.xlu1 %5656  ;;  %v5331_v40 = vpop.permute.xlu0 %5330  ;;  %vm12990_vm3 = vcmp.eq.s32.totalorder %v11314_v49, 3  ;;  %vm12991_vm6 = vcmp.eq.s32.totalorder %v11314_v49, 4  ;;  %vm12992_vm15 = vcmp.eq.s32.totalorder %v11314_v49, 5 }
0x6983   :  { %v5333_v7 = vsel %vm1478_vm12, %v5331_v40, 0.0  ;;  %s10523_s22 = smov [#allocation29]   ;;  %vm12993_vm12 = vcmp.eq.s32.totalorder %v11314_v49, 6 }
0x6984   :  { %v5659_v57 = vsel %vm1920_vm13, %v5657_v59, %v5333_v7  ;;  %s7959_s16 = sshll.u32 %s10523_s22, 4  ;;  %vm12994_vm13 = vcmp.eq.s32.totalorder %v11314_v49, 7  ;;  %s7960_s16 = int_to_ptr.vmem [resolvable:$true] %s7959_s16 }
0x6985   :  { %s10457_s9 = scalar_lea.vmem %s7960_s16, 16  ;;  %s10461_s24 = scalar_lea.vmem %s7960_s16, 32 }
0x6986   :  { %v5983_v24 = vpop.permute.xlu1 %5982  ;;  %p10458_p2 = scmp.ne.s32.totalorder %s7960_s16, %s10457_s9  ;;  %p10462_p3 = scmp.lt.s32.totalorder %s7960_s16, %s7960_s16 }
0x6987   :  { %v5985_v30 = vsel %vm2362_vm8, %v5983_v24, %v5659_v57  ;;  %p10463_p4 = scmp.lt.s32.totalorder %s10461_s24, %s10457_s9 }
0x6989   :  { %p10464_p5 = por %p10463_p4, %p10462_p3 }
0x698a   :  { %v6309_v11 = vpop.permute.xlu1 %6308 }
0x698b   :  { %v6311_v1 = vsel %vm12990_vm3, %v6309_v11, %v5985_v30  ;;  %p10465_p6 = pnand %p10464_p5, %p10458_p2 }
0x698e   :  { %v6635_v46 = vpop.permute.xlu1 %6634 }
0x698f   :  { %v6637_v39 = vsel %vm12991_vm6, %v6635_v46, %v6311_v1 }
0x6992   :  { %v6961_v51 = vpop.permute.xlu1 %6960 }
0x6993   :  { %v6963_v61 = vsel %vm12992_vm15, %v6961_v51, %v6637_v39 }
0x6996   :  { %v7287_v54 = vpop.permute.xlu1 %7286 }
0x6997   :  { %v7289_v34 = vsel %vm12993_vm12, %v7287_v54, %v6963_v61 }
0x699a   :  { %v7613_v21 = vpop.permute.xlu1 %7612 }
0x699b   :  { %v7615_v44 = vsel %vm12994_vm13, %v7613_v21, %v7289_v34 }
0x69d0   :  { %v7939_v19 = vpop.permute.xlu1 %7938 }
0x69d1   :  { %v7941_v62 = vsel %vm4967_vm9, %v7939_v19, %v7615_v44 }
0x69d2   :  { %7942 = vst [vmem:[#allocation29] sm:$0x1] %v7941_v62 }
0x69d3   :  { %10468 = shalt.err (!%p10465_p6)
}
0x69d4   :  { %s10469_s11 = scalar_lea.hbm %s12891_s23, 16 }
0x69d5   :  { %p10470_p7 = scmp.ne.s32.totalorder %s12891_s23, %s10469_s11  ;;  %p10473_p8 = scmp.lt.u32.totalorder %s10469_s11, %s12891_s23 }
0x69d7   :  { %p10475_p9 = pnand %p10473_p8, %p10470_p7 }
0x69d9   :  { %10478 = shalt.err (!%p10475_p9)
}
0x69da   :  { %7962 = dma.vmem_to_hbm [thread:$0]  %s7960_s16, 16, %s12891_s23, [#allocation30]  }
0x69db   :  { %10495 = dma.done.wait [#allocation6], 16  }
0x69dc   :  { %10496 = vsyncadd [#allocation6], 4294967280 }
0x69dd   :  { %10497 = dma.done.wait [#allocation30], 16  }
0x69de   :  { %10498 = vsyncadd [#allocation30], 4294967280 }
0x69df   :  { %7969 = vsyncpa [#allocation5], 1 }
0x69e0   :  { %7970 = vsyncpa [#allocation8], 1 }
0x69e1   :  { %7971 = vsyncpa [#allocation11], 1 }
0x69e2   :  { %7972 = vsyncpa [#allocation14], 1 }
0x69e3   :  { %7973 = vsyncpa [#allocation17], 1 }
0x69e4   :  { %7974 = vsyncpa [#allocation20], 1 }
0x69e5   :  { %7975 = vsyncpa [#allocation23], 1 }
0x69e6   :  { %7976 = vsyncpa [#allocation26], 1 }
0x69e7   :  { %7977 = vsyncpa [#allocation6], 1 }
0x69e8   :  { %7978 = vsyncpa [#allocation30], 1 }

</bundles_post_ra>
